<compile_context>
chip_gen: v7x
topology: tpu7x:2x2x1
jax: 0.10.0
libtpu: 0.0.40
codegen_flags: <defaults>
</compile_context>

<pallas_src>
import functools

import jax
import jax.numpy as jnp
from jax import lax
from jax.experimental import pallas as pl
from jax.experimental.pallas import tpu as pltpu


# ---------------------------------------------------------------------------
# helpers
# ---------------------------------------------------------------------------
def _round_up(x, m):
    return (x + m - 1) // m * m


def _vmem_limit_bytes():
    """Scoped-VMEM limit derived from the actual chip (fallback: v7x-safe)."""
    try:
        cap = int(pltpu.get_tpu_info().vmem_capacity_bytes)
    except Exception:
        cap = 64 << 20  # conservative: v7x per-TC physical VMEM
    return max(32 << 20, min(int(cap * 0.75), 100 << 20))


# ---------------------------------------------------------------------------
# Kernel 1: tiled GEMM + bias (+ optional LeakyReLU), K-reduction axis last.
#   Used for block 1 (no norm) and the final conv.
# ---------------------------------------------------------------------------
def _gemm_bias_act_kernel(x_ref, w_ref, b_ref, o_ref, acc_ref, *, apply_leaky):
    @pl.when(pl.program_id(2) == 0)
    def _init():
        acc_ref[...] = jnp.zeros_like(acc_ref)

    acc_ref[...] += jnp.dot(x_ref[...], w_ref[...],
                            preferred_element_type=jnp.float32)

    @pl.when(pl.program_id(2) == pl.num_programs(2) - 1)
    def _fini():
        y = acc_ref[...] + b_ref[...]
        if apply_leaky:
            y = jnp.where(y >= 0.0, y, 0.2 * y)
        o_ref[...] = y.astype(o_ref.dtype)


def _gemm_bias_act(x, w, b, *, apply_leaky, out_dtype):
    """x: (M, K) bf16, w: (K, Cout) bf16, b: (1, Cout) f32 -> (M, Cout)."""
    M, K = x.shape
    Cout = w.shape[1]
    assert w.shape[0] == K and b.shape == (1, Cout)

    limit = _vmem_limit_bytes()
    budget = int(limit * 0.6)

    # Large M tile (amortizes the ~0.35us/grid-step overhead); tiny-M case
    # (final conv on small inputs) rounds up to the 8-row sublane minimum and
    # runs in a single step.
    TM = min(2048, _round_up(M, 8))
    Mp = _round_up(M, TM)
    if Mp != M:
        x = jnp.pad(x, ((0, Mp - M), (0, 0)))

    TN = Cout if Cout <= 512 else 512
    assert Cout % TN == 0

    out_itemsize = jnp.dtype(out_dtype).itemsize

    def _footprint(tk):
        return (2 * TM * tk * 2          # x, double-buffered bf16
                + 2 * tk * TN * 2        # w, double-buffered bf16
                + 2 * TM * TN * out_itemsize  # out, double-buffered
                + TM * TN * 4)           # f32 accumulator scratch

    TK = None
    for cand in [K] + [t for t in (4096, 2048, 1024, 512, 256, 128) if t < K]:
        if K % cand == 0 and _footprint(cand) <= budget:
            TK = cand
            break
    if TK is None:
        TK = 128
    assert K % TK == 0, f"K={K} not divisible by TK={TK}"

    grid = (Mp // TM, Cout // TN, K // TK)
    out = pl.pallas_call(
        functools.partial(_gemm_bias_act_kernel, apply_leaky=apply_leaky),
        out_shape=jax.ShapeDtypeStruct((Mp, Cout), out_dtype),
        grid=grid,
        in_specs=[
            pl.BlockSpec((TM, TK), lambda i, j, k: (i, k)),
            pl.BlockSpec((TK, TN), lambda i, j, k: (k, j)),
            pl.BlockSpec((1, TN), lambda i, j, k: (0, j)),
        ],
        out_specs=pl.BlockSpec((TM, TN), lambda i, j, k: (i, j)),
        scratch_shapes=[pltpu.VMEM((TM, TN), jnp.float32)],
        compiler_params=pltpu.CompilerParams(
            dimension_semantics=("parallel", "parallel", "arbitrary"),
            vmem_limit_bytes=limit),
    )(x, w, b)
    return out[:M]


# ---------------------------------------------------------------------------
# Kernel 2: fused Conv-GEMM + bias + InstanceNorm2d + LeakyReLU (blocks 2-4).
#   grid = (batch, C-tiles, K-tiles); per-(image, C-tile) output stays resident
#   in an f32 accumulator; per-channel norm applied in the finalize phase.
# ---------------------------------------------------------------------------
def _conv_in_lrelu_kernel(x_ref, w_ref, b_ref, o_ref, acc_ref, *, inv_hw):
    k = pl.program_id(2)

    @pl.when(k == 0)
    def _init():
        acc_ref[...] = jnp.zeros_like(acc_ref)

    acc_ref[...] += jnp.dot(x_ref[0], w_ref[...],
                            preferred_element_type=jnp.float32)

    @pl.when(k == pl.num_programs(2) - 1)
    def _fini():
        y = acc_ref[...] + b_ref[...]
        # InstanceNorm2d(affine=False, eps=1e-5): per-channel, biased variance,
        # single pass in f32 (stats independent across C tiles).
        mean = jnp.sum(y, axis=0, keepdims=True) * inv_hw
        var = jnp.sum(y * y, axis=0, keepdims=True) * inv_hw - mean * mean
        var = jnp.maximum(var, 0.0)
        y = (y - mean) * lax.rsqrt(var + 1e-5)
        y = jnp.where(y >= 0.0, y, 0.2 * y)
        o_ref[0] = y.astype(o_ref.dtype)


def _conv_in_lrelu(x, w, b, *, out_dtype=jnp.bfloat16):
    """x: (N, HW, K) bf16 per-image patches, w: (K, C) bf16, b: (1, C) f32."""
    N, HW, K = x.shape
    C = w.shape[1]
    assert w.shape[0] == K and b.shape == (1, C)

    limit = _vmem_limit_bytes()
    budget = int(limit * 0.6)

    # C tile: per-channel norm stats => C splits are fully independent. A
    # second parallel axis keeps both v7x TensorCores busy even at N == 1 and
    # shrinks the resident accumulator/output blocks.
    if C <= 128:
        TC = C
    elif N >= 2:
        TC = 256
    else:
        TC = 128
    TC = min(TC, C)
    assert C % TC == 0

    acc_bytes = HW * TC * 4
    out_bytes = 2 * HW * TC * jnp.dtype(out_dtype).itemsize
    bias_bytes = 2 * C * 4

    def _fits(tk):
        x_bytes = 2 * HW * tk * 2
        w_bytes = 2 * tk * TC * 2
        return acc_bytes + out_bytes + bias_bytes + x_bytes + w_bytes <= budget

    # Prefer full-K residency (one grid step per (n, c): fewest DMA descriptors,
    # weights not re-streamed within the reduction) when the honest budget fits.
    TK = None
    for cand in [K] + [t for t in (2048, 1024, 512, 256, 128) if t < K]:
        if K % cand == 0 and _fits(cand):
            TK = cand
            break
    if TK is None:
        # TODO(synk): very large spatial inputs need an HW-tiled two-pass
        # stats/apply fallback; for now take the smallest K tile.
        TK = 128
    assert K % TK == 0, f"K={K} not divisible by TK={TK}"

    grid = (N, C // TC, K // TK)
    return pl.pallas_call(
        functools.partial(_conv_in_lrelu_kernel, inv_hw=1.0 / HW),
        out_shape=jax.ShapeDtypeStruct((N, HW, C), out_dtype),
        grid=grid,
        in_specs=[
            pl.BlockSpec((1, HW, TK), lambda n, c, k: (n, 0, k)),
            pl.BlockSpec((TK, TC), lambda n, c, k: (k, c)),
            pl.BlockSpec((1, TC), lambda n, c, k: (0, c)),
        ],
        out_specs=pl.BlockSpec((1, HW, TC), lambda n, c, k: (n, 0, c)),
        scratch_shapes=[pltpu.VMEM((HW, TC), jnp.float32)],
        compiler_params=pltpu.CompilerParams(
            dimension_semantics=("parallel", "parallel", "arbitrary"),
            vmem_limit_bytes=limit),
    )(x, w, b)


# ---------------------------------------------------------------------------
# Patch construction (glue JAX, channels stay lane-minor throughout).
# ---------------------------------------------------------------------------
def _s2d_patches(x):
    """k=4/s=2/p=1 conv patches via 2x2 space-to-depth: only a 4x expansion.

    x: (N, H, W, C) NHWC -> patches (N, Ho, Wo, 16*C) with K ordered
    (i, j, dr, dc, ci) to match _prep_weight_s2d.
    """
    N, H, W, C = x.shape
    assert H % 2 == 0 and W % 2 == 0, "stride-2 conv expects even spatial dims"
    xp = jnp.pad(x, ((0, 0), (1, 1), (1, 1), (0, 0)))
    Hp, Wp = H + 2, W + 2
    # 2x2 space-to-depth: (N, Hp, Wp, C) -> (N, Hp//2, Wp//2, 4*C)
    xs = xp.reshape(N, Hp // 2, 2, Wp // 2, 2, C)
    xs = xs.transpose(0, 1, 3, 2, 4, 5).reshape(N, Hp // 2, Wp // 2, 4 * C)
    Ho, Wo = H // 2, W // 2
    # The k=4/s=2 conv is now a k=2/s=1 conv over xs -> only 4 taps.
    taps = [xs[:, i:i + Ho, j:j + Wo, :] for i in range(2) for j in range(2)]
    return jnp.concatenate(taps, axis=-1), Ho, Wo


def _im2col_s1(x, k=4, p=1):
    """Standard im2col for the final k=4/s=1/p=1 conv. K order (kh, kw, ci)."""
    N, H, W, C = x.shape
    xp = jnp.pad(x, ((0, 0), (p, p), (p, p), (0, 0)))
    Ho = H + 2 * p - k + 1
    Wo = W + 2 * p - k + 1
    taps = [xp[:, i:i + Ho, j:j + Wo, :] for i in range(k) for j in range(k)]
    return jnp.concatenate(taps, axis=-1), Ho, Wo


# ---------------------------------------------------------------------------
# Parameter prep: PyTorch-layout (Cout, Cin, 4, 4) weights -> 2D bf16 GEMM
# weights matching the patch K-ordering; done once, outside the forward pass.
# ---------------------------------------------------------------------------
def _prep_weight_s2d(w):
    """(Cout, Cin, 4, 4) -> (16*Cin, Cout), K ordered (i, j, dr, dc, ci)."""
    Cout, Cin, kh, kw = w.shape
    assert kh == 4 and kw == 4
    wr = w.reshape(Cout, Cin, 2, 2, 2, 2)   # (co, ci, i, dr, j, dc)
    wr = wr.transpose(2, 4, 3, 5, 1, 0)     # (i, j, dr, dc, ci, co)
    return wr.reshape(16 * Cin, Cout)


def prepare_params(params, in_channels=3):
    cin_pad = _round_up(in_channels, 8)     # lane-friendly padded input channels
    prepped = {}
    for idx in range(1, 6):
        w = params[f"w{idx}"].astype(jnp.float32)   # (Cout, Cin, 4, 4)
        b = params[f"b{idx}"].astype(jnp.float32)   # (Cout,)
        Cout = w.shape[0]
        if idx == 1 and w.shape[1] < cin_pad:
            w = jnp.pad(w, ((0, 0), (0, cin_pad - w.shape[1]), (0, 0), (0, 0)))
        if idx == 5:
            # pad Cout 1 -> 128 for a lane-dense MXU tile; extras dropped later
            w = jnp.pad(w, ((0, 128 - Cout), (0, 0), (0, 0), (0, 0)))
            b = jnp.pad(b, ((0, 128 - Cout),))
            w2d = w.transpose(2, 3, 1, 0).reshape(-1, w.shape[0])
        else:
            w2d = _prep_weight_s2d(w)
        prepped[f"w{idx}"] = w2d.astype(jnp.bfloat16)
        prepped[f"b{idx}"] = b.reshape(1, -1).astype(jnp.float32)
    return prepped


# ---------------------------------------------------------------------------
# Full discriminator forward (NCHW in / NCHW out, like the PyTorch module)
# ---------------------------------------------------------------------------
def discriminator_forward(x_nchw, prepped):
    # Static (shape-derived) padded input-channel count -- no traced bools.
    cin_pad = prepped["w1"].shape[0] // 16

    x = jnp.transpose(x_nchw, (0, 2, 3, 1))         # NCHW -> NHWC
    N, H, W, C = x.shape
    if C < cin_pad:
        x = jnp.pad(x, ((0, 0), (0, 0), (0, 0), (0, cin_pad - C)))
    x = x.astype(jnp.bfloat16)

    # block 1: Conv(3->64, s2) + LeakyReLU (no norm), fused into GEMM epilogue
    patches, Ho, Wo = _s2d_patches(x)
    cols = patches.reshape(N * Ho * Wo, -1)
    y = _gemm_bias_act(cols, prepped["w1"], prepped["b1"],
                       apply_leaky=True, out_dtype=jnp.bfloat16)
    x = y.reshape(N, Ho, Wo, -1)

    # blocks 2-4: Conv(s2) + InstanceNorm2d + LeakyReLU fused in one kernel
    for idx in (2, 3, 4):
        patches, Ho, Wo = _s2d_patches(x)
        cols = patches.reshape(N, Ho * Wo, -1)
        y = _conv_in_lrelu(cols, prepped[f"w{idx}"], prepped[f"b{idx}"],
                           out_dtype=jnp.bfloat16)
        x = y.reshape(N, Ho, Wo, -1)

    # final Conv(512->1, k=4, s=1, p=1), no activation, f32 output
    patches, Ho, Wo = _im2col_s1(x)
    cols = patches.reshape(N * Ho * Wo, -1)
    y = _gemm_bias_act(cols, prepped["w5"], prepped["b5"],
                       apply_leaky=False, out_dtype=jnp.float32)
    y = y[:, :1].reshape(N, Ho, Wo, 1)
    return jnp.transpose(y, (0, 3, 1, 2))           # NHWC -> NCHW


def init_params(key, in_channels=3):
    dims = [(64, in_channels), (128, 64), (256, 128), (512, 256), (1, 512)]
    params = {}
    for idx, (co, ci) in enumerate(dims, start=1):
        key, kw_, kb_ = jax.random.split(key, 3)
        params[f"w{idx}"] = 0.05 * jax.random.normal(
            kw_, (co, ci, 4, 4), dtype=jnp.float32)
        params[f"b{idx}"] = 0.01 * jax.random.normal(
            kb_, (co,), dtype=jnp.float32)
    return params


if __name__ == "__main__":
    key = jax.random.PRNGKey(0)
    kp, kx = jax.random.split(key)

    params = init_params(kp, in_channels=3)
    prepped = prepare_params(params, in_channels=3)

    # 32x32 input -> 16 -> 8 -> 4 -> 2 -> final conv -> 1x1 patch output
    x = jax.random.normal(kx, (2, 3, 32, 32), dtype=jnp.float32)

    fwd = jax.jit(discriminator_forward)
    out = jax.block_until_ready(fwd(x, prepped))

    assert out.shape == (2, 1, 1, 1), out.shape
    assert bool(jnp.all(jnp.isfinite(out)))
    print("KERNEL_OK")
</pallas_src>

<mosaic_0001>
module attributes {stable_mosaic.version = 11 : i64} {
  func.func @_gemm_bias_act_kernel(%arg0: i32, %arg1: i32, %arg2: i32, %arg3: memref<512x128xbf16, #tpu.memory_space<vmem>>, %arg4: memref<128x64xbf16, #tpu.memory_space<vmem>>, %arg5: memref<1x64xf32, #tpu.memory_space<vmem>>, %arg6: memref<512x64xbf16, #tpu.memory_space<vmem>>, %arg7: memref<512x64xf32, #tpu.memory_space<vmem>>) attributes {dimension_semantics = [#tpu.dimension_semantics<parallel>, #tpu.dimension_semantics<parallel>, #tpu.dimension_semantics<arbitrary>], iteration_bounds = array<i64: 1, 1, 1>, scalar_prefetch = 0 : i64, scratch_operands = 1 : i64, tpu.core_type = #tpu.core_type<tc>, window_params = [{transform_indices = @transform_0, window_bounds = array<i64: 512, 128>}, {transform_indices = @transform_1, window_bounds = array<i64: 128, 64>}, {transform_indices = @transform_2, window_bounds = array<i64: 1, 64>}, {transform_indices = @transform_3, window_bounds = array<i64: 512, 64>}]} {
    %c0_i32 = arith.constant 0 : i32
    %0 = arith.cmpi eq, %arg2, %c0_i32 : i32
    %1 = arith.extui %0 : i1 to i32
    %c0_i32_0 = arith.constant 0 : i32
    %2 = arith.cmpi ne, %1, %c0_i32_0 : i32
    scf.if %2 {
      %cst_10 = arith.constant 0.000000e+00 : f32
      %12 = vector.broadcast %cst_10 : f32 to vector<512x64xf32>
      %c0_11 = arith.constant 0 : index
      %c0_12 = arith.constant 0 : index
      %13 = vector.load %arg7[%c0_11, %c0_12] : memref<512x64xf32, #tpu.memory_space<vmem>>, vector<512x64xf32>
      tpu.vector_store %arg7[%c0_11, %c0_12], %12 {strides = array<i32>} : memref<512x64xf32, #tpu.memory_space<vmem>>, vector<512x64xf32>,
    } else {
    }
    %c0 = arith.constant 0 : index
    %c0_1 = arith.constant 0 : index
    %3 = vector.load %arg7[%c0, %c0_1] : memref<512x64xf32, #tpu.memory_space<vmem>>, vector<512x64xf32>
    %c0_2 = arith.constant 0 : index
    %c0_3 = arith.constant 0 : index
    %4 = vector.load %arg3[%c0_2, %c0_3] : memref<512x128xbf16, #tpu.memory_space<vmem>>, vector<512x128xbf16>
    %c0_4 = arith.constant 0 : index
    %c0_5 = arith.constant 0 : index
    %5 = vector.load %arg4[%c0_4, %c0_5] : memref<128x64xbf16, #tpu.memory_space<vmem>>, vector<128x64xbf16>
    %cst = arith.constant dense<0.000000e+00> : vector<512x64xf32>
    %6 = tpu.matmul %4, %5, %cst {dimension_numbers = #tpu.dot_dimension_numbers<[1], [0], [0], [1], [0, 0, 1, 1], [], []>} : vector<512x128xbf16>, vector<128x64xbf16>, vector<512x64xf32> -> vector<512x64xf32>
    %7 = arith.addf %3, %6 : vector<512x64xf32>
    %c0_6 = arith.constant 0 : index
    %c0_7 = arith.constant 0 : index
    %8 = vector.load %arg7[%c0_6, %c0_7] : memref<512x64xf32, #tpu.memory_space<vmem>>, vector<512x64xf32>
    tpu.vector_store %arg7[%c0_6, %c0_7], %7 {strides = array<i32>} : memref<512x64xf32, #tpu.memory_space<vmem>>, vector<512x64xf32>,
    %c0_i32_8 = arith.constant 0 : i32
    %9 = arith.cmpi eq, %arg2, %c0_i32_8 : i32
    %10 = arith.extui %9 : i1 to i32
    %c0_i32_9 = arith.constant 0 : i32
    %11 = arith.cmpi ne, %10, %c0_i32_9 : i32
    scf.if %11 {
      %c0_10 = arith.constant 0 : index
      %c0_11 = arith.constant 0 : index
      %12 = vector.load %arg7[%c0_10, %c0_11] : memref<512x64xf32, #tpu.memory_space<vmem>>, vector<512x64xf32>
      %c0_12 = arith.constant 0 : index
      %c0_13 = arith.constant 0 : index
      %13 = vector.load %arg5[%c0_12, %c0_13] : memref<1x64xf32, #tpu.memory_space<vmem>>, vector<1x64xf32>
      %14 = vector.broadcast %13 : vector<1x64xf32> to vector<512x64xf32>
      %15 = arith.addf %12, %14 : vector<512x64xf32>
      %cst_14 = arith.constant 0.000000e+00 : f32
      %16 = vector.broadcast %cst_14 : f32 to vector<512x64xf32>
      %17 = arith.cmpf oge, %15, %16 : vector<512x64xf32>
      %cst_15 = arith.constant 2.000000e-01 : f32
      %18 = vector.broadcast %cst_15 : f32 to vector<512x64xf32>
      %19 = arith.mulf %18, %15 : vector<512x64xf32>
      %20 = arith.select %17, %15, %19 : vector<512x64xi1>, vector<512x64xf32>
      %21 = arith.truncf %20 : vector<512x64xf32> to vector<512x64xbf16>
      %c0_16 = arith.constant 0 : index
      %c0_17 = arith.constant 0 : index
      %22 = vector.load %arg6[%c0_16, %c0_17] : memref<512x64xbf16, #tpu.memory_space<vmem>>, vector<512x64xbf16>
      tpu.vector_store %arg6[%c0_16, %c0_17], %21 {strides = array<i32>} : memref<512x64xbf16, #tpu.memory_space<vmem>>, vector<512x64xbf16>,
    } else {
    }
    return
  }
  func.func @transform_0(%arg0: i32, %arg1: i32, %arg2: i32) -> (i32, i32) {
    %c0_i32 = arith.constant 0 : i32
    return %arg0, %arg2 : i32, i32
  }
  func.func @transform_1(%arg0: i32, %arg1: i32, %arg2: i32) -> (i32, i32) {
    %c0_i32 = arith.constant 0 : i32
    return %arg2, %arg1 : i32, i32
  }
  func.func @transform_2(%arg0: i32, %arg1: i32, %arg2: i32) -> (i32, i32) {
    %c0_i32 = arith.constant 0 : i32
    %c0_i32_0 = arith.constant 0 : i32
    return %c0_i32, %arg1 : i32, i32
  }
  func.func @transform_3(%arg0: i32, %arg1: i32, %arg2: i32) -> (i32, i32) {
    %c0_i32 = arith.constant 0 : i32
    return %arg0, %arg1 : i32, i32
  }
}

module attributes {stable_mosaic.version = 11 : i64} {
  func.func @_conv_in_lrelu_kernel(%arg0: i32, %arg1: i32, %arg2: i32, %arg3: memref<1x64x1024xbf16, #tpu.memory_space<vmem>>, %arg4: memref<1024x128xbf16, #tpu.memory_space<vmem>>, %arg5: memref<1x128xf32, #tpu.memory_space<vmem>>, %arg6: memref<1x64x128xbf16, #tpu.memory_space<vmem>>, %arg7: memref<64x128xf32, #tpu.memory_space<vmem>>) attributes {dimension_semantics = [#tpu.dimension_semantics<parallel>, #tpu.dimension_semantics<parallel>, #tpu.dimension_semantics<arbitrary>], iteration_bounds = array<i64: 2, 1, 1>, scalar_prefetch = 0 : i64, scratch_operands = 1 : i64, tpu.core_type = #tpu.core_type<tc>, window_params = [{transform_indices = @transform_0, window_bounds = array<i64: 1, 64, 1024>}, {transform_indices = @transform_1, window_bounds = array<i64: 1024, 128>}, {transform_indices = @transform_2, window_bounds = array<i64: 1, 128>}, {transform_indices = @transform_3, window_bounds = array<i64: 1, 64, 128>}]} {
    %c0_i32 = arith.constant 0 : i32
    %0 = arith.cmpi eq, %arg2, %c0_i32 : i32
    %1 = arith.extui %0 : i1 to i32
    %c0_i32_0 = arith.constant 0 : i32
    %2 = arith.cmpi ne, %1, %c0_i32_0 : i32
    scf.if %2 {
      %cst_11 = arith.constant 0.000000e+00 : f32
      %13 = vector.broadcast %cst_11 : f32 to vector<64x128xf32>
      %c0_12 = arith.constant 0 : index
      %c0_13 = arith.constant 0 : index
      %14 = vector.load %arg7[%c0_12, %c0_13] : memref<64x128xf32, #tpu.memory_space<vmem>>, vector<64x128xf32>
      tpu.vector_store %arg7[%c0_12, %c0_13], %13 {strides = array<i32>} : memref<64x128xf32, #tpu.memory_space<vmem>>, vector<64x128xf32>,
    } else {
    }
    %c0 = arith.constant 0 : index
    %c0_1 = arith.constant 0 : index
    %3 = vector.load %arg7[%c0, %c0_1] : memref<64x128xf32, #tpu.memory_space<vmem>>, vector<64x128xf32>
    %c0_2 = arith.constant 0 : index
    %c0_3 = arith.constant 0 : index
    %c0_4 = arith.constant 0 : index
    %4 = vector.load %arg3[%c0_2, %c0_3, %c0_4] : memref<1x64x1024xbf16, #tpu.memory_space<vmem>>, vector<1x64x1024xbf16>
    %5 = vector.shape_cast %4 : vector<1x64x1024xbf16> to vector<64x1024xbf16>
    %c0_5 = arith.constant 0 : index
    %c0_6 = arith.constant 0 : index
    %6 = vector.load %arg4[%c0_5, %c0_6] : memref<1024x128xbf16, #tpu.memory_space<vmem>>, vector<1024x128xbf16>
    %cst = arith.constant dense<0.000000e+00> : vector<64x128xf32>
    %7 = tpu.matmul %5, %6, %cst {dimension_numbers = #tpu.dot_dimension_numbers<[1], [0], [0], [1], [0, 0, 1, 1], [], []>} : vector<64x1024xbf16>, vector<1024x128xbf16>, vector<64x128xf32> -> vector<64x128xf32>
    %8 = arith.addf %3, %7 : vector<64x128xf32>
    %c0_7 = arith.constant 0 : index
    %c0_8 = arith.constant 0 : index
    %9 = vector.load %arg7[%c0_7, %c0_8] : memref<64x128xf32, #tpu.memory_space<vmem>>, vector<64x128xf32>
    tpu.vector_store %arg7[%c0_7, %c0_8], %8 {strides = array<i32>} : memref<64x128xf32, #tpu.memory_space<vmem>>, vector<64x128xf32>,
    %c0_i32_9 = arith.constant 0 : i32
    %10 = arith.cmpi eq, %arg2, %c0_i32_9 : i32
    %11 = arith.extui %10 : i1 to i32
    %c0_i32_10 = arith.constant 0 : i32
    %12 = arith.cmpi ne, %11, %c0_i32_10 : i32
    scf.if %12 {
      %c0_11 = arith.constant 0 : index
      %c0_12 = arith.constant 0 : index
      %13 = vector.load %arg7[%c0_11, %c0_12] : memref<64x128xf32, #tpu.memory_space<vmem>>, vector<64x128xf32>
      %c0_13 = arith.constant 0 : index
      %c0_14 = arith.constant 0 : index
      %14 = vector.load %arg5[%c0_13, %c0_14] : memref<1x128xf32, #tpu.memory_space<vmem>>, vector<1x128xf32>
      %15 = vector.broadcast %14 : vector<1x128xf32> to vector<64x128xf32>
      %16 = arith.addf %13, %15 : vector<64x128xf32>
      %cst_15 = arith.constant dense<0.000000e+00> : vector<128xf32>
      %17 = vector.multi_reduction <add>, %16, %cst_15 [0] : vector<64x128xf32> to vector<128xf32>
      %18 = vector.shape_cast %17 : vector<128xf32> to vector<1x128xf32>
      %cst_16 = arith.constant 1.562500e-02 : f32
      %19 = vector.broadcast %cst_16 : f32 to vector<1x128xf32>
      %20 = arith.mulf %18, %19 : vector<1x128xf32>
      %21 = arith.mulf %16, %16 : vector<64x128xf32>
      %cst_17 = arith.constant dense<0.000000e+00> : vector<128xf32>
      %22 = vector.multi_reduction <add>, %21, %cst_17 [0] : vector<64x128xf32> to vector<128xf32>
      %23 = vector.shape_cast %22 : vector<128xf32> to vector<1x128xf32>
      %cst_18 = arith.constant 1.562500e-02 : f32
      %24 = vector.broadcast %cst_18 : f32 to vector<1x128xf32>
      %25 = arith.mulf %23, %24 : vector<1x128xf32>
      %26 = arith.mulf %20, %20 : vector<1x128xf32>
      %27 = arith.subf %25, %26 : vector<1x128xf32>
      %cst_19 = arith.constant 0.000000e+00 : f32
      %28 = vector.broadcast %cst_19 : f32 to vector<1x128xf32>
      %29 = arith.maximumf %27, %28 : vector<1x128xf32>
      %30 = vector.broadcast %20 : vector<1x128xf32> to vector<64x128xf32>
      %31 = arith.subf %16, %30 : vector<64x128xf32>
      %cst_20 = arith.constant 9.99999974E-6 : f32
      %32 = vector.broadcast %cst_20 : f32 to vector<1x128xf32>
      %33 = arith.addf %29, %32 : vector<1x128xf32>
      %34 = math.rsqrt %33 : vector<1x128xf32>
      %35 = vector.broadcast %34 : vector<1x128xf32> to vector<64x128xf32>
      %36 = arith.mulf %31, %35 : vector<64x128xf32>
      %cst_21 = arith.constant 0.000000e+00 : f32
      %37 = vector.broadcast %cst_21 : f32 to vector<64x128xf32>
      %38 = arith.cmpf oge, %36, %37 : vector<64x128xf32>
      %cst_22 = arith.constant 2.000000e-01 : f32
      %39 = vector.broadcast %cst_22 : f32 to vector<64x128xf32>
      %40 = arith.mulf %39, %36 : vector<64x128xf32>
      %41 = arith.select %38, %36, %40 : vector<64x128xi1>, vector<64x128xf32>
      %42 = arith.truncf %41 : vector<64x128xf32> to vector<64x128xbf16>
      %c0_23 = arith.constant 0 : index
      %c0_24 = arith.constant 0 : index
      %c0_25 = arith.constant 0 : index
      %43 = vector.load %arg6[%c0_23, %c0_24, %c0_25] : memref<1x64x128xbf16, #tpu.memory_space<vmem>>, vector<1x64x128xbf16>
      %44 = vector.shape_cast %43 : vector<1x64x128xbf16> to vector<64x128xbf16>
      %45 = vector.shape_cast %42 : vector<64x128xbf16> to vector<1x64x128xbf16>
      tpu.vector_store %arg6[%c0_23, %c0_24, %c0_25], %45 {strides = array<i32>} : memref<1x64x128xbf16, #tpu.memory_space<vmem>>, vector<1x64x128xbf16>,
    } else {
    }
    return
  }
  func.func @transform_0(%arg0: i32, %arg1: i32, %arg2: i32) -> (i32, i32, i32) {
    %c0_i32 = arith.constant 0 : i32
    %c0_i32_0 = arith.constant 0 : i32
    return %arg0, %c0_i32, %arg2 : i32, i32, i32
  }
  func.func @transform_1(%arg0: i32, %arg1: i32, %arg2: i32) -> (i32, i32) {
    %c0_i32 = arith.constant 0 : i32
    return %arg2, %arg1 : i32, i32
  }
  func.func @transform_2(%arg0: i32, %arg1: i32, %arg2: i32) -> (i32, i32) {
    %c0_i32 = arith.constant 0 : i32
    %c0_i32_0 = arith.constant 0 : i32
    return %c0_i32, %arg1 : i32, i32
  }
  func.func @transform_3(%arg0: i32, %arg1: i32, %arg2: i32) -> (i32, i32, i32) {
    %c0_i32 = arith.constant 0 : i32
    %c0_i32_0 = arith.constant 0 : i32
    return %arg0, %c0_i32, %arg1 : i32, i32, i32
  }
}

module attributes {stable_mosaic.version = 11 : i64} {
  func.func @_conv_in_lrelu_kernel(%arg0: i32, %arg1: i32, %arg2: i32, %arg3: memref<1x16x2048xbf16, #tpu.memory_space<vmem>>, %arg4: memref<2048x256xbf16, #tpu.memory_space<vmem>>, %arg5: memref<1x256xf32, #tpu.memory_space<vmem>>, %arg6: memref<1x16x256xbf16, #tpu.memory_space<vmem>>, %arg7: memref<16x256xf32, #tpu.memory_space<vmem>>) attributes {dimension_semantics = [#tpu.dimension_semantics<parallel>, #tpu.dimension_semantics<parallel>, #tpu.dimension_semantics<arbitrary>], iteration_bounds = array<i64: 2, 1, 1>, scalar_prefetch = 0 : i64, scratch_operands = 1 : i64, tpu.core_type = #tpu.core_type<tc>, window_params = [{transform_indices = @transform_0, window_bounds = array<i64: 1, 16, 2048>}, {transform_indices = @transform_1, window_bounds = array<i64: 2048, 256>}, {transform_indices = @transform_2, window_bounds = array<i64: 1, 256>}, {transform_indices = @transform_3, window_bounds = array<i64: 1, 16, 256>}]} {
    %c0_i32 = arith.constant 0 : i32
    %0 = arith.cmpi eq, %arg2, %c0_i32 : i32
    %1 = arith.extui %0 : i1 to i32
    %c0_i32_0 = arith.constant 0 : i32
    %2 = arith.cmpi ne, %1, %c0_i32_0 : i32
    scf.if %2 {
      %cst_11 = arith.constant 0.000000e+00 : f32
      %13 = vector.broadcast %cst_11 : f32 to vector<16x256xf32>
      %c0_12 = arith.constant 0 : index
      %c0_13 = arith.constant 0 : index
      %14 = vector.load %arg7[%c0_12, %c0_13] : memref<16x256xf32, #tpu.memory_space<vmem>>, vector<16x256xf32>
      tpu.vector_store %arg7[%c0_12, %c0_13], %13 {strides = array<i32>} : memref<16x256xf32, #tpu.memory_space<vmem>>, vector<16x256xf32>,
    } else {
    }
    %c0 = arith.constant 0 : index
    %c0_1 = arith.constant 0 : index
    %3 = vector.load %arg7[%c0, %c0_1] : memref<16x256xf32, #tpu.memory_space<vmem>>, vector<16x256xf32>
    %c0_2 = arith.constant 0 : index
    %c0_3 = arith.constant 0 : index
    %c0_4 = arith.constant 0 : index
    %4 = vector.load %arg3[%c0_2, %c0_3, %c0_4] : memref<1x16x2048xbf16, #tpu.memory_space<vmem>>, vector<1x16x2048xbf16>
    %5 = vector.shape_cast %4 : vector<1x16x2048xbf16> to vector<16x2048xbf16>
    %c0_5 = arith.constant 0 : index
    %c0_6 = arith.constant 0 : index
    %6 = vector.load %arg4[%c0_5, %c0_6] : memref<2048x256xbf16, #tpu.memory_space<vmem>>, vector<2048x256xbf16>
    %cst = arith.constant dense<0.000000e+00> : vector<16x256xf32>
    %7 = tpu.matmul %5, %6, %cst {dimension_numbers = #tpu.dot_dimension_numbers<[1], [0], [0], [1], [0, 0, 1, 1], [], []>} : vector<16x2048xbf16>, vector<2048x256xbf16>, vector<16x256xf32> -> vector<16x256xf32>
    %8 = arith.addf %3, %7 : vector<16x256xf32>
    %c0_7 = arith.constant 0 : index
    %c0_8 = arith.constant 0 : index
    %9 = vector.load %arg7[%c0_7, %c0_8] : memref<16x256xf32, #tpu.memory_space<vmem>>, vector<16x256xf32>
    tpu.vector_store %arg7[%c0_7, %c0_8], %8 {strides = array<i32>} : memref<16x256xf32, #tpu.memory_space<vmem>>, vector<16x256xf32>,
    %c0_i32_9 = arith.constant 0 : i32
    %10 = arith.cmpi eq, %arg2, %c0_i32_9 : i32
    %11 = arith.extui %10 : i1 to i32
    %c0_i32_10 = arith.constant 0 : i32
    %12 = arith.cmpi ne, %11, %c0_i32_10 : i32
    scf.if %12 {
      %c0_11 = arith.constant 0 : index
      %c0_12 = arith.constant 0 : index
      %13 = vector.load %arg7[%c0_11, %c0_12] : memref<16x256xf32, #tpu.memory_space<vmem>>, vector<16x256xf32>
      %c0_13 = arith.constant 0 : index
      %c0_14 = arith.constant 0 : index
      %14 = vector.load %arg5[%c0_13, %c0_14] : memref<1x256xf32, #tpu.memory_space<vmem>>, vector<1x256xf32>
      %15 = vector.broadcast %14 : vector<1x256xf32> to vector<16x256xf32>
      %16 = arith.addf %13, %15 : vector<16x256xf32>
      %cst_15 = arith.constant dense<0.000000e+00> : vector<256xf32>
      %17 = vector.multi_reduction <add>, %16, %cst_15 [0] : vector<16x256xf32> to vector<256xf32>
      %18 = vector.shape_cast %17 : vector<256xf32> to vector<1x256xf32>
      %cst_16 = arith.constant 6.250000e-02 : f32
      %19 = vector.broadcast %cst_16 : f32 to vector<1x256xf32>
      %20 = arith.mulf %18, %19 : vector<1x256xf32>
      %21 = arith.mulf %16, %16 : vector<16x256xf32>
      %cst_17 = arith.constant dense<0.000000e+00> : vector<256xf32>
      %22 = vector.multi_reduction <add>, %21, %cst_17 [0] : vector<16x256xf32> to vector<256xf32>
      %23 = vector.shape_cast %22 : vector<256xf32> to vector<1x256xf32>
      %cst_18 = arith.constant 6.250000e-02 : f32
      %24 = vector.broadcast %cst_18 : f32 to vector<1x256xf32>
      %25 = arith.mulf %23, %24 : vector<1x256xf32>
      %26 = arith.mulf %20, %20 : vector<1x256xf32>
      %27 = arith.subf %25, %26 : vector<1x256xf32>
      %cst_19 = arith.constant 0.000000e+00 : f32
      %28 = vector.broadcast %cst_19 : f32 to vector<1x256xf32>
      %29 = arith.maximumf %27, %28 : vector<1x256xf32>
      %30 = vector.broadcast %20 : vector<1x256xf32> to vector<16x256xf32>
      %31 = arith.subf %16, %30 : vector<16x256xf32>
      %cst_20 = arith.constant 9.99999974E-6 : f32
      %32 = vector.broadcast %cst_20 : f32 to vector<1x256xf32>
      %33 = arith.addf %29, %32 : vector<1x256xf32>
      %34 = math.rsqrt %33 : vector<1x256xf32>
      %35 = vector.broadcast %34 : vector<1x256xf32> to vector<16x256xf32>
      %36 = arith.mulf %31, %35 : vector<16x256xf32>
      %cst_21 = arith.constant 0.000000e+00 : f32
      %37 = vector.broadcast %cst_21 : f32 to vector<16x256xf32>
      %38 = arith.cmpf oge, %36, %37 : vector<16x256xf32>
      %cst_22 = arith.constant 2.000000e-01 : f32
      %39 = vector.broadcast %cst_22 : f32 to vector<16x256xf32>
      %40 = arith.mulf %39, %36 : vector<16x256xf32>
      %41 = arith.select %38, %36, %40 : vector<16x256xi1>, vector<16x256xf32>
      %42 = arith.truncf %41 : vector<16x256xf32> to vector<16x256xbf16>
      %c0_23 = arith.constant 0 : index
      %c0_24 = arith.constant 0 : index
      %c0_25 = arith.constant 0 : index
      %43 = vector.load %arg6[%c0_23, %c0_24, %c0_25] : memref<1x16x256xbf16, #tpu.memory_space<vmem>>, vector<1x16x256xbf16>
      %44 = vector.shape_cast %43 : vector<1x16x256xbf16> to vector<16x256xbf16>
      %45 = vector.shape_cast %42 : vector<16x256xbf16> to vector<1x16x256xbf16>
      tpu.vector_store %arg6[%c0_23, %c0_24, %c0_25], %45 {strides = array<i32>} : memref<1x16x256xbf16, #tpu.memory_space<vmem>>, vector<1x16x256xbf16>,
    } else {
    }
    return
  }
  func.func @transform_0(%arg0: i32, %arg1: i32, %arg2: i32) -> (i32, i32, i32) {
    %c0_i32 = arith.constant 0 : i32
    %c0_i32_0 = arith.constant 0 : i32
    return %arg0, %c0_i32, %arg2 : i32, i32, i32
  }
  func.func @transform_1(%arg0: i32, %arg1: i32, %arg2: i32) -> (i32, i32) {
    %c0_i32 = arith.constant 0 : i32
    return %arg2, %arg1 : i32, i32
  }
  func.func @transform_2(%arg0: i32, %arg1: i32, %arg2: i32) -> (i32, i32) {
    %c0_i32 = arith.constant 0 : i32
    %c0_i32_0 = arith.constant 0 : i32
    return %c0_i32, %arg1 : i32, i32
  }
  func.func @transform_3(%arg0: i32, %arg1: i32, %arg2: i32) -> (i32, i32, i32) {
    %c0_i32 = arith.constant 0 : i32
    %c0_i32_0 = arith.constant 0 : i32
    return %arg0, %c0_i32, %arg1 : i32, i32, i32
  }
}

module attributes {stable_mosaic.version = 11 : i64} {
  func.func @_conv_in_lrelu_kernel(%arg0: i32, %arg1: i32, %arg2: i32, %arg3: memref<1x4x4096xbf16, #tpu.memory_space<vmem>>, %arg4: memref<4096x256xbf16, #tpu.memory_space<vmem>>, %arg5: memref<1x256xf32, #tpu.memory_space<vmem>>, %arg6: memref<1x4x256xbf16, #tpu.memory_space<vmem>>, %arg7: memref<4x256xf32, #tpu.memory_space<vmem>>) attributes {dimension_semantics = [#tpu.dimension_semantics<parallel>, #tpu.dimension_semantics<parallel>, #tpu.dimension_semantics<arbitrary>], iteration_bounds = array<i64: 2, 2, 1>, scalar_prefetch = 0 : i64, scratch_operands = 1 : i64, tpu.core_type = #tpu.core_type<tc>, window_params = [{transform_indices = @transform_0, window_bounds = array<i64: 1, 4, 4096>}, {transform_indices = @transform_1, window_bounds = array<i64: 4096, 256>}, {transform_indices = @transform_2, window_bounds = array<i64: 1, 256>}, {transform_indices = @transform_3, window_bounds = array<i64: 1, 4, 256>}]} {
    %c0_i32 = arith.constant 0 : i32
    %0 = arith.cmpi eq, %arg2, %c0_i32 : i32
    %1 = arith.extui %0 : i1 to i32
    %c0_i32_0 = arith.constant 0 : i32
    %2 = arith.cmpi ne, %1, %c0_i32_0 : i32
    scf.if %2 {
      %cst_11 = arith.constant 0.000000e+00 : f32
      %13 = vector.broadcast %cst_11 : f32 to vector<4x256xf32>
      %c0_12 = arith.constant 0 : index
      %c0_13 = arith.constant 0 : index
      %14 = vector.load %arg7[%c0_12, %c0_13] : memref<4x256xf32, #tpu.memory_space<vmem>>, vector<4x256xf32>
      tpu.vector_store %arg7[%c0_12, %c0_13], %13 {strides = array<i32>} : memref<4x256xf32, #tpu.memory_space<vmem>>, vector<4x256xf32>,
    } else {
    }
    %c0 = arith.constant 0 : index
    %c0_1 = arith.constant 0 : index
    %3 = vector.load %arg7[%c0, %c0_1] : memref<4x256xf32, #tpu.memory_space<vmem>>, vector<4x256xf32>
    %c0_2 = arith.constant 0 : index
    %c0_3 = arith.constant 0 : index
    %c0_4 = arith.constant 0 : index
    %4 = vector.load %arg3[%c0_2, %c0_3, %c0_4] : memref<1x4x4096xbf16, #tpu.memory_space<vmem>>, vector<1x4x4096xbf16>
    %5 = vector.shape_cast %4 : vector<1x4x4096xbf16> to vector<4x4096xbf16>
    %c0_5 = arith.constant 0 : index
    %c0_6 = arith.constant 0 : index
    %6 = vector.load %arg4[%c0_5, %c0_6] : memref<4096x256xbf16, #tpu.memory_space<vmem>>, vector<4096x256xbf16>
    %cst = arith.constant dense<0.000000e+00> : vector<4x256xf32>
    %7 = tpu.matmul %5, %6, %cst {dimension_numbers = #tpu.dot_dimension_numbers<[1], [0], [0], [1], [0, 0, 1, 1], [], []>} : vector<4x4096xbf16>, vector<4096x256xbf16>, vector<4x256xf32> -> vector<4x256xf32>
    %8 = arith.addf %3, %7 : vector<4x256xf32>
    %c0_7 = arith.constant 0 : index
    %c0_8 = arith.constant 0 : index
    %9 = vector.load %arg7[%c0_7, %c0_8] : memref<4x256xf32, #tpu.memory_space<vmem>>, vector<4x256xf32>
    tpu.vector_store %arg7[%c0_7, %c0_8], %8 {strides = array<i32>} : memref<4x256xf32, #tpu.memory_space<vmem>>, vector<4x256xf32>,
    %c0_i32_9 = arith.constant 0 : i32
    %10 = arith.cmpi eq, %arg2, %c0_i32_9 : i32
    %11 = arith.extui %10 : i1 to i32
    %c0_i32_10 = arith.constant 0 : i32
    %12 = arith.cmpi ne, %11, %c0_i32_10 : i32
    scf.if %12 {
      %c0_11 = arith.constant 0 : index
      %c0_12 = arith.constant 0 : index
      %13 = vector.load %arg7[%c0_11, %c0_12] : memref<4x256xf32, #tpu.memory_space<vmem>>, vector<4x256xf32>
      %c0_13 = arith.constant 0 : index
      %c0_14 = arith.constant 0 : index
      %14 = vector.load %arg5[%c0_13, %c0_14] : memref<1x256xf32, #tpu.memory_space<vmem>>, vector<1x256xf32>
      %15 = vector.broadcast %14 : vector<1x256xf32> to vector<4x256xf32>
      %16 = arith.addf %13, %15 : vector<4x256xf32>
      %cst_15 = arith.constant dense<0.000000e+00> : vector<256xf32>
      %17 = vector.multi_reduction <add>, %16, %cst_15 [0] : vector<4x256xf32> to vector<256xf32>
      %18 = vector.shape_cast %17 : vector<256xf32> to vector<1x256xf32>
      %cst_16 = arith.constant 2.500000e-01 : f32
      %19 = vector.broadcast %cst_16 : f32 to vector<1x256xf32>
      %20 = arith.mulf %18, %19 : vector<1x256xf32>
      %21 = arith.mulf %16, %16 : vector<4x256xf32>
      %cst_17 = arith.constant dense<0.000000e+00> : vector<256xf32>
      %22 = vector.multi_reduction <add>, %21, %cst_17 [0] : vector<4x256xf32> to vector<256xf32>
      %23 = vector.shape_cast %22 : vector<256xf32> to vector<1x256xf32>
      %cst_18 = arith.constant 2.500000e-01 : f32
      %24 = vector.broadcast %cst_18 : f32 to vector<1x256xf32>
      %25 = arith.mulf %23, %24 : vector<1x256xf32>
      %26 = arith.mulf %20, %20 : vector<1x256xf32>
      %27 = arith.subf %25, %26 : vector<1x256xf32>
      %cst_19 = arith.constant 0.000000e+00 : f32
      %28 = vector.broadcast %cst_19 : f32 to vector<1x256xf32>
      %29 = arith.maximumf %27, %28 : vector<1x256xf32>
      %30 = vector.broadcast %20 : vector<1x256xf32> to vector<4x256xf32>
      %31 = arith.subf %16, %30 : vector<4x256xf32>
      %cst_20 = arith.constant 9.99999974E-6 : f32
      %32 = vector.broadcast %cst_20 : f32 to vector<1x256xf32>
      %33 = arith.addf %29, %32 : vector<1x256xf32>
      %34 = math.rsqrt %33 : vector<1x256xf32>
      %35 = vector.broadcast %34 : vector<1x256xf32> to vector<4x256xf32>
      %36 = arith.mulf %31, %35 : vector<4x256xf32>
      %cst_21 = arith.constant 0.000000e+00 : f32
      %37 = vector.broadcast %cst_21 : f32 to vector<4x256xf32>
      %38 = arith.cmpf oge, %36, %37 : vector<4x256xf32>
      %cst_22 = arith.constant 2.000000e-01 : f32
      %39 = vector.broadcast %cst_22 : f32 to vector<4x256xf32>
      %40 = arith.mulf %39, %36 : vector<4x256xf32>
      %41 = arith.select %38, %36, %40 : vector<4x256xi1>, vector<4x256xf32>
      %42 = arith.truncf %41 : vector<4x256xf32> to vector<4x256xbf16>
      %c0_23 = arith.constant 0 : index
      %c0_24 = arith.constant 0 : index
      %c0_25 = arith.constant 0 : index
      %43 = vector.load %arg6[%c0_23, %c0_24, %c0_25] : memref<1x4x256xbf16, #tpu.memory_space<vmem>>, vector<1x4x256xbf16>
      %44 = vector.shape_cast %43 : vector<1x4x256xbf16> to vector<4x256xbf16>
      %45 = vector.shape_cast %42 : vector<4x256xbf16> to vector<1x4x256xbf16>
      tpu.vector_store %arg6[%c0_23, %c0_24, %c0_25], %45 {strides = array<i32>} : memref<1x4x256xbf16, #tpu.memory_space<vmem>>, vector<1x4x256xbf16>,
    } else {
    }
    return
  }
  func.func @transform_0(%arg0: i32, %arg1: i32, %arg2: i32) -> (i32, i32, i32) {
    %c0_i32 = arith.constant 0 : i32
    %c0_i32_0 = arith.constant 0 : i32
    return %arg0, %c0_i32, %arg2 : i32, i32, i32
  }
  func.func @transform_1(%arg0: i32, %arg1: i32, %arg2: i32) -> (i32, i32) {
    %c0_i32 = arith.constant 0 : i32
    return %arg2, %arg1 : i32, i32
  }
  func.func @transform_2(%arg0: i32, %arg1: i32, %arg2: i32) -> (i32, i32) {
    %c0_i32 = arith.constant 0 : i32
    %c0_i32_0 = arith.constant 0 : i32
    return %c0_i32, %arg1 : i32, i32
  }
  func.func @transform_3(%arg0: i32, %arg1: i32, %arg2: i32) -> (i32, i32, i32) {
    %c0_i32 = arith.constant 0 : i32
    %c0_i32_0 = arith.constant 0 : i32
    return %arg0, %c0_i32, %arg1 : i32, i32, i32
  }
}

module attributes {stable_mosaic.version = 11 : i64} {
  func.func @_gemm_bias_act_kernel(%arg0: i32, %arg1: i32, %arg2: i32, %arg3: memref<8x8192xbf16, #tpu.memory_space<vmem>>, %arg4: memref<8192x128xbf16, #tpu.memory_space<vmem>>, %arg5: memref<1x128xf32, #tpu.memory_space<vmem>>, %arg6: memref<8x128xf32, #tpu.memory_space<vmem>>, %arg7: memref<8x128xf32, #tpu.memory_space<vmem>>) attributes {dimension_semantics = [#tpu.dimension_semantics<parallel>, #tpu.dimension_semantics<parallel>, #tpu.dimension_semantics<arbitrary>], iteration_bounds = array<i64: 1, 1, 1>, scalar_prefetch = 0 : i64, scratch_operands = 1 : i64, tpu.core_type = #tpu.core_type<tc>, window_params = [{transform_indices = @transform_0, window_bounds = array<i64: 8, 8192>}, {transform_indices = @transform_1, window_bounds = array<i64: 8192, 128>}, {transform_indices = @transform_2, window_bounds = array<i64: 1, 128>}, {transform_indices = @transform_3, window_bounds = array<i64: 8, 128>}]} {
    %c0_i32 = arith.constant 0 : i32
    %0 = arith.cmpi eq, %arg2, %c0_i32 : i32
    %1 = arith.extui %0 : i1 to i32
    %c0_i32_0 = arith.constant 0 : i32
    %2 = arith.cmpi ne, %1, %c0_i32_0 : i32
    scf.if %2 {
      %cst_10 = arith.constant 0.000000e+00 : f32
      %12 = vector.broadcast %cst_10 : f32 to vector<8x128xf32>
      %c0_11 = arith.constant 0 : index
      %c0_12 = arith.constant 0 : index
      %13 = vector.load %arg7[%c0_11, %c0_12] : memref<8x128xf32, #tpu.memory_space<vmem>>, vector<8x128xf32>
      tpu.vector_store %arg7[%c0_11, %c0_12], %12 {strides = array<i32>} : memref<8x128xf32, #tpu.memory_space<vmem>>, vector<8x128xf32>,
    } else {
    }
    %c0 = arith.constant 0 : index
    %c0_1 = arith.constant 0 : index
    %3 = vector.load %arg7[%c0, %c0_1] : memref<8x128xf32, #tpu.memory_space<vmem>>, vector<8x128xf32>
    %c0_2 = arith.constant 0 : index
    %c0_3 = arith.constant 0 : index
    %4 = vector.load %arg3[%c0_2, %c0_3] : memref<8x8192xbf16, #tpu.memory_space<vmem>>, vector<8x8192xbf16>
    %c0_4 = arith.constant 0 : index
    %c0_5 = arith.constant 0 : index
    %5 = vector.load %arg4[%c0_4, %c0_5] : memref<8192x128xbf16, #tpu.memory_space<vmem>>, vector<8192x128xbf16>
    %cst = arith.constant dense<0.000000e+00> : vector<8x128xf32>
    %6 = tpu.matmul %4, %5, %cst {dimension_numbers = #tpu.dot_dimension_numbers<[1], [0], [0], [1], [0, 0, 1, 1], [], []>} : vector<8x8192xbf16>, vector<8192x128xbf16>, vector<8x128xf32> -> vector<8x128xf32>
    %7 = arith.addf %3, %6 : vector<8x128xf32>
    %c0_6 = arith.constant 0 : index
    %c0_7 = arith.constant 0 : index
    %8 = vector.load %arg7[%c0_6, %c0_7] : memref<8x128xf32, #tpu.memory_space<vmem>>, vector<8x128xf32>
    tpu.vector_store %arg7[%c0_6, %c0_7], %7 {strides = array<i32>} : memref<8x128xf32, #tpu.memory_space<vmem>>, vector<8x128xf32>,
    %c0_i32_8 = arith.constant 0 : i32
    %9 = arith.cmpi eq, %arg2, %c0_i32_8 : i32
    %10 = arith.extui %9 : i1 to i32
    %c0_i32_9 = arith.constant 0 : i32
    %11 = arith.cmpi ne, %10, %c0_i32_9 : i32
    scf.if %11 {
      %c0_10 = arith.constant 0 : index
      %c0_11 = arith.constant 0 : index
      %12 = vector.load %arg7[%c0_10, %c0_11] : memref<8x128xf32, #tpu.memory_space<vmem>>, vector<8x128xf32>
      %c0_12 = arith.constant 0 : index
      %c0_13 = arith.constant 0 : index
      %13 = vector.load %arg5[%c0_12, %c0_13] : memref<1x128xf32, #tpu.memory_space<vmem>>, vector<1x128xf32>
      %14 = vector.broadcast %13 : vector<1x128xf32> to vector<8x128xf32>
      %15 = arith.addf %12, %14 : vector<8x128xf32>
      %c0_14 = arith.constant 0 : index
      %c0_15 = arith.constant 0 : index
      %16 = vector.load %arg6[%c0_14, %c0_15] : memref<8x128xf32, #tpu.memory_space<vmem>>, vector<8x128xf32>
      tpu.vector_store %arg6[%c0_14, %c0_15], %15 {strides = array<i32>} : memref<8x128xf32, #tpu.memory_space<vmem>>, vector<8x128xf32>,
    } else {
    }
    return
  }
  func.func @transform_0(%arg0: i32, %arg1: i32, %arg2: i32) -> (i32, i32) {
    %c0_i32 = arith.constant 0 : i32
    return %arg0, %arg2 : i32, i32
  }
  func.func @transform_1(%arg0: i32, %arg1: i32, %arg2: i32) -> (i32, i32) {
    %c0_i32 = arith.constant 0 : i32
    return %arg2, %arg1 : i32, i32
  }
  func.func @transform_2(%arg0: i32, %arg1: i32, %arg2: i32) -> (i32, i32) {
    %c0_i32 = arith.constant 0 : i32
    %c0_i32_0 = arith.constant 0 : i32
    return %c0_i32, %arg1 : i32, i32
  }
  func.func @transform_3(%arg0: i32, %arg1: i32, %arg2: i32) -> (i32, i32) {
    %c0_i32 = arith.constant 0 : i32
    return %arg0, %arg1 : i32, i32
  }
}

</mosaic_0001>

<bundles_post_ra>
// kernel: discriminator_forward.5
= control target key start
LH: loop header
LB: loop body
LE: loop exit
PB: predicated region body
PF: predicated region fallthrough
CT: control target
= control target key end

     0   :  { %vm19_vm0 = vcmask 523264   ;;  %v1888_v1 = vmov 0.0   ;;  %vm1472_vm1 = vcmask 519168   ;;  %s2676_s1 = inlined_call_operand.vmem [shape: bf16[128,64], index: 1, kind: input, shape index: {}]   ;;  %s2677_s0 = inlined_call_operand.vmem [shape: bf16[512,128], index: 0, kind: input, shape index: {}]   ;;  %s2678_s2 = inlined_call_operand.vmem [shape: f32[1,64], index: 2, kind: input, shape index: {}]   ;;  %s2679_s3 = inlined_call_operand.vmem [shape: bf16[512,64], index: 3, kind: output, shape index: {}]  }
   0x1   :  { %v1912_v0 = vld [vmem:[%s2676_s1] sm:$0xff]   ;;  %22 = vst.msk [vmem:[#allocation2 + $0x10] sm:$0xff] %vm19_vm0, %v1888_v1  ;;  %20 = vst.msk [vmem:[#allocation2] sm:$0xff] %vm19_vm0, %v1888_v1  ;;  %v1848_v2 = vld [vmem:[%s2676_s1 + $0x8] sm:$0xff]  }
   0x2   :  { %21 = vst.msk [vmem:[#allocation2 + $0x8] sm:$0xff] %vm19_vm0, %v1888_v1  ;;  %23 = vst.msk [vmem:[#allocation2 + $0x18] sm:$0xff] %vm19_vm0, %v1888_v1  ;;  %1750 = vmatprep.subr.bf16.mxu0 %v1912_v0  ;;  %1830 = vmatprep.subr.bf16.mxu1 %v1912_v0  ;;  %v1849_v3 = vld [vmem:[%s2676_s1 + $0x10] sm:$0xff]   ;;  %v1850_v4 = vld [vmem:[%s2676_s1 + $0x18] sm:$0xff]  }
   0x3   :  { %24 = vst.msk [vmem:[#allocation2 + $0x20] sm:$0xff] %vm19_vm0, %v1888_v1  ;;  %25 = vst.msk [vmem:[#allocation2 + $0x28] sm:$0xff] %vm19_vm0, %v1888_v1  ;;  %1751 = vmatpush3.bf16.msra.mxu0 %v1912_v0  ;;  %1838 = vmatpush3.bf16.msra.mxu1 %v1912_v0  ;;  %v1855_v5 = vld [vmem:[%s2677_s0] sm:$0xff]   ;;  %v1852_v8 = vld [vmem:[%s2676_s1 + $0x28] sm:$0xff]  }
   0x4   :  { %26 = vst.msk [vmem:[#allocation2 + $0x30] sm:$0xff] %vm19_vm0, %v1888_v1  ;;  %27 = vst.msk [vmem:[#allocation2 + $0x38] sm:$0xff] %vm19_vm0, %v1888_v1  ;;  %1752 = vmatprep.subr.bf16.mxu0 %v1848_v2  ;;  %1831 = vmatprep.subr.bf16.mxu1 %v1848_v2  ;;  %v1856_v6 = vld [vmem:[%s2677_s0 + $0x80] sm:$0xff]   ;;  %v1853_v9 = vld [vmem:[%s2676_s1 + $0x30] sm:$0xff]  }
   0x5   :  { %28 = vst.msk [vmem:[#allocation2 + $0x40] sm:$0xff] %vm19_vm0, %v1888_v1  ;;  %29 = vst.msk [vmem:[#allocation2 + $0x48] sm:$0xff] %vm19_vm0, %v1888_v1  ;;  %1766 = vmatprep.mubr.bf16.mxu0 %v1855_v5  ;;  %v1851_v7 = vld [vmem:[%s2676_s1 + $0x20] sm:$0xff]   ;;  %1798 = vmatprep.mubr.bf16.mxu1 %v1856_v6  ;;  %v1854_v10 = vld [vmem:[%s2676_s1 + $0x38] sm:$0xff]  }
   0x6   :  { %30 = vst.msk [vmem:[#allocation2 + $0x50] sm:$0xff] %vm19_vm0, %v1888_v1  ;;  %31 = vst.msk [vmem:[#allocation2 + $0x58] sm:$0xff] %vm19_vm0, %v1888_v1  ;;  %v1857_v11 = vld [vmem:[%s2677_s0 + $0x8] sm:$0xff]   ;;  %v1859_v13 = vld [vmem:[%s2677_s0 + $0x10] sm:$0xff]  }
   0x7   :  { %32 = vst.msk [vmem:[#allocation2 + $0x60] sm:$0xff] %vm19_vm0, %v1888_v1  ;;  %33 = vst.msk [vmem:[#allocation2 + $0x68] sm:$0xff] %vm19_vm0, %v1888_v1  ;;  %1753 = vmatpush3.bf16.msra.mxu0 %v1848_v2  ;;  %1839 = vmatpush3.bf16.msra.mxu1 %v1848_v2  ;;  %v1858_v12 = vld [vmem:[%s2677_s0 + $0x88] sm:$0xff]   ;;  %v1860_v14 = vld [vmem:[%s2677_s0 + $0x90] sm:$0xff]  }
   0x8   :  { %34 = vst.msk [vmem:[#allocation2 + $0x70] sm:$0xff] %vm19_vm0, %v1888_v1  ;;  %35 = vst.msk [vmem:[#allocation2 + $0x78] sm:$0xff] %vm19_vm0, %v1888_v1  ;;  %1754 = vmatprep.subr.bf16.mxu0 %v1849_v3  ;;  %1832 = vmatprep.subr.bf16.mxu1 %v1849_v3  ;;  %v1861_v15 = vld [vmem:[%s2677_s0 + $0x18] sm:$0xff]   ;;  %v1863_v17 = vld [vmem:[%s2677_s0 + $0x20] sm:$0xff]  }
   0x9   :  { %36 = vst.msk [vmem:[#allocation2 + $0x80] sm:$0xff] %vm19_vm0, %v1888_v1  ;;  %37 = vst.msk [vmem:[#allocation2 + $0x88] sm:$0xff] %vm19_vm0, %v1888_v1  ;;  %v1862_v16 = vld [vmem:[%s2677_s0 + $0x98] sm:$0xff]   ;;  %v1864_v18 = vld [vmem:[%s2677_s0 + $0xa0] sm:$0xff]  }
   0xa   :  { %38 = vst.msk [vmem:[#allocation2 + $0x90] sm:$0xff] %vm19_vm0, %v1888_v1  ;;  %39 = vst.msk [vmem:[#allocation2 + $0x98] sm:$0xff] %vm19_vm0, %v1888_v1  ;;  %v1865_v19 = vld [vmem:[%s2677_s0 + $0x28] sm:$0xff]   ;;  %v1867_v21 = vld [vmem:[%s2677_s0 + $0x30] sm:$0xff]  }
   0xb   :  { %40 = vst.msk [vmem:[#allocation2 + $0xa0] sm:$0xff] %vm19_vm0, %v1888_v1  ;;  %41 = vst.msk [vmem:[#allocation2 + $0xa8] sm:$0xff] %vm19_vm0, %v1888_v1  ;;  %1755 = vmatpush3.bf16.msra.mxu0 %v1849_v3  ;;  %1840 = vmatpush3.bf16.msra.mxu1 %v1849_v3  ;;  %v1866_v20 = vld [vmem:[%s2677_s0 + $0xa8] sm:$0xff]   ;;  %v1868_v22 = vld [vmem:[%s2677_s0 + $0xb0] sm:$0xff]  }
   0xc   :  { %42 = vst.msk [vmem:[#allocation2 + $0xb0] sm:$0xff] %vm19_vm0, %v1888_v1  ;;  %43 = vst.msk [vmem:[#allocation2 + $0xb8] sm:$0xff] %vm19_vm0, %v1888_v1  ;;  %1756 = vmatprep.subr.bf16.mxu0 %v1850_v4  ;;  %1833 = vmatprep.subr.bf16.mxu1 %v1850_v4  ;;  %v1869_v23 = vld [vmem:[%s2677_s0 + $0x38] sm:$0xff]   ;;  %v1871_v25 = vld [vmem:[%s2677_s0 + $0x40] sm:$0xff]  }
   0xd   :  { %44 = vst.msk [vmem:[#allocation2 + $0xc0] sm:$0xff] %vm19_vm0, %v1888_v1  ;;  %45 = vst.msk [vmem:[#allocation2 + $0xc8] sm:$0xff] %vm19_vm0, %v1888_v1  ;;  %v1870_v24 = vld [vmem:[%s2677_s0 + $0xb8] sm:$0xff]   ;;  %v1872_v26 = vld [vmem:[%s2677_s0 + $0xc0] sm:$0xff]  }
   0xe   :  { %46 = vst.msk [vmem:[#allocation2 + $0xd0] sm:$0xff] %vm19_vm0, %v1888_v1  ;;  %47 = vst.msk [vmem:[#allocation2 + $0xd8] sm:$0xff] %vm19_vm0, %v1888_v1  ;;  %v1873_v27 = vld [vmem:[%s2677_s0 + $0x48] sm:$0xff]   ;;  %v1875_v29 = vld [vmem:[%s2677_s0 + $0x50] sm:$0xff]  }
   0xf   :  { %48 = vst.msk [vmem:[#allocation2 + $0xe0] sm:$0xff] %vm19_vm0, %v1888_v1  ;;  %49 = vst.msk [vmem:[#allocation2 + $0xe8] sm:$0xff] %vm19_vm0, %v1888_v1  ;;  %1757 = vmatpush3.bf16.msra.mxu0 %v1850_v4  ;;  %1841 = vmatpush3.bf16.msra.mxu1 %v1850_v4  ;;  %v1874_v28 = vld [vmem:[%s2677_s0 + $0xc8] sm:$0xff]   ;;  %v1876_v30 = vld [vmem:[%s2677_s0 + $0xd0] sm:$0xff]  }
  0x10   :  { %50 = vst.msk [vmem:[#allocation2 + $0xf0] sm:$0xff] %vm19_vm0, %v1888_v1  ;;  %51 = vst.msk [vmem:[#allocation2 + $0xf8] sm:$0xff] %vm19_vm0, %v1888_v1  ;;  %1758 = vmatprep.subr.bf16.mxu0 %v1851_v7  ;;  %1834 = vmatprep.subr.bf16.mxu1 %v1851_v7  ;;  %v1877_v31 = vld [vmem:[%s2677_s0 + $0x58] sm:$0xff]   ;;  %v1879_v33 = vld [vmem:[%s2677_s0 + $0x60] sm:$0xff]  }
  0x11   :  { %52 = vst.msk [vmem:[#allocation2 + $0x100] sm:$0xff] %vm19_vm0, %v1888_v1  ;;  %53 = vst.msk [vmem:[#allocation2 + $0x108] sm:$0xff] %vm19_vm0, %v1888_v1  ;;  %v1878_v32 = vld [vmem:[%s2677_s0 + $0xd8] sm:$0xff]   ;;  %v1880_v34 = vld [vmem:[%s2677_s0 + $0xe0] sm:$0xff]  }
  0x12   :  { %54 = vst.msk [vmem:[#allocation2 + $0x110] sm:$0xff] %vm19_vm0, %v1888_v1  ;;  %55 = vst.msk [vmem:[#allocation2 + $0x118] sm:$0xff] %vm19_vm0, %v1888_v1  ;;  %v1881_v35 = vld [vmem:[%s2677_s0 + $0x68] sm:$0xff]   ;;  %v1883_v37 = vld [vmem:[%s2677_s0 + $0x70] sm:$0xff]  }
  0x13   :  { %56 = vst.msk [vmem:[#allocation2 + $0x120] sm:$0xff] %vm19_vm0, %v1888_v1  ;;  %57 = vst.msk [vmem:[#allocation2 + $0x128] sm:$0xff] %vm19_vm0, %v1888_v1  ;;  %1759 = vmatpush3.bf16.msra.mxu0 %v1851_v7  ;;  %1842 = vmatpush3.bf16.msra.mxu1 %v1851_v7  ;;  %v1882_v36 = vld [vmem:[%s2677_s0 + $0xe8] sm:$0xff]   ;;  %v1884_v38 = vld [vmem:[%s2677_s0 + $0xf0] sm:$0xff]  }
  0x14   :  { %58 = vst.msk [vmem:[#allocation2 + $0x130] sm:$0xff] %vm19_vm0, %v1888_v1  ;;  %59 = vst.msk [vmem:[#allocation2 + $0x138] sm:$0xff] %vm19_vm0, %v1888_v1  ;;  %1760 = vmatprep.subr.bf16.mxu0 %v1852_v8  ;;  %1835 = vmatprep.subr.bf16.mxu1 %v1852_v8  ;;  %v1885_v39 = vld [vmem:[%s2677_s0 + $0x78] sm:$0xff]   ;;  %v86_v41 = vld [vmem:[#allocation2 + $0x10] sm:$0xff] }
  0x15   :  { %60 = vst.msk [vmem:[#allocation2 + $0x140] sm:$0xff] %vm19_vm0, %v1888_v1  ;;  %61 = vst.msk [vmem:[#allocation2 + $0x148] sm:$0xff] %vm19_vm0, %v1888_v1  ;;  %v1886_v40 = vld [vmem:[%s2677_s0 + $0xf8] sm:$0xff]   ;;  %v84_v43 = vld [vmem:[#allocation2] sm:$0xff] }
  0x16   :  { %62 = vst.msk [vmem:[#allocation2 + $0x150] sm:$0xff] %vm19_vm0, %v1888_v1  ;;  %63 = vst.msk [vmem:[#allocation2 + $0x158] sm:$0xff] %vm19_vm0, %v1888_v1  ;;  %v87_v47 = vld [vmem:[#allocation2 + $0x18] sm:$0xff]  ;;  %v85_v53 = vld [vmem:[#allocation2 + $0x8] sm:$0xff] }
  0x17   :  { %64 = vst.msk [vmem:[#allocation2 + $0x160] sm:$0xff] %vm19_vm0, %v1888_v1  ;;  %65 = vst.msk [vmem:[#allocation2 + $0x168] sm:$0xff] %vm19_vm0, %v1888_v1  ;;  %1761 = vmatpush3.bf16.msra.mxu0 %v1852_v8  ;;  %1843 = vmatpush3.bf16.msra.mxu1 %v1852_v8  ;;  %v88_v3 = vld [vmem:[#allocation2 + $0x20] sm:$0xff]  ;;  %v91_v8 = vld [vmem:[#allocation2 + $0x38] sm:$0xff] }
  0x18   :  { %66 = vst.msk [vmem:[#allocation2 + $0x170] sm:$0xff] %vm19_vm0, %v1888_v1  ;;  %67 = vst.msk [vmem:[#allocation2 + $0x178] sm:$0xff] %vm19_vm0, %v1888_v1  ;;  %1762 = vmatprep.subr.bf16.mxu0 %v1853_v9  ;;  %1836 = vmatprep.subr.bf16.mxu1 %v1853_v9  ;;  %v116_v44 = vld [vmem:[#allocation2 + $0x100] sm:$0xff]  ;;  %v117_v54 = vld [vmem:[#allocation2 + $0x108] sm:$0xff] }
  0x19   :  { %68 = vst.msk [vmem:[#allocation2 + $0x180] sm:$0xff] %vm19_vm0, %v1888_v1  ;;  %69 = vst.msk [vmem:[#allocation2 + $0x188] sm:$0xff] %vm19_vm0, %v1888_v1  ;;  %v118_v42 = vld [vmem:[#allocation2 + $0x110] sm:$0xff]  ;;  %v119_v48 = vld [vmem:[#allocation2 + $0x118] sm:$0xff] }
  0x1a   :  { %70 = vst.msk [vmem:[#allocation2 + $0x190] sm:$0xff] %vm19_vm0, %v1888_v1  ;;  %71 = vst.msk [vmem:[#allocation2 + $0x198] sm:$0xff] %vm19_vm0, %v1888_v1  ;;  %v120_v4 = vld [vmem:[#allocation2 + $0x120] sm:$0xff] }
  0x1b   :  { %72 = vst.msk [vmem:[#allocation2 + $0x1a0] sm:$0xff] %vm19_vm0, %v1888_v1  ;;  %73 = vst.msk [vmem:[#allocation2 + $0x1a8] sm:$0xff] %vm19_vm0, %v1888_v1  ;;  %1763 = vmatpush3.bf16.msra.mxu0 %v1853_v9  ;;  %1844 = vmatpush3.bf16.msra.mxu1 %v1853_v9  ;;  %v122_v2 = vld [vmem:[#allocation2 + $0x130] sm:$0xff]  ;;  %v2174_v5 = vld [vmem:[%s2678_s2] ss:$0 sm:$0xff] }
  0x1c   :  { %74 = vst.msk [vmem:[#allocation2 + $0x1b0] sm:$0xff] %vm19_vm0, %v1888_v1  ;;  %75 = vst.msk [vmem:[#allocation2 + $0x1b8] sm:$0xff] %vm19_vm0, %v1888_v1  ;;  %1764 = vmatprep.subr.bf16.mxu0 %v1854_v10  ;;  %1837 = vmatprep.subr.bf16.mxu1 %v1854_v10  ;;  %v123_v9 = vld [vmem:[#allocation2 + $0x138] sm:$0xff] }
  0x1d   :  { %76 = vst.msk [vmem:[#allocation2 + $0x1c0] sm:$0xff] %vm19_vm0, %v1888_v1  ;;  %77 = vst.msk [vmem:[#allocation2 + $0x1c8] sm:$0xff] %vm19_vm0, %v1888_v1 }
  0x1e   :  { %78 = vst.msk [vmem:[#allocation2 + $0x1d0] sm:$0xff] %vm19_vm0, %v1888_v1  ;;  %79 = vst.msk [vmem:[#allocation2 + $0x1d8] sm:$0xff] %vm19_vm0, %v1888_v1 }
  0x1f   :  { %80 = vst.msk [vmem:[#allocation2 + $0x1e0] sm:$0xff] %vm19_vm0, %v1888_v1  ;;  %81 = vst.msk [vmem:[#allocation2 + $0x1e8] sm:$0xff] %vm19_vm0, %v1888_v1  ;;  %1765 = vmatpush3.bf16.msra.mxu0 %v1854_v10  ;;  %1845 = vmatpush3.bf16.msra.mxu1 %v1854_v10 }
  0x20   :  { %82 = vst.msk [vmem:[#allocation2 + $0x1f0] sm:$0xff] %vm19_vm0, %v1888_v1  ;;  %83 = vst.msk [vmem:[#allocation2 + $0x1f8] sm:$0xff] %vm19_vm0, %v1888_v1  ;;  %v90_v1 = vld [vmem:[#allocation2 + $0x30] sm:$0xff] }
  0x22   :  { %1767 = vmatmul.mubr.bf16.vlgmr.msra.gmra.mrb[0].mxu0 %v1857_v11  ;;  %1799 = vmatmul.mubr.bf16.vlgmr.msra.gmra.mrb[0].mxu1 %v1858_v12 }
  0x23   :  { %1770 = vmatprep.mubr.bf16.mxu0 %v1859_v13  ;;  %1802 = vmatprep.mubr.bf16.mxu1 %v1860_v14  ;;  %v89_v14 = vld [vmem:[#allocation2 + $0x28] sm:$0xff] }
  0x2a   :  { %1771 = vmatmul.mubr.bf16.gmra.mrb[4].mxu0 %v1861_v15  ;;  %1803 = vmatmul.mubr.bf16.gmra.mrb[4].mxu1 %v1862_v16  ;;  %v121_v15 = vld [vmem:[#allocation2 + $0x128] sm:$0xff] }
  0x2b   :  { %1774 = vmatprep.mubr.bf16.mxu0 %v1863_v17  ;;  %1806 = vmatprep.mubr.bf16.mxu1 %v1864_v18 }
  0x32   :  { %1775 = vmatmul.mubr.bf16.gmra.mrb[8].mxu0 %v1865_v19  ;;  %1807 = vmatmul.mubr.bf16.gmra.mrb[8].mxu1 %v1866_v20 }
  0x33   :  { %1778 = vmatprep.mubr.bf16.mxu0 %v1867_v21  ;;  %1810 = vmatprep.mubr.bf16.mxu1 %v1868_v22 }
  0x3a   :  { %1779 = vmatmul.mubr.bf16.gmra.mrb[12].mxu0 %v1869_v23  ;;  %1811 = vmatmul.mubr.bf16.gmra.mrb[12].mxu1 %v1870_v24 }
  0x3b   :  { %1782 = vmatprep.mubr.bf16.mxu0 %v1871_v25  ;;  %1814 = vmatprep.mubr.bf16.mxu1 %v1872_v26 }
  0x42   :  { %1783 = vmatmul.mubr.bf16.gmra.mrb[16].mxu0 %v1873_v27  ;;  %1815 = vmatmul.mubr.bf16.gmra.mrb[16].mxu1 %v1874_v28 }
  0x43   :  { %1786 = vmatprep.mubr.bf16.mxu0 %v1875_v29  ;;  %1818 = vmatprep.mubr.bf16.mxu1 %v1876_v30 }
  0x4a   :  { %1787 = vmatmul.mubr.bf16.gmra.mrb[20].mxu0 %v1877_v31  ;;  %1819 = vmatmul.mubr.bf16.gmra.mrb[20].mxu1 %v1878_v32 }
  0x4b   :  { %1790 = vmatprep.mubr.bf16.mxu0 %v1879_v33  ;;  %1822 = vmatprep.mubr.bf16.mxu1 %v1880_v34 }
  0x52   :  { %1791 = vmatmul.mubr.bf16.gmra.mrb[24].mxu0 %v1881_v35  ;;  %1823 = vmatmul.mubr.bf16.gmra.mrb[24].mxu1 %v1882_v36 }
  0x53   :  { %1794 = vmatprep.mubr.bf16.mxu0 %v1883_v37  ;;  %1826 = vmatprep.mubr.bf16.mxu1 %v1884_v38 }
  0x5a   :  { %1795 = vmatmul.mubr.bf16.gmra.mrb[28].mxu0 %v1885_v39  ;;  %1827 = vmatmul.mubr.bf16.gmra.mrb[28].mxu1 %v1886_v40 }
  0xf5   :  { %v1768_v45 = vpop.f32.mrb[0].mxu0  ;;  %v1800_v46 = vpop.f32.mrb[0].mxu1 }
  0xf6   :  { %v759_v49 = vadd.f32 %v1768_v45, %v86_v41  ;;  %v791_v50 = vadd.f32 %v1800_v46, %v118_v42  ;;  %v502_v51 = vpop.f32.mrb[1].mxu0  ;;  %v630_v52 = vpop.f32.mrb[1].mxu1 }
  0xf7   :  { %v757_v55 = vadd.f32 %v502_v51, %v84_v43  ;;  %v789_v56 = vadd.f32 %v630_v52, %v116_v44  ;;  %v1769_v57 = vpop.f32.mrb[2].mxu0  ;;  %v1801_v58 = vpop.f32.mrb[2].mxu1 }
  0xf8   :  { %824 = vst.msk [vmem:[#allocation2 + $0x10] sm:$0xff] %vm19_vm0, %v759_v49  ;;  %856 = vst.msk [vmem:[#allocation2 + $0x110] sm:$0xff] %vm19_vm0, %v791_v50  ;;  %v760_v59 = vadd.f32 %v1769_v57, %v87_v47  ;;  %v792_v60 = vadd.f32 %v1801_v58, %v119_v48  ;;  %v505_v61 = vpop.f32.mrb[3].mxu0  ;;  %v633_v62 = vpop.f32.mrb[3].mxu1  ;;  %v94_v50 = vld [vmem:[#allocation2 + $0x50] sm:$0xff] }
  0xf9   :  { %822 = vst.msk [vmem:[#allocation2] sm:$0xff] %vm19_vm0, %v757_v55  ;;  %854 = vst.msk [vmem:[#allocation2 + $0x100] sm:$0xff] %vm19_vm0, %v789_v56  ;;  %v758_v63 = vadd.f32 %v505_v61, %v85_v53  ;;  %v790_v0 = vadd.f32 %v633_v62, %v117_v54 }
  0xfa   :  { %825 = vst.msk [vmem:[#allocation2 + $0x18] sm:$0xff] %vm19_vm0, %v760_v59  ;;  %857 = vst.msk [vmem:[#allocation2 + $0x118] sm:$0xff] %vm19_vm0, %v792_v60 }
  0xfb   :  { %823 = vst.msk [vmem:[#allocation2 + $0x8] sm:$0xff] %vm19_vm0, %v758_v63  ;;  %855 = vst.msk [vmem:[#allocation2 + $0x108] sm:$0xff] %vm19_vm0, %v790_v0 }
  0xfd   :  { %v1772_v6 = vpop.f32.mrb[4].mxu0  ;;  %v1804_v7 = vpop.f32.mrb[4].mxu1 }
  0xfe   :  { %v763_v10 = vadd.f32 %v1772_v6, %v90_v1  ;;  %v795_v11 = vadd.f32 %v1804_v7, %v122_v2  ;;  %v518_v12 = vpop.f32.mrb[5].mxu0  ;;  %v646_v13 = vpop.f32.mrb[5].mxu1 }
  0xff   :  { %v891_v16 = vld [vmem:[#allocation2 + $0x10] sm:$0xff]  ;;  %v761_v18 = vadd.f32 %v518_v12, %v88_v3  ;;  %v793_v19 = vadd.f32 %v646_v13, %v120_v4  ;;  %v1773_v20 = vpop.f32.mrb[6].mxu0  ;;  %v1805_v21 = vpop.f32.mrb[6].mxu1 }
 0x100   :  { %v923_v17 = vld [vmem:[#allocation2 + $0x110] sm:$0xff]  ;;  %v962_v22 = vadd.f32 %v2174_v5, %v891_v16  ;;  %v889_v24 = vld [vmem:[#allocation2] sm:$0xff]  ;;  %828 = vst.msk [vmem:[#allocation2 + $0x30] sm:$0xff] %vm19_vm0, %v763_v10  ;;  %860 = vst.msk [vmem:[#allocation2 + $0x130] sm:$0xff] %vm19_vm0, %v795_v11  ;;  %v764_v26 = vadd.f32 %v1773_v20, %v91_v8  ;;  %v796_v27 = vadd.f32 %v1805_v21, %v123_v9  ;;  %v521_v28 = vpop.f32.mrb[7].mxu0  ;;  %v649_v29 = vpop.f32.mrb[7].mxu1 }
 0x101   :  { %v994_v23 = vadd.f32 %v2174_v5, %v923_v17  ;;  %v921_v25 = vld [vmem:[#allocation2 + $0x100] sm:$0xff]  ;;  %v960_v30 = vadd.f32 %v2174_v5, %v889_v24  ;;  %v892_v32 = vld [vmem:[#allocation2 + $0x18] sm:$0xff]  ;;  %826 = vst.msk [vmem:[#allocation2 + $0x20] sm:$0xff] %vm19_vm0, %v761_v18  ;;  %858 = vst.msk [vmem:[#allocation2 + $0x120] sm:$0xff] %vm19_vm0, %v793_v19  ;;  %v762_v34 = vadd.f32 %v521_v28, %v89_v14 }
 0x102   :  { %v992_v31 = vadd.f32 %v2174_v5, %v921_v25  ;;  %v924_v33 = vld [vmem:[#allocation2 + $0x118] sm:$0xff]  ;;  %v794_v35 = vadd.f32 %v649_v29, %v121_v15  ;;  %vm1026_vm2 = vcmp.ge.f32.partialorder %v962_v22, 0.0  ;;  %v1090_v36 = vmul.f32 0.2, %v962_v22  ;;  %829 = vst.msk [vmem:[#allocation2 + $0x38] sm:$0xff] %vm19_vm0, %v764_v26  ;;  %861 = vst.msk [vmem:[#allocation2 + $0x138] sm:$0xff] %vm19_vm0, %v796_v27 }
 0x103   :  { %vm1058_vm3 = vcmp.ge.f32.partialorder %v994_v23, 0.0  ;;  %v1122_v37 = vmul.f32 0.2, %v994_v23  ;;  %vm1024_vm4 = vcmp.ge.f32.partialorder %v960_v30, 0.0  ;;  %v1088_v38 = vmul.f32 0.2, %v960_v30 }
 0x104   :  { %vm1056_vm5 = vcmp.ge.f32.partialorder %v992_v31, 0.0  ;;  %v1120_v39 = vmul.f32 0.2, %v992_v31  ;;  %827 = vst.msk [vmem:[#allocation2 + $0x28] sm:$0xff] %vm19_vm0, %v762_v34  ;;  %859 = vst.msk [vmem:[#allocation2 + $0x128] sm:$0xff] %vm19_vm0, %v794_v35  ;;  %v1154_v40 = vsel %vm1026_vm2, %v962_v22, %v1090_v36  ;;  %v963_v42 = vadd.f32 %v2174_v5, %v892_v32  ;;  %v890_v44 = vld [vmem:[#allocation2 + $0x8] sm:$0xff] }
 0x105   :  { %v1186_v41 = vsel %vm1058_vm3, %v994_v23, %v1122_v37  ;;  %v995_v43 = vadd.f32 %v2174_v5, %v924_v33  ;;  %v922_v45 = vld [vmem:[#allocation2 + $0x108] sm:$0xff]  ;;  %v1648_v46 = vpack.c.bf16 %v1154_v40, %v1154_v40  ;;  %v1152_v48 = vsel %vm1024_vm4, %v960_v30, %v1088_v38  ;;  %v1776_v51 = vpop.f32.mrb[8].mxu0  ;;  %v2190_v52 = vpop.f32.mrb[8].mxu1  ;;  %v126_v35 = vld [vmem:[#allocation2 + $0x150] sm:$0xff] }
 0x106   :  { %v1680_v47 = vpack.c.bf16 %v1186_v41, %v1186_v41  ;;  %v1184_v49 = vsel %vm1056_vm5, %v992_v31, %v1120_v39  ;;  %v1646_v53 = vpack.c.bf16 %v1152_v48, %v1152_v48  ;;  %vm1027_vm6 = vcmp.ge.f32.partialorder %v963_v42, 0.0  ;;  %v2192_v56 = vpop.f32.mrb[9].mxu0  ;;  %v2194_v57 = vpop.f32.mrb[9].mxu1 }
 0x107   :  { %v1678_v54 = vpack.c.bf16 %v1184_v49, %v1184_v49  ;;  %v1091_v55 = vmul.f32 0.2, %v963_v42  ;;  %1475 = vst.msk [vmem:[%s2679_s3 + $0x8] sm:$0xf] %vm1472_vm1, %v1648_v46  ;;  %vm1059_vm7 = vcmp.ge.f32.partialorder %v995_v43, 0.0  ;;  %v961_v59 = vadd.f32 %v2174_v5, %v890_v44  ;;  %v895_v61 = vld [vmem:[#allocation2 + $0x30] sm:$0xff] }
 0x108   :  { %1507 = vst.msk [vmem:[%s2679_s3 + $0x88] sm:$0xf] %vm1472_vm1, %v1680_v47  ;;  %v1123_v58 = vmul.f32 0.2, %v995_v43  ;;  %v993_v60 = vadd.f32 %v2174_v5, %v922_v45  ;;  %v927_v62 = vld [vmem:[#allocation2 + $0x130] sm:$0xff]  ;;  %v2206_v63 = vpop.f32.mrb[10].mxu0  ;;  %v966_v1 = vadd.f32 %v2174_v5, %v895_v61  ;;  %v767_v3 = vadd.f32 %v1776_v51, %v94_v50 }
 0x109   :  { %1473 = vst.msk [vmem:[%s2679_s3] sm:$0xf] %vm1472_vm1, %v1646_v53  ;;  %1505 = vst.msk [vmem:[%s2679_s3 + $0x80] sm:$0xf] %vm1472_vm1, %v1678_v54  ;;  %v1155_v0 = vsel %vm1027_vm6, %v963_v42, %v1091_v55  ;;  %v998_v2 = vadd.f32 %v2174_v5, %v927_v62  ;;  %v2218_v4 = vpop.f32.mrb[10].mxu1  ;;  %v2220_v6 = vpop.f32.mrb[11].mxu0  ;;  %v799_v51 = vadd.f32 %v2190_v52, %v126_v35 }
 0x10a   :  { %v1649_v7 = vpack.c.bf16 %v1155_v0, %v1155_v0  ;;  %v1187_v8 = vsel %vm1059_vm7, %v995_v43, %v1123_v58  ;;  %vm1025_vm8 = vcmp.ge.f32.partialorder %v961_v59, 0.0  ;;  %v1089_v9 = vmul.f32 0.2, %v961_v59  ;;  %v893_v10 = vld [vmem:[#allocation2 + $0x20] sm:$0xff]  ;;  %v2223_v12 = vpop.f32.mrb[11].mxu1  ;;  %v896_v15 = vld [vmem:[#allocation2 + $0x38] sm:$0xff] }
 0x10b   :  { %v925_v11 = vld [vmem:[#allocation2 + $0x120] sm:$0xff]  ;;  %v1681_v13 = vpack.c.bf16 %v1187_v8, %v1187_v8  ;;  %vm1057_vm9 = vcmp.ge.f32.partialorder %v993_v60, 0.0  ;;  %v1121_v14 = vmul.f32 0.2, %v993_v60  ;;  %vm1030_vm10 = vcmp.ge.f32.partialorder %v966_v1, 0.0  ;;  %832 = vst.msk [vmem:[#allocation2 + $0x50] sm:$0xff] %vm19_vm0, %v767_v3 }
 0x10c   :  { %1476 = vst.msk [vmem:[%s2679_s3 + $0xc] sm:$0xf] %vm1472_vm1, %v1649_v7  ;;  %v1153_v16 = vsel %vm1025_vm8, %v961_v59, %v1089_v9  ;;  %v1094_v17 = vmul.f32 0.2, %v966_v1  ;;  %vm1062_vm11 = vcmp.ge.f32.partialorder %v998_v2, 0.0  ;;  %v964_v21 = vadd.f32 %v2174_v5, %v893_v10  ;;  %v928_v27 = vld [vmem:[#allocation2 + $0x138] sm:$0xff] }
 0x10d   :  { %v1126_v18 = vmul.f32 0.2, %v998_v2  ;;  %1508 = vst.msk [vmem:[%s2679_s3 + $0x8c] sm:$0xf] %vm1472_vm1, %v1681_v13  ;;  %v1647_v19 = vpack.c.bf16 %v1153_v16, %v1153_v16  ;;  %v1185_v20 = vsel %vm1057_vm9, %v993_v60, %v1121_v14  ;;  %v996_v22 = vadd.f32 %v2174_v5, %v925_v11  ;;  %v894_v28 = vld [vmem:[#allocation2 + $0x28] sm:$0xff]  ;;  %v2237_v30 = vpop.f32.mrb[12].mxu0 }
 0x10e   :  { %v1679_v23 = vpack.c.bf16 %v1185_v20, %v1185_v20  ;;  %v1158_v24 = vsel %vm1030_vm10, %v966_v1, %v1094_v17  ;;  %v967_v26 = vadd.f32 %v2174_v5, %v896_v15  ;;  %v926_v29 = vld [vmem:[#allocation2 + $0x128] sm:$0xff]  ;;  %v2239_v31 = vpop.f32.mrb[12].mxu1  ;;  %vm1028_vm12 = vcmp.ge.f32.partialorder %v964_v21, 0.0  ;;  %v2245_v36 = vpop.f32.mrb[13].mxu0  ;;  %v92_v44 = vld [vmem:[#allocation2 + $0x40] sm:$0xff]  ;;  %v95_v54 = vld [vmem:[#allocation2 + $0x58] sm:$0xff] }
 0x10f   :  { %v1190_v25 = vsel %vm1062_vm11, %v998_v2, %v1126_v18  ;;  %1474 = vst.msk [vmem:[%s2679_s3 + $0x4] sm:$0xf] %vm1472_vm1, %v1647_v19  ;;  %v1652_v32 = vpack.c.bf16 %v1158_v24, %v1158_v24  ;;  %v1092_v34 = vmul.f32 0.2, %v964_v21  ;;  %v2247_v37 = vpop.f32.mrb[13].mxu1  ;;  %vm1060_vm13 = vcmp.ge.f32.partialorder %v996_v22, 0.0 }
 0x110   :  { %v1684_v33 = vpack.c.bf16 %v1190_v25, %v1190_v25  ;;  %1506 = vst.msk [vmem:[%s2679_s3 + $0x84] sm:$0xf] %vm1472_vm1, %v1679_v23  ;;  %v1124_v38 = vmul.f32 0.2, %v996_v22  ;;  %vm1031_vm14 = vcmp.ge.f32.partialorder %v967_v26, 0.0  ;;  %v999_v41 = vadd.f32 %v2174_v5, %v928_v27  ;;  %v2264_v45 = vpop.f32.mrb[14].mxu0 }
 0x111   :  { %v1095_v39 = vmul.f32 0.2, %v967_v26  ;;  %1479 = vst.msk [vmem:[%s2679_s3 + $0x18] sm:$0xf] %vm1472_vm1, %v1652_v32  ;;  %v1156_v40 = vsel %vm1028_vm12, %v964_v21, %v1092_v34  ;;  %v965_v42 = vadd.f32 %v2174_v5, %v894_v28  ;;  %v997_v43 = vadd.f32 %v2174_v5, %v926_v29  ;;  %v2266_v46 = vpop.f32.mrb[14].mxu1  ;;  %v124_v53 = vld [vmem:[#allocation2 + $0x140] sm:$0xff] }
 0x112   :  { %1511 = vst.msk [vmem:[%s2679_s3 + $0x98] sm:$0xf] %vm1472_vm1, %v1684_v33  ;;  %v1650_v47 = vpack.c.bf16 %v1156_v40, %v1156_v40  ;;  %v1188_v48 = vsel %vm1060_vm13, %v996_v22, %v1124_v38  ;;  %v899_v50 = vld [vmem:[#allocation2 + $0x50] sm:$0xff]  ;;  %v2269_v55 = vpop.f32.mrb[15].mxu0  ;;  %v2271_v58 = vpop.f32.mrb[15].mxu1  ;;  %vm1063_vm15 = vcmp.ge.f32.partialorder %v999_v41, 0.0  ;;  %v765_v9 = vadd.f32 %v2192_v56, %v92_v44 }
 0x113   :  { %v1159_v49 = vsel %vm1031_vm14, %v967_v26, %v1095_v39  ;;  %v1682_v59 = vpack.c.bf16 %v1188_v48, %v1188_v48  ;;  %v1127_v61 = vmul.f32 0.2, %v999_v41  ;;  %v127_v62 = vld [vmem:[#allocation2 + $0x158] sm:$0xff]  ;;  %v93_v0 = vld [vmem:[#allocation2 + $0x48] sm:$0xff]  ;;  %v98_v2 = vld [vmem:[#allocation2 + $0x70] sm:$0xff]  ;;  %vm1029_vm2 = vcmp.ge.f32.partialorder %v965_v42, 0.0 }
 0x114   :  { %v1653_v60 = vpack.c.bf16 %v1159_v49, %v1159_v49  ;;  %v125_v1 = vld [vmem:[#allocation2 + $0x148] sm:$0xff]  ;;  %1477 = vst.msk [vmem:[%s2679_s3 + $0x10] sm:$0xf] %vm1472_vm1, %v1650_v47  ;;  %v1093_v52 = vmul.f32 0.2, %v965_v42  ;;  %vm1061_vm3 = vcmp.ge.f32.partialorder %v997_v43, 0.0  ;;  %v970_v8 = vadd.f32 %v2174_v5, %v899_v50 }
 0x115   :  { %v1125_v3 = vmul.f32 0.2, %v997_v43  ;;  %864 = vst.msk [vmem:[#allocation2 + $0x150] sm:$0xff] %vm19_vm0, %v799_v51  ;;  %v1191_v7 = vsel %vm1063_vm15, %v999_v41, %v1127_v61  ;;  %v797_v10 = vadd.f32 %v2194_v57, %v124_v53  ;;  %v130_v11 = vld [vmem:[#allocation2 + $0x170] sm:$0xff]  ;;  %v96_v13 = vld [vmem:[#allocation2 + $0x60] sm:$0xff]  ;;  %v768_v18 = vadd.f32 %v2206_v63, %v95_v54  ;;  %v99_v19 = vld [vmem:[#allocation2 + $0x78] sm:$0xff] }
 0x116   :  { %1509 = vst.msk [vmem:[%s2679_s3 + $0x90] sm:$0xf] %vm1472_vm1, %v1682_v59  ;;  %1480 = vst.msk [vmem:[%s2679_s3 + $0x1c] sm:$0xf] %vm1472_vm1, %v1653_v60  ;;  %v128_v14 = vld [vmem:[#allocation2 + $0x160] sm:$0xff]  ;;  %v1685_v15 = vpack.c.bf16 %v1191_v7, %v1191_v7  ;;  %v1157_v16 = vsel %vm1029_vm2, %v965_v42, %v1093_v52  ;;  %v131_v20 = vld [vmem:[#allocation2 + $0x178] sm:$0xff]  ;;  %v800_v63 = vadd.f32 %v2218_v4, %v127_v62 }
 0x117   :  { %v1189_v17 = vsel %vm1061_vm3, %v997_v43, %v1125_v3  ;;  %v97_v21 = vld [vmem:[#allocation2 + $0x68] sm:$0xff]  ;;  %v1784_v22 = vpop.f32.mrb[16].mxu0  ;;  %v1816_v23 = vpop.f32.mrb[16].mxu1  ;;  %v1651_v24 = vpack.c.bf16 %v1157_v16, %v1157_v16  ;;  %vm1034_vm4 = vcmp.ge.f32.partialorder %v970_v8, 0.0  ;;  %v1098_v26 = vmul.f32 0.2, %v970_v8 }
 0x118   :  { %v1683_v25 = vpack.c.bf16 %v1189_v17, %v1189_v17  ;;  %830 = vst.msk [vmem:[#allocation2 + $0x40] sm:$0xff] %vm19_vm0, %v765_v9  ;;  %862 = vst.msk [vmem:[#allocation2 + $0x140] sm:$0xff] %vm19_vm0, %v797_v10  ;;  %v129_v56 = vld [vmem:[#allocation2 + $0x168] sm:$0xff]  ;;  %v566_v57 = vpop.f32.mrb[17].mxu0  ;;  %v694_v27 = vpop.f32.mrb[17].mxu1  ;;  %v766_v28 = vadd.f32 %v2220_v6, %v93_v0  ;;  %v798_v29 = vadd.f32 %v2223_v12, %v125_v1  ;;  %v102_v33 = vld [vmem:[#allocation2 + $0x90] sm:$0xff] }
 0x119   :  { %1512 = vst.msk [vmem:[%s2679_s3 + $0x9c] sm:$0xf] %vm1472_vm1, %v1685_v15  ;;  %v771_v32 = vadd.f32 %v2237_v30, %v98_v2  ;;  %v134_v34 = vld [vmem:[#allocation2 + $0x190] sm:$0xff]  ;;  %v100_v35 = vld [vmem:[#allocation2 + $0x80] sm:$0xff]  ;;  %v1785_v38 = vpop.f32.mrb[18].mxu0  ;;  %v1817_v39 = vpop.f32.mrb[18].mxu1  ;;  %v1162_v4 = vsel %vm1034_vm4, %v970_v8, %v1098_v26  ;;  %v803_v6 = vadd.f32 %v2239_v31, %v130_v11  ;;  %v769_v12 = vadd.f32 %v2245_v36, %v96_v13 }
 0x11a   :  { %833 = vst.msk [vmem:[#allocation2 + $0x58] sm:$0xff] %vm19_vm0, %v768_v18  ;;  %v801_v30 = vadd.f32 %v2247_v37, %v128_v14  ;;  %v132_v40 = vld [vmem:[#allocation2 + $0x180] sm:$0xff]  ;;  %v103_v41 = vld [vmem:[#allocation2 + $0x98] sm:$0xff]  ;;  %v569_v43 = vpop.f32.mrb[19].mxu0  ;;  %v697_v44 = vpop.f32.mrb[19].mxu1  ;;  %v1656_v47 = vpack.c.bf16 %v1162_v4, %v1162_v4  ;;  %865 = vst.msk [vmem:[#allocation2 + $0x158] sm:$0xff] %vm19_vm0, %v800_v63  ;;  %v772_v31 = vadd.f32 %v2264_v45, %v99_v19 }
 0x11b   :  { %1478 = vst.msk [vmem:[%s2679_s3 + $0x14] sm:$0xf] %vm1472_vm1, %v1651_v24  ;;  %1510 = vst.msk [vmem:[%s2679_s3 + $0x94] sm:$0xf] %vm1472_vm1, %v1683_v25  ;;  %v135_v42 = vld [vmem:[#allocation2 + $0x198] sm:$0xff]  ;;  %v804_v36 = vadd.f32 %v2266_v46, %v131_v20  ;;  %v770_v37 = vadd.f32 %v2269_v55, %v97_v21  ;;  %v101_v48 = vld [vmem:[#allocation2 + $0x88] sm:$0xff]  ;;  %v802_v51 = vadd.f32 %v2271_v58, %v129_v56 }
 0x11c   :  { %831 = vst.msk [vmem:[#allocation2 + $0x48] sm:$0xff] %vm19_vm0, %v766_v28  ;;  %863 = vst.msk [vmem:[#allocation2 + $0x148] sm:$0xff] %vm19_vm0, %v798_v29  ;;  %v133_v49 = vld [vmem:[#allocation2 + $0x188] sm:$0xff]  ;;  %v931_v50 = vld [vmem:[#allocation2 + $0x150] sm:$0xff]  ;;  %v775_v53 = vadd.f32 %v1784_v22, %v102_v33  ;;  %v807_v54 = vadd.f32 %v1816_v23, %v134_v34  ;;  %v773_v59 = vadd.f32 %v566_v57, %v100_v35 }
 0x11d   :  { %836 = vst.msk [vmem:[#allocation2 + $0x70] sm:$0xff] %vm19_vm0, %v771_v32  ;;  %868 = vst.msk [vmem:[#allocation2 + $0x170] sm:$0xff] %vm19_vm0, %v803_v6  ;;  %v1002_v45 = vadd.f32 %v2174_v5, %v931_v50  ;;  %v805_v46 = vadd.f32 %v694_v27, %v132_v40  ;;  %v776_v55 = vadd.f32 %v1785_v38, %v103_v41  ;;  %v106_v58 = vld [vmem:[#allocation2 + $0xb0] sm:$0xff]  ;;  %v104_v1 = vld [vmem:[#allocation2 + $0xa0] sm:$0xff]  ;;  %v1788_v7 = vpop.f32.mrb[20].mxu0  ;;  %v1820_v13 = vpop.f32.mrb[20].mxu1 }
 0x11e   :  { %834 = vst.msk [vmem:[#allocation2 + $0x60] sm:$0xff] %vm19_vm0, %v769_v12  ;;  %866 = vst.msk [vmem:[#allocation2 + $0x160] sm:$0xff] %vm19_vm0, %v801_v30  ;;  %v808_v60 = vadd.f32 %v1817_v39, %v135_v42  ;;  %v774_v61 = vadd.f32 %v569_v43, %v101_v48  ;;  %v806_v62 = vadd.f32 %v697_v44, %v133_v49  ;;  %v138_v0 = vld [vmem:[#allocation2 + $0x1b0] sm:$0xff]  ;;  %v582_v14 = vpop.f32.mrb[21].mxu0  ;;  %v136_v19 = vld [vmem:[#allocation2 + $0x1a0] sm:$0xff]  ;;  %v710_v20 = vpop.f32.mrb[21].mxu1 }
 0x11f   :  { %1483 = vst.msk [vmem:[%s2679_s3 + $0x28] sm:$0xf] %vm1472_vm1, %v1656_v47  ;;  %vm1066_vm5 = vcmp.ge.f32.partialorder %v1002_v45, 0.0  ;;  %v1130_v2 = vmul.f32 0.2, %v1002_v45  ;;  %v897_v52 = vld [vmem:[#allocation2 + $0x40] sm:$0xff]  ;;  %v779_v11 = vadd.f32 %v1788_v7, %v106_v58  ;;  %v811_v17 = vadd.f32 %v1820_v13, %v138_v0 }
 0x120   :  { %837 = vst.msk [vmem:[#allocation2 + $0x78] sm:$0xff] %vm19_vm0, %v772_v31  ;;  %869 = vst.msk [vmem:[#allocation2 + $0x178] sm:$0xff] %vm19_vm0, %v804_v36  ;;  %v929_v3 = vld [vmem:[#allocation2 + $0x140] sm:$0xff]  ;;  %v968_v8 = vadd.f32 %v2174_v5, %v897_v52  ;;  %v777_v18 = vadd.f32 %v582_v14, %v104_v1  ;;  %v2345_v21 = vpop.f32.mrb[22].mxu0  ;;  %v809_v33 = vadd.f32 %v710_v20, %v136_v19  ;;  %v2357_v34 = vpop.f32.mrb[22].mxu1 }
 0x121   :  { %835 = vst.msk [vmem:[#allocation2 + $0x68] sm:$0xff] %vm19_vm0, %v770_v37  ;;  %867 = vst.msk [vmem:[#allocation2 + $0x168] sm:$0xff] %vm19_vm0, %v802_v51  ;;  %v1000_v9 = vadd.f32 %v2174_v5, %v929_v3  ;;  %v900_v10 = vld [vmem:[#allocation2 + $0x58] sm:$0xff]  ;;  %v1194_v15 = vsel %vm1066_vm5, %v1002_v45, %v1130_v2  ;;  %v2359_v35 = vpop.f32.mrb[23].mxu0  ;;  %v2363_v40 = vpop.f32.mrb[23].mxu1 }
 0x122   :  { %840 = vst.msk [vmem:[#allocation2 + $0x90] sm:$0xff] %vm19_vm0, %v775_v53  ;;  %872 = vst.msk [vmem:[#allocation2 + $0x190] sm:$0xff] %vm19_vm0, %v807_v54  ;;  %v971_v16 = vadd.f32 %v2174_v5, %v900_v10  ;;  %v1688_v22 = vpack.c.bf16 %v1194_v15, %v1194_v15  ;;  %vm1032_vm6 = vcmp.ge.f32.partialorder %v968_v8, 0.0  ;;  %v1096_v23 = vmul.f32 0.2, %v968_v8  ;;  %v932_v24 = vld [vmem:[#allocation2 + $0x158] sm:$0xff] }
 0x123   :  { %838 = vst.msk [vmem:[#allocation2 + $0x80] sm:$0xff] %vm19_vm0, %v773_v59  ;;  %870 = vst.msk [vmem:[#allocation2 + $0x180] sm:$0xff] %vm19_vm0, %v805_v46  ;;  %vm1064_vm7 = vcmp.ge.f32.partialorder %v1000_v9, 0.0  ;;  %v898_v25 = vld [vmem:[#allocation2 + $0x48] sm:$0xff]  ;;  %v1128_v26 = vmul.f32 0.2, %v1000_v9  ;;  %v1003_v57 = vadd.f32 %v2174_v5, %v932_v24 }
 0x124   :  { %841 = vst.msk [vmem:[#allocation2 + $0x98] sm:$0xff] %vm19_vm0, %v776_v55  ;;  %873 = vst.msk [vmem:[#allocation2 + $0x198] sm:$0xff] %vm19_vm0, %v808_v60  ;;  %vm1035_vm8 = vcmp.ge.f32.partialorder %v971_v16, 0.0  ;;  %v1099_v56 = vmul.f32 0.2, %v971_v16  ;;  %v930_v27 = vld [vmem:[#allocation2 + $0x148] sm:$0xff]  ;;  %v1160_v63 = vsel %vm1032_vm6, %v968_v8, %v1096_v23  ;;  %v969_v28 = vadd.f32 %v2174_v5, %v898_v25 }
 0x125   :  { %839 = vst.msk [vmem:[#allocation2 + $0x88] sm:$0xff] %vm19_vm0, %v774_v61  ;;  %871 = vst.msk [vmem:[#allocation2 + $0x188] sm:$0xff] %vm19_vm0, %v806_v62  ;;  %v1001_v29 = vadd.f32 %v2174_v5, %v930_v27  ;;  %v903_v32 = vld [vmem:[#allocation2 + $0x70] sm:$0xff]  ;;  %v1654_v38 = vpack.c.bf16 %v1160_v63, %v1160_v63  ;;  %v1192_v39 = vsel %vm1064_vm7, %v1000_v9, %v1128_v26  ;;  %vm1067_vm9 = vcmp.ge.f32.partialorder %v1003_v57, 0.0  ;;  %v901_v12 = vld [vmem:[#allocation2 + $0x60] sm:$0xff]  ;;  %v2383_v50 = vpop.f32.mrb[24].mxu0 }
 0x126   :  { %844 = vst.msk [vmem:[#allocation2 + $0xb0] sm:$0xff] %vm19_vm0, %v779_v11  ;;  %876 = vst.msk [vmem:[#allocation2 + $0x1b0] sm:$0xff] %vm19_vm0, %v811_v17  ;;  %v1163_v4 = vsel %vm1035_vm8, %v971_v16, %v1099_v56  ;;  %v935_v6 = vld [vmem:[#allocation2 + $0x170] sm:$0xff]  ;;  %v933_v30 = vld [vmem:[#allocation2 + $0x160] sm:$0xff]  ;;  %v1686_v41 = vpack.c.bf16 %v1192_v39, %v1192_v39  ;;  %v1131_v43 = vmul.f32 0.2, %v1003_v57  ;;  %v974_v31 = vadd.f32 %v2174_v5, %v903_v32 }
 0x127   :  { %842 = vst.msk [vmem:[#allocation2 + $0xa0] sm:$0xff] %vm19_vm0, %v777_v18  ;;  %v1657_v42 = vpack.c.bf16 %v1163_v4, %v1163_v4  ;;  %vm1033_vm10 = vcmp.ge.f32.partialorder %v969_v28, 0.0  ;;  %874 = vst.msk [vmem:[#allocation2 + $0x1a0] sm:$0xff] %vm19_vm0, %v809_v33  ;;  %v1097_v44 = vmul.f32 0.2, %v969_v28  ;;  %vm1065_vm11 = vcmp.ge.f32.partialorder %v1001_v29, 0.0 }
 0x128   :  { %1515 = vst.msk [vmem:[%s2679_s3 + $0xa8] sm:$0xf] %vm1472_vm1, %v1688_v22  ;;  %1481 = vst.msk [vmem:[%s2679_s3 + $0x20] sm:$0xf] %vm1472_vm1, %v1654_v38  ;;  %v1129_v47 = vmul.f32 0.2, %v1001_v29  ;;  %v1195_v36 = vsel %vm1067_vm9, %v1003_v57, %v1131_v43  ;;  %v1006_v37 = vadd.f32 %v2174_v5, %v935_v6  ;;  %v972_v48 = vadd.f32 %v2174_v5, %v901_v12 }
 0x129   :  { %1513 = vst.msk [vmem:[%s2679_s3 + $0xa0] sm:$0xf] %vm1472_vm1, %v1686_v41  ;;  %1484 = vst.msk [vmem:[%s2679_s3 + $0x2c] sm:$0xf] %vm1472_vm1, %v1657_v42  ;;  %v1004_v49 = vadd.f32 %v2174_v5, %v933_v30  ;;  %v2385_v51 = vpop.f32.mrb[24].mxu1  ;;  %v1689_v53 = vpack.c.bf16 %v1195_v36, %v1195_v36  ;;  %v1161_v54 = vsel %vm1033_vm10, %v969_v28, %v1097_v44  ;;  %vm1038_vm12 = vcmp.ge.f32.partialorder %v974_v31, 0.0 }
 0x12a   :  { %v1193_v59 = vsel %vm1065_vm11, %v1001_v29, %v1129_v47  ;;  %v904_v45 = vld [vmem:[#allocation2 + $0x78] sm:$0xff]  ;;  %v2388_v55 = vpop.f32.mrb[25].mxu0  ;;  %v2390_v60 = vpop.f32.mrb[25].mxu1  ;;  %v1655_v58 = vpack.c.bf16 %v1161_v54, %v1161_v54  ;;  %v1102_v62 = vmul.f32 0.2, %v974_v31  ;;  %vm1070_vm13 = vcmp.ge.f32.partialorder %v1006_v37, 0.0 }
 0x12b   :  { %v936_v46 = vld [vmem:[#allocation2 + $0x178] sm:$0xff]  ;;  %v1687_v61 = vpack.c.bf16 %v1193_v59, %v1193_v59  ;;  %v902_v0 = vld [vmem:[#allocation2 + $0x68] sm:$0xff]  ;;  %1516 = vst.msk [vmem:[%s2679_s3 + $0xac] sm:$0xf] %vm1472_vm1, %v1689_v53  ;;  %v1134_v1 = vmul.f32 0.2, %v1006_v37  ;;  %v975_v7 = vadd.f32 %v2174_v5, %v904_v45 }
 0x12c   :  { %vm1036_vm14 = vcmp.ge.f32.partialorder %v972_v48, 0.0  ;;  %v1100_v2 = vmul.f32 0.2, %v972_v48  ;;  %vm1068_vm15 = vcmp.ge.f32.partialorder %v1004_v49, 0.0  ;;  %1482 = vst.msk [vmem:[%s2679_s3 + $0x24] sm:$0xf] %vm1472_vm1, %v1655_v58  ;;  %v1166_v52 = vsel %vm1038_vm12, %v974_v31, %v1102_v62 }
 0x12d   :  { %1514 = vst.msk [vmem:[%s2679_s3 + $0xa4] sm:$0xf] %vm1472_vm1, %v1687_v61  ;;  %v1132_v3 = vmul.f32 0.2, %v1004_v49  ;;  %v1007_v8 = vadd.f32 %v2174_v5, %v936_v46  ;;  %v2407_v9 = vpop.f32.mrb[26].mxu0  ;;  %v2409_v10 = vpop.f32.mrb[26].mxu1  ;;  %v1660_v11 = vpack.c.bf16 %v1166_v52, %v1166_v52  ;;  %v1198_v13 = vsel %vm1070_vm13, %v1006_v37, %v1134_v1 }
 0x12e   :  { %v1164_v14 = vsel %vm1036_vm14, %v972_v48, %v1100_v2  ;;  %v973_v15 = vadd.f32 %v2174_v5, %v902_v0  ;;  %v934_v16 = vld [vmem:[#allocation2 + $0x168] sm:$0xff]  ;;  %v907_v17 = vld [vmem:[#allocation2 + $0x90] sm:$0xff]  ;;  %v2413_v18 = vpop.f32.mrb[27].mxu0  ;;  %v2415_v19 = vpop.f32.mrb[27].mxu1  ;;  %v1692_v20 = vpack.c.bf16 %v1198_v13, %v1198_v13  ;;  %vm1039_vm2 = vcmp.ge.f32.partialorder %v975_v7, 0.0  ;;  %v905_v25 = vld [vmem:[#allocation2 + $0x80] sm:$0xff] }
 0x12f   :  { %v1658_v22 = vpack.c.bf16 %v1164_v14, %v1164_v14  ;;  %v1196_v23 = vsel %vm1068_vm15, %v1004_v49, %v1132_v3  ;;  %v939_v24 = vld [vmem:[#allocation2 + $0x190] sm:$0xff]  ;;  %1487 = vst.msk [vmem:[%s2679_s3 + $0x38] sm:$0xf] %vm1472_vm1, %v1660_v11  ;;  %v1103_v56 = vmul.f32 0.2, %v975_v7  ;;  %vm1071_vm3 = vcmp.ge.f32.partialorder %v1007_v8, 0.0 }
 0x130   :  { %v1690_v26 = vpack.c.bf16 %v1196_v23, %v1196_v23  ;;  %v1135_v57 = vmul.f32 0.2, %v1007_v8  ;;  %v2422_v27 = vpop.f32.mrb[28].mxu0  ;;  %1519 = vst.msk [vmem:[%s2679_s3 + $0xb8] sm:$0xf] %vm1472_vm1, %v1692_v20  ;;  %vm1037_vm4 = vcmp.ge.f32.partialorder %v973_v15, 0.0  ;;  %v1005_v28 = vadd.f32 %v2174_v5, %v934_v16 }
 0x131   :  { %1485 = vst.msk [vmem:[%s2679_s3 + $0x30] sm:$0xf] %vm1472_vm1, %v1658_v22  ;;  %v1101_v63 = vmul.f32 0.2, %v973_v15  ;;  %v978_v29 = vadd.f32 %v2174_v5, %v907_v17  ;;  %v2434_v32 = vpop.f32.mrb[28].mxu1  ;;  %v2436_v33 = vpop.f32.mrb[29].mxu0  ;;  %v1167_v38 = vsel %vm1039_vm2, %v975_v7, %v1103_v56  ;;  %v1010_v4 = vadd.f32 %v2174_v5, %v939_v24 }
 0x132   :  { %1517 = vst.msk [vmem:[%s2679_s3 + $0xb0] sm:$0xf] %vm1472_vm1, %v1690_v26  ;;  %v1199_v39 = vsel %vm1071_vm3, %v1007_v8, %v1135_v57  ;;  %v976_v6 = vadd.f32 %v2174_v5, %v905_v25  ;;  %v2445_v12 = vpop.f32.mrb[29].mxu1  ;;  %v2447_v30 = vpop.f32.mrb[30].mxu0  ;;  %v1661_v41 = vpack.c.bf16 %v1167_v38, %v1167_v38  ;;  %vm1069_vm5 = vcmp.ge.f32.partialorder %v1005_v28, 0.0  ;;  %v937_v44 = vld [vmem:[#allocation2 + $0x180] sm:$0xff] }
 0x133   :  { %v1693_v42 = vpack.c.bf16 %v1199_v39, %v1199_v39  ;;  %v1165_v43 = vsel %vm1037_vm4, %v973_v15, %v1101_v63  ;;  %v908_v47 = vld [vmem:[#allocation2 + $0x98] sm:$0xff]  ;;  %v2449_v31 = vpop.f32.mrb[30].mxu1  ;;  %v2451_v36 = vpop.f32.mrb[31].mxu0  ;;  %v1133_v48 = vmul.f32 0.2, %v1005_v28  ;;  %vm1042_vm6 = vcmp.ge.f32.partialorder %v978_v29, 0.0 }
 0x134   :  { %v1659_v37 = vpack.c.bf16 %v1165_v43, %v1165_v43  ;;  %v1106_v49 = vmul.f32 0.2, %v978_v29  ;;  %v2453_v53 = vpop.f32.mrb[31].mxu1  ;;  %1488 = vst.msk [vmem:[%s2679_s3 + $0x3c] sm:$0xf] %vm1472_vm1, %v1661_v41  ;;  %vm1074_vm7 = vcmp.ge.f32.partialorder %v1010_v4, 0.0  ;;  %v1008_v58 = vadd.f32 %v2174_v5, %v937_v44 }
 0x135   :  { %1520 = vst.msk [vmem:[%s2679_s3 + $0xbc] sm:$0xf] %vm1472_vm1, %v1693_v42  ;;  %v1138_v54 = vmul.f32 0.2, %v1010_v4  ;;  %vm1040_vm8 = vcmp.ge.f32.partialorder %v976_v6, 0.0  ;;  %v1197_v45 = vsel %vm1069_vm5, %v1005_v28, %v1133_v48  ;;  %v979_v61 = vadd.f32 %v2174_v5, %v908_v47  ;;  %v940_v62 = vld [vmem:[#allocation2 + $0x198] sm:$0xff] }
 0x136   :  { %v1104_v59 = vmul.f32 0.2, %v976_v6  ;;  %1486 = vst.msk [vmem:[%s2679_s3 + $0x34] sm:$0xf] %vm1472_vm1, %v1659_v37  ;;  %v1170_v46 = vsel %vm1042_vm6, %v978_v29, %v1106_v49  ;;  %v906_v0 = vld [vmem:[#allocation2 + $0x88] sm:$0xff]  ;;  %v1691_v1 = vpack.c.bf16 %v1197_v45, %v1197_v45  ;;  %v911_v8 = vld [vmem:[#allocation2 + $0xb0] sm:$0xff]  ;;  %v1011_v17 = vadd.f32 %v2174_v5, %v940_v62 }
 0x137   :  { %v1664_v2 = vpack.c.bf16 %v1170_v46, %v1170_v46  ;;  %v1202_v52 = vsel %vm1074_vm7, %v1010_v4, %v1138_v54  ;;  %v938_v7 = vld [vmem:[#allocation2 + $0x188] sm:$0xff]  ;;  %v943_v11 = vld [vmem:[#allocation2 + $0x1b0] sm:$0xff]  ;;  %vm1072_vm9 = vcmp.ge.f32.partialorder %v1008_v58, 0.0  ;;  %v1136_v15 = vmul.f32 0.2, %v1008_v58  ;;  %v909_v29 = vld [vmem:[#allocation2 + $0xa0] sm:$0xff] }
 0x138   :  { %v1168_v3 = vsel %vm1040_vm8, %v976_v6, %v1104_v59  ;;  %v1696_v13 = vpack.c.bf16 %v1202_v52, %v1202_v52  ;;  %1518 = vst.msk [vmem:[%s2679_s3 + $0xb4] sm:$0xf] %vm1472_vm1, %v1691_v1  ;;  %vm1043_vm10 = vcmp.ge.f32.partialorder %v979_v61, 0.0  ;;  %v1107_v16 = vmul.f32 0.2, %v979_v61  ;;  %v941_v6 = vld [vmem:[#allocation2 + $0x1a0] sm:$0xff] }
 0x139   :  { %v1662_v14 = vpack.c.bf16 %v1168_v3, %v1168_v3  ;;  %1491 = vst.msk [vmem:[%s2679_s3 + $0x48] sm:$0xf] %vm1472_vm1, %v1664_v2  ;;  %v977_v20 = vadd.f32 %v2174_v5, %v906_v0  ;;  %v1200_v22 = vsel %vm1072_vm9, %v1008_v58, %v1136_v15  ;;  %v1009_v23 = vadd.f32 %v2174_v5, %v938_v7  ;;  %v107_v44 = vld [vmem:[#allocation2 + $0xb8] sm:$0xff]  ;;  %v105_v59 = vld [vmem:[#allocation2 + $0xa8] sm:$0xff]  ;;  %v110_v0 = vld [vmem:[#allocation2 + $0xd0] sm:$0xff] }
 0x13a   :  { %1523 = vst.msk [vmem:[%s2679_s3 + $0xc8] sm:$0xf] %vm1472_vm1, %v1696_v13  ;;  %v982_v24 = vadd.f32 %v2174_v5, %v911_v8  ;;  %v1014_v25 = vadd.f32 %v2174_v5, %v943_v11  ;;  %v1694_v26 = vpack.c.bf16 %v1200_v22, %v1200_v22  ;;  %v1171_v56 = vsel %vm1043_vm10, %v979_v61, %v1107_v16  ;;  %v139_v54 = vld [vmem:[#allocation2 + $0x1b8] sm:$0xff]  ;;  %v137_v45 = vld [vmem:[#allocation2 + $0x1a8] sm:$0xff]  ;;  %v142_v1 = vld [vmem:[#allocation2 + $0x1d0] sm:$0xff] }
 0x13b   :  { %1489 = vst.msk [vmem:[%s2679_s3 + $0x40] sm:$0xf] %vm1472_vm1, %v1662_v14  ;;  %vm1075_vm11 = vcmp.ge.f32.partialorder %v1011_v17, 0.0  ;;  %v1139_v57 = vmul.f32 0.2, %v1011_v17  ;;  %v1665_v63 = vpack.c.bf16 %v1171_v56, %v1171_v56  ;;  %vm1041_vm12 = vcmp.ge.f32.partialorder %v977_v20, 0.0 }
 0x13c   :  { %v1105_v28 = vmul.f32 0.2, %v977_v20  ;;  %vm1073_vm13 = vcmp.ge.f32.partialorder %v1009_v23, 0.0  ;;  %1521 = vst.msk [vmem:[%s2679_s3 + $0xc0] sm:$0xf] %vm1472_vm1, %v1694_v26  ;;  %vm1046_vm14 = vcmp.ge.f32.partialorder %v982_v24, 0.0  ;;  %v980_v49 = vadd.f32 %v2174_v5, %v909_v29 }
 0x13d   :  { %v1203_v38 = vsel %vm1075_vm11, %v1011_v17, %v1139_v57  ;;  %v1137_v39 = vmul.f32 0.2, %v1009_v23  ;;  %v1110_v4 = vmul.f32 0.2, %v982_v24  ;;  %1492 = vst.msk [vmem:[%s2679_s3 + $0x4c] sm:$0xf] %vm1472_vm1, %v1665_v63  ;;  %v1012_v62 = vadd.f32 %v2174_v5, %v941_v6 }
 0x13e   :  { %v1697_v41 = vpack.c.bf16 %v1203_v38, %v1203_v38  ;;  %v1169_v42 = vsel %vm1041_vm12, %v977_v20, %v1105_v28  ;;  %vm1078_vm15 = vcmp.ge.f32.partialorder %v1014_v25, 0.0  ;;  %v1142_v43 = vmul.f32 0.2, %v1014_v25  ;;  %v108_v2 = vld [vmem:[#allocation2 + $0xc0] sm:$0xff]  ;;  %v111_v11 = vld [vmem:[#allocation2 + $0xd8] sm:$0xff]  ;;  %v141_v16 = vld [vmem:[#allocation2 + $0x1c8] sm:$0xff] }
 0x13f   :  { %v1663_v47 = vpack.c.bf16 %v1169_v42, %v1169_v42  ;;  %v1201_v37 = vsel %vm1073_vm13, %v1009_v23, %v1137_v39  ;;  %v1174_v48 = vsel %vm1046_vm14, %v982_v24, %v1110_v4  ;;  %vm1044_vm2 = vcmp.ge.f32.partialorder %v980_v49, 0.0  ;;  %v140_v8 = vld [vmem:[#allocation2 + $0x1c0] sm:$0xff]  ;;  %v143_v13 = vld [vmem:[#allocation2 + $0x1d8] sm:$0xff]  ;;  %v114_v17 = vld [vmem:[#allocation2 + $0xf0] sm:$0xff] }
 0x140   :  { %1524 = vst.msk [vmem:[%s2679_s3 + $0xcc] sm:$0xf] %vm1472_vm1, %v1697_v41  ;;  %v1695_v46 = vpack.c.bf16 %v1201_v37, %v1201_v37  ;;  %v1668_v58 = vpack.c.bf16 %v1174_v48, %v1174_v48  ;;  %v1206_v61 = vsel %vm1078_vm15, %v1014_v25, %v1142_v43  ;;  %v1108_v3 = vmul.f32 0.2, %v980_v49  ;;  %v146_v24 = vld [vmem:[#allocation2 + $0x1f0] sm:$0xff]  ;;  %v144_v25 = vld [vmem:[#allocation2 + $0x1e0] sm:$0xff] }
 0x141   :  { %1490 = vst.msk [vmem:[%s2679_s3 + $0x44] sm:$0xf] %vm1472_vm1, %v1663_v47  ;;  %v1700_v52 = vpack.c.bf16 %v1206_v61, %v1206_v61  ;;  %v780_v7 = vadd.f32 %v2345_v21, %v107_v44  ;;  %vm1076_vm3 = vcmp.ge.f32.partialorder %v1012_v62, 0.0  ;;  %v1140_v5 = vmul.f32 0.2, %v1012_v62  ;;  %v109_v21 = vld [vmem:[#allocation2 + $0xc8] sm:$0xff] }
 0x142   :  { %1522 = vst.msk [vmem:[%s2679_s3 + $0xc4] sm:$0xf] %vm1472_vm1, %v1695_v46  ;;  %1495 = vst.msk [vmem:[%s2679_s3 + $0x58] sm:$0xf] %vm1472_vm1, %v1668_v58  ;;  %v812_v14 = vadd.f32 %v2357_v34, %v139_v54  ;;  %v778_v15 = vadd.f32 %v2359_v35, %v105_v59  ;;  %v1172_v20 = vsel %vm1044_vm2, %v980_v49, %v1108_v3  ;;  %v112_v35 = vld [vmem:[#allocation2 + $0xe0] sm:$0xff]  ;;  %v115_v28 = vld [vmem:[#allocation2 + $0xf8] sm:$0xff] }
 0x143   :  { %1527 = vst.msk [vmem:[%s2679_s3 + $0xd8] sm:$0xf] %vm1472_vm1, %v1700_v52  ;;  %v810_v22 = vadd.f32 %v2363_v40, %v137_v45  ;;  %v783_v23 = vadd.f32 %v2383_v50, %v110_v0  ;;  %v815_v34 = vadd.f32 %v2385_v51, %v142_v1  ;;  %v1666_v26 = vpack.c.bf16 %v1172_v20, %v1172_v20  ;;  %v147_v40 = vld [vmem:[#allocation2 + $0x1f8] sm:$0xff]  ;;  %v113_v29 = vld [vmem:[#allocation2 + $0xe8] sm:$0xff] }
 0x144   :  { %845 = vst.msk [vmem:[#allocation2 + $0xb8] sm:$0xff] %vm19_vm0, %v780_v7  ;;  %v1204_v56 = vsel %vm1076_vm3, %v1012_v62, %v1140_v5  ;;  %877 = vst.msk [vmem:[#allocation2 + $0x1b8] sm:$0xff] %vm19_vm0, %v812_v14  ;;  %v781_v57 = vadd.f32 %v2388_v55, %v108_v2  ;;  %v813_v63 = vadd.f32 %v2390_v60, %v140_v8  ;;  %v145_v4 = vld [vmem:[#allocation2 + $0x1e8] sm:$0xff] }
 0x145   :  { %843 = vst.msk [vmem:[#allocation2 + $0xa8] sm:$0xff] %vm19_vm0, %v778_v15  ;;  %v1698_v50 = vpack.c.bf16 %v1204_v56, %v1204_v56  ;;  %875 = vst.msk [vmem:[#allocation2 + $0x1a8] sm:$0xff] %vm19_vm0, %v810_v22  ;;  %v784_v51 = vadd.f32 %v2407_v9, %v111_v11  ;;  %v816_v38 = vadd.f32 %v2409_v10, %v143_v13 }
 0x146   :  { %848 = vst.msk [vmem:[#allocation2 + $0xd0] sm:$0xff] %vm19_vm0, %v783_v23  ;;  %880 = vst.msk [vmem:[#allocation2 + $0x1d0] sm:$0xff] %vm19_vm0, %v815_v34  ;;  %v782_v39 = vadd.f32 %v2413_v18, %v109_v21  ;;  %v814_v55 = vadd.f32 %v2415_v19, %v141_v16  ;;  %v787_v60 = vadd.f32 %v2422_v27, %v114_v17 }
 0x147   :  { %1493 = vst.msk [vmem:[%s2679_s3 + $0x50] sm:$0xf] %vm1472_vm1, %v1666_v26  ;;  %v819_v9 = vadd.f32 %v2434_v32, %v146_v24  ;;  %v785_v10 = vadd.f32 %v2436_v33, %v112_v35  ;;  %1525 = vst.msk [vmem:[%s2679_s3 + $0xd0] sm:$0xf] %vm1472_vm1, %v1698_v50  ;;  %v817_v18 = vadd.f32 %v2445_v12, %v144_v25 }
 0x148   :  { %846 = vst.msk [vmem:[#allocation2 + $0xc0] sm:$0xff] %vm19_vm0, %v781_v57  ;;  %878 = vst.msk [vmem:[#allocation2 + $0x1c0] sm:$0xff] %vm19_vm0, %v813_v63  ;;  %v788_v19 = vadd.f32 %v2447_v30, %v115_v28  ;;  %v820_v27 = vadd.f32 %v2449_v31, %v147_v40  ;;  %v786_v32 = vadd.f32 %v2451_v36, %v113_v29  ;;  %v2574_v30 = vld [vmem:[%s2678_s2] ss:$0 sm:$0xff] }
 0x149   :  { %849 = vst.msk [vmem:[#allocation2 + $0xd8] sm:$0xff] %vm19_vm0, %v784_v51  ;;  %881 = vst.msk [vmem:[#allocation2 + $0x1d8] sm:$0xff] %vm19_vm0, %v816_v38  ;;  %v818_v33 = vadd.f32 %v2453_v53, %v145_v4 }
 0x14a   :  { %847 = vst.msk [vmem:[#allocation2 + $0xc8] sm:$0xff] %vm19_vm0, %v782_v39  ;;  %879 = vst.msk [vmem:[#allocation2 + $0x1c8] sm:$0xff] %vm19_vm0, %v814_v55 }
 0x14b   :  { %852 = vst.msk [vmem:[#allocation2 + $0xf0] sm:$0xff] %vm19_vm0, %v787_v60  ;;  %884 = vst.msk [vmem:[#allocation2 + $0x1f0] sm:$0xff] %vm19_vm0, %v819_v9  ;;  %v912_v12 = vld [vmem:[#allocation2 + $0xb8] sm:$0xff] }
 0x14c   :  { %850 = vst.msk [vmem:[#allocation2 + $0xe0] sm:$0xff] %vm19_vm0, %v785_v10  ;;  %882 = vst.msk [vmem:[#allocation2 + $0x1e0] sm:$0xff] %vm19_vm0, %v817_v18  ;;  %v983_v31 = vadd.f32 %v2574_v30, %v912_v12  ;;  %v944_v36 = vld [vmem:[#allocation2 + $0x1b8] sm:$0xff]  ;;  %v910_v53 = vld [vmem:[#allocation2 + $0xa8] sm:$0xff] }
 0x14d   :  { %853 = vst.msk [vmem:[#allocation2 + $0xf8] sm:$0xff] %vm19_vm0, %v788_v19  ;;  %885 = vst.msk [vmem:[#allocation2 + $0x1f8] sm:$0xff] %vm19_vm0, %v820_v27  ;;  %v1015_v6 = vadd.f32 %v2574_v30, %v944_v36  ;;  %v981_v41 = vadd.f32 %v2574_v30, %v910_v53  ;;  %v942_v42 = vld [vmem:[#allocation2 + $0x1a8] sm:$0xff]  ;;  %v915_v43 = vld [vmem:[#allocation2 + $0xd0] sm:$0xff] }
 0x14e   :  { %851 = vst.msk [vmem:[#allocation2 + $0xe8] sm:$0xff] %vm19_vm0, %v786_v32  ;;  %883 = vst.msk [vmem:[#allocation2 + $0x1e8] sm:$0xff] %vm19_vm0, %v818_v33  ;;  %vm1047_vm4 = vcmp.ge.f32.partialorder %v983_v31, 0.0  ;;  %v1111_v44 = vmul.f32 0.2, %v983_v31  ;;  %v1013_v47 = vadd.f32 %v2574_v30, %v942_v42  ;;  %v986_v37 = vadd.f32 %v2574_v30, %v915_v43  ;;  %v947_v48 = vld [vmem:[#allocation2 + $0x1d0] sm:$0xff] }
 0x14f   :  { %vm1079_vm0 = vcmp.ge.f32.partialorder %v1015_v6, 0.0  ;;  %v1143_v49 = vmul.f32 0.2, %v1015_v6  ;;  %vm1045_vm5 = vcmp.ge.f32.partialorder %v981_v41, 0.0  ;;  %v1109_v54 = vmul.f32 0.2, %v981_v41 }
 0x150   :  { %v1175_v59 = vsel %vm1047_vm4, %v983_v31, %v1111_v44  ;;  %vm1077_vm6 = vcmp.ge.f32.partialorder %v1013_v47, 0.0  ;;  %v1141_v45 = vmul.f32 0.2, %v1013_v47  ;;  %vm1050_vm7 = vcmp.ge.f32.partialorder %v986_v37, 0.0  ;;  %v913_v46 = vld [vmem:[#allocation2 + $0xc0] sm:$0xff]  ;;  %v916_v2 = vld [vmem:[#allocation2 + $0xd8] sm:$0xff] }
 0x151   :  { %v945_v58 = vld [vmem:[#allocation2 + $0x1c0] sm:$0xff]  ;;  %v1669_v61 = vpack.c.bf16 %v1175_v59, %v1175_v59  ;;  %v1207_v62 = vsel %vm1079_vm0, %v1015_v6, %v1143_v49  ;;  %v1173_v0 = vsel %vm1045_vm5, %v981_v41, %v1109_v54  ;;  %v1114_v1 = vmul.f32 0.2, %v986_v37  ;;  %v948_v15 = vld [vmem:[#allocation2 + $0x1d8] sm:$0xff]  ;;  %v914_v20 = vld [vmem:[#allocation2 + $0xc8] sm:$0xff] }
 0x152   :  { %v1701_v52 = vpack.c.bf16 %v1207_v62, %v1207_v62  ;;  %v1667_v3 = vpack.c.bf16 %v1173_v0, %v1173_v0  ;;  %v1205_v7 = vsel %vm1077_vm6, %v1013_v47, %v1141_v45  ;;  %v1018_v8 = vadd.f32 %v2574_v30, %v947_v48  ;;  %v946_v25 = vld [vmem:[#allocation2 + $0x1c8] sm:$0xff]  ;;  %v919_v28 = vld [vmem:[#allocation2 + $0xf0] sm:$0xff] }
 0x153   :  { %1496 = vst.msk [vmem:[%s2679_s3 + $0x5c] sm:$0xf] %vm1472_vm1, %v1669_v61  ;;  %v1699_v11 = vpack.c.bf16 %v1205_v7, %v1205_v7  ;;  %v1178_v13 = vsel %vm1050_vm7, %v986_v37, %v1114_v1  ;;  %v984_v5 = vadd.f32 %v2574_v30, %v913_v46  ;;  %v1016_v14 = vadd.f32 %v2574_v30, %v945_v58  ;;  %v951_v40 = vld [vmem:[#allocation2 + $0x1f0] sm:$0xff]  ;;  %v917_v29 = vld [vmem:[#allocation2 + $0xe0] sm:$0xff] }
 0x154   :  { %1528 = vst.msk [vmem:[%s2679_s3 + $0xdc] sm:$0xf] %vm1472_vm1, %v1701_v52  ;;  %1494 = vst.msk [vmem:[%s2679_s3 + $0x54] sm:$0xf] %vm1472_vm1, %v1667_v3  ;;  %v1672_v21 = vpack.c.bf16 %v1178_v13, %v1178_v13  ;;  %vm1082_vm8 = vcmp.ge.f32.partialorder %v1018_v8, 0.0  ;;  %v987_v17 = vadd.f32 %v2574_v30, %v916_v2  ;;  %v1019_v35 = vadd.f32 %v2574_v30, %v948_v15  ;;  %v949_v39 = vld [vmem:[#allocation2 + $0x1e0] sm:$0xff] }
 0x155   :  { %v1146_v16 = vmul.f32 0.2, %v1018_v8  ;;  %1526 = vst.msk [vmem:[%s2679_s3 + $0xd4] sm:$0xf] %vm1472_vm1, %v1699_v11  ;;  %vm1048_vm9 = vcmp.ge.f32.partialorder %v984_v5, 0.0  ;;  %vm1080_vm10 = vcmp.ge.f32.partialorder %v1016_v14, 0.0  ;;  %v985_v63 = vadd.f32 %v2574_v30, %v914_v20 }
 0x156   :  { %v1112_v22 = vmul.f32 0.2, %v984_v5  ;;  %v1144_v23 = vmul.f32 0.2, %v1016_v14  ;;  %1499 = vst.msk [vmem:[%s2679_s3 + $0x68] sm:$0xf] %vm1472_vm1, %v1672_v21  ;;  %v1017_v10 = vadd.f32 %v2574_v30, %v946_v25  ;;  %v990_v18 = vadd.f32 %v2574_v30, %v919_v28 }
 0x157   :  { %v1210_v34 = vsel %vm1082_vm8, %v1018_v8, %v1146_v16  ;;  %vm1051_vm11 = vcmp.ge.f32.partialorder %v987_v17, 0.0  ;;  %v1115_v24 = vmul.f32 0.2, %v987_v17  ;;  %vm1083_vm12 = vcmp.ge.f32.partialorder %v1019_v35, 0.0  ;;  %v920_v4 = vld [vmem:[#allocation2 + $0xf8] sm:$0xff]  ;;  %v918_v59 = vld [vmem:[#allocation2 + $0xe8] sm:$0xff] }
 0x158   :  { %v1704_v26 = vpack.c.bf16 %v1210_v34, %v1210_v34  ;;  %v1176_v56 = vsel %vm1048_vm9, %v984_v5, %v1112_v22  ;;  %v1208_v57 = vsel %vm1080_vm10, %v1016_v14, %v1144_v23  ;;  %v1147_v60 = vmul.f32 0.2, %v1019_v35  ;;  %v952_v47 = vld [vmem:[#allocation2 + $0x1f8] sm:$0xff]  ;;  %v950_v45 = vld [vmem:[#allocation2 + $0x1e8] sm:$0xff] }
 0x159   :  { %v1670_v50 = vpack.c.bf16 %v1176_v56, %v1176_v56  ;;  %v1702_v51 = vpack.c.bf16 %v1208_v57, %v1208_v57  ;;  %v1179_v38 = vsel %vm1051_vm11, %v987_v17, %v1115_v24  ;;  %vm1049_vm13 = vcmp.ge.f32.partialorder %v985_v63, 0.0 }
 0x15a   :  { %1531 = vst.msk [vmem:[%s2679_s3 + $0xe8] sm:$0xf] %vm1472_vm1, %v1704_v26  ;;  %v1673_v55 = vpack.c.bf16 %v1179_v38, %v1179_v38  ;;  %v1113_v9 = vmul.f32 0.2, %v985_v63  ;;  %v1022_v19 = vadd.f32 %v2574_v30, %v951_v40  ;;  %v988_v27 = vadd.f32 %v2574_v30, %v917_v29 }
 0x15b   :  { %1497 = vst.msk [vmem:[%s2679_s3 + $0x60] sm:$0xf] %vm1472_vm1, %v1670_v50  ;;  %1529 = vst.msk [vmem:[%s2679_s3 + $0xe0] sm:$0xf] %vm1472_vm1, %v1702_v51  ;;  %v1211_v32 = vsel %vm1083_vm12, %v1019_v35, %v1147_v60  ;;  %v1020_v12 = vadd.f32 %v2574_v30, %v949_v39  ;;  %v991_v31 = vadd.f32 %v2574_v30, %v920_v4  ;;  %vm1081_vm14 = vcmp.ge.f32.partialorder %v1017_v10, 0.0 }
 0x15c   :  { %1500 = vst.msk [vmem:[%s2679_s3 + $0x6c] sm:$0xf] %vm1472_vm1, %v1673_v55  ;;  %v1177_v33 = vsel %vm1049_vm13, %v985_v63, %v1113_v9  ;;  %v1705_v36 = vpack.c.bf16 %v1211_v32, %v1211_v32  ;;  %v1145_v6 = vmul.f32 0.2, %v1017_v10  ;;  %vm1054_vm15 = vcmp.ge.f32.partialorder %v990_v18, 0.0 }
 0x15d   :  { %v1671_v53 = vpack.c.bf16 %v1177_v33, %v1177_v33  ;;  %v1118_v41 = vmul.f32 0.2, %v990_v18  ;;  %vm1086_vm2 = vcmp.ge.f32.partialorder %v1022_v19, 0.0  ;;  %v1150_v42 = vmul.f32 0.2, %v1022_v19 }
 0x15e   :  { %1532 = vst.msk [vmem:[%s2679_s3 + $0xec] sm:$0xf] %vm1472_vm1, %v1705_v36  ;;  %v1209_v43 = vsel %vm1081_vm14, %v1017_v10, %v1145_v6  ;;  %vm1052_vm3 = vcmp.ge.f32.partialorder %v988_v27, 0.0  ;;  %v1116_v44 = vmul.f32 0.2, %v988_v27  ;;  %vm1084_vm4 = vcmp.ge.f32.partialorder %v1020_v12, 0.0 }
 0x15f   :  { %1498 = vst.msk [vmem:[%s2679_s3 + $0x64] sm:$0xf] %vm1472_vm1, %v1671_v53  ;;  %v1703_v37 = vpack.c.bf16 %v1209_v43, %v1209_v43  ;;  %v1182_v48 = vsel %vm1054_vm15, %v990_v18, %v1118_v41  ;;  %v1214_v49 = vsel %vm1086_vm2, %v1022_v19, %v1150_v42  ;;  %v1148_v54 = vmul.f32 0.2, %v1020_v12 }
 0x160   :  { %v1676_v46 = vpack.c.bf16 %v1182_v48, %v1182_v48  ;;  %v1708_v58 = vpack.c.bf16 %v1214_v49, %v1214_v49  ;;  %v1180_v61 = vsel %vm1052_vm3, %v988_v27, %v1116_v44  ;;  %vm1055_vm0 = vcmp.ge.f32.partialorder %v991_v31, 0.0 }
 0x161   :  { %1530 = vst.msk [vmem:[%s2679_s3 + $0xe4] sm:$0xf] %vm1472_vm1, %v1703_v37  ;;  %v1674_v62 = vpack.c.bf16 %v1180_v61, %v1180_v61  ;;  %v1212_v0 = vsel %vm1084_vm4, %v1020_v12, %v1148_v54  ;;  %v1119_v1 = vmul.f32 0.2, %v991_v31  ;;  %v1023_v2 = vadd.f32 %v2574_v30, %v952_v47 }
 0x162   :  { %1503 = vst.msk [vmem:[%s2679_s3 + $0x78] sm:$0xf] %vm1472_vm1, %v1676_v46  ;;  %1535 = vst.msk [vmem:[%s2679_s3 + $0xf8] sm:$0xf] %vm1472_vm1, %v1708_v58  ;;  %v1706_v52 = vpack.c.bf16 %v1212_v0, %v1212_v0  ;;  %v989_v3 = vadd.f32 %v2574_v30, %v918_v59  ;;  %v1021_v7 = vadd.f32 %v2574_v30, %v950_v45 }
 0x163   :  { %1501 = vst.msk [vmem:[%s2679_s3 + $0x70] sm:$0xf] %vm1472_vm1, %v1674_v62  ;;  %v1183_v8 = vsel %vm1055_vm0, %v991_v31, %v1119_v1  ;;  %vm1087_vm5 = vcmp.ge.f32.partialorder %v1023_v2, 0.0  ;;  %v1151_v11 = vmul.f32 0.2, %v1023_v2 }
 0x164   :  { %1533 = vst.msk [vmem:[%s2679_s3 + $0xf0] sm:$0xf] %vm1472_vm1, %v1706_v52  ;;  %v1677_v13 = vpack.c.bf16 %v1183_v8, %v1183_v8  ;;  %vm1053_vm6 = vcmp.ge.f32.partialorder %v989_v3, 0.0  ;;  %v1117_v5 = vmul.f32 0.2, %v989_v3  ;;  %vm1085_vm7 = vcmp.ge.f32.partialorder %v1021_v7, 0.0 }
 0x165   :  { %v1215_v14 = vsel %vm1087_vm5, %v1023_v2, %v1151_v11  ;;  %v1149_v15 = vmul.f32 0.2, %v1021_v7 }
 0x166   :  { %1504 = vst.msk [vmem:[%s2679_s3 + $0x7c] sm:$0xf] %vm1472_vm1, %v1677_v13  ;;  %v1709_v30 = vpack.c.bf16 %v1215_v14, %v1215_v14  ;;  %v1181_v21 = vsel %vm1053_vm6, %v989_v3, %v1117_v5 }
 0x167   :  { %v1675_v16 = vpack.c.bf16 %v1181_v21, %v1181_v21  ;;  %v1213_v17 = vsel %vm1085_vm7, %v1021_v7, %v1149_v15 }
 0x168   :  { %1536 = vst.msk [vmem:[%s2679_s3 + $0xfc] sm:$0xf] %vm1472_vm1, %v1709_v30  ;;  %v1707_v20 = vpack.c.bf16 %v1213_v17, %v1213_v17 }
 0x169   :  { %1502 = vst.msk [vmem:[%s2679_s3 + $0x74] sm:$0xf] %vm1472_vm1, %v1675_v16 }
 0x16a   :  { %1534 = vst.msk [vmem:[%s2679_s3 + $0xf4] sm:$0xf] %vm1472_vm1, %v1707_v20 }

// kernel: discriminator_forward.6
= control target key start
LH: loop header
LB: loop body
LE: loop exit
PB: predicated region body
PF: predicated region fallthrough
CT: control target
= control target key end

     0   :  { %s1971_s12 = smov 0   ;;  %s1973_s13 = smov 0   ;;  %s2304_s0 = inlined_call_operand.vmem [shape: bf16[2,64,1024], index: 0, kind: input, shape index: {}]   ;;  %s2305_s1 = inlined_call_operand.vmem [shape: bf16[1024,128], index: 1, kind: input, shape index: {}]   ;;  %s2306_s2 = inlined_call_operand.vmem [shape: f32[1,128], index: 2, kind: input, shape index: {}]   ;;  %s2307_s3 = inlined_call_operand.vmem [shape: bf16[2,64,128], index: 3, kind: output, shape index: {}]  }
   0x1   :  { %s1975_s14 = smov 0  }
   0x2 LB: > { %s32_s15 = sadd.s32 1, %s1945_s13  ;;  %p1532_p0 = scmp.ge.s32.totalorder %s1949_s14, 1  ;;  %s1949_s14 = sphi %s1975_s14, %s13_s14   ;;  %s1945_s13 = sphi %s1973_s13, %s2309_s13   ;;  %s1941_s12 = sphi %s1971_s12, %s2308_s12  }
   0x3   : > { %p34_p1 = scmp.ge.s32.totalorder %s32_s15, 2  ;;  %p189_p2 = scmp.lt.s32.totalorder %s1949_s14, 3 }
   0x5   : > { %s2311_s15 = smov (%p34_p1, %s32_s15), 0  ;;  %p190_p3 = pnand %p1532_p0, %p189_p2 }
   0x6   : > { %v1861_v0 = vld [vmem:[%s2305_s1 + $0x40] sm:$0xff] (!%p190_p3)   ;;  %v1865_v4 = vld [vmem:[%s2305_s1 + $0x48] sm:$0xff] (!%p190_p3)   ;;  %v1869_v8 = vld [vmem:[%s2305_s1 + $0x50] sm:$0xff] (!%p190_p3)   ;;  %p232_p4 = scmp.lt.s32.totalorder (!%p190_p3), %s1941_s12, 1 }
   0x7   : > { %193 = sbr.rel (%p190_p3) target bundleno = 366 (0x16e), region = 32  ;;  %v1862_v1 = vld [vmem:[%s2305_s1 + $0xc0] sm:$0xff] (!%p190_p3)   ;;  %1677 = vmatprep.subr.bf16.mxu0 (!%p190_p3), %v1861_v0  ;;  %v1866_v5 = vld [vmem:[%s2305_s1 + $0xc8] sm:$0xff] (!%p190_p3)   ;;  %v1870_v9 = vld [vmem:[%s2305_s1 + $0xd0] sm:$0xff] (!%p190_p3)  }
   0x8   : > { %v1863_v2 = vld [vmem:[%s2305_s1] sm:$0xff] (!%p190_p3)   ;;  %1717 = vmatprep.subr.bf16.mxu1 (!%p190_p3), %v1862_v1  ;;  %v1867_v6 = vld [vmem:[%s2305_s1 + $0x8] sm:$0xff] (!%p190_p3)   ;;  %v1871_v10 = vld [vmem:[%s2305_s1 + $0x10] sm:$0xff] (!%p190_p3)  }
   0x9   : > { %v1864_v3 = vld [vmem:[%s2305_s1 + $0x80] sm:$0xff] (!%p190_p3)   ;;  %1678 = vmatpush3.bf16.msra.mxu0 (!%p190_p3), %v1863_v2  ;;  %v1868_v7 = vld [vmem:[%s2305_s1 + $0x88] sm:$0xff] (!%p190_p3)   ;;  %v1872_v11 = vld [vmem:[%s2305_s1 + $0x90] sm:$0xff] (!%p190_p3)  }
   0xa   : > { %1718 = vmatpush3.bf16.msra.mxu1 (!%p190_p3), %v1864_v3  ;;  %1679 = vmatprep.subr.bf16.mxu0 (!%p190_p3), %v1865_v4  ;;  %v1873_v12 = vld [vmem:[%s2305_s1 + $0x58] sm:$0xff] (!%p190_p3)   ;;  %v1877_v16 = vld [vmem:[%s2305_s1 + $0x60] sm:$0xff] (!%p190_p3)   ;;  %v1881_v20 = vld [vmem:[%s2305_s1 + $0x68] sm:$0xff] (!%p190_p3)  }
   0xb   : > { %1719 = vmatprep.subr.bf16.mxu1 (!%p190_p3), %v1866_v5  ;;  %v1874_v13 = vld [vmem:[%s2305_s1 + $0xd8] sm:$0xff] (!%p190_p3)   ;;  %v1878_v17 = vld [vmem:[%s2305_s1 + $0xe0] sm:$0xff] (!%p190_p3)   ;;  %v1882_v21 = vld [vmem:[%s2305_s1 + $0xe8] sm:$0xff] (!%p190_p3)  }
   0xc   : > { %v1875_v14 = vld [vmem:[%s2305_s1 + $0x18] sm:$0xff] (!%p190_p3)   ;;  %v1879_v18 = vld [vmem:[%s2305_s1 + $0x20] sm:$0xff] (!%p190_p3)   ;;  %v1883_v22 = vld [vmem:[%s2305_s1 + $0x28] sm:$0xff] (!%p190_p3)  }
   0xd   : > { %1680 = vmatpush3.bf16.msra.mxu0 (!%p190_p3), %v1867_v6  ;;  %v1876_v15 = vld [vmem:[%s2305_s1 + $0x98] sm:$0xff] (!%p190_p3)   ;;  %v1880_v19 = vld [vmem:[%s2305_s1 + $0xa0] sm:$0xff] (!%p190_p3)   ;;  %v1884_v23 = vld [vmem:[%s2305_s1 + $0xa8] sm:$0xff] (!%p190_p3)  }
   0xe   : > { %1720 = vmatpush3.bf16.msra.mxu1 %v1868_v7  ;;  %1681 = vmatprep.subr.bf16.mxu0 %v1869_v8  ;;  %s2313_s12 = smov (!%p232_p4, %s1941_s12), 1  ;;  %v1885_v24 = vld [vmem:[%s2305_s1 + $0x70] sm:$0xff]   ;;  %v1889_v28 = vld [vmem:[%s2305_s1 + $0x78] sm:$0xff]   ;;  %v1893_v40 = vld [vmem:[%s2305_s1 + $0x140] sm:$0xff]  }
   0xf   : > { %1721 = vmatprep.subr.bf16.mxu1 %v1870_v9  ;;  %v1886_v25 = vld [vmem:[%s2305_s1 + $0xf0] sm:$0xff]   ;;  %s1644_s24 = sshll.u32 %s2313_s12, 8  ;;  %v1890_v29 = vld [vmem:[%s2305_s1 + $0xf8] sm:$0xff]   ;;  %v1894_v41 = vld [vmem:[%s2305_s1 + $0x1c0] sm:$0xff]   ;;  %s1645_s10 = sshll.u32 %s2313_s12, 5 }
  0x10   : > { %v1887_v26 = vld [vmem:[%s2305_s1 + $0x30] sm:$0xff]   ;;  %s2089_s6 = scalar_lea.vmem %s2304_s0, %s1644_s24  ;;  %v1891_v30 = vld [vmem:[%s2305_s1 + $0x38] sm:$0xff]   ;;  %v1895_v42 = vld [vmem:[%s2305_s1 + $0x100] sm:$0xff]   ;;  %s260_s12 = scalar_lea.vmem %s2307_s3, %s1645_s10 }
  0x11   : > { %1682 = vmatpush3.bf16.msra.mxu0 %v1871_v10  ;;  %v1888_v27 = vld [vmem:[%s2305_s1 + $0xb0] sm:$0xff]   ;;  %v1892_v31 = vld [vmem:[%s2305_s1 + $0xb8] sm:$0xff]   ;;  %v282_v32 = vld [vmem:[%s2089_s6] sm:$0xff] }
  0x12   : > { %1722 = vmatpush3.bf16.msra.mxu1 %v1872_v11  ;;  %1683 = vmatprep.subr.bf16.mxu0 %v1873_v12  ;;  %v286_v33 = vld [vmem:[%s2089_s6 + $0x20] sm:$0xff]  ;;  %v283_v34 = vld [vmem:[%s2089_s6 + $0x8] sm:$0xff]  ;;  %v1901_v56 = vld [vmem:[%s2305_s1 + $0x150] sm:$0xff]  }
  0x13   : > { %1723 = vmatprep.subr.bf16.mxu1 %v1874_v13  ;;  %v1537_v35 = vcombine.low %v282_v32, %v286_v33  ;;  %v1538_v36 = vcombine.high %v282_v32, %v286_v33  ;;  %v287_v37 = vld [vmem:[%s2089_s6 + $0x28] sm:$0xff]  ;;  %v1896_v43 = vld [vmem:[%s2305_s1 + $0x180] sm:$0xff]   ;;  %v1902_v57 = vld [vmem:[%s2305_s1 + $0x1d0] sm:$0xff]  }
  0x14   : > { %v1539_v38 = vcombine.low %v283_v34, %v287_v37  ;;  %v1540_v39 = vcombine.high %v283_v34, %v287_v37  ;;  %v1897_v44 = vld [vmem:[%s2305_s1 + $0x148] sm:$0xff]   ;;  %v290_v48 = vld [vmem:[%s2089_s6 + $0x40] sm:$0xff]  ;;  %v1903_v58 = vld [vmem:[%s2305_s1 + $0x110] sm:$0xff]  }
  0x15   : > { %1684 = vmatpush3.bf16.msra.mxu0 %v1875_v14  ;;  %1018 = vmatprep.mubr.bf16.mxu0 %v1538_v36  ;;  %v1898_v45 = vld [vmem:[%s2305_s1 + $0x1c8] sm:$0xff]   ;;  %v294_v49 = vld [vmem:[%s2089_s6 + $0x60] sm:$0xff]  ;;  %v1904_v59 = vld [vmem:[%s2305_s1 + $0x190] sm:$0xff]  }
  0x16   : > { %1724 = vmatpush3.bf16.msra.mxu1 %v1876_v15  ;;  %1685 = vmatprep.subr.bf16.mxu0 %v1877_v16  ;;  %v1899_v46 = vld [vmem:[%s2305_s1 + $0x108] sm:$0xff]   ;;  %v1546_v50 = vcombine.high %v290_v48, %v294_v49  ;;  %v1545_v53 = vcombine.low %v290_v48, %v294_v49  ;;  %v1905_v60 = vld [vmem:[%s2305_s1 + $0x158] sm:$0xff]   ;;  %v298_v0 = vld [vmem:[%s2089_s6 + $0x80] sm:$0xff] }
  0x17   : > { %1725 = vmatprep.subr.bf16.mxu1 %v1878_v17  ;;  %1083 = vmatprep.mubr.bf16.mxu1 %v1540_v39  ;;  %v1900_v47 = vld [vmem:[%s2305_s1 + $0x188] sm:$0xff]   ;;  %v1906_v61 = vld [vmem:[%s2305_s1 + $0x1d8] sm:$0xff]   ;;  %v302_v1 = vld [vmem:[%s2089_s6 + $0xa0] sm:$0xff] }
  0x18   : > { %v291_v51 = vld [vmem:[%s2089_s6 + $0x48] sm:$0xff]  ;;  %v1907_v62 = vld [vmem:[%s2305_s1 + $0x118] sm:$0xff]   ;;  %v1554_v4 = vcombine.high %v298_v0, %v302_v1  ;;  %v1553_v6 = vcombine.low %v298_v0, %v302_v1  ;;  %v1909_v8 = vld [vmem:[%s2305_s1 + $0x160] sm:$0xff]  }
  0x19   : > { %1686 = vmatpush3.bf16.msra.mxu0 %v1879_v18  ;;  %v295_v52 = vld [vmem:[%s2089_s6 + $0x68] sm:$0xff]  ;;  %v1908_v63 = vld [vmem:[%s2305_s1 + $0x198] sm:$0xff]   ;;  %v1910_v9 = vld [vmem:[%s2305_s1 + $0x1e0] sm:$0xff]  }
  0x1a   : > { %1726 = vmatpush3.bf16.msra.mxu1 %v1880_v19  ;;  %1687 = vmatprep.subr.bf16.mxu0 %v1881_v20  ;;  %v1548_v54 = vcombine.high %v291_v51, %v295_v52  ;;  %v1547_v55 = vcombine.low %v291_v51, %v295_v52  ;;  %v299_v2 = vld [vmem:[%s2089_s6 + $0x88] sm:$0xff]  ;;  %v1911_v10 = vld [vmem:[%s2305_s1 + $0x120] sm:$0xff]   ;;  %v284_v32 = vld [vmem:[%s2089_s6 + $0x10] sm:$0xff] }
  0x1b   : > { %1727 = vmatprep.subr.bf16.mxu1 %v1882_v21  ;;  %v303_v3 = vld [vmem:[%s2089_s6 + $0xa8] sm:$0xff]  ;;  %v1912_v11 = vld [vmem:[%s2305_s1 + $0x1a0] sm:$0xff]   ;;  %v288_v33 = vld [vmem:[%s2089_s6 + $0x30] sm:$0xff] }
  0x1c   : > { %v1556_v5 = vcombine.high %v299_v2, %v303_v3  ;;  %v1555_v7 = vcombine.low %v299_v2, %v303_v3  ;;  %v1913_v12 = vld [vmem:[%s2305_s1 + $0x168] sm:$0xff]   ;;  %v306_v16 = vld [vmem:[%s2089_s6 + $0xc0] sm:$0xff]  ;;  %v1541_v34 = vcombine.low %v284_v32, %v288_v33  ;;  %v285_v36 = vld [vmem:[%s2089_s6 + $0x18] sm:$0xff] }
  0x1d   : > { %1688 = vmatpush3.bf16.msra.mxu0 %v1883_v22  ;;  %v1914_v13 = vld [vmem:[%s2305_s1 + $0x1e8] sm:$0xff]   ;;  %v310_v17 = vld [vmem:[%s2089_s6 + $0xe0] sm:$0xff]  ;;  %v289_v37 = vld [vmem:[%s2089_s6 + $0x38] sm:$0xff] }
  0x1e   : > { %1728 = vmatpush3.bf16.msra.mxu1 %v1884_v23  ;;  %1689 = vmatprep.subr.bf16.mxu0 %v1885_v24  ;;  %v1915_v14 = vld [vmem:[%s2305_s1 + $0x128] sm:$0xff]   ;;  %v1562_v19 = vcombine.high %v306_v16, %v310_v17  ;;  %v1561_v21 = vcombine.low %v306_v16, %v310_v17  ;;  %v1917_v24 = vld [vmem:[%s2305_s1 + $0x170] sm:$0xff]   ;;  %v1543_v39 = vcombine.low %v285_v36, %v289_v37  ;;  %v301_v48 = vld [vmem:[%s2089_s6 + $0x98] sm:$0xff] }
  0x1f   : > { %1729 = vmatprep.subr.bf16.mxu1 %v1886_v25  ;;  %v1916_v15 = vld [vmem:[%s2305_s1 + $0x1a8] sm:$0xff]   ;;  %v1918_v25 = vld [vmem:[%s2305_s1 + $0x1f0] sm:$0xff]   ;;  %v305_v49 = vld [vmem:[%s2089_s6 + $0xb8] sm:$0xff] }
  0x20   : > { %v307_v18 = vld [vmem:[%s2089_s6 + $0xc8] sm:$0xff] }
  0x21   : > { %1690 = vmatpush3.bf16.msra.mxu0 %v1887_v26  ;;  %v311_v20 = vld [vmem:[%s2089_s6 + $0xe8] sm:$0xff]  ;;  %v1919_v26 = vld [vmem:[%s2305_s1 + $0x130] sm:$0xff]  }
  0x22   : > { %1730 = vmatpush3.bf16.msra.mxu1 %v1888_v27  ;;  %1691 = vmatprep.subr.bf16.mxu0 %v1889_v28  ;;  %v1564_v22 = vcombine.high %v307_v18, %v311_v20  ;;  %v1563_v23 = vcombine.low %v307_v18, %v311_v20  ;;  %v1920_v27 = vld [vmem:[%s2305_s1 + $0x1b0] sm:$0xff]   ;;  %v1921_v28 = vld [vmem:[%s2305_s1 + $0x178] sm:$0xff]  }
  0x23   : > { %1731 = vmatprep.subr.bf16.mxu1 %v1890_v29  ;;  %v1922_v29 = vld [vmem:[%s2305_s1 + $0x1f8] sm:$0xff]  }
  0x25   : > { %1692 = vmatpush3.bf16.msra.mxu0 %v1891_v30  ;;  %v1923_v30 = vld [vmem:[%s2305_s1 + $0x138] sm:$0xff]  }
  0x26   : > { %1732 = vmatpush3.bf16.msra.mxu1 %v1892_v31  ;;  %1757 = vmatprep.subr.bf16.mxu0 %v1893_v40  ;;  %v1924_v31 = vld [vmem:[%s2305_s1 + $0x1b8] sm:$0xff]   ;;  %v1544_v40 = vcombine.high %v285_v36, %v289_v37 }
  0x27   : > { %1797 = vmatprep.subr.bf16.mxu1 %v1894_v41  ;;  %v296_v41 = vld [vmem:[%s2089_s6 + $0x70] sm:$0xff] }
  0x28   : > { %1019 = vmatmul.mubr.bf16.vlgmr.msra.gmra.mrb[0].mxu0 %v1537_v35  ;;  %v1542_v35 = vcombine.high %v284_v32, %v288_v33 }
  0x29   : > { %1084 = vmatmul.mubr.bf16.vlgmr.msra.gmra.mrb[0].mxu1 %v1539_v38  ;;  %1758 = vmatpush3.bf16.msra.mxu0 %v1895_v42  ;;  %v292_v38 = vld [vmem:[%s2089_s6 + $0x50] sm:$0xff]  ;;  %v293_v42 = vld [vmem:[%s2089_s6 + $0x58] sm:$0xff] }
  0x2a   : > { %1798 = vmatpush3.bf16.msra.mxu1 %v1896_v43  ;;  %1759 = vmatprep.subr.bf16.mxu0 %v1897_v44  ;;  %v297_v43 = vld [vmem:[%s2089_s6 + $0x78] sm:$0xff]  ;;  %v1550_v44 = vcombine.high %v292_v38, %v296_v41 }
  0x2b   : > { %1799 = vmatprep.subr.bf16.mxu1 %v1898_v45  ;;  %1026 = vmatprep.mubr.bf16.mxu0 %v1546_v50  ;;  %v1552_v45 = vcombine.high %v293_v42, %v297_v43  ;;  %v1549_v50 = vcombine.low %v292_v38, %v296_v41  ;;  %v1551_v51 = vcombine.low %v293_v42, %v297_v43 }
  0x2c   : > { %1091 = vmatprep.mubr.bf16.mxu1 %v1548_v54  ;;  %v308_v54 = vld [vmem:[%s2089_s6 + $0xd0] sm:$0xff] }
  0x2d   : > { %1760 = vmatpush3.bf16.msra.mxu0 %v1899_v46  ;;  %v300_v46 = vld [vmem:[%s2089_s6 + $0x90] sm:$0xff] }
  0x2e   : > { %1800 = vmatpush3.bf16.msra.mxu1 %v1900_v47  ;;  %1761 = vmatprep.subr.bf16.mxu0 %v1901_v56  ;;  %v304_v47 = vld [vmem:[%s2089_s6 + $0xb0] sm:$0xff]  ;;  %v309_v56 = vld [vmem:[%s2089_s6 + $0xd8] sm:$0xff] }
  0x2f   : > { %1801 = vmatprep.subr.bf16.mxu1 %v1902_v57  ;;  %v1558_v52 = vcombine.high %v300_v46, %v304_v47  ;;  %v313_v57 = vld [vmem:[%s2089_s6 + $0xf8] sm:$0xff] }
  0x30   : > { %1027 = vmatmul.mubr.bf16.gmra.mrb[4].mxu0 %v1545_v53  ;;  %v1560_v53 = vcombine.high %v301_v48, %v305_v49 }
  0x31   : > { %1092 = vmatmul.mubr.bf16.gmra.mrb[4].mxu1 %v1547_v55  ;;  %1762 = vmatpush3.bf16.msra.mxu0 %v1903_v58  ;;  %v312_v55 = vld [vmem:[%s2089_s6 + $0xf0] sm:$0xff]  ;;  %v1557_v58 = vcombine.low %v300_v46, %v304_v47 }
  0x32   : > { %1802 = vmatpush3.bf16.msra.mxu1 %v1904_v59  ;;  %1763 = vmatprep.subr.bf16.mxu0 %v1905_v60  ;;  %v1559_v59 = vcombine.low %v301_v48, %v305_v49  ;;  %v1566_v60 = vcombine.high %v308_v54, %v312_v55 }
  0x33   : > { %1803 = vmatprep.subr.bf16.mxu1 %v1906_v61  ;;  %1034 = vmatprep.mubr.bf16.mxu0 %v1554_v4  ;;  %v1568_v61 = vcombine.high %v309_v56, %v313_v57 }
  0x34   : > { %1099 = vmatprep.mubr.bf16.mxu1 %v1556_v5 }
  0x35   : > { %1764 = vmatpush3.bf16.msra.mxu0 %v1907_v62  ;;  %v1565_v62 = vcombine.low %v308_v54, %v312_v55 }
  0x36   : > { %1804 = vmatpush3.bf16.msra.mxu1 %v1908_v63  ;;  %1765 = vmatprep.subr.bf16.mxu0 %v1909_v8  ;;  %v1567_v63 = vcombine.low %v309_v56, %v313_v57 }
  0x37   : > { %1805 = vmatprep.subr.bf16.mxu1 %v1910_v9 }
  0x38   : > { %1035 = vmatmul.mubr.bf16.gmra.mrb[8].mxu0 %v1553_v6 }
  0x39   : > { %1100 = vmatmul.mubr.bf16.gmra.mrb[8].mxu1 %v1555_v7  ;;  %1766 = vmatpush3.bf16.msra.mxu0 %v1911_v10 }
  0x3a   : > { %1806 = vmatpush3.bf16.msra.mxu1 %v1912_v11  ;;  %1767 = vmatprep.subr.bf16.mxu0 %v1913_v12 }
  0x3b   : > { %1807 = vmatprep.subr.bf16.mxu1 %v1914_v13  ;;  %1042 = vmatprep.mubr.bf16.mxu0 %v1562_v19 }
  0x3c   : > { %1107 = vmatprep.mubr.bf16.mxu1 %v1564_v22 }
  0x3d   : > { %1768 = vmatpush3.bf16.msra.mxu0 %v1915_v14 }
  0x3e   : > { %1808 = vmatpush3.bf16.msra.mxu1 %v1916_v15  ;;  %1769 = vmatprep.subr.bf16.mxu0 %v1917_v24 }
  0x3f   : > { %1809 = vmatprep.subr.bf16.mxu1 %v1918_v25 }
  0x40   : > { %1043 = vmatmul.mubr.bf16.gmra.mrb[12].mxu0 %v1561_v21 }
  0x41   : > { %1108 = vmatmul.mubr.bf16.gmra.mrb[12].mxu1 %v1563_v23  ;;  %1770 = vmatpush3.bf16.msra.mxu0 %v1919_v26 }
  0x42   : > { %1810 = vmatpush3.bf16.msra.mxu1 %v1920_v27  ;;  %1771 = vmatprep.subr.bf16.mxu0 %v1921_v28 }
  0x43   : > { %1811 = vmatprep.subr.bf16.mxu1 %v1922_v29  ;;  %1148 = vmatprep.mubr.bf16.mxu0 %v1542_v35 }
  0x44   : > { %1213 = vmatprep.mubr.bf16.mxu1 %v1544_v40 }
  0x45   : > { %1772 = vmatpush3.bf16.msra.mxu0 %v1923_v30 }
  0x46   : > { %1812 = vmatpush3.bf16.msra.mxu1 %v1924_v31 }
  0x48   : > { %1149 = vmatmul.mubr.bf16.vlgmr.msra.gmra.mrb[16].mxu0 %v1541_v34 }
  0x49   : > { %1214 = vmatmul.mubr.bf16.vlgmr.msra.gmra.mrb[16].mxu1 %v1543_v39  ;;  %1156 = vmatprep.mubr.bf16.mxu0 %v1550_v44 }
  0x4a   : > { %1221 = vmatprep.mubr.bf16.mxu1 %v1552_v45 }
  0x50   : > { %1157 = vmatmul.mubr.bf16.gmra.mrb[20].mxu0 %v1549_v50 }
  0x51   : > { %1222 = vmatmul.mubr.bf16.gmra.mrb[20].mxu1 %v1551_v51  ;;  %1164 = vmatprep.mubr.bf16.mxu0 %v1558_v52 }
  0x52   : > { %1229 = vmatprep.mubr.bf16.mxu1 %v1560_v53 }
  0x58   : > { %1165 = vmatmul.mubr.bf16.gmra.mrb[24].mxu0 %v1557_v58 }
  0x59   : > { %1230 = vmatmul.mubr.bf16.gmra.mrb[24].mxu1 %v1559_v59  ;;  %1172 = vmatprep.mubr.bf16.mxu0 %v1566_v60 }
  0x5a   : > { %1237 = vmatprep.mubr.bf16.mxu1 %v1568_v61 }
  0x60   : > { %1173 = vmatmul.mubr.bf16.gmra.mrb[28].mxu0 %v1565_v62 }
  0x61   : > { %1238 = vmatmul.mubr.bf16.gmra.mrb[28].mxu1 %v1567_v63 }
  0xfb   : > { %v1693_v0 = vpop.f32.mrb[0].mxu0 }
  0xfc   : > { %v1733_v1 = vpop.f32.mrb[0].mxu1  ;;  %v1694_v2 = vpop.f32.mrb[1].mxu0 }
  0xfd   : > { %v1695_v3 = vadd.f32 %v1694_v2, %v1693_v0  ;;  %v1734_v4 = vpop.f32.mrb[1].mxu1  ;;  %v1696_v5 = vpop.f32.mrb[2].mxu0 }
  0xfe   : > { %v1735_v6 = vadd.f32 %v1734_v4, %v1733_v1  ;;  %v1736_v7 = vpop.f32.mrb[2].mxu1  ;;  %v1697_v8 = vpop.f32.mrb[3].mxu0  ;;  %v2238_v4 = vld [vmem:[%s2306_s2] ss:$0 sm:$0xff] }
  0xff   : > { %v1698_v9 = vadd.f32 %v1697_v8, %v1696_v5  ;;  %v1737_v10 = vpop.f32.mrb[3].mxu1 }
 0x100   : > { %v1086_v11 = vadd.f32 %v1735_v6, %v1695_v3  ;;  %v1738_v12 = vadd.f32 %v1737_v10, %v1736_v7 }
 0x102   : > { %v1089_v13 = vadd.f32 %v1738_v12, %v1698_v9 }
 0x103   : > { %v1699_v14 = vpop.f32.mrb[4].mxu0 }
 0x104   : > { %v1739_v15 = vpop.f32.mrb[4].mxu1  ;;  %v1700_v16 = vpop.f32.mrb[5].mxu0 }
 0x105   : > { %v1701_v17 = vadd.f32 %v1700_v16, %v1699_v14  ;;  %v1740_v18 = vpop.f32.mrb[5].mxu1  ;;  %v1702_v19 = vpop.f32.mrb[6].mxu0 }
 0x106   : > { %v1741_v20 = vadd.f32 %v1740_v18, %v1739_v15  ;;  %v1742_v21 = vpop.f32.mrb[6].mxu1  ;;  %v1703_v22 = vpop.f32.mrb[7].mxu0 }
 0x107   : > { %v1704_v23 = vadd.f32 %v1703_v22, %v1702_v19  ;;  %v1743_v24 = vpop.f32.mrb[7].mxu1 }
 0x108   : > { %v1094_v25 = vadd.f32 %v1741_v20, %v1701_v17  ;;  %v1744_v26 = vadd.f32 %v1743_v24, %v1742_v21 }
 0x10a   : > { %v2225_v27 = vadd.f32 %v1744_v26, %v1704_v23 }
 0x10b   : > { %v1705_v28 = vpop.f32.mrb[8].mxu0 }
 0x10c   : > { %v1745_v29 = vpop.f32.mrb[8].mxu1  ;;  %v1706_v30 = vpop.f32.mrb[9].mxu0 }
 0x10d   : > { %v1746_v31 = vpop.f32.mrb[9].mxu1  ;;  %v1707_v32 = vadd.f32 %v1706_v30, %v1705_v28  ;;  %v1708_v34 = vpop.f32.mrb[10].mxu0 }
 0x10e   : > { %v1747_v33 = vadd.f32 %v1746_v31, %v1745_v29  ;;  %v1748_v35 = vpop.f32.mrb[10].mxu1  ;;  %v1709_v36 = vpop.f32.mrb[11].mxu0 }
 0x10f   : > { %v1749_v37 = vpop.f32.mrb[11].mxu1  ;;  %v1710_v39 = vadd.f32 %v1709_v36, %v1708_v34 }
 0x110   : > { %v2227_v38 = vadd.f32 %v1747_v33, %v1707_v32  ;;  %v1750_v40 = vadd.f32 %v1749_v37, %v1748_v35 }
 0x112   : > { %v2229_v41 = vadd.f32 %v1750_v40, %v1710_v39 }
 0x113   : > { %v1711_v42 = vpop.f32.mrb[12].mxu0 }
 0x114   : > { %v1751_v43 = vpop.f32.mrb[12].mxu1  ;;  %v1712_v44 = vpop.f32.mrb[13].mxu0 }
 0x115   : > { %v1713_v45 = vadd.f32 %v1712_v44, %v1711_v42  ;;  %v1752_v46 = vpop.f32.mrb[13].mxu1  ;;  %v1714_v47 = vpop.f32.mrb[14].mxu0 }
 0x116   : > { %v1753_v48 = vadd.f32 %v1752_v46, %v1751_v43  ;;  %v1754_v49 = vpop.f32.mrb[14].mxu1  ;;  %v1715_v50 = vpop.f32.mrb[15].mxu0 }
 0x117   : > { %v1716_v51 = vadd.f32 %v1715_v50, %v1714_v47  ;;  %v1755_v52 = vpop.f32.mrb[15].mxu1 }
 0x118   : > { %v2231_v53 = vadd.f32 %v1753_v48, %v1713_v45  ;;  %v1756_v54 = vadd.f32 %v1755_v52, %v1754_v49 }
 0x11a   : > { %v2233_v55 = vadd.f32 %v1756_v54, %v1716_v51 }
 0x11b   : > { %v1773_v56 = vpop.f32.mrb[16].mxu0 }
 0x11c   : > { %v1813_v57 = vpop.f32.mrb[16].mxu1  ;;  %v1774_v58 = vpop.f32.mrb[17].mxu0 }
 0x11d   : > { %v1775_v59 = vadd.f32 %v1774_v58, %v1773_v56  ;;  %v1814_v60 = vpop.f32.mrb[17].mxu1  ;;  %v1776_v61 = vpop.f32.mrb[18].mxu0 }
 0x11e   : > { %v1815_v62 = vadd.f32 %v1814_v60, %v1813_v57  ;;  %v1816_v63 = vpop.f32.mrb[18].mxu1  ;;  %v1777_v0 = vpop.f32.mrb[19].mxu0 }
 0x11f   : > { %v1151_v1 = vadd.f32 %v1775_v59, %v1086_v11  ;;  %v1778_v2 = vadd.f32 %v1777_v0, %v1776_v61  ;;  %v1817_v3 = vpop.f32.mrb[19].mxu1 }
 0x120   : > { %v1818_v5 = vadd.f32 %v1817_v3, %v1816_v63 }
 0x121   : > { %v1216_v6 = vadd.f32 %v1815_v62, %v1151_v1  ;;  %v1154_v7 = vadd.f32 %v1778_v2, %v1089_v13 }
 0x123   : > { %v2241_v8 = vadd.f32 %v2238_v4, %v1216_v6  ;;  %v1219_v9 = vadd.f32 %v1818_v5, %v1154_v7  ;;  %v1779_v10 = vpop.f32.mrb[20].mxu0 }
 0x124   : > { %v1819_v12 = vpop.f32.mrb[20].mxu1  ;;  %v1780_v14 = vpop.f32.mrb[21].mxu0 }
 0x125   : > { %v2244_v15 = vadd.f32 %v2238_v4, %v1219_v9  ;;  %v1781_v11 = vadd.f32 %v1780_v14, %v1779_v10  ;;  %v1820_v16 = vpop.f32.mrb[21].mxu1  ;;  %v1782_v17 = vpop.f32.mrb[22].mxu0  ;;  %v1302_v18 = vmul.f32 %v2241_v8, %v2241_v8 }
 0x126   : > { %v1821_v19 = vadd.f32 %v1820_v16, %v1819_v12  ;;  %v1822_v20 = vpop.f32.mrb[22].mxu1  ;;  %v1783_v21 = vpop.f32.mrb[23].mxu0 }
 0x127   : > { %v1288_v13 = vadd.f32 %v2244_v15, %v2241_v8  ;;  %v1303_v22 = vmul.f32 %v2244_v15, %v2244_v15  ;;  %v1159_v23 = vadd.f32 %v1781_v11, %v1094_v25  ;;  %v1784_v24 = vadd.f32 %v1783_v21, %v1782_v17  ;;  %v1823_v26 = vpop.f32.mrb[23].mxu1 }
 0x128   : > { %v1824_v28 = vadd.f32 %v1823_v26, %v1822_v20 }
 0x129   : > { %v1310_v29 = vadd.f32 %v1303_v22, %v1302_v18  ;;  %v1224_v30 = vadd.f32 %v1821_v19, %v1159_v23  ;;  %v1162_v31 = vadd.f32 %v1784_v24, %v2225_v27 }
 0x12b   : > { %v2254_v32 = vadd.f32 %v2238_v4, %v1224_v30  ;;  %v1227_v33 = vadd.f32 %v1824_v28, %v1162_v31  ;;  %v1785_v34 = vpop.f32.mrb[24].mxu0 }
 0x12c   : > { %v1825_v35 = vpop.f32.mrb[24].mxu1  ;;  %v1786_v36 = vpop.f32.mrb[25].mxu0 }
 0x12d   : > { %v1289_v37 = vadd.f32 %v1288_v13, %v2254_v32  ;;  %v1304_v39 = vmul.f32 %v2254_v32, %v2254_v32  ;;  %v2260_v25 = vadd.f32 %v2238_v4, %v1227_v33  ;;  %v1787_v40 = vadd.f32 %v1786_v36, %v1785_v34  ;;  %v1826_v42 = vpop.f32.mrb[25].mxu1  ;;  %v1788_v43 = vpop.f32.mrb[26].mxu0 }
 0x12e   : > { %v1827_v44 = vadd.f32 %v1826_v42, %v1825_v35  ;;  %v1828_v27 = vpop.f32.mrb[26].mxu1  ;;  %v1789_v45 = vpop.f32.mrb[27].mxu0 }
 0x12f   : > { %v1311_v46 = vadd.f32 %v1310_v29, %v1304_v39  ;;  %v1290_v47 = vadd.f32 %v1289_v37, %v2260_v25  ;;  %v1305_v48 = vmul.f32 %v2260_v25, %v2260_v25  ;;  %v1167_v49 = vadd.f32 %v1787_v40, %v2227_v38  ;;  %v1829_v50 = vpop.f32.mrb[27].mxu1 }
 0x130   : > { %v1790_v51 = vadd.f32 %v1789_v45, %v1788_v43  ;;  %v1830_v52 = vadd.f32 %v1829_v50, %v1828_v27 }
 0x131   : > { %v1312_v54 = vadd.f32 %v1311_v46, %v1305_v48  ;;  %v1232_v56 = vadd.f32 %v1827_v44, %v1167_v49 }
 0x132   : > { %v1170_v57 = vadd.f32 %v1790_v51, %v2229_v41 }
 0x133   : > { %v2268_v58 = vadd.f32 %v2238_v4, %v1232_v56  ;;  %v1791_v59 = vpop.f32.mrb[28].mxu0 }
 0x134   : > { %v1235_v60 = vadd.f32 %v1830_v52, %v1170_v57  ;;  %v1831_v61 = vpop.f32.mrb[28].mxu1  ;;  %v1792_v62 = vpop.f32.mrb[29].mxu0 }
 0x135   : > { %v1291_v63 = vadd.f32 %v1290_v47, %v2268_v58  ;;  %v1306_v0 = vmul.f32 %v2268_v58, %v2268_v58  ;;  %v1793_v38 = vadd.f32 %v1792_v62, %v1791_v59  ;;  %v1832_v1 = vpop.f32.mrb[29].mxu1  ;;  %v1794_v2 = vpop.f32.mrb[30].mxu0 }
 0x136   : > { %v1285_v3 = vadd.f32 %v2238_v4, %v1235_v60  ;;  %v1833_v5 = vadd.f32 %v1832_v1, %v1831_v61  ;;  %v1834_v6 = vpop.f32.mrb[30].mxu1  ;;  %v1795_v41 = vpop.f32.mrb[31].mxu0 }
 0x137   : > { %v1313_v7 = vadd.f32 %v1312_v54, %v1306_v0  ;;  %v1175_v9 = vadd.f32 %v1793_v38, %v2231_v53  ;;  %v1796_v10 = vadd.f32 %v1795_v41, %v1794_v2  ;;  %v1835_v12 = vpop.f32.mrb[31].mxu1 }
 0x138   : > { %v1292_v14 = vadd.f32 %v1291_v63, %v1285_v3  ;;  %v1307_v11 = vmul.f32 %v1285_v3, %v1285_v3  ;;  %v1836_v16 = vadd.f32 %v1835_v12, %v1834_v6 }
 0x139   : > { %v1240_v17 = vadd.f32 %v1833_v5, %v1175_v9  ;;  %v1178_v18 = vadd.f32 %v1796_v10, %v2233_v55 }
 0x13a   : > { %v1314_v19 = vadd.f32 %v1313_v7, %v1307_v11 }
 0x13b   : > { %v1286_v20 = vadd.f32 %v2238_v4, %v1240_v17  ;;  %v1243_v21 = vadd.f32 %v1836_v16, %v1178_v18 }
 0x13d   : > { %v1293_v13 = vadd.f32 %v1292_v14, %v1286_v20  ;;  %v1308_v22 = vmul.f32 %v1286_v20, %v1286_v20  ;;  %v1287_v23 = vadd.f32 %v2238_v4, %v1243_v21 }
 0x13f   : > { %v1315_v24 = vadd.f32 %v1314_v19, %v1308_v22  ;;  %v1294_v26 = vadd.f32 %v1293_v13, %v1287_v23  ;;  %v1309_v28 = vmul.f32 %v1287_v23, %v1287_v23 }
 0x141   : > { %v1295_v53 = vrot.slane %v1294_v26, 4  ;;  %v1316_v29 = vadd.f32 %v1315_v24, %v1309_v28 }
 0x143   : > { %v1296_v30 = vadd.f32 %v1295_v53, %v1294_v26  ;;  %v1317_v31 = vrot.slane %v1316_v29, 4 }
 0x145   : > { %v1297_v33 = vrot.slane %v1296_v30, 2  ;;  %v1318_v34 = vadd.f32 %v1317_v31, %v1316_v29 }
 0x147   : > { %v1298_v35 = vadd.f32 %v1297_v33, %v1296_v30  ;;  %v1319_v36 = vrot.slane %v1318_v34, 2 }
 0x149   : > { %v1299_v55 = vrot.slane %v1298_v35, 1  ;;  %v1320_v37 = vadd.f32 %v1319_v36, %v1318_v34 }
 0x14b   : > { %v1300_v39 = vadd.f32 %v1299_v55, %v1298_v35  ;;  %v1321_v40 = vrot.slane %v1320_v37, 1 }
 0x14d   : > { %v1301_v42 = vmul.f32 0.015625, %v1300_v39  ;;  %v1322_v43 = vadd.f32 %v1321_v40, %v1320_v37 }
 0x14f   : > { %v1323_v44 = vmul.f32 0.015625, %v1322_v43  ;;  %v1324_v27 = vmul.f32 %v1301_v42, %v1301_v42  ;;  %v1327_v4 = vsub.f32 %v2241_v8, %v1301_v42  ;;  %v1328_v45 = vsub.f32 %v2244_v15, %v1301_v42 }
 0x150   : > { %v1329_v46 = vsub.f32 %v2254_v32, %v1301_v42  ;;  %v1330_v47 = vsub.f32 %v2260_v25, %v1301_v42  ;;  %v1331_v48 = vsub.f32 %v2268_v58, %v1301_v42  ;;  %v1332_v49 = vsub.f32 %v1285_v3, %v1301_v42 }
 0x151   : > { %v1325_v50 = vsub.f32 %v1323_v44, %v1324_v27  ;;  %v1333_v51 = vsub.f32 %v1286_v20, %v1301_v42  ;;  %v1334_v52 = vsub.f32 %v1287_v23, %v1301_v42 }
 0x153   : > { %v1326_v54 = vmax.f32 %v1325_v50, 0.0 }
 0x155   : > { %v1335_v56 = vadd.f32 1e-05, %v1326_v54 }
 0x157   : > { %1925 = vrsqrt.f32 %v1335_v56 }
 0x161   : > { %v1926_v57 = vpop.eup %1925 }
 0x162   : > { %v1337_v59 = vmul.f32 %v1926_v57, %v1327_v4  ;;  %v1338_v60 = vmul.f32 %v1926_v57, %v1328_v45  ;;  %v1339_v8 = vmul.f32 %v1926_v57, %v1329_v46  ;;  %v1340_v61 = vmul.f32 %v1926_v57, %v1330_v47 }
 0x163   : > { %v1341_v15 = vmul.f32 %v1926_v57, %v1331_v48  ;;  %v1342_v62 = vmul.f32 %v1926_v57, %v1332_v49  ;;  %v1343_v32 = vmul.f32 %v1926_v57, %v1333_v51  ;;  %v1344_v63 = vmul.f32 %v1926_v57, %v1334_v52 }
 0x164   : > { %vm1345_vm0 = vcmp.ge.f32.partialorder %v1337_v59, 0.0  ;;  %vm1346_vm1 = vcmp.ge.f32.partialorder %v1338_v60, 0.0  ;;  %vm1347_vm2 = vcmp.ge.f32.partialorder %v1339_v8, 0.0  ;;  %vm1348_vm3 = vcmp.ge.f32.partialorder %v1340_v61, 0.0 }
 0x165   : > { %vm1349_vm4 = vcmp.ge.f32.partialorder %v1341_v15, 0.0  ;;  %vm1350_vm5 = vcmp.ge.f32.partialorder %v1342_v62, 0.0  ;;  %vm1351_vm6 = vcmp.ge.f32.partialorder %v1343_v32, 0.0  ;;  %vm1352_vm7 = vcmp.ge.f32.partialorder %v1344_v63, 0.0 }
 0x166   : > { %v1353_v25 = vmul.f32 0.2, %v1337_v59  ;;  %v1354_v58 = vmul.f32 0.2, %v1338_v60  ;;  %v1355_v0 = vmul.f32 0.2, %v1339_v8 }
 0x167   : > { %v1356_v38 = vmul.f32 0.2, %v1340_v61  ;;  %v1357_v1 = vmul.f32 0.2, %v1341_v15  ;;  %v1358_v2 = vmul.f32 0.2, %v1342_v62 }
 0x168   : > { %v1359_v3 = vmul.f32 0.2, %v1343_v32  ;;  %v1360_v5 = vmul.f32 0.2, %v1344_v63  ;;  %v1361_v6 = vsel %vm1345_vm0, %v1337_v59, %v1353_v25  ;;  %v1362_v41 = vsel %vm1346_vm1, %v1338_v60, %v1354_v58 }
 0x169   : > { %v1363_v7 = vsel %vm1347_vm2, %v1339_v8, %v1355_v0  ;;  %v1364_v9 = vsel %vm1348_vm3, %v1340_v61, %v1356_v38  ;;  %v1365_v10 = vsel %vm1349_vm4, %v1341_v15, %v1357_v1  ;;  %v1366_v12 = vsel %vm1350_vm5, %v1342_v62, %v1358_v2 }
 0x16a   : > { %v1367_v14 = vsel %vm1351_vm6, %v1343_v32, %v1359_v3  ;;  %v1368_v11 = vsel %vm1352_vm7, %v1344_v63, %v1360_v5  ;;  %v1657_v16 = vpack.c.bf16 %v1362_v41, %v1361_v6  ;;  %v1662_v17 = vpack.c.bf16 %v1364_v9, %v1363_v7 }
 0x16b   : > { %v1667_v18 = vpack.c.bf16 %v1366_v12, %v1365_v10  ;;  %v1672_v19 = vpack.c.bf16 %v1368_v11, %v1367_v14 }
 0x16c   : > { %1658 = vst [vmem:[%s260_s12] sm:$0xff] %v1657_v16   ;;  %1674 = vst [vmem:[%s260_s12 + $0x8] sm:$0xff] %v1662_v17  }
 0x16d   : > { %1675 = vst [vmem:[%s260_s12 + $0x10] sm:$0xff] %v1667_v18   ;;  %1676 = vst [vmem:[%s260_s12 + $0x18] sm:$0xff] %v1672_v19  }
 0x16e PF: > { %s13_s14 = sadd.s32 1, %s1949_s14   ;;  %s2308_s12 = smov %s1945_s13 }
 0x16f   : > { %p10_p5 = scmp.ge.s32.totalorder %s13_s14, 4   ;;  %s2309_s13 = smov %s2311_s15 }
 0x171   :  { %12 = sbr.rel (!%p10_p5) target bundleno = 2 (0x2), region = 76 }

// kernel: discriminator_forward.7
= control target key start
LH: loop header
LB: loop body
LE: loop exit
PB: predicated region body
PF: predicated region fallthrough
CT: control target
= control target key end

     0   :  { %s3274_s12 = smov 0   ;;  %s3276_s13 = smov 0   ;;  %s4152_s0 = inlined_call_operand.vmem [shape: bf16[2,16,2048], index: 0, kind: input, shape index: {}]   ;;  %s4153_s1 = inlined_call_operand.vmem [shape: bf16[2048,256], index: 1, kind: input, shape index: {}]   ;;  %s4154_s2 = inlined_call_operand.vmem [shape: f32[1,256], index: 2, kind: input, shape index: {}]   ;;  %s4155_s3 = inlined_call_operand.vmem [shape: bf16[2,16,256], index: 3, kind: output, shape index: {}]  }
   0x1   :  { %s3278_s14 = smov 0  }
   0x2 LB: > { %s32_s15 = sadd.s32 1, %s3248_s13  ;;  %p2505_p0 = scmp.ge.s32.totalorder %s3252_s14, 1  ;;  %s3252_s14 = sphi %s3278_s14, %s13_s14   ;;  %s3248_s13 = sphi %s3276_s13, %s4157_s13   ;;  %s3244_s12 = sphi %s3274_s12, %s4156_s12  }
   0x3   : > { %p34_p1 = scmp.ge.s32.totalorder %s32_s15, 2  ;;  %p194_p2 = scmp.lt.s32.totalorder %s3252_s14, 3 }
   0x5   : > { %s4159_s15 = smov (%p34_p1, %s32_s15), 0  ;;  %p195_p3 = pnand %p2505_p0, %p194_p2 }
   0x6   : > { %v2842_v0 = vld [vmem:[%s4153_s1 + $0x4] ss:$8 sps:$4 sm:$0xff] (!%p195_p3)   ;;  %v2846_v2 = vld [vmem:[%s4153_s1] ss:$8 sps:$4 sm:$0xff] (!%p195_p3)   ;;  %v2848_v4 = vld [vmem:[%s4153_s1 + $0x14] ss:$8 sps:$4 sm:$0xff] (!%p195_p3)  }
   0x7   : > { %198 = sbr.rel (%p195_p3) target bundleno = 526 (0x20e), region = 32  ;;  %v2844_v1 = vld [vmem:[%s4153_s1 + $0x404] ss:$8 sps:$4 sm:$0xff] (!%p195_p3)   ;;  %1921 = vmatprep.subr.bf16.mxu1 (!%p195_p3), %v2842_v0  ;;  %v2847_v3 = vld [vmem:[%s4153_s1 + $0x400] ss:$8 sps:$4 sm:$0xff] (!%p195_p3)   ;;  %p241_p4 = scmp.lt.s32.totalorder (!%p195_p3), %s3244_s12, 1 }
   0x8   : > { %2093 = vmatprep.subr.bf16.mxu0 (!%p195_p3), %v2844_v1  ;;  %1922 = vmatpush1.bf16.msra.mxu1 (!%p195_p3), %v2846_v2  ;;  %v2850_v5 = vld [vmem:[%s4153_s1 + $0x414] ss:$8 sps:$4 sm:$0xff] (!%p195_p3)   ;;  %v2852_v6 = vld [vmem:[%s4153_s1 + $0x10] ss:$8 sps:$4 sm:$0xff] (!%p195_p3)   ;;  %v2854_v8 = vld [vmem:[%s4153_s1 + $0x24] ss:$8 sps:$4 sm:$0xff] (!%p195_p3)  }
   0x9   : > { %2094 = vmatpush1.bf16.msra.mxu0 (!%p195_p3), %v2847_v3  ;;  %1923 = vmatprep.subr.bf16.mxu1 (!%p195_p3), %v2848_v4  ;;  %v2853_v7 = vld [vmem:[%s4153_s1 + $0x410] ss:$8 sps:$4 sm:$0xff] (!%p195_p3)   ;;  %v2856_v9 = vld [vmem:[%s4153_s1 + $0x424] ss:$8 sps:$4 sm:$0xff] (!%p195_p3)   ;;  %v2858_v10 = vld [vmem:[%s4153_s1 + $0x20] ss:$8 sps:$4 sm:$0xff] (!%p195_p3)  }
   0xa   : > { %2095 = vmatprep.subr.bf16.mxu0 (!%p195_p3), %v2850_v5  ;;  %v2859_v11 = vld [vmem:[%s4153_s1 + $0x420] ss:$8 sps:$4 sm:$0xff] (!%p195_p3)   ;;  %v2860_v12 = vld [vmem:[%s4153_s1 + $0x34] ss:$8 sps:$4 sm:$0xff] (!%p195_p3)   ;;  %v2864_v14 = vld [vmem:[%s4153_s1 + $0x30] ss:$8 sps:$4 sm:$0xff] (!%p195_p3)  }
   0xb   : > { %v2862_v13 = vld [vmem:[%s4153_s1 + $0x434] ss:$8 sps:$4 sm:$0xff] (!%p195_p3)   ;;  %v2865_v15 = vld [vmem:[%s4153_s1 + $0x430] ss:$8 sps:$4 sm:$0xff] (!%p195_p3)   ;;  %v2866_v16 = vld [vmem:[%s4153_s1 + $0x44] ss:$8 sps:$4 sm:$0xff] (!%p195_p3)  }
   0xc   : > { %1924 = vmatpush1.bf16.msra.mxu1 (!%p195_p3), %v2852_v6  ;;  %v2868_v17 = vld [vmem:[%s4153_s1 + $0x444] ss:$8 sps:$4 sm:$0xff] (!%p195_p3)   ;;  %v2870_v18 = vld [vmem:[%s4153_s1 + $0x40] ss:$8 sps:$4 sm:$0xff] (!%p195_p3)   ;;  %v2872_v20 = vld [vmem:[%s4153_s1 + $0x54] ss:$8 sps:$4 sm:$0xff] (!%p195_p3)  }
   0xd   : > { %2096 = vmatpush1.bf16.msra.mxu0 (!%p195_p3), %v2853_v7  ;;  %1925 = vmatprep.subr.bf16.mxu1 (!%p195_p3), %v2854_v8  ;;  %v2871_v19 = vld [vmem:[%s4153_s1 + $0x440] ss:$8 sps:$4 sm:$0xff] (!%p195_p3)   ;;  %v2874_v21 = vld [vmem:[%s4153_s1 + $0x454] ss:$8 sps:$4 sm:$0xff] (!%p195_p3)   ;;  %v2876_v22 = vld [vmem:[%s4153_s1 + $0x50] ss:$8 sps:$4 sm:$0xff] (!%p195_p3)  }
   0xe   : > { %2097 = vmatprep.subr.bf16.mxu0 %v2856_v9  ;;  %v2877_v23 = vld [vmem:[%s4153_s1 + $0x450] ss:$8 sps:$4 sm:$0xff]   ;;  %v2878_v24 = vld [vmem:[%s4153_s1 + $0x64] ss:$8 sps:$4 sm:$0xff]   ;;  %v2882_v26 = vld [vmem:[%s4153_s1 + $0x60] ss:$8 sps:$4 sm:$0xff]  }
   0xf   : > { %v2880_v25 = vld [vmem:[%s4153_s1 + $0x464] ss:$8 sps:$4 sm:$0xff]   ;;  %v2883_v27 = vld [vmem:[%s4153_s1 + $0x460] ss:$8 sps:$4 sm:$0xff]   ;;  %v2884_v28 = vld [vmem:[%s4153_s1 + $0x74] ss:$8 sps:$4 sm:$0xff]  }
  0x10   : > { %1926 = vmatpush1.bf16.msra.mxu1 %v2858_v10  ;;  %v2886_v29 = vld [vmem:[%s4153_s1 + $0x474] ss:$8 sps:$4 sm:$0xff]   ;;  %v2888_v30 = vld [vmem:[%s4153_s1 + $0x70] ss:$8 sps:$4 sm:$0xff]   ;;  %v2890_v32 = vld [vmem:[%s4153_s1 + $0x84] ss:$8 sps:$4 sm:$0xff]  }
  0x11   : > { %2098 = vmatpush1.bf16.msra.mxu0 %v2859_v11  ;;  %1927 = vmatprep.subr.bf16.mxu1 %v2860_v12  ;;  %v2889_v31 = vld [vmem:[%s4153_s1 + $0x470] ss:$8 sps:$4 sm:$0xff]   ;;  %v2892_v33 = vld [vmem:[%s4153_s1 + $0x484] ss:$8 sps:$4 sm:$0xff]   ;;  %v2894_v34 = vld [vmem:[%s4153_s1 + $0x80] ss:$8 sps:$4 sm:$0xff]  }
  0x12   : > { %2099 = vmatprep.subr.bf16.mxu0 %v2862_v13  ;;  %v2895_v35 = vld [vmem:[%s4153_s1 + $0x480] ss:$8 sps:$4 sm:$0xff]   ;;  %v2896_v36 = vld [vmem:[%s4153_s1 + $0x94] ss:$8 sps:$4 sm:$0xff]   ;;  %s4161_s12 = smov (!%p241_p4, %s3244_s12), 1 }
  0x13   : > { %v2898_v37 = vld [vmem:[%s4153_s1 + $0x494] ss:$8 sps:$4 sm:$0xff]   ;;  %v2900_v38 = vld [vmem:[%s4153_s1 + $0x90] ss:$8 sps:$4 sm:$0xff]   ;;  %v2902_v40 = vld [vmem:[%s4153_s1 + $0xa4] ss:$8 sps:$4 sm:$0xff]  }
  0x14   : > { %1928 = vmatpush1.bf16.msra.mxu1 %v2864_v14  ;;  %v2901_v39 = vld [vmem:[%s4153_s1 + $0x490] ss:$8 sps:$4 sm:$0xff]   ;;  %s2786_s29 = sshll.u32 %s4161_s12, 7  ;;  %v2904_v41 = vld [vmem:[%s4153_s1 + $0x4a4] ss:$8 sps:$4 sm:$0xff]   ;;  %s2787_s18 = sshll.u32 %s4161_s12, 4 }
  0x15   : > { %2100 = vmatpush1.bf16.msra.mxu0 %v2865_v15  ;;  %1929 = vmatprep.subr.bf16.mxu1 %v2866_v16  ;;  %v2906_v42 = vld [vmem:[%s4153_s1 + $0xa0] ss:$8 sps:$4 sm:$0xff]   ;;  %s3434_s11 = scalar_lea.vmem %s4152_s0, %s2786_s29  ;;  %v2908_v44 = vld [vmem:[%s4153_s1 + $0xb4] ss:$8 sps:$4 sm:$0xff]   ;;  %v2912_v46 = vld [vmem:[%s4153_s1 + $0xb0] ss:$8 sps:$4 sm:$0xff]   ;;  %s275_s21 = scalar_lea.vmem %s4155_s3, %s2787_s18 }
  0x16   : > { %2101 = vmatprep.subr.bf16.mxu0 %v2868_v17  ;;  %v2907_v43 = vld [vmem:[%s4153_s1 + $0x4a0] ss:$8 sps:$4 sm:$0xff]   ;;  %v2910_v45 = vld [vmem:[%s4153_s1 + $0x4b4] ss:$8 sps:$4 sm:$0xff]   ;;  %v2913_v47 = vld [vmem:[%s4153_s1 + $0x4b0] ss:$8 sps:$4 sm:$0xff]  }
  0x17   : > { %v289_v48 = vld [vmem:[%s3434_s11] sm:$0xff]  ;;  %v2920_v58 = vld [vmem:[%s4153_s1 + $0xd4] ss:$8 sps:$4 sm:$0xff]   ;;  %v2924_v60 = vld [vmem:[%s4153_s1 + $0xd0] ss:$8 sps:$4 sm:$0xff]  }
  0x18   : > { %1930 = vmatpush1.bf16.msra.mxu1 %v2870_v18  ;;  %v297_v49 = vld [vmem:[%s3434_s11 + $0x40] sm:$0xff]  ;;  %v2922_v59 = vld [vmem:[%s4153_s1 + $0x4d4] ss:$8 sps:$4 sm:$0xff]   ;;  %v2925_v61 = vld [vmem:[%s4153_s1 + $0x4d0] ss:$8 sps:$4 sm:$0xff]  }
  0x19   : > { %2102 = vmatpush1.bf16.msra.mxu0 %v2871_v19  ;;  %1931 = vmatprep.subr.bf16.mxu1 %v2872_v20  ;;  %v2914_v50 = vld [vmem:[%s4153_s1 + $0xc4] ss:$8 sps:$4 sm:$0xff]   ;;  %v2511_v52 = vcombine.high %v289_v48, %v297_v49  ;;  %v2918_v56 = vld [vmem:[%s4153_s1 + $0xc0] ss:$8 sps:$4 sm:$0xff]   ;;  %v2932_v2 = vld [vmem:[%s4153_s1 + $0xf4] ss:$8 sps:$4 sm:$0xff]   ;;  %v2510_v8 = vcombine.low %v289_v48, %v297_v49 }
  0x1a   : > { %2103 = vmatprep.subr.bf16.mxu0 %v2874_v21  ;;  %v2916_v51 = vld [vmem:[%s4153_s1 + $0x4c4] ss:$8 sps:$4 sm:$0xff]   ;;  %v2919_v57 = vld [vmem:[%s4153_s1 + $0x4c0] ss:$8 sps:$4 sm:$0xff]   ;;  %v2934_v3 = vld [vmem:[%s4153_s1 + $0x4f4] ss:$8 sps:$4 sm:$0xff]  }
  0x1b   : > { %v293_v53 = vld [vmem:[%s3434_s11 + $0x20] sm:$0xff]  ;;  %1953 = vmatprep.mubr.bf16.mxu1 %v2511_v52  ;;  %v2936_v4 = vld [vmem:[%s4153_s1 + $0xf0] ss:$8 sps:$4 sm:$0xff]   ;;  %v2946_v12 = vld [vmem:[%s4153_s1 + $0x114] ss:$8 sps:$4 sm:$0xff]  }
  0x1c   : > { %1932 = vmatpush1.bf16.msra.mxu1 %v2876_v22  ;;  %v301_v54 = vld [vmem:[%s3434_s11 + $0x60] sm:$0xff]  ;;  %v2937_v5 = vld [vmem:[%s4153_s1 + $0x4f0] ss:$8 sps:$4 sm:$0xff]   ;;  %v2949_v13 = vld [vmem:[%s4153_s1 + $0x514] ss:$8 sps:$4 sm:$0xff]  }
  0x1d   : > { %2104 = vmatpush1.bf16.msra.mxu0 %v2877_v23  ;;  %1933 = vmatprep.subr.bf16.mxu1 %v2878_v24  ;;  %v2519_v55 = vcombine.high %v293_v53, %v301_v54  ;;  %v2926_v62 = vld [vmem:[%s4153_s1 + $0xe4] ss:$8 sps:$4 sm:$0xff]   ;;  %v2930_v0 = vld [vmem:[%s4153_s1 + $0xe0] ss:$8 sps:$4 sm:$0xff]   ;;  %v2518_v10 = vcombine.low %v293_v53, %v301_v54  ;;  %v2944_v14 = vld [vmem:[%s4153_s1 + $0x110] ss:$8 sps:$4 sm:$0xff]  }
  0x1e   : > { %2105 = vmatprep.subr.bf16.mxu0 %v2880_v25  ;;  %v2928_v63 = vld [vmem:[%s4153_s1 + $0x4e4] ss:$8 sps:$4 sm:$0xff]   ;;  %v2931_v1 = vld [vmem:[%s4153_s1 + $0x4e0] ss:$8 sps:$4 sm:$0xff]   ;;  %v2947_v15 = vld [vmem:[%s4153_s1 + $0x510] ss:$8 sps:$4 sm:$0xff]  }
  0x1f   : > { %2125 = vmatprep.mubr.bf16.mxu0 %v2519_v55  ;;  %v2940_v6 = vld [vmem:[%s4153_s1 + $0x104] ss:$8 sps:$4 sm:$0xff]   ;;  %v2938_v9 = vld [vmem:[%s4153_s1 + $0x100] ss:$8 sps:$4 sm:$0xff]   ;;  %v2958_v20 = vld [vmem:[%s4153_s1 + $0x134] ss:$8 sps:$4 sm:$0xff]  }
  0x20   : > { %1934 = vmatpush1.bf16.msra.mxu1 %v2882_v26  ;;  %v2943_v7 = vld [vmem:[%s4153_s1 + $0x504] ss:$8 sps:$4 sm:$0xff]   ;;  %v2941_v11 = vld [vmem:[%s4153_s1 + $0x500] ss:$8 sps:$4 sm:$0xff]   ;;  %v2961_v21 = vld [vmem:[%s4153_s1 + $0x534] ss:$8 sps:$4 sm:$0xff]  }
  0x21   : > { %2106 = vmatpush1.bf16.msra.mxu0 %v2883_v27  ;;  %1935 = vmatprep.subr.bf16.mxu1 %v2884_v28  ;;  %v2952_v16 = vld [vmem:[%s4153_s1 + $0x124] ss:$8 sps:$4 sm:$0xff]   ;;  %v2950_v18 = vld [vmem:[%s4153_s1 + $0x120] ss:$8 sps:$4 sm:$0xff]   ;;  %v2956_v22 = vld [vmem:[%s4153_s1 + $0x130] ss:$8 sps:$4 sm:$0xff]  }
  0x22   : > { %2107 = vmatprep.subr.bf16.mxu0 %v2886_v29  ;;  %v2955_v17 = vld [vmem:[%s4153_s1 + $0x524] ss:$8 sps:$4 sm:$0xff]   ;;  %v2953_v19 = vld [vmem:[%s4153_s1 + $0x520] ss:$8 sps:$4 sm:$0xff]   ;;  %v2959_v23 = vld [vmem:[%s4153_s1 + $0x530] ss:$8 sps:$4 sm:$0xff]  }
  0x23   : > { %v2964_v24 = vld [vmem:[%s4153_s1 + $0x144] ss:$8 sps:$4 sm:$0xff]   ;;  %v2962_v26 = vld [vmem:[%s4153_s1 + $0x140] ss:$8 sps:$4 sm:$0xff]   ;;  %v2970_v28 = vld [vmem:[%s4153_s1 + $0x154] ss:$8 sps:$4 sm:$0xff]  }
  0x24   : > { %1936 = vmatpush1.bf16.msra.mxu1 %v2888_v30  ;;  %v2967_v25 = vld [vmem:[%s4153_s1 + $0x544] ss:$8 sps:$4 sm:$0xff]   ;;  %v2965_v27 = vld [vmem:[%s4153_s1 + $0x540] ss:$8 sps:$4 sm:$0xff]   ;;  %v2973_v29 = vld [vmem:[%s4153_s1 + $0x554] ss:$8 sps:$4 sm:$0xff]  }
  0x25   : > { %2108 = vmatpush1.bf16.msra.mxu0 %v2889_v31  ;;  %1937 = vmatprep.subr.bf16.mxu1 %v2890_v32  ;;  %v2968_v30 = vld [vmem:[%s4153_s1 + $0x150] ss:$8 sps:$4 sm:$0xff]   ;;  %v2976_v32 = vld [vmem:[%s4153_s1 + $0x164] ss:$8 sps:$4 sm:$0xff]   ;;  %v2986_v48 = vld [vmem:[%s4153_s1 + $0x180] ss:$8 sps:$4 sm:$0xff]  }
  0x26   : > { %2109 = vmatprep.subr.bf16.mxu0 %v2892_v33  ;;  %v2971_v31 = vld [vmem:[%s4153_s1 + $0x550] ss:$8 sps:$4 sm:$0xff]   ;;  %v2979_v33 = vld [vmem:[%s4153_s1 + $0x564] ss:$8 sps:$4 sm:$0xff]   ;;  %v2989_v49 = vld [vmem:[%s4153_s1 + $0x580] ss:$8 sps:$4 sm:$0xff]  }
  0x27   : > { %v2992_v52 = vld [vmem:[%s4153_s1 + $0x190] ss:$8 sps:$4 sm:$0xff]   ;;  %v3000_v54 = vld [vmem:[%s4153_s1 + $0x1a4] ss:$8 sps:$4 sm:$0xff]  }
  0x28   : > { %1938 = vmatpush1.bf16.msra.mxu1 %v2894_v34  ;;  %v2974_v34 = vld [vmem:[%s4153_s1 + $0x160] ss:$8 sps:$4 sm:$0xff]   ;;  %v2995_v53 = vld [vmem:[%s4153_s1 + $0x590] ss:$8 sps:$4 sm:$0xff]   ;;  %v3003_v55 = vld [vmem:[%s4153_s1 + $0x5a4] ss:$8 sps:$4 sm:$0xff]  }
  0x29   : > { %2110 = vmatpush1.bf16.msra.mxu0 %v2895_v35  ;;  %1939 = vmatprep.subr.bf16.mxu1 %v2896_v36  ;;  %v2977_v35 = vld [vmem:[%s4153_s1 + $0x560] ss:$8 sps:$4 sm:$0xff]  }
  0x2a   : > { %2111 = vmatprep.subr.bf16.mxu0 %v2898_v37  ;;  %v3585_v36 = vld [vmem:[%s3434_s11 + $0x8] sm:$0xff] }
  0x2b   : > { %v3588_v37 = vld [vmem:[%s3434_s11 + $0x48] sm:$0xff] }
  0x2c   : > { %1940 = vmatpush1.bf16.msra.mxu1 %v2900_v38  ;;  %v2982_v38 = vld [vmem:[%s4153_s1 + $0x174] ss:$8 sps:$4 sm:$0xff]  }
  0x2d   : > { %2112 = vmatpush1.bf16.msra.mxu0 %v2901_v39  ;;  %1941 = vmatprep.subr.bf16.mxu1 %v2902_v40  ;;  %v2985_v39 = vld [vmem:[%s4153_s1 + $0x574] ss:$8 sps:$4 sm:$0xff]   ;;  %v2513_v40 = vcombine.high %v3585_v36, %v3588_v37 }
  0x2e   : > { %2113 = vmatprep.subr.bf16.mxu0 %v2904_v41  ;;  %v3599_v41 = vld [vmem:[%s3434_s11 + $0x28] sm:$0xff] }
  0x30   : > { %1942 = vmatpush1.bf16.msra.mxu1 %v2906_v42  ;;  %v3602_v42 = vld [vmem:[%s3434_s11 + $0x68] sm:$0xff] }
  0x31   : > { %2114 = vmatpush1.bf16.msra.mxu0 %v2907_v43  ;;  %1943 = vmatprep.subr.bf16.mxu1 %v2908_v44  ;;  %v2521_v43 = vcombine.high %v3599_v41, %v3602_v42  ;;  %v2980_v44 = vld [vmem:[%s4153_s1 + $0x170] ss:$8 sps:$4 sm:$0xff]  }
  0x32   : > { %2115 = vmatprep.subr.bf16.mxu0 %v2910_v45  ;;  %v2983_v45 = vld [vmem:[%s4153_s1 + $0x570] ss:$8 sps:$4 sm:$0xff]  }
  0x34   : > { %1944 = vmatpush1.bf16.msra.mxu1 %v2912_v46  ;;  %v2988_v46 = vld [vmem:[%s4153_s1 + $0x184] ss:$8 sps:$4 sm:$0xff]  }
  0x35   : > { %2116 = vmatpush1.bf16.msra.mxu0 %v2913_v47  ;;  %1945 = vmatprep.subr.bf16.mxu1 %v2914_v50  ;;  %v2991_v47 = vld [vmem:[%s4153_s1 + $0x584] ss:$8 sps:$4 sm:$0xff]   ;;  %v2994_v50 = vld [vmem:[%s4153_s1 + $0x194] ss:$8 sps:$4 sm:$0xff]  }
  0x36   : > { %2117 = vmatprep.subr.bf16.mxu0 %v2916_v51  ;;  %v2997_v51 = vld [vmem:[%s4153_s1 + $0x594] ss:$8 sps:$4 sm:$0xff]  }
  0x38   : > { %1946 = vmatpush1.bf16.msra.mxu1 %v2918_v56  ;;  %v2998_v56 = vld [vmem:[%s4153_s1 + $0x1a0] ss:$8 sps:$4 sm:$0xff]  }
  0x39   : > { %2118 = vmatpush1.bf16.msra.mxu0 %v2919_v57  ;;  %1947 = vmatprep.subr.bf16.mxu1 %v2920_v58  ;;  %v3001_v57 = vld [vmem:[%s4153_s1 + $0x5a0] ss:$8 sps:$4 sm:$0xff]   ;;  %v3006_v58 = vld [vmem:[%s4153_s1 + $0x1b4] ss:$8 sps:$4 sm:$0xff]  }
  0x3a   : > { %2119 = vmatprep.subr.bf16.mxu0 %v2922_v59  ;;  %v3009_v59 = vld [vmem:[%s4153_s1 + $0x5b4] ss:$8 sps:$4 sm:$0xff]  }
  0x3c   : > { %1948 = vmatpush1.bf16.msra.mxu1 %v2924_v60  ;;  %v3004_v60 = vld [vmem:[%s4153_s1 + $0x1b0] ss:$8 sps:$4 sm:$0xff]  }
  0x3d   : > { %2120 = vmatpush1.bf16.msra.mxu0 %v2925_v61  ;;  %1949 = vmatprep.subr.bf16.mxu1 %v2926_v62  ;;  %v3007_v61 = vld [vmem:[%s4153_s1 + $0x5b0] ss:$8 sps:$4 sm:$0xff]   ;;  %v3012_v62 = vld [vmem:[%s4153_s1 + $0x1c4] ss:$8 sps:$4 sm:$0xff]  }
  0x3e   : > { %2121 = vmatprep.subr.bf16.mxu0 %v2928_v63  ;;  %v3015_v63 = vld [vmem:[%s4153_s1 + $0x5c4] ss:$8 sps:$4 sm:$0xff]  }
  0x40   : > { %1950 = vmatpush1.bf16.msra.mxu1 %v2930_v0  ;;  %v3010_v0 = vld [vmem:[%s4153_s1 + $0x1c0] ss:$8 sps:$4 sm:$0xff]  }
  0x41   : > { %2122 = vmatpush1.bf16.msra.mxu0 %v2931_v1  ;;  %1951 = vmatprep.subr.bf16.mxu1 %v2932_v2  ;;  %v3013_v1 = vld [vmem:[%s4153_s1 + $0x5c0] ss:$8 sps:$4 sm:$0xff]   ;;  %v3018_v2 = vld [vmem:[%s4153_s1 + $0x1d4] ss:$8 sps:$4 sm:$0xff]  }
  0x42   : > { %2123 = vmatprep.subr.bf16.mxu0 %v2934_v3  ;;  %v3021_v3 = vld [vmem:[%s4153_s1 + $0x5d4] ss:$8 sps:$4 sm:$0xff]  }
  0x44   : > { %1952 = vmatpush1.bf16.msra.mxu1 %v2936_v4  ;;  %v3016_v4 = vld [vmem:[%s4153_s1 + $0x1d0] ss:$8 sps:$4 sm:$0xff]  }
  0x45   : > { %2124 = vmatpush1.bf16.msra.mxu0 %v2937_v5  ;;  %1964 = vmatprep.subr.bf16.mxu1 %v2940_v6  ;;  %v3019_v5 = vld [vmem:[%s4153_s1 + $0x5d0] ss:$8 sps:$4 sm:$0xff]   ;;  %v3024_v6 = vld [vmem:[%s4153_s1 + $0x1e4] ss:$8 sps:$4 sm:$0xff]  }
  0x46   : > { %2136 = vmatprep.subr.bf16.mxu0 %v2943_v7  ;;  %v3027_v7 = vld [vmem:[%s4153_s1 + $0x5e4] ss:$8 sps:$4 sm:$0xff]  }
  0x47   : > { %1954 = vmatmul.mubr.bf16.vlgmr.msra.gmra.mrb[0].mxu1 %v2510_v8  ;;  %v3022_v8 = vld [vmem:[%s4153_s1 + $0x1e0] ss:$8 sps:$4 sm:$0xff]  }
  0x48   : > { %2126 = vmatmul.mubr.bf16.vlgmr.msra.gmra.mrb[0].mxu0 %v2518_v10  ;;  %1965 = vmatpush1.bf16.msra.mxu1 %v2938_v9  ;;  %v3025_v9 = vld [vmem:[%s4153_s1 + $0x5e0] ss:$8 sps:$4 sm:$0xff]   ;;  %v3030_v10 = vld [vmem:[%s4153_s1 + $0x1f4] ss:$8 sps:$4 sm:$0xff]  }
  0x49   : > { %2137 = vmatpush1.bf16.msra.mxu0 %v2941_v11  ;;  %1966 = vmatprep.subr.bf16.mxu1 %v2946_v12  ;;  %v3033_v11 = vld [vmem:[%s4153_s1 + $0x5f4] ss:$8 sps:$4 sm:$0xff]   ;;  %v3028_v12 = vld [vmem:[%s4153_s1 + $0x1f0] ss:$8 sps:$4 sm:$0xff]  }
  0x4a   : > { %2138 = vmatprep.subr.bf16.mxu0 %v2949_v13  ;;  %1996 = vmatprep.mubr.bf16.mxu1 %v2513_v40  ;;  %v3031_v13 = vld [vmem:[%s4153_s1 + $0x5f0] ss:$8 sps:$4 sm:$0xff]   ;;  %v3058_v40 = vld [vmem:[%s4153_s1 + $0x240] ss:$8 sps:$4 sm:$0xff]  }
  0x4b   : > { %2168 = vmatprep.mubr.bf16.mxu0 %v2521_v43  ;;  %v3069_v43 = vld [vmem:[%s4153_s1 + $0x654] ss:$8 sps:$4 sm:$0xff]  }
  0x4c   : > { %1967 = vmatpush1.bf16.msra.mxu1 %v2944_v14  ;;  %v3036_v14 = vld [vmem:[%s4153_s1 + $0x204] ss:$8 sps:$4 sm:$0xff]  }
  0x4d   : > { %2139 = vmatpush1.bf16.msra.mxu0 %v2947_v15  ;;  %1968 = vmatprep.subr.bf16.mxu1 %v2952_v16  ;;  %v3039_v15 = vld [vmem:[%s4153_s1 + $0x604] ss:$8 sps:$4 sm:$0xff]   ;;  %v2512_v16 = vcombine.low %v3585_v36, %v3588_v37  ;;  %v3052_v36 = vld [vmem:[%s4153_s1 + $0x230] ss:$8 sps:$4 sm:$0xff]  }
  0x4e   : > { %2140 = vmatprep.subr.bf16.mxu0 %v2955_v17  ;;  %v3034_v17 = vld [vmem:[%s4153_s1 + $0x200] ss:$8 sps:$4 sm:$0xff]   ;;  %v3055_v37 = vld [vmem:[%s4153_s1 + $0x630] ss:$8 sps:$4 sm:$0xff]  }
  0x50   : > { %1969 = vmatpush1.bf16.msra.mxu1 %v2950_v18  ;;  %v2520_v18 = vcombine.low %v3599_v41, %v3602_v42  ;;  %v3061_v41 = vld [vmem:[%s4153_s1 + $0x640] ss:$8 sps:$4 sm:$0xff]   ;;  %v3066_v42 = vld [vmem:[%s4153_s1 + $0x254] ss:$8 sps:$4 sm:$0xff]  }
  0x51   : > { %2141 = vmatpush1.bf16.msra.mxu0 %v2953_v19  ;;  %1970 = vmatprep.subr.bf16.mxu1 %v2958_v20  ;;  %v3037_v19 = vld [vmem:[%s4153_s1 + $0x600] ss:$8 sps:$4 sm:$0xff]   ;;  %v3042_v20 = vld [vmem:[%s4153_s1 + $0x214] ss:$8 sps:$4 sm:$0xff]  }
  0x52   : > { %2142 = vmatprep.subr.bf16.mxu0 %v2961_v21  ;;  %v3045_v21 = vld [vmem:[%s4153_s1 + $0x614] ss:$8 sps:$4 sm:$0xff]  }
  0x54   : > { %1971 = vmatpush1.bf16.msra.mxu1 %v2956_v22  ;;  %v3040_v22 = vld [vmem:[%s4153_s1 + $0x210] ss:$8 sps:$4 sm:$0xff]  }
  0x55   : > { %2143 = vmatpush1.bf16.msra.mxu0 %v2959_v23  ;;  %1972 = vmatprep.subr.bf16.mxu1 %v2964_v24  ;;  %v3043_v23 = vld [vmem:[%s4153_s1 + $0x610] ss:$8 sps:$4 sm:$0xff]  }
  0x56   : > { %2144 = vmatprep.subr.bf16.mxu0 %v2967_v25  ;;  %v3737_v24 = vld [vmem:[%s3434_s11 + $0x10] sm:$0xff] }
  0x57   : > { %v3740_v25 = vld [vmem:[%s3434_s11 + $0x50] sm:$0xff] }
  0x58   : > { %1973 = vmatpush1.bf16.msra.mxu1 %v2962_v26  ;;  %v3048_v26 = vld [vmem:[%s4153_s1 + $0x224] ss:$8 sps:$4 sm:$0xff]  }
  0x59   : > { %2145 = vmatpush1.bf16.msra.mxu0 %v2965_v27  ;;  %1974 = vmatprep.subr.bf16.mxu1 %v2970_v28  ;;  %v3051_v27 = vld [vmem:[%s4153_s1 + $0x624] ss:$8 sps:$4 sm:$0xff]   ;;  %v2515_v28 = vcombine.high %v3737_v24, %v3740_v25 }
  0x5a   : > { %2146 = vmatprep.subr.bf16.mxu0 %v2973_v29  ;;  %v3751_v29 = vld [vmem:[%s3434_s11 + $0x30] sm:$0xff] }
  0x5c   : > { %1975 = vmatpush1.bf16.msra.mxu1 %v2968_v30  ;;  %v3754_v30 = vld [vmem:[%s3434_s11 + $0x70] sm:$0xff] }
  0x5d   : > { %2147 = vmatpush1.bf16.msra.mxu0 %v2971_v31  ;;  %1976 = vmatprep.subr.bf16.mxu1 %v2976_v32  ;;  %v2523_v31 = vcombine.high %v3751_v29, %v3754_v30  ;;  %v3046_v32 = vld [vmem:[%s4153_s1 + $0x220] ss:$8 sps:$4 sm:$0xff]  }
  0x5e   : > { %2148 = vmatprep.subr.bf16.mxu0 %v2979_v33  ;;  %v3049_v33 = vld [vmem:[%s4153_s1 + $0x620] ss:$8 sps:$4 sm:$0xff]  }
  0x60   : > { %1977 = vmatpush1.bf16.msra.mxu1 %v2974_v34  ;;  %v3054_v34 = vld [vmem:[%s4153_s1 + $0x234] ss:$8 sps:$4 sm:$0xff]  }
  0x61   : > { %2149 = vmatpush1.bf16.msra.mxu0 %v2977_v35  ;;  %1978 = vmatprep.subr.bf16.mxu1 %v2982_v38  ;;  %v3057_v35 = vld [vmem:[%s4153_s1 + $0x634] ss:$8 sps:$4 sm:$0xff]   ;;  %v3060_v38 = vld [vmem:[%s4153_s1 + $0x244] ss:$8 sps:$4 sm:$0xff]  }
  0x62   : > { %2150 = vmatprep.subr.bf16.mxu0 %v2985_v39  ;;  %v3063_v39 = vld [vmem:[%s4153_s1 + $0x644] ss:$8 sps:$4 sm:$0xff]  }
  0x64   : > { %1979 = vmatpush1.bf16.msra.mxu1 %v2980_v44  ;;  %v3064_v44 = vld [vmem:[%s4153_s1 + $0x250] ss:$8 sps:$4 sm:$0xff]  }
  0x65   : > { %2151 = vmatpush1.bf16.msra.mxu0 %v2983_v45  ;;  %1980 = vmatprep.subr.bf16.mxu1 %v2988_v46  ;;  %v3067_v45 = vld [vmem:[%s4153_s1 + $0x650] ss:$8 sps:$4 sm:$0xff]   ;;  %v3072_v46 = vld [vmem:[%s4153_s1 + $0x264] ss:$8 sps:$4 sm:$0xff]  }
  0x66   : > { %2152 = vmatprep.subr.bf16.mxu0 %v2991_v47  ;;  %v3075_v47 = vld [vmem:[%s4153_s1 + $0x664] ss:$8 sps:$4 sm:$0xff]  }
  0x68   : > { %1981 = vmatpush1.bf16.msra.mxu1 %v2986_v48  ;;  %v3070_v48 = vld [vmem:[%s4153_s1 + $0x260] ss:$8 sps:$4 sm:$0xff]  }
  0x69   : > { %2153 = vmatpush1.bf16.msra.mxu0 %v2989_v49  ;;  %1982 = vmatprep.subr.bf16.mxu1 %v2994_v50  ;;  %v3073_v49 = vld [vmem:[%s4153_s1 + $0x660] ss:$8 sps:$4 sm:$0xff]   ;;  %v3078_v50 = vld [vmem:[%s4153_s1 + $0x274] ss:$8 sps:$4 sm:$0xff]  }
  0x6a   : > { %2154 = vmatprep.subr.bf16.mxu0 %v2997_v51  ;;  %v3081_v51 = vld [vmem:[%s4153_s1 + $0x674] ss:$8 sps:$4 sm:$0xff]  }
  0x6c   : > { %1983 = vmatpush1.bf16.msra.mxu1 %v2992_v52  ;;  %v3076_v52 = vld [vmem:[%s4153_s1 + $0x270] ss:$8 sps:$4 sm:$0xff]  }
  0x6d   : > { %2155 = vmatpush1.bf16.msra.mxu0 %v2995_v53  ;;  %1984 = vmatprep.subr.bf16.mxu1 %v3000_v54  ;;  %v3079_v53 = vld [vmem:[%s4153_s1 + $0x670] ss:$8 sps:$4 sm:$0xff]   ;;  %v3084_v54 = vld [vmem:[%s4153_s1 + $0x284] ss:$8 sps:$4 sm:$0xff]  }
  0x6e   : > { %2156 = vmatprep.subr.bf16.mxu0 %v3003_v55  ;;  %v3087_v55 = vld [vmem:[%s4153_s1 + $0x684] ss:$8 sps:$4 sm:$0xff]  }
  0x70   : > { %1985 = vmatpush1.bf16.msra.mxu1 %v2998_v56  ;;  %v3082_v56 = vld [vmem:[%s4153_s1 + $0x280] ss:$8 sps:$4 sm:$0xff]  }
  0x71   : > { %2157 = vmatpush1.bf16.msra.mxu0 %v3001_v57  ;;  %1986 = vmatprep.subr.bf16.mxu1 %v3006_v58  ;;  %v3085_v57 = vld [vmem:[%s4153_s1 + $0x680] ss:$8 sps:$4 sm:$0xff]   ;;  %v3090_v58 = vld [vmem:[%s4153_s1 + $0x294] ss:$8 sps:$4 sm:$0xff]  }
  0x72   : > { %2158 = vmatprep.subr.bf16.mxu0 %v3009_v59  ;;  %v3093_v59 = vld [vmem:[%s4153_s1 + $0x694] ss:$8 sps:$4 sm:$0xff]  }
  0x74   : > { %1987 = vmatpush1.bf16.msra.mxu1 %v3004_v60  ;;  %v3088_v60 = vld [vmem:[%s4153_s1 + $0x290] ss:$8 sps:$4 sm:$0xff]  }
  0x75   : > { %2159 = vmatpush1.bf16.msra.mxu0 %v3007_v61  ;;  %1988 = vmatprep.subr.bf16.mxu1 %v3012_v62  ;;  %v3091_v61 = vld [vmem:[%s4153_s1 + $0x690] ss:$8 sps:$4 sm:$0xff]   ;;  %v3096_v62 = vld [vmem:[%s4153_s1 + $0x2a4] ss:$8 sps:$4 sm:$0xff]  }
  0x76   : > { %2160 = vmatprep.subr.bf16.mxu0 %v3015_v63  ;;  %v3099_v63 = vld [vmem:[%s4153_s1 + $0x6a4] ss:$8 sps:$4 sm:$0xff]  }
  0x78   : > { %1989 = vmatpush1.bf16.msra.mxu1 %v3010_v0  ;;  %v3094_v0 = vld [vmem:[%s4153_s1 + $0x2a0] ss:$8 sps:$4 sm:$0xff]  }
  0x79   : > { %2161 = vmatpush1.bf16.msra.mxu0 %v3013_v1  ;;  %1990 = vmatprep.subr.bf16.mxu1 %v3018_v2  ;;  %v3097_v1 = vld [vmem:[%s4153_s1 + $0x6a0] ss:$8 sps:$4 sm:$0xff]   ;;  %v3102_v2 = vld [vmem:[%s4153_s1 + $0x2b4] ss:$8 sps:$4 sm:$0xff]  }
  0x7a   : > { %2162 = vmatprep.subr.bf16.mxu0 %v3021_v3  ;;  %v3105_v3 = vld [vmem:[%s4153_s1 + $0x6b4] ss:$8 sps:$4 sm:$0xff]  }
  0x7c   : > { %1991 = vmatpush1.bf16.msra.mxu1 %v3016_v4  ;;  %v3100_v4 = vld [vmem:[%s4153_s1 + $0x2b0] ss:$8 sps:$4 sm:$0xff]  }
  0x7d   : > { %2163 = vmatpush1.bf16.msra.mxu0 %v3019_v5  ;;  %1992 = vmatprep.subr.bf16.mxu1 %v3024_v6  ;;  %v3103_v5 = vld [vmem:[%s4153_s1 + $0x6b0] ss:$8 sps:$4 sm:$0xff]   ;;  %v3108_v6 = vld [vmem:[%s4153_s1 + $0x2c4] ss:$8 sps:$4 sm:$0xff]  }
  0x7e   : > { %2164 = vmatprep.subr.bf16.mxu0 %v3027_v7  ;;  %v3111_v7 = vld [vmem:[%s4153_s1 + $0x6c4] ss:$8 sps:$4 sm:$0xff]  }
  0x80   : > { %1993 = vmatpush1.bf16.msra.mxu1 %v3022_v8  ;;  %v3106_v8 = vld [vmem:[%s4153_s1 + $0x2c0] ss:$8 sps:$4 sm:$0xff]  }
  0x81   : > { %2165 = vmatpush1.bf16.msra.mxu0 %v3025_v9  ;;  %1994 = vmatprep.subr.bf16.mxu1 %v3030_v10  ;;  %v3109_v9 = vld [vmem:[%s4153_s1 + $0x6c0] ss:$8 sps:$4 sm:$0xff]   ;;  %v3114_v10 = vld [vmem:[%s4153_s1 + $0x2d4] ss:$8 sps:$4 sm:$0xff]  }
  0x82   : > { %2166 = vmatprep.subr.bf16.mxu0 %v3033_v11  ;;  %v3117_v11 = vld [vmem:[%s4153_s1 + $0x6d4] ss:$8 sps:$4 sm:$0xff]  }
  0x84   : > { %1995 = vmatpush1.bf16.msra.mxu1 %v3028_v12  ;;  %v3112_v12 = vld [vmem:[%s4153_s1 + $0x2d0] ss:$8 sps:$4 sm:$0xff]  }
  0x85   : > { %2167 = vmatpush1.bf16.msra.mxu0 %v3031_v13  ;;  %2007 = vmatprep.subr.bf16.mxu1 %v3036_v14  ;;  %v3115_v13 = vld [vmem:[%s4153_s1 + $0x6d0] ss:$8 sps:$4 sm:$0xff]   ;;  %v3120_v14 = vld [vmem:[%s4153_s1 + $0x2e4] ss:$8 sps:$4 sm:$0xff]  }
  0x86   : > { %2179 = vmatprep.subr.bf16.mxu0 %v3039_v15  ;;  %v3123_v15 = vld [vmem:[%s4153_s1 + $0x6e4] ss:$8 sps:$4 sm:$0xff]  }
  0x87   : > { %1997 = vmatmul.mubr.bf16.vlgmr.msra.gmra.mrb[0].mxu1 %v2512_v16  ;;  %v3118_v16 = vld [vmem:[%s4153_s1 + $0x2e0] ss:$8 sps:$4 sm:$0xff]  }
  0x88   : > { %2169 = vmatmul.mubr.bf16.vlgmr.msra.gmra.mrb[0].mxu0 %v2520_v18  ;;  %2008 = vmatpush1.bf16.msra.mxu1 %v3034_v17  ;;  %v3121_v17 = vld [vmem:[%s4153_s1 + $0x6e0] ss:$8 sps:$4 sm:$0xff]   ;;  %v3126_v18 = vld [vmem:[%s4153_s1 + $0x2f4] ss:$8 sps:$4 sm:$0xff]  }
  0x89   : > { %2180 = vmatpush1.bf16.msra.mxu0 %v3037_v19  ;;  %2009 = vmatprep.subr.bf16.mxu1 %v3042_v20  ;;  %v3129_v19 = vld [vmem:[%s4153_s1 + $0x6f4] ss:$8 sps:$4 sm:$0xff]   ;;  %v3124_v20 = vld [vmem:[%s4153_s1 + $0x2f0] ss:$8 sps:$4 sm:$0xff]  }
  0x8a   : > { %2181 = vmatprep.subr.bf16.mxu0 %v3045_v21  ;;  %2039 = vmatprep.mubr.bf16.mxu1 %v2515_v28  ;;  %v3127_v21 = vld [vmem:[%s4153_s1 + $0x6f0] ss:$8 sps:$4 sm:$0xff]   ;;  %v2522_v28 = vcombine.low %v3751_v29, %v3754_v30 }
  0x8b   : > { %2211 = vmatprep.mubr.bf16.mxu0 %v2523_v31  ;;  %v3934_v31 = vld [vmem:[%s3434_s11 + $0x58] sm:$0xff] }
  0x8c   : > { %2010 = vmatpush1.bf16.msra.mxu1 %v3040_v22  ;;  %v3132_v22 = vld [vmem:[%s4153_s1 + $0x304] ss:$8 sps:$4 sm:$0xff]  }
  0x8d   : > { %2182 = vmatpush1.bf16.msra.mxu0 %v3043_v23  ;;  %2011 = vmatprep.subr.bf16.mxu1 %v3048_v26  ;;  %v3135_v23 = vld [vmem:[%s4153_s1 + $0x704] ss:$8 sps:$4 sm:$0xff]   ;;  %v3927_v26 = vld [vmem:[%s3434_s11 + $0x18] sm:$0xff] }
  0x8e   : > { %2183 = vmatprep.subr.bf16.mxu0 %v3051_v27  ;;  %v2514_v27 = vcombine.low %v3737_v24, %v3740_v25  ;;  %v3138_v24 = vld [vmem:[%s4153_s1 + $0x314] ss:$8 sps:$4 sm:$0xff]   ;;  %v2517_v29 = vcombine.high %v3927_v26, %v3934_v31 }
  0x8f   : > { %v3141_v25 = vld [vmem:[%s4153_s1 + $0x714] ss:$8 sps:$4 sm:$0xff]  }
  0x90   : > { %2012 = vmatpush1.bf16.msra.mxu1 %v3046_v32  ;;  %v3937_v32 = vld [vmem:[%s3434_s11 + $0x38] sm:$0xff] }
  0x91   : > { %2184 = vmatpush1.bf16.msra.mxu0 %v3049_v33  ;;  %2013 = vmatprep.subr.bf16.mxu1 %v3054_v34  ;;  %v3940_v33 = vld [vmem:[%s3434_s11 + $0x78] sm:$0xff]  ;;  %v3130_v34 = vld [vmem:[%s4153_s1 + $0x300] ss:$8 sps:$4 sm:$0xff]  }
  0x92   : > { %2185 = vmatprep.subr.bf16.mxu0 %v3057_v35  ;;  %v3133_v35 = vld [vmem:[%s4153_s1 + $0x700] ss:$8 sps:$4 sm:$0xff]   ;;  %v2525_v30 = vcombine.high %v3937_v32, %v3940_v33 }
  0x94   : > { %2014 = vmatpush1.bf16.msra.mxu1 %v3052_v36  ;;  %v3136_v36 = vld [vmem:[%s4153_s1 + $0x310] ss:$8 sps:$4 sm:$0xff]  }
  0x95   : > { %2186 = vmatpush1.bf16.msra.mxu0 %v3055_v37  ;;  %2015 = vmatprep.subr.bf16.mxu1 %v3060_v38  ;;  %v3139_v37 = vld [vmem:[%s4153_s1 + $0x710] ss:$8 sps:$4 sm:$0xff]   ;;  %v3144_v38 = vld [vmem:[%s4153_s1 + $0x324] ss:$8 sps:$4 sm:$0xff]  }
  0x96   : > { %2187 = vmatprep.subr.bf16.mxu0 %v3063_v39  ;;  %v3147_v39 = vld [vmem:[%s4153_s1 + $0x724] ss:$8 sps:$4 sm:$0xff]  }
  0x98   : > { %2016 = vmatpush1.bf16.msra.mxu1 %v3058_v40  ;;  %v3142_v40 = vld [vmem:[%s4153_s1 + $0x320] ss:$8 sps:$4 sm:$0xff]  }
  0x99   : > { %2188 = vmatpush1.bf16.msra.mxu0 %v3061_v41  ;;  %2017 = vmatprep.subr.bf16.mxu1 %v3066_v42  ;;  %v3145_v41 = vld [vmem:[%s4153_s1 + $0x720] ss:$8 sps:$4 sm:$0xff]   ;;  %v3150_v42 = vld [vmem:[%s4153_s1 + $0x334] ss:$8 sps:$4 sm:$0xff]  }
  0x9a   : > { %2189 = vmatprep.subr.bf16.mxu0 %v3069_v43  ;;  %v3153_v43 = vld [vmem:[%s4153_s1 + $0x734] ss:$8 sps:$4 sm:$0xff]  }
  0x9c   : > { %2018 = vmatpush1.bf16.msra.mxu1 %v3064_v44  ;;  %v3148_v44 = vld [vmem:[%s4153_s1 + $0x330] ss:$8 sps:$4 sm:$0xff]  }
  0x9d   : > { %2190 = vmatpush1.bf16.msra.mxu0 %v3067_v45  ;;  %2019 = vmatprep.subr.bf16.mxu1 %v3072_v46  ;;  %v3151_v45 = vld [vmem:[%s4153_s1 + $0x730] ss:$8 sps:$4 sm:$0xff]   ;;  %v3156_v46 = vld [vmem:[%s4153_s1 + $0x344] ss:$8 sps:$4 sm:$0xff]  }
  0x9e   : > { %2191 = vmatprep.subr.bf16.mxu0 %v3075_v47  ;;  %v3159_v47 = vld [vmem:[%s4153_s1 + $0x744] ss:$8 sps:$4 sm:$0xff]  }
  0xa0   : > { %2020 = vmatpush1.bf16.msra.mxu1 %v3070_v48  ;;  %v3154_v48 = vld [vmem:[%s4153_s1 + $0x340] ss:$8 sps:$4 sm:$0xff]  }
  0xa1   : > { %2192 = vmatpush1.bf16.msra.mxu0 %v3073_v49  ;;  %2021 = vmatprep.subr.bf16.mxu1 %v3078_v50  ;;  %v3157_v49 = vld [vmem:[%s4153_s1 + $0x740] ss:$8 sps:$4 sm:$0xff]   ;;  %v3162_v50 = vld [vmem:[%s4153_s1 + $0x354] ss:$8 sps:$4 sm:$0xff]  }
  0xa2   : > { %2193 = vmatprep.subr.bf16.mxu0 %v3081_v51  ;;  %v3165_v51 = vld [vmem:[%s4153_s1 + $0x754] ss:$8 sps:$4 sm:$0xff]  }
  0xa4   : > { %2022 = vmatpush1.bf16.msra.mxu1 %v3076_v52  ;;  %v3160_v52 = vld [vmem:[%s4153_s1 + $0x350] ss:$8 sps:$4 sm:$0xff]  }
  0xa5   : > { %2194 = vmatpush1.bf16.msra.mxu0 %v3079_v53  ;;  %2023 = vmatprep.subr.bf16.mxu1 %v3084_v54  ;;  %v3163_v53 = vld [vmem:[%s4153_s1 + $0x750] ss:$8 sps:$4 sm:$0xff]   ;;  %v3168_v54 = vld [vmem:[%s4153_s1 + $0x364] ss:$8 sps:$4 sm:$0xff]  }
  0xa6   : > { %2195 = vmatprep.subr.bf16.mxu0 %v3087_v55  ;;  %v3171_v55 = vld [vmem:[%s4153_s1 + $0x764] ss:$8 sps:$4 sm:$0xff]  }
  0xa8   : > { %2024 = vmatpush1.bf16.msra.mxu1 %v3082_v56  ;;  %v3166_v56 = vld [vmem:[%s4153_s1 + $0x360] ss:$8 sps:$4 sm:$0xff]  }
  0xa9   : > { %2196 = vmatpush1.bf16.msra.mxu0 %v3085_v57  ;;  %2025 = vmatprep.subr.bf16.mxu1 %v3090_v58  ;;  %v3169_v57 = vld [vmem:[%s4153_s1 + $0x760] ss:$8 sps:$4 sm:$0xff]   ;;  %v3174_v58 = vld [vmem:[%s4153_s1 + $0x374] ss:$8 sps:$4 sm:$0xff]  }
  0xaa   : > { %2197 = vmatprep.subr.bf16.mxu0 %v3093_v59  ;;  %v3177_v59 = vld [vmem:[%s4153_s1 + $0x774] ss:$8 sps:$4 sm:$0xff]  }
  0xac   : > { %2026 = vmatpush1.bf16.msra.mxu1 %v3088_v60  ;;  %v3172_v60 = vld [vmem:[%s4153_s1 + $0x370] ss:$8 sps:$4 sm:$0xff]  }
  0xad   : > { %2198 = vmatpush1.bf16.msra.mxu0 %v3091_v61  ;;  %2027 = vmatprep.subr.bf16.mxu1 %v3096_v62  ;;  %v3175_v61 = vld [vmem:[%s4153_s1 + $0x770] ss:$8 sps:$4 sm:$0xff]   ;;  %v3180_v62 = vld [vmem:[%s4153_s1 + $0x384] ss:$8 sps:$4 sm:$0xff]  }
  0xae   : > { %2199 = vmatprep.subr.bf16.mxu0 %v3099_v63  ;;  %v3183_v63 = vld [vmem:[%s4153_s1 + $0x784] ss:$8 sps:$4 sm:$0xff]  }
  0xb0   : > { %2028 = vmatpush1.bf16.msra.mxu1 %v3094_v0  ;;  %v3178_v0 = vld [vmem:[%s4153_s1 + $0x380] ss:$8 sps:$4 sm:$0xff]  }
  0xb1   : > { %2200 = vmatpush1.bf16.msra.mxu0 %v3097_v1  ;;  %2029 = vmatprep.subr.bf16.mxu1 %v3102_v2  ;;  %v3181_v1 = vld [vmem:[%s4153_s1 + $0x780] ss:$8 sps:$4 sm:$0xff]   ;;  %v3186_v2 = vld [vmem:[%s4153_s1 + $0x394] ss:$8 sps:$4 sm:$0xff]  }
  0xb2   : > { %2201 = vmatprep.subr.bf16.mxu0 %v3105_v3  ;;  %v3189_v3 = vld [vmem:[%s4153_s1 + $0x794] ss:$8 sps:$4 sm:$0xff]  }
  0xb4   : > { %2030 = vmatpush1.bf16.msra.mxu1 %v3100_v4  ;;  %v3184_v4 = vld [vmem:[%s4153_s1 + $0x390] ss:$8 sps:$4 sm:$0xff]  }
  0xb5   : > { %2202 = vmatpush1.bf16.msra.mxu0 %v3103_v5  ;;  %2031 = vmatprep.subr.bf16.mxu1 %v3108_v6  ;;  %v3187_v5 = vld [vmem:[%s4153_s1 + $0x790] ss:$8 sps:$4 sm:$0xff]   ;;  %v3192_v6 = vld [vmem:[%s4153_s1 + $0x3a4] ss:$8 sps:$4 sm:$0xff]  }
  0xb6   : > { %2203 = vmatprep.subr.bf16.mxu0 %v3111_v7  ;;  %v3195_v7 = vld [vmem:[%s4153_s1 + $0x7a4] ss:$8 sps:$4 sm:$0xff]  }
  0xb8   : > { %2032 = vmatpush1.bf16.msra.mxu1 %v3106_v8  ;;  %v3190_v8 = vld [vmem:[%s4153_s1 + $0x3a0] ss:$8 sps:$4 sm:$0xff]  }
  0xb9   : > { %2204 = vmatpush1.bf16.msra.mxu0 %v3109_v9  ;;  %2033 = vmatprep.subr.bf16.mxu1 %v3114_v10  ;;  %v3193_v9 = vld [vmem:[%s4153_s1 + $0x7a0] ss:$8 sps:$4 sm:$0xff]   ;;  %v3198_v10 = vld [vmem:[%s4153_s1 + $0x3b4] ss:$8 sps:$4 sm:$0xff]  }
  0xba   : > { %2205 = vmatprep.subr.bf16.mxu0 %v3117_v11  ;;  %v3201_v11 = vld [vmem:[%s4153_s1 + $0x7b4] ss:$8 sps:$4 sm:$0xff]  }
  0xbc   : > { %2034 = vmatpush1.bf16.msra.mxu1 %v3112_v12  ;;  %v3196_v12 = vld [vmem:[%s4153_s1 + $0x3b0] ss:$8 sps:$4 sm:$0xff]  }
  0xbd   : > { %2206 = vmatpush1.bf16.msra.mxu0 %v3115_v13  ;;  %2035 = vmatprep.subr.bf16.mxu1 %v3120_v14  ;;  %v3199_v13 = vld [vmem:[%s4153_s1 + $0x7b0] ss:$8 sps:$4 sm:$0xff]   ;;  %v3204_v14 = vld [vmem:[%s4153_s1 + $0x3c4] ss:$8 sps:$4 sm:$0xff]  }
  0xbe   : > { %2207 = vmatprep.subr.bf16.mxu0 %v3123_v15  ;;  %v3207_v15 = vld [vmem:[%s4153_s1 + $0x7c4] ss:$8 sps:$4 sm:$0xff]  }
  0xc0   : > { %2036 = vmatpush1.bf16.msra.mxu1 %v3118_v16  ;;  %v3202_v16 = vld [vmem:[%s4153_s1 + $0x3c0] ss:$8 sps:$4 sm:$0xff]  }
  0xc1   : > { %2208 = vmatpush1.bf16.msra.mxu0 %v3121_v17  ;;  %2037 = vmatprep.subr.bf16.mxu1 %v3126_v18  ;;  %v3205_v17 = vld [vmem:[%s4153_s1 + $0x7c0] ss:$8 sps:$4 sm:$0xff]   ;;  %v3210_v18 = vld [vmem:[%s4153_s1 + $0x3d4] ss:$8 sps:$4 sm:$0xff]  }
  0xc2   : > { %2209 = vmatprep.subr.bf16.mxu0 %v3129_v19  ;;  %v3213_v19 = vld [vmem:[%s4153_s1 + $0x7d4] ss:$8 sps:$4 sm:$0xff]  }
  0xc4   : > { %2038 = vmatpush1.bf16.msra.mxu1 %v3124_v20  ;;  %v3208_v20 = vld [vmem:[%s4153_s1 + $0x3d0] ss:$8 sps:$4 sm:$0xff]  }
  0xc5   : > { %2210 = vmatpush1.bf16.msra.mxu0 %v3127_v21  ;;  %2050 = vmatprep.subr.bf16.mxu1 %v3132_v22  ;;  %v3211_v21 = vld [vmem:[%s4153_s1 + $0x7d0] ss:$8 sps:$4 sm:$0xff]   ;;  %v3216_v22 = vld [vmem:[%s4153_s1 + $0x3e4] ss:$8 sps:$4 sm:$0xff]  }
  0xc6   : > { %2222 = vmatprep.subr.bf16.mxu0 %v3135_v23  ;;  %v3219_v23 = vld [vmem:[%s4153_s1 + $0x7e4] ss:$8 sps:$4 sm:$0xff]  }
  0xc7   : > { %2040 = vmatmul.mubr.bf16.vlgmr.msra.gmra.mrb[0].mxu1 %v2514_v27  ;;  %v3214_v27 = vld [vmem:[%s4153_s1 + $0x3e0] ss:$8 sps:$4 sm:$0xff]  }
  0xc8   : > { %2212 = vmatmul.mubr.bf16.vlgmr.msra.gmra.mrb[0].mxu0 %v2522_v28  ;;  %2051 = vmatpush1.bf16.msra.mxu1 %v3130_v34  ;;  %v3217_v28 = vld [vmem:[%s4153_s1 + $0x7e0] ss:$8 sps:$4 sm:$0xff]   ;;  %v3222_v34 = vld [vmem:[%s4153_s1 + $0x3f4] ss:$8 sps:$4 sm:$0xff]  }
  0xc9   : > { %2223 = vmatpush1.bf16.msra.mxu0 %v3133_v35  ;;  %2052 = vmatprep.subr.bf16.mxu1 %v3138_v24  ;;  %v3225_v35 = vld [vmem:[%s4153_s1 + $0x7f4] ss:$8 sps:$4 sm:$0xff]   ;;  %v3220_v24 = vld [vmem:[%s4153_s1 + $0x3f0] ss:$8 sps:$4 sm:$0xff]  }
  0xca   : > { %2224 = vmatprep.subr.bf16.mxu0 %v3141_v25  ;;  %2082 = vmatprep.mubr.bf16.mxu1 %v2517_v29  ;;  %v3223_v25 = vld [vmem:[%s4153_s1 + $0x7f0] ss:$8 sps:$4 sm:$0xff]   ;;  %v2516_v29 = vcombine.low %v3927_v26, %v3934_v31 }
  0xcb   : > { %2254 = vmatprep.mubr.bf16.mxu0 %v2525_v30  ;;  %v2524_v30 = vcombine.low %v3937_v32, %v3940_v33 }
  0xcc   : > { %2053 = vmatpush1.bf16.msra.mxu1 %v3136_v36  ;;  %v2282_v36 = vlaneseq }
  0xcd   : > { %2225 = vmatpush1.bf16.msra.mxu0 %v3139_v37  ;;  %2054 = vmatprep.subr.bf16.mxu1 %v3144_v38 }
  0xce   : > { %2226 = vmatprep.subr.bf16.mxu0 %v3147_v39  ;;  %v2283_v37 = vshrl.u32 %v2282_v36, 7  ;;  %v2280_v39 = vld [vmem:[%s4154_s2] sm:$0x3] }
  0xd0   : > { %2055 = vmatpush1.bf16.msra.mxu1 %v3142_v40  ;;  %v2284_v38 = vsub.s32 0, %v2283_v37  ;;  %v2288_v40 = vsub.s32 1, %v2283_v37 }
  0xd1   : > { %2227 = vmatpush1.bf16.msra.mxu0 %v3145_v41  ;;  %2056 = vmatprep.subr.bf16.mxu1 %v3150_v42 }
  0xd2   : > { %2228 = vmatprep.subr.bf16.mxu0 %v3153_v43  ;;  %v2285_v41 = vrot.slane %v2280_v39, %v2284_v38 }
  0xd4   : > { %2057 = vmatpush1.bf16.msra.mxu1 %v3148_v44  ;;  %v2289_v44 = vrot.slane %v2280_v39, %v2288_v40 }
  0xd5   : > { %2229 = vmatpush1.bf16.msra.mxu0 %v3151_v45  ;;  %2058 = vmatprep.subr.bf16.mxu1 %v3156_v46 }
  0xd6   : > { %2230 = vmatprep.subr.bf16.mxu0 %v3159_v47 }
  0xd8   : > { %2059 = vmatpush1.bf16.msra.mxu1 %v3154_v48 }
  0xd9   : > { %2231 = vmatpush1.bf16.msra.mxu0 %v3157_v49  ;;  %2060 = vmatprep.subr.bf16.mxu1 %v3162_v50 }
  0xda   : > { %2232 = vmatprep.subr.bf16.mxu0 %v3165_v51 }
  0xdc   : > { %2061 = vmatpush1.bf16.msra.mxu1 %v3160_v52 }
  0xdd   : > { %2233 = vmatpush1.bf16.msra.mxu0 %v3163_v53  ;;  %2062 = vmatprep.subr.bf16.mxu1 %v3168_v54 }
  0xde   : > { %2234 = vmatprep.subr.bf16.mxu0 %v3171_v55 }
  0xe0   : > { %2063 = vmatpush1.bf16.msra.mxu1 %v3166_v56 }
  0xe1   : > { %2235 = vmatpush1.bf16.msra.mxu0 %v3169_v57  ;;  %2064 = vmatprep.subr.bf16.mxu1 %v3174_v58 }
  0xe2   : > { %2236 = vmatprep.subr.bf16.mxu0 %v3177_v59 }
  0xe4   : > { %2065 = vmatpush1.bf16.msra.mxu1 %v3172_v60 }
  0xe5   : > { %2237 = vmatpush1.bf16.msra.mxu0 %v3175_v61  ;;  %2066 = vmatprep.subr.bf16.mxu1 %v3180_v62 }
  0xe6   : > { %2238 = vmatprep.subr.bf16.mxu0 %v3183_v63 }
  0xe8   : > { %2067 = vmatpush1.bf16.msra.mxu1 %v3178_v0 }
  0xe9   : > { %2239 = vmatpush1.bf16.msra.mxu0 %v3181_v1  ;;  %2068 = vmatprep.subr.bf16.mxu1 %v3186_v2 }
  0xea   : > { %2240 = vmatprep.subr.bf16.mxu0 %v3189_v3 }
  0xec   : > { %2069 = vmatpush1.bf16.msra.mxu1 %v3184_v4 }
  0xed   : > { %2241 = vmatpush1.bf16.msra.mxu0 %v3187_v5  ;;  %2070 = vmatprep.subr.bf16.mxu1 %v3192_v6 }
  0xee   : > { %2242 = vmatprep.subr.bf16.mxu0 %v3195_v7 }
  0xf0   : > { %2071 = vmatpush1.bf16.msra.mxu1 %v3190_v8 }
  0xf1   : > { %2243 = vmatpush1.bf16.msra.mxu0 %v3193_v9  ;;  %2072 = vmatprep.subr.bf16.mxu1 %v3198_v10 }
  0xf2   : > { %2244 = vmatprep.subr.bf16.mxu0 %v3201_v11 }
  0xf4   : > { %2073 = vmatpush1.bf16.msra.mxu1 %v3196_v12 }
  0xf5   : > { %2245 = vmatpush1.bf16.msra.mxu0 %v3199_v13  ;;  %2074 = vmatprep.subr.bf16.mxu1 %v3204_v14 }
  0xf6   : > { %2246 = vmatprep.subr.bf16.mxu0 %v3207_v15 }
  0xf8   : > { %2075 = vmatpush1.bf16.msra.mxu1 %v3202_v16 }
  0xf9   : > { %2247 = vmatpush1.bf16.msra.mxu0 %v3205_v17  ;;  %2076 = vmatprep.subr.bf16.mxu1 %v3210_v18 }
  0xfa   : > { %2248 = vmatprep.subr.bf16.mxu0 %v3213_v19 }
  0xfc   : > { %2077 = vmatpush1.bf16.msra.mxu1 %v3208_v20 }
  0xfd   : > { %2249 = vmatpush1.bf16.msra.mxu0 %v3211_v21  ;;  %2078 = vmatprep.subr.bf16.mxu1 %v3216_v22 }
  0xfe   : > { %2250 = vmatprep.subr.bf16.mxu0 %v3219_v23 }
 0x100   : > { %2079 = vmatpush1.bf16.msra.mxu1 %v3214_v27 }
 0x101   : > { %2251 = vmatpush1.bf16.msra.mxu0 %v3217_v28  ;;  %2080 = vmatprep.subr.bf16.mxu1 %v3222_v34 }
 0x102   : > { %2252 = vmatprep.subr.bf16.mxu0 %v3225_v35 }
 0x104   : > { %2081 = vmatpush1.bf16.msra.mxu1 %v3220_v24 }
 0x105   : > { %2253 = vmatpush1.bf16.msra.mxu0 %v3223_v25 }
 0x107   : > { %2083 = vmatmul.mubr.bf16.vlgmr.msra.gmra.mrb[0].mxu1 %v2516_v29 }
 0x108   : > { %2255 = vmatmul.mubr.bf16.vlgmr.msra.gmra.mrb[0].mxu0 %v2524_v30 }
 0x1da   : > { %v2084_v42 = vpop.f32.mrb[0].mxu1 }
 0x1db   : > { %v2256_v43 = vpop.f32.mrb[0].mxu0  ;;  %v2086_v31 = vpop.f32.mrb[1].mxu1 }
 0x1dc   : > { %v2790_v26 = vadd.f32 %v2256_v43, %v2084_v42  ;;  %v2258_v45 = vpop.f32.mrb[1].mxu0  ;;  %v2088_v33 = vpop.f32.mrb[2].mxu1 }
 0x1dd   : > { %v2791_v32 = vadd.f32 %v2258_v45, %v2086_v31  ;;  %v2260_v46 = vpop.f32.mrb[2].mxu0  ;;  %v2090_v49 = vpop.f32.mrb[3].mxu1 }
 0x1de   : > { %v2292_v47 = vadd.f32 %v2790_v26, %v2285_v41  ;;  %v2792_v48 = vadd.f32 %v2260_v46, %v2088_v33  ;;  %v2262_v50 = vpop.f32.mrb[3].mxu0 }
 0x1df   : > { %v2293_v51 = vadd.f32 %v2791_v32, %v2289_v44  ;;  %v2793_v52 = vadd.f32 %v2262_v50, %v2090_v49 }
 0x1e0   : > { %v2294_v53 = vadd.f32 %v2792_v48, %v2285_v41  ;;  %v2312_v55 = vmul.f32 %v2292_v47, %v2292_v47 }
 0x1e1   : > { %v2295_v54 = vadd.f32 %v2793_v52, %v2289_v44  ;;  %v2313_v58 = vmul.f32 %v2293_v51, %v2293_v51 }
 0x1e2   : > { %v2296_v56 = vadd.f32 %v2294_v53, %v2292_v47  ;;  %v2314_v57 = vmul.f32 %v2294_v53, %v2294_v53 }
 0x1e3   : > { %v2303_v59 = vadd.f32 %v2295_v54, %v2293_v51  ;;  %v2315_v60 = vmul.f32 %v2295_v54, %v2295_v54 }
 0x1e4   : > { %v2297_v61 = vrot.slane %v2296_v56, 4  ;;  %v2316_v62 = vadd.f32 %v2314_v57, %v2312_v55 }
 0x1e5   : > { %v2304_v63 = vrot.slane %v2303_v59, 4  ;;  %v2323_v0 = vadd.f32 %v2315_v60, %v2313_v58 }
 0x1e6   : > { %v2298_v1 = vadd.f32 %v2297_v61, %v2296_v56  ;;  %v2317_v2 = vrot.slane %v2316_v62, 4 }
 0x1e7   : > { %v2305_v3 = vadd.f32 %v2304_v63, %v2303_v59  ;;  %v2324_v4 = vrot.slane %v2323_v0, 4 }
 0x1e8   : > { %v2299_v5 = vrot.slane %v2298_v1, 2  ;;  %v2318_v6 = vadd.f32 %v2317_v2, %v2316_v62 }
 0x1e9   : > { %v2306_v7 = vrot.slane %v2305_v3, 2  ;;  %v2325_v8 = vadd.f32 %v2324_v4, %v2323_v0 }
 0x1ea   : > { %v2300_v9 = vadd.f32 %v2299_v5, %v2298_v1  ;;  %v2319_v10 = vrot.slane %v2318_v6, 2 }
 0x1eb   : > { %v2307_v11 = vadd.f32 %v2306_v7, %v2305_v3  ;;  %v2326_v12 = vrot.slane %v2325_v8, 2 }
 0x1ec   : > { %v2301_v13 = vrot.slane %v2300_v9, 1  ;;  %v2320_v14 = vadd.f32 %v2319_v10, %v2318_v6 }
 0x1ed   : > { %v2308_v15 = vrot.slane %v2307_v11, 1  ;;  %v2327_v16 = vadd.f32 %v2326_v12, %v2325_v8 }
 0x1ee   : > { %v2302_v17 = vadd.f32 %v2301_v13, %v2300_v9  ;;  %v2321_v18 = vrot.slane %v2320_v14, 1 }
 0x1ef   : > { %v2309_v19 = vadd.f32 %v2308_v15, %v2307_v11  ;;  %v2328_v20 = vrot.slane %v2327_v16, 1 }
 0x1f0   : > { %v2310_v21 = vmul.f32 0.0625, %v2302_v17  ;;  %v2322_v22 = vadd.f32 %v2321_v18, %v2320_v14 }
 0x1f1   : > { %v2311_v23 = vmul.f32 0.0625, %v2309_v19  ;;  %v2329_v27 = vadd.f32 %v2328_v20, %v2327_v16 }
 0x1f2   : > { %v2330_v28 = vmul.f32 0.0625, %v2322_v22  ;;  %v2332_v34 = vmul.f32 %v2310_v21, %v2310_v21  ;;  %v2338_v35 = vsub.f32 %v2292_v47, %v2310_v21  ;;  %v2340_v24 = vsub.f32 %v2294_v53, %v2310_v21 }
 0x1f3   : > { %v2331_v25 = vmul.f32 0.0625, %v2329_v27  ;;  %v2333_v29 = vmul.f32 %v2311_v23, %v2311_v23  ;;  %v2339_v30 = vsub.f32 %v2293_v51, %v2311_v23  ;;  %v2341_v36 = vsub.f32 %v2295_v54, %v2311_v23 }
 0x1f4   : > { %v2334_v37 = vsub.f32 %v2330_v28, %v2332_v34 }
 0x1f5   : > { %v2335_v38 = vsub.f32 %v2331_v25, %v2333_v29 }
 0x1f6   : > { %v2336_v39 = vmax.f32 %v2334_v37, 0.0 }
 0x1f7   : > { %v2337_v40 = vmax.f32 %v2335_v38, 0.0 }
 0x1f8   : > { %v2342_v41 = vadd.f32 1e-05, %v2336_v39 }
 0x1f9   : > { %v2343_v42 = vadd.f32 1e-05, %v2337_v40 }
 0x1fa   : > { %3226 = vrsqrt.f32 %v2342_v41 }
 0x1fb   : > { %3228 = vrsqrt.f32 %v2343_v42 }
 0x204   : > { %v3227_v43 = vpop.eup %3226 }
 0x205   : > { %v3229_v44 = vpop.eup %3228  ;;  %v2346_v26 = vmul.f32 %v3227_v43, %v2338_v35  ;;  %v2348_v31 = vmul.f32 %v3227_v43, %v2340_v24 }
 0x206   : > { %v2347_v45 = vmul.f32 %v3229_v44, %v2339_v30  ;;  %v2349_v32 = vmul.f32 %v3229_v44, %v2341_v36 }
 0x207   : > { %vm2350_vm0 = vcmp.ge.f32.partialorder %v2346_v26, 0.0  ;;  %vm2352_vm1 = vcmp.ge.f32.partialorder %v2348_v31, 0.0  ;;  %v2354_v33 = vmul.f32 0.2, %v2346_v26  ;;  %v2356_v46 = vmul.f32 0.2, %v2348_v31 }
 0x208   : > { %vm2351_vm2 = vcmp.ge.f32.partialorder %v2347_v45, 0.0  ;;  %vm2353_vm3 = vcmp.ge.f32.partialorder %v2349_v32, 0.0  ;;  %v2355_v47 = vmul.f32 0.2, %v2347_v45  ;;  %v2357_v48 = vmul.f32 0.2, %v2349_v32 }
 0x209   : > { %v2360_v49 = vsel %vm2352_vm1, %v2348_v31, %v2356_v46  ;;  %v2358_v50 = vsel %vm2350_vm0, %v2346_v26, %v2354_v33 }
 0x20a   : > { %v2359_v51 = vsel %vm2351_vm2, %v2347_v45, %v2355_v47  ;;  %v2361_v52 = vsel %vm2353_vm3, %v2349_v32, %v2357_v48 }
 0x20b   : > { %v2788_v53 = vpack.c.bf16 %v2359_v51, %v2358_v50  ;;  %v2789_v54 = vpack.c.bf16 %v2361_v52, %v2360_v49 }
 0x20d   : > { %2374 = vst [vmem:[%s275_s21] sm:$0xff] %v2788_v53  ;;  %2375 = vst [vmem:[%s275_s21 + $0x8] sm:$0xff] %v2789_v54 }
 0x20e PF: > { %s13_s14 = sadd.s32 1, %s3252_s14   ;;  %s4156_s12 = smov %s3248_s13 }
 0x20f   : > { %p10_p5 = scmp.ge.s32.totalorder %s13_s14, 4   ;;  %s4157_s13 = smov %s4159_s15 }
 0x211   :  { %12 = sbr.rel (!%p10_p5) target bundleno = 2 (0x2), region = 76 }

// kernel: discriminator_forward.8
= control target key start
LH: loop header
LB: loop body
LE: loop exit
PB: predicated region body
PF: predicated region fallthrough
CT: control target
= control target key end

     0   :  { %s10087_s12 = smov 0   ;;  %s10089_s13 = smov 0   ;;  %s11863_s0 = inlined_call_operand.vmem [shape: bf16[2,4,4096], index: 0, kind: input, shape index: {}]   ;;  %s11864_s1 = inlined_call_operand.vmem [shape: bf16[4096,512], index: 1, kind: input, shape index: {}]   ;;  %s11865_s2 = inlined_call_operand.vmem [shape: f32[1,512], index: 2, kind: input, shape index: {}]   ;;  %s11866_s3 = inlined_call_operand.vmem [shape: bf16[2,4,512], index: 3, kind: output, shape index: {}]  }
   0x1   :  { %s10091_s14 = smov 0   ;;  %s10093_s15 = smov 0  }
   0x2   :  { %s10095_s16 = smov 0   ;;  %s10097_s17 = smov 0  }
   0x3   :  { %s10099_s18 = smov 0  }
   0x4 LB: > { %s28_s19 = sadd.s32 1, %s10056_s16  ;;  %s32_s20 = sadd.s32 1, %s10060_s17  ;;  %s10064_s18 = sphi %s10099_s18, %s13_s18   ;;  %s10060_s17 = sphi %s10097_s17, %s11872_s17   ;;  %s10056_s16 = sphi %s10095_s16, %s11871_s16   ;;  %s10052_s15 = sphi %s10093_s15, %s11870_s15   ;;  %s10048_s14 = sphi %s10091_s14, %s11869_s14   ;;  %s10044_s13 = sphi %s10089_s13, %s11868_s13   ;;  %s10040_s12 = sphi %s10087_s12, %s11867_s12  }
   0x5   : > { %p30_p0 = scmp.ge.s32.totalorder %s28_s19, 2  ;;  %s69_s21 = sadd.s32 1, %s10044_s13 }
   0x6   : > { %p76_p1 = scmp.ne.s32.totalorder %s10044_s13, %s10040_s12  ;;  %p77_p2 = scmp.eq.s32.totalorder %s10064_s18, 0 }
   0x7   : > { %s11874_s19 = smov (%p30_p0, %s28_s19), 0  ;;  %s11876_s20 = smov (!%p30_p0, %s32_s20), %s10060_s17 }
   0x8   : > { %s65_s22 = ssub.s32 %s10056_s16, %s11874_s19  ;;  %p78_p3 = por %p77_p2, %p76_p1 }
   0x9   : > { %p34_p4 = scmp.ge.s32.totalorder %s11876_s20, 2  ;;  %p67_p5 = scmp.eq.s32.totalorder %s65_s22, 0 }
   0xa   : > { %p8585_p6 = scmp.ge.s32.totalorder %s10064_s18, 4 }
   0xb   : > { %s11878_s20 = smov (%p34_p4, %s11876_s20), 0 }
   0xc   : > { %s10136_s23 = scalar_select %p67_p5, %s10044_s13, %s69_s21  }
   0xd   : > { %156 = sbr.rel (%p8585_p6) target bundleno = 280 (0x118), region = 16 }
  0x14   : > { %172 = sbr.rel (!%p78_p3) target bundleno = 280 (0x118), region = 24  ;;  %s174_s24 = sand.u32 (%p78_p3), 1, %s10044_s13  }
  0x15   : > { %s9113_s25 = sshll.u32 (%p78_p3), %s10056_s16, 3  ;;  %s8586_s26 = sshll.u32 (%p78_p3), %s174_s24, 12 }
  0x16   : > { %s10144_s29 = scalar_lea.vmem (%p78_p3), %s11864_s1, %s9113_s25  ;;  %s10149_s30 = scalar_lea.vmem (%p78_p3), [#allocation3], %s8586_s26 }
  0x17   : > { %v1235_v0 = vld [vmem:[%s10144_s29] sm:$0xff] (%p78_p3)  ;;  %v1237_v1 = vld [vmem:[%s10144_s29 + $0x10] sm:$0xff] (%p78_p3) }
  0x18   : > { %v1239_v2 = vld [vmem:[%s10144_s29 + $0x20] sm:$0xff] (%p78_p3)  ;;  %1236 = vst [vmem:[%s10149_s30] sm:$0xff] (%p78_p3), %v1235_v0  ;;  %1238 = vst [vmem:[%s10149_s30 + $0x8] sm:$0xff] (%p78_p3), %v1237_v1  ;;  %v1241_v3 = vld [vmem:[%s10144_s29 + $0x30] sm:$0xff] (%p78_p3) }
  0x19   : > { %1240 = vst [vmem:[%s10149_s30 + $0x10] sm:$0xff] (%p78_p3), %v1239_v2  ;;  %v1243_v4 = vld [vmem:[%s10144_s29 + $0x40] sm:$0xff] (%p78_p3)  ;;  %v1245_v5 = vld [vmem:[%s10144_s29 + $0x50] sm:$0xff] (%p78_p3)  ;;  %1242 = vst [vmem:[%s10149_s30 + $0x18] sm:$0xff] (%p78_p3), %v1241_v3 }
  0x1a   : > { %1244 = vst [vmem:[%s10149_s30 + $0x20] sm:$0xff] (%p78_p3), %v1243_v4  ;;  %1246 = vst [vmem:[%s10149_s30 + $0x28] sm:$0xff] (%p78_p3), %v1245_v5  ;;  %v1247_v6 = vld [vmem:[%s10144_s29 + $0x60] sm:$0xff] (%p78_p3)  ;;  %v1249_v7 = vld [vmem:[%s10144_s29 + $0x70] sm:$0xff] (%p78_p3) }
  0x1b   : > { %v1251_v8 = vld [vmem:[%s10144_s29 + $0x80] sm:$0xff]  ;;  %1248 = vst [vmem:[%s10149_s30 + $0x30] sm:$0xff] %v1247_v6  ;;  %1250 = vst [vmem:[%s10149_s30 + $0x38] sm:$0xff] %v1249_v7  ;;  %v1253_v9 = vld [vmem:[%s10144_s29 + $0x90] sm:$0xff] }
  0x1c   : > { %1252 = vst [vmem:[%s10149_s30 + $0x40] sm:$0xff] %v1251_v8  ;;  %v1255_v10 = vld [vmem:[%s10144_s29 + $0xa0] sm:$0xff]  ;;  %v1257_v11 = vld [vmem:[%s10144_s29 + $0xb0] sm:$0xff]  ;;  %1254 = vst [vmem:[%s10149_s30 + $0x48] sm:$0xff] %v1253_v9 }
  0x1d   : > { %1256 = vst [vmem:[%s10149_s30 + $0x50] sm:$0xff] %v1255_v10  ;;  %1258 = vst [vmem:[%s10149_s30 + $0x58] sm:$0xff] %v1257_v11  ;;  %v1259_v12 = vld [vmem:[%s10144_s29 + $0xc0] sm:$0xff]  ;;  %v1261_v13 = vld [vmem:[%s10144_s29 + $0xd0] sm:$0xff] }
  0x1e   : > { %v1263_v14 = vld [vmem:[%s10144_s29 + $0xe0] sm:$0xff]  ;;  %1260 = vst [vmem:[%s10149_s30 + $0x60] sm:$0xff] %v1259_v12  ;;  %1262 = vst [vmem:[%s10149_s30 + $0x68] sm:$0xff] %v1261_v13  ;;  %v1265_v15 = vld [vmem:[%s10144_s29 + $0xf0] sm:$0xff] }
  0x1f   : > { %1264 = vst [vmem:[%s10149_s30 + $0x70] sm:$0xff] %v1263_v14  ;;  %v1267_v16 = vld [vmem:[%s10144_s29 + $0x100] sm:$0xff]  ;;  %v1269_v17 = vld [vmem:[%s10144_s29 + $0x110] sm:$0xff]  ;;  %1266 = vst [vmem:[%s10149_s30 + $0x78] sm:$0xff] %v1265_v15 }
  0x20   : > { %1268 = vst [vmem:[%s10149_s30 + $0x80] sm:$0xff] %v1267_v16  ;;  %1270 = vst [vmem:[%s10149_s30 + $0x88] sm:$0xff] %v1269_v17  ;;  %v1271_v18 = vld [vmem:[%s10144_s29 + $0x120] sm:$0xff]  ;;  %v1273_v19 = vld [vmem:[%s10144_s29 + $0x130] sm:$0xff] }
  0x21   : > { %v1275_v20 = vld [vmem:[%s10144_s29 + $0x140] sm:$0xff]  ;;  %1272 = vst [vmem:[%s10149_s30 + $0x90] sm:$0xff] %v1271_v18  ;;  %1274 = vst [vmem:[%s10149_s30 + $0x98] sm:$0xff] %v1273_v19  ;;  %v1277_v21 = vld [vmem:[%s10144_s29 + $0x150] sm:$0xff] }
  0x22   : > { %1276 = vst [vmem:[%s10149_s30 + $0xa0] sm:$0xff] %v1275_v20  ;;  %v1279_v22 = vld [vmem:[%s10144_s29 + $0x160] sm:$0xff]  ;;  %v1281_v23 = vld [vmem:[%s10144_s29 + $0x170] sm:$0xff]  ;;  %1278 = vst [vmem:[%s10149_s30 + $0xa8] sm:$0xff] %v1277_v21 }
  0x23   : > { %1280 = vst [vmem:[%s10149_s30 + $0xb0] sm:$0xff] %v1279_v22  ;;  %1282 = vst [vmem:[%s10149_s30 + $0xb8] sm:$0xff] %v1281_v23  ;;  %v1283_v24 = vld [vmem:[%s10144_s29 + $0x180] sm:$0xff]  ;;  %v1285_v25 = vld [vmem:[%s10144_s29 + $0x190] sm:$0xff] }
  0x24   : > { %v1287_v26 = vld [vmem:[%s10144_s29 + $0x1a0] sm:$0xff]  ;;  %1284 = vst [vmem:[%s10149_s30 + $0xc0] sm:$0xff] %v1283_v24  ;;  %1286 = vst [vmem:[%s10149_s30 + $0xc8] sm:$0xff] %v1285_v25  ;;  %v1289_v27 = vld [vmem:[%s10144_s29 + $0x1b0] sm:$0xff] }
  0x25   : > { %1288 = vst [vmem:[%s10149_s30 + $0xd0] sm:$0xff] %v1287_v26  ;;  %v1291_v28 = vld [vmem:[%s10144_s29 + $0x1c0] sm:$0xff]  ;;  %v1293_v29 = vld [vmem:[%s10144_s29 + $0x1d0] sm:$0xff]  ;;  %1290 = vst [vmem:[%s10149_s30 + $0xd8] sm:$0xff] %v1289_v27 }
  0x26   : > { %1292 = vst [vmem:[%s10149_s30 + $0xe0] sm:$0xff] %v1291_v28  ;;  %1294 = vst [vmem:[%s10149_s30 + $0xe8] sm:$0xff] %v1293_v29  ;;  %v1295_v30 = vld [vmem:[%s10144_s29 + $0x1e0] sm:$0xff]  ;;  %v1297_v31 = vld [vmem:[%s10144_s29 + $0x1f0] sm:$0xff] }
  0x27   : > { %v1299_v32 = vld [vmem:[%s10144_s29 + $0x200] sm:$0xff]  ;;  %1296 = vst [vmem:[%s10149_s30 + $0xf0] sm:$0xff] %v1295_v30  ;;  %1298 = vst [vmem:[%s10149_s30 + $0xf8] sm:$0xff] %v1297_v31  ;;  %v1301_v33 = vld [vmem:[%s10144_s29 + $0x210] sm:$0xff] }
  0x28   : > { %1300 = vst [vmem:[%s10149_s30 + $0x100] sm:$0xff] %v1299_v32  ;;  %v1303_v34 = vld [vmem:[%s10144_s29 + $0x220] sm:$0xff]  ;;  %v1305_v35 = vld [vmem:[%s10144_s29 + $0x230] sm:$0xff]  ;;  %1302 = vst [vmem:[%s10149_s30 + $0x108] sm:$0xff] %v1301_v33 }
  0x29   : > { %1304 = vst [vmem:[%s10149_s30 + $0x110] sm:$0xff] %v1303_v34  ;;  %1306 = vst [vmem:[%s10149_s30 + $0x118] sm:$0xff] %v1305_v35  ;;  %v1307_v36 = vld [vmem:[%s10144_s29 + $0x240] sm:$0xff]  ;;  %v1309_v37 = vld [vmem:[%s10144_s29 + $0x250] sm:$0xff] }
  0x2a   : > { %v1311_v38 = vld [vmem:[%s10144_s29 + $0x260] sm:$0xff]  ;;  %1308 = vst [vmem:[%s10149_s30 + $0x120] sm:$0xff] %v1307_v36  ;;  %1310 = vst [vmem:[%s10149_s30 + $0x128] sm:$0xff] %v1309_v37  ;;  %v1313_v39 = vld [vmem:[%s10144_s29 + $0x270] sm:$0xff] }
  0x2b   : > { %1312 = vst [vmem:[%s10149_s30 + $0x130] sm:$0xff] %v1311_v38  ;;  %v1315_v40 = vld [vmem:[%s10144_s29 + $0x280] sm:$0xff]  ;;  %v1317_v41 = vld [vmem:[%s10144_s29 + $0x290] sm:$0xff]  ;;  %1314 = vst [vmem:[%s10149_s30 + $0x138] sm:$0xff] %v1313_v39 }
  0x2c   : > { %1316 = vst [vmem:[%s10149_s30 + $0x140] sm:$0xff] %v1315_v40  ;;  %1318 = vst [vmem:[%s10149_s30 + $0x148] sm:$0xff] %v1317_v41  ;;  %v1319_v42 = vld [vmem:[%s10144_s29 + $0x2a0] sm:$0xff]  ;;  %v1321_v43 = vld [vmem:[%s10144_s29 + $0x2b0] sm:$0xff] }
  0x2d   : > { %v1323_v44 = vld [vmem:[%s10144_s29 + $0x2c0] sm:$0xff]  ;;  %1320 = vst [vmem:[%s10149_s30 + $0x150] sm:$0xff] %v1319_v42  ;;  %1322 = vst [vmem:[%s10149_s30 + $0x158] sm:$0xff] %v1321_v43  ;;  %v1325_v45 = vld [vmem:[%s10144_s29 + $0x2d0] sm:$0xff] }
  0x2e   : > { %1324 = vst [vmem:[%s10149_s30 + $0x160] sm:$0xff] %v1323_v44  ;;  %v1327_v46 = vld [vmem:[%s10144_s29 + $0x2e0] sm:$0xff]  ;;  %v1329_v47 = vld [vmem:[%s10144_s29 + $0x2f0] sm:$0xff]  ;;  %1326 = vst [vmem:[%s10149_s30 + $0x168] sm:$0xff] %v1325_v45 }
  0x2f   : > { %1328 = vst [vmem:[%s10149_s30 + $0x170] sm:$0xff] %v1327_v46  ;;  %1330 = vst [vmem:[%s10149_s30 + $0x178] sm:$0xff] %v1329_v47  ;;  %v1331_v48 = vld [vmem:[%s10144_s29 + $0x300] sm:$0xff]  ;;  %v1333_v49 = vld [vmem:[%s10144_s29 + $0x310] sm:$0xff] }
  0x30   : > { %v1335_v50 = vld [vmem:[%s10144_s29 + $0x320] sm:$0xff]  ;;  %1332 = vst [vmem:[%s10149_s30 + $0x180] sm:$0xff] %v1331_v48  ;;  %1334 = vst [vmem:[%s10149_s30 + $0x188] sm:$0xff] %v1333_v49  ;;  %v1337_v51 = vld [vmem:[%s10144_s29 + $0x330] sm:$0xff] }
  0x31   : > { %1336 = vst [vmem:[%s10149_s30 + $0x190] sm:$0xff] %v1335_v50  ;;  %v1339_v52 = vld [vmem:[%s10144_s29 + $0x340] sm:$0xff]  ;;  %v1341_v53 = vld [vmem:[%s10144_s29 + $0x350] sm:$0xff]  ;;  %1338 = vst [vmem:[%s10149_s30 + $0x198] sm:$0xff] %v1337_v51 }
  0x32   : > { %1340 = vst [vmem:[%s10149_s30 + $0x1a0] sm:$0xff] %v1339_v52  ;;  %1342 = vst [vmem:[%s10149_s30 + $0x1a8] sm:$0xff] %v1341_v53  ;;  %v1343_v54 = vld [vmem:[%s10144_s29 + $0x360] sm:$0xff]  ;;  %v1345_v55 = vld [vmem:[%s10144_s29 + $0x370] sm:$0xff] }
  0x33   : > { %v1347_v56 = vld [vmem:[%s10144_s29 + $0x380] sm:$0xff]  ;;  %1344 = vst [vmem:[%s10149_s30 + $0x1b0] sm:$0xff] %v1343_v54  ;;  %1346 = vst [vmem:[%s10149_s30 + $0x1b8] sm:$0xff] %v1345_v55  ;;  %v1349_v57 = vld [vmem:[%s10144_s29 + $0x390] sm:$0xff] }
  0x34   : > { %1348 = vst [vmem:[%s10149_s30 + $0x1c0] sm:$0xff] %v1347_v56  ;;  %v1351_v58 = vld [vmem:[%s10144_s29 + $0x3a0] sm:$0xff]  ;;  %v1353_v59 = vld [vmem:[%s10144_s29 + $0x3b0] sm:$0xff]  ;;  %1350 = vst [vmem:[%s10149_s30 + $0x1c8] sm:$0xff] %v1349_v57 }
  0x35   : > { %1352 = vst [vmem:[%s10149_s30 + $0x1d0] sm:$0xff] %v1351_v58  ;;  %1354 = vst [vmem:[%s10149_s30 + $0x1d8] sm:$0xff] %v1353_v59  ;;  %v1355_v60 = vld [vmem:[%s10144_s29 + $0x3c0] sm:$0xff]  ;;  %v1357_v61 = vld [vmem:[%s10144_s29 + $0x3d0] sm:$0xff] }
  0x36   : > { %v1359_v62 = vld [vmem:[%s10144_s29 + $0x3e0] sm:$0xff]  ;;  %1356 = vst [vmem:[%s10149_s30 + $0x1e0] sm:$0xff] %v1355_v60  ;;  %1358 = vst [vmem:[%s10149_s30 + $0x1e8] sm:$0xff] %v1357_v61  ;;  %v1361_v63 = vld [vmem:[%s10144_s29 + $0x3f0] sm:$0xff] }
  0x37   : > { %1360 = vst [vmem:[%s10149_s30 + $0x1f0] sm:$0xff] %v1359_v62  ;;  %v1363_v0 = vld [vmem:[%s10144_s29 + $0x400] sm:$0xff]  ;;  %v1365_v1 = vld [vmem:[%s10144_s29 + $0x410] sm:$0xff]  ;;  %1362 = vst [vmem:[%s10149_s30 + $0x1f8] sm:$0xff] %v1361_v63 }
  0x38   : > { %1364 = vst [vmem:[%s10149_s30 + $0x200] sm:$0xff] %v1363_v0  ;;  %1366 = vst [vmem:[%s10149_s30 + $0x208] sm:$0xff] %v1365_v1  ;;  %v1367_v2 = vld [vmem:[%s10144_s29 + $0x420] sm:$0xff]  ;;  %v1369_v3 = vld [vmem:[%s10144_s29 + $0x430] sm:$0xff] }
  0x39   : > { %v1371_v4 = vld [vmem:[%s10144_s29 + $0x440] sm:$0xff]  ;;  %1368 = vst [vmem:[%s10149_s30 + $0x210] sm:$0xff] %v1367_v2  ;;  %1370 = vst [vmem:[%s10149_s30 + $0x218] sm:$0xff] %v1369_v3  ;;  %v1373_v5 = vld [vmem:[%s10144_s29 + $0x450] sm:$0xff] }
  0x3a   : > { %1372 = vst [vmem:[%s10149_s30 + $0x220] sm:$0xff] %v1371_v4  ;;  %v1375_v6 = vld [vmem:[%s10144_s29 + $0x460] sm:$0xff]  ;;  %v1377_v7 = vld [vmem:[%s10144_s29 + $0x470] sm:$0xff]  ;;  %1374 = vst [vmem:[%s10149_s30 + $0x228] sm:$0xff] %v1373_v5 }
  0x3b   : > { %1376 = vst [vmem:[%s10149_s30 + $0x230] sm:$0xff] %v1375_v6  ;;  %1378 = vst [vmem:[%s10149_s30 + $0x238] sm:$0xff] %v1377_v7  ;;  %v1379_v8 = vld [vmem:[%s10144_s29 + $0x480] sm:$0xff]  ;;  %v1381_v9 = vld [vmem:[%s10144_s29 + $0x490] sm:$0xff] }
  0x3c   : > { %v1383_v10 = vld [vmem:[%s10144_s29 + $0x4a0] sm:$0xff]  ;;  %1380 = vst [vmem:[%s10149_s30 + $0x240] sm:$0xff] %v1379_v8  ;;  %1382 = vst [vmem:[%s10149_s30 + $0x248] sm:$0xff] %v1381_v9  ;;  %v1385_v11 = vld [vmem:[%s10144_s29 + $0x4b0] sm:$0xff] }
  0x3d   : > { %1384 = vst [vmem:[%s10149_s30 + $0x250] sm:$0xff] %v1383_v10  ;;  %v1387_v12 = vld [vmem:[%s10144_s29 + $0x4c0] sm:$0xff]  ;;  %v1389_v13 = vld [vmem:[%s10144_s29 + $0x4d0] sm:$0xff]  ;;  %1386 = vst [vmem:[%s10149_s30 + $0x258] sm:$0xff] %v1385_v11 }
  0x3e   : > { %1388 = vst [vmem:[%s10149_s30 + $0x260] sm:$0xff] %v1387_v12  ;;  %1390 = vst [vmem:[%s10149_s30 + $0x268] sm:$0xff] %v1389_v13  ;;  %v1391_v14 = vld [vmem:[%s10144_s29 + $0x4e0] sm:$0xff]  ;;  %v1393_v15 = vld [vmem:[%s10144_s29 + $0x4f0] sm:$0xff] }
  0x3f   : > { %v1395_v16 = vld [vmem:[%s10144_s29 + $0x500] sm:$0xff]  ;;  %1392 = vst [vmem:[%s10149_s30 + $0x270] sm:$0xff] %v1391_v14  ;;  %1394 = vst [vmem:[%s10149_s30 + $0x278] sm:$0xff] %v1393_v15  ;;  %v1397_v17 = vld [vmem:[%s10144_s29 + $0x510] sm:$0xff] }
  0x40   : > { %1396 = vst [vmem:[%s10149_s30 + $0x280] sm:$0xff] %v1395_v16  ;;  %v1399_v18 = vld [vmem:[%s10144_s29 + $0x520] sm:$0xff]  ;;  %v1401_v19 = vld [vmem:[%s10144_s29 + $0x530] sm:$0xff]  ;;  %1398 = vst [vmem:[%s10149_s30 + $0x288] sm:$0xff] %v1397_v17 }
  0x41   : > { %1400 = vst [vmem:[%s10149_s30 + $0x290] sm:$0xff] %v1399_v18  ;;  %1402 = vst [vmem:[%s10149_s30 + $0x298] sm:$0xff] %v1401_v19  ;;  %v1403_v20 = vld [vmem:[%s10144_s29 + $0x540] sm:$0xff]  ;;  %v1405_v21 = vld [vmem:[%s10144_s29 + $0x550] sm:$0xff] }
  0x42   : > { %v1407_v22 = vld [vmem:[%s10144_s29 + $0x560] sm:$0xff]  ;;  %1404 = vst [vmem:[%s10149_s30 + $0x2a0] sm:$0xff] %v1403_v20  ;;  %1406 = vst [vmem:[%s10149_s30 + $0x2a8] sm:$0xff] %v1405_v21  ;;  %v1409_v23 = vld [vmem:[%s10144_s29 + $0x570] sm:$0xff] }
  0x43   : > { %1408 = vst [vmem:[%s10149_s30 + $0x2b0] sm:$0xff] %v1407_v22  ;;  %v1411_v24 = vld [vmem:[%s10144_s29 + $0x580] sm:$0xff]  ;;  %v1413_v25 = vld [vmem:[%s10144_s29 + $0x590] sm:$0xff]  ;;  %1410 = vst [vmem:[%s10149_s30 + $0x2b8] sm:$0xff] %v1409_v23 }
  0x44   : > { %1412 = vst [vmem:[%s10149_s30 + $0x2c0] sm:$0xff] %v1411_v24  ;;  %1414 = vst [vmem:[%s10149_s30 + $0x2c8] sm:$0xff] %v1413_v25  ;;  %v1415_v26 = vld [vmem:[%s10144_s29 + $0x5a0] sm:$0xff]  ;;  %v1417_v27 = vld [vmem:[%s10144_s29 + $0x5b0] sm:$0xff] }
  0x45   : > { %v1419_v28 = vld [vmem:[%s10144_s29 + $0x5c0] sm:$0xff]  ;;  %1416 = vst [vmem:[%s10149_s30 + $0x2d0] sm:$0xff] %v1415_v26  ;;  %1418 = vst [vmem:[%s10149_s30 + $0x2d8] sm:$0xff] %v1417_v27  ;;  %v1421_v29 = vld [vmem:[%s10144_s29 + $0x5d0] sm:$0xff] }
  0x46   : > { %1420 = vst [vmem:[%s10149_s30 + $0x2e0] sm:$0xff] %v1419_v28  ;;  %v1423_v30 = vld [vmem:[%s10144_s29 + $0x5e0] sm:$0xff]  ;;  %v1425_v31 = vld [vmem:[%s10144_s29 + $0x5f0] sm:$0xff]  ;;  %1422 = vst [vmem:[%s10149_s30 + $0x2e8] sm:$0xff] %v1421_v29 }
  0x47   : > { %1424 = vst [vmem:[%s10149_s30 + $0x2f0] sm:$0xff] %v1423_v30  ;;  %1426 = vst [vmem:[%s10149_s30 + $0x2f8] sm:$0xff] %v1425_v31  ;;  %v1427_v32 = vld [vmem:[%s10144_s29 + $0x600] sm:$0xff]  ;;  %v1429_v33 = vld [vmem:[%s10144_s29 + $0x610] sm:$0xff] }
  0x48   : > { %v1431_v34 = vld [vmem:[%s10144_s29 + $0x620] sm:$0xff]  ;;  %1428 = vst [vmem:[%s10149_s30 + $0x300] sm:$0xff] %v1427_v32  ;;  %1430 = vst [vmem:[%s10149_s30 + $0x308] sm:$0xff] %v1429_v33  ;;  %v1433_v35 = vld [vmem:[%s10144_s29 + $0x630] sm:$0xff] }
  0x49   : > { %1432 = vst [vmem:[%s10149_s30 + $0x310] sm:$0xff] %v1431_v34  ;;  %v1435_v36 = vld [vmem:[%s10144_s29 + $0x640] sm:$0xff]  ;;  %v1437_v37 = vld [vmem:[%s10144_s29 + $0x650] sm:$0xff]  ;;  %1434 = vst [vmem:[%s10149_s30 + $0x318] sm:$0xff] %v1433_v35 }
  0x4a   : > { %1436 = vst [vmem:[%s10149_s30 + $0x320] sm:$0xff] %v1435_v36  ;;  %1438 = vst [vmem:[%s10149_s30 + $0x328] sm:$0xff] %v1437_v37  ;;  %v1439_v38 = vld [vmem:[%s10144_s29 + $0x660] sm:$0xff]  ;;  %v1441_v39 = vld [vmem:[%s10144_s29 + $0x670] sm:$0xff] }
  0x4b   : > { %v1443_v40 = vld [vmem:[%s10144_s29 + $0x680] sm:$0xff]  ;;  %1440 = vst [vmem:[%s10149_s30 + $0x330] sm:$0xff] %v1439_v38  ;;  %1442 = vst [vmem:[%s10149_s30 + $0x338] sm:$0xff] %v1441_v39  ;;  %v1445_v41 = vld [vmem:[%s10144_s29 + $0x690] sm:$0xff] }
  0x4c   : > { %1444 = vst [vmem:[%s10149_s30 + $0x340] sm:$0xff] %v1443_v40  ;;  %v1447_v42 = vld [vmem:[%s10144_s29 + $0x6a0] sm:$0xff]  ;;  %v1449_v43 = vld [vmem:[%s10144_s29 + $0x6b0] sm:$0xff]  ;;  %1446 = vst [vmem:[%s10149_s30 + $0x348] sm:$0xff] %v1445_v41 }
  0x4d   : > { %1448 = vst [vmem:[%s10149_s30 + $0x350] sm:$0xff] %v1447_v42  ;;  %1450 = vst [vmem:[%s10149_s30 + $0x358] sm:$0xff] %v1449_v43  ;;  %v1451_v44 = vld [vmem:[%s10144_s29 + $0x6c0] sm:$0xff]  ;;  %v1453_v45 = vld [vmem:[%s10144_s29 + $0x6d0] sm:$0xff] }
  0x4e   : > { %v1455_v46 = vld [vmem:[%s10144_s29 + $0x6e0] sm:$0xff]  ;;  %1452 = vst [vmem:[%s10149_s30 + $0x360] sm:$0xff] %v1451_v44  ;;  %1454 = vst [vmem:[%s10149_s30 + $0x368] sm:$0xff] %v1453_v45  ;;  %v1457_v47 = vld [vmem:[%s10144_s29 + $0x6f0] sm:$0xff] }
  0x4f   : > { %1456 = vst [vmem:[%s10149_s30 + $0x370] sm:$0xff] %v1455_v46  ;;  %v1459_v48 = vld [vmem:[%s10144_s29 + $0x700] sm:$0xff]  ;;  %v1461_v49 = vld [vmem:[%s10144_s29 + $0x710] sm:$0xff]  ;;  %1458 = vst [vmem:[%s10149_s30 + $0x378] sm:$0xff] %v1457_v47 }
  0x50   : > { %1460 = vst [vmem:[%s10149_s30 + $0x380] sm:$0xff] %v1459_v48  ;;  %1462 = vst [vmem:[%s10149_s30 + $0x388] sm:$0xff] %v1461_v49  ;;  %v1463_v50 = vld [vmem:[%s10144_s29 + $0x720] sm:$0xff]  ;;  %v1465_v51 = vld [vmem:[%s10144_s29 + $0x730] sm:$0xff] }
  0x51   : > { %v1467_v52 = vld [vmem:[%s10144_s29 + $0x740] sm:$0xff]  ;;  %1464 = vst [vmem:[%s10149_s30 + $0x390] sm:$0xff] %v1463_v50  ;;  %1466 = vst [vmem:[%s10149_s30 + $0x398] sm:$0xff] %v1465_v51  ;;  %v1469_v53 = vld [vmem:[%s10144_s29 + $0x750] sm:$0xff] }
  0x52   : > { %1468 = vst [vmem:[%s10149_s30 + $0x3a0] sm:$0xff] %v1467_v52  ;;  %v1471_v54 = vld [vmem:[%s10144_s29 + $0x760] sm:$0xff]  ;;  %v1473_v55 = vld [vmem:[%s10144_s29 + $0x770] sm:$0xff]  ;;  %1470 = vst [vmem:[%s10149_s30 + $0x3a8] sm:$0xff] %v1469_v53 }
  0x53   : > { %1472 = vst [vmem:[%s10149_s30 + $0x3b0] sm:$0xff] %v1471_v54  ;;  %1474 = vst [vmem:[%s10149_s30 + $0x3b8] sm:$0xff] %v1473_v55  ;;  %v1475_v56 = vld [vmem:[%s10144_s29 + $0x780] sm:$0xff]  ;;  %v1477_v57 = vld [vmem:[%s10144_s29 + $0x790] sm:$0xff] }
  0x54   : > { %v1479_v58 = vld [vmem:[%s10144_s29 + $0x7a0] sm:$0xff]  ;;  %1476 = vst [vmem:[%s10149_s30 + $0x3c0] sm:$0xff] %v1475_v56  ;;  %1478 = vst [vmem:[%s10149_s30 + $0x3c8] sm:$0xff] %v1477_v57  ;;  %v1481_v59 = vld [vmem:[%s10144_s29 + $0x7b0] sm:$0xff] }
  0x55   : > { %1480 = vst [vmem:[%s10149_s30 + $0x3d0] sm:$0xff] %v1479_v58  ;;  %v1483_v60 = vld [vmem:[%s10144_s29 + $0x7c0] sm:$0xff]  ;;  %v1485_v61 = vld [vmem:[%s10144_s29 + $0x7d0] sm:$0xff]  ;;  %1482 = vst [vmem:[%s10149_s30 + $0x3d8] sm:$0xff] %v1481_v59 }
  0x56   : > { %1484 = vst [vmem:[%s10149_s30 + $0x3e0] sm:$0xff] %v1483_v60  ;;  %1486 = vst [vmem:[%s10149_s30 + $0x3e8] sm:$0xff] %v1485_v61  ;;  %v1487_v62 = vld [vmem:[%s10144_s29 + $0x7e0] sm:$0xff]  ;;  %v1489_v63 = vld [vmem:[%s10144_s29 + $0x7f0] sm:$0xff] }
  0x57   : > { %v1491_v0 = vld [vmem:[%s10144_s29 + $0x800] sm:$0xff]  ;;  %1488 = vst [vmem:[%s10149_s30 + $0x3f0] sm:$0xff] %v1487_v62  ;;  %1490 = vst [vmem:[%s10149_s30 + $0x3f8] sm:$0xff] %v1489_v63  ;;  %v1493_v1 = vld [vmem:[%s10144_s29 + $0x810] sm:$0xff] }
  0x58   : > { %1492 = vst [vmem:[%s10149_s30 + $0x400] sm:$0xff] %v1491_v0  ;;  %v1495_v2 = vld [vmem:[%s10144_s29 + $0x820] sm:$0xff]  ;;  %v1497_v3 = vld [vmem:[%s10144_s29 + $0x830] sm:$0xff]  ;;  %1494 = vst [vmem:[%s10149_s30 + $0x408] sm:$0xff] %v1493_v1 }
  0x59   : > { %1496 = vst [vmem:[%s10149_s30 + $0x410] sm:$0xff] %v1495_v2  ;;  %1498 = vst [vmem:[%s10149_s30 + $0x418] sm:$0xff] %v1497_v3  ;;  %v1499_v4 = vld [vmem:[%s10144_s29 + $0x840] sm:$0xff]  ;;  %v1501_v5 = vld [vmem:[%s10144_s29 + $0x850] sm:$0xff] }
  0x5a   : > { %v1503_v6 = vld [vmem:[%s10144_s29 + $0x860] sm:$0xff]  ;;  %1500 = vst [vmem:[%s10149_s30 + $0x420] sm:$0xff] %v1499_v4  ;;  %1502 = vst [vmem:[%s10149_s30 + $0x428] sm:$0xff] %v1501_v5  ;;  %v1505_v7 = vld [vmem:[%s10144_s29 + $0x870] sm:$0xff] }
  0x5b   : > { %1504 = vst [vmem:[%s10149_s30 + $0x430] sm:$0xff] %v1503_v6  ;;  %v1507_v8 = vld [vmem:[%s10144_s29 + $0x880] sm:$0xff]  ;;  %v1509_v9 = vld [vmem:[%s10144_s29 + $0x890] sm:$0xff]  ;;  %1506 = vst [vmem:[%s10149_s30 + $0x438] sm:$0xff] %v1505_v7 }
  0x5c   : > { %1508 = vst [vmem:[%s10149_s30 + $0x440] sm:$0xff] %v1507_v8  ;;  %1510 = vst [vmem:[%s10149_s30 + $0x448] sm:$0xff] %v1509_v9  ;;  %v1511_v10 = vld [vmem:[%s10144_s29 + $0x8a0] sm:$0xff]  ;;  %v1513_v11 = vld [vmem:[%s10144_s29 + $0x8b0] sm:$0xff] }
  0x5d   : > { %v1515_v12 = vld [vmem:[%s10144_s29 + $0x8c0] sm:$0xff]  ;;  %1512 = vst [vmem:[%s10149_s30 + $0x450] sm:$0xff] %v1511_v10  ;;  %1514 = vst [vmem:[%s10149_s30 + $0x458] sm:$0xff] %v1513_v11  ;;  %v1517_v13 = vld [vmem:[%s10144_s29 + $0x8d0] sm:$0xff] }
  0x5e   : > { %1516 = vst [vmem:[%s10149_s30 + $0x460] sm:$0xff] %v1515_v12  ;;  %v1519_v14 = vld [vmem:[%s10144_s29 + $0x8e0] sm:$0xff]  ;;  %v1521_v15 = vld [vmem:[%s10144_s29 + $0x8f0] sm:$0xff]  ;;  %1518 = vst [vmem:[%s10149_s30 + $0x468] sm:$0xff] %v1517_v13 }
  0x5f   : > { %1520 = vst [vmem:[%s10149_s30 + $0x470] sm:$0xff] %v1519_v14  ;;  %1522 = vst [vmem:[%s10149_s30 + $0x478] sm:$0xff] %v1521_v15  ;;  %v1523_v16 = vld [vmem:[%s10144_s29 + $0x900] sm:$0xff]  ;;  %v1525_v17 = vld [vmem:[%s10144_s29 + $0x910] sm:$0xff] }
  0x60   : > { %v1527_v18 = vld [vmem:[%s10144_s29 + $0x920] sm:$0xff]  ;;  %1524 = vst [vmem:[%s10149_s30 + $0x480] sm:$0xff] %v1523_v16  ;;  %1526 = vst [vmem:[%s10149_s30 + $0x488] sm:$0xff] %v1525_v17  ;;  %v1529_v19 = vld [vmem:[%s10144_s29 + $0x930] sm:$0xff] }
  0x61   : > { %1528 = vst [vmem:[%s10149_s30 + $0x490] sm:$0xff] %v1527_v18  ;;  %v1531_v20 = vld [vmem:[%s10144_s29 + $0x940] sm:$0xff]  ;;  %v1533_v21 = vld [vmem:[%s10144_s29 + $0x950] sm:$0xff]  ;;  %1530 = vst [vmem:[%s10149_s30 + $0x498] sm:$0xff] %v1529_v19 }
  0x62   : > { %1532 = vst [vmem:[%s10149_s30 + $0x4a0] sm:$0xff] %v1531_v20  ;;  %1534 = vst [vmem:[%s10149_s30 + $0x4a8] sm:$0xff] %v1533_v21  ;;  %v1535_v22 = vld [vmem:[%s10144_s29 + $0x960] sm:$0xff]  ;;  %v1537_v23 = vld [vmem:[%s10144_s29 + $0x970] sm:$0xff] }
  0x63   : > { %v1539_v24 = vld [vmem:[%s10144_s29 + $0x980] sm:$0xff]  ;;  %1536 = vst [vmem:[%s10149_s30 + $0x4b0] sm:$0xff] %v1535_v22  ;;  %1538 = vst [vmem:[%s10149_s30 + $0x4b8] sm:$0xff] %v1537_v23  ;;  %v1541_v25 = vld [vmem:[%s10144_s29 + $0x990] sm:$0xff] }
  0x64   : > { %1540 = vst [vmem:[%s10149_s30 + $0x4c0] sm:$0xff] %v1539_v24  ;;  %v1543_v26 = vld [vmem:[%s10144_s29 + $0x9a0] sm:$0xff]  ;;  %v1545_v27 = vld [vmem:[%s10144_s29 + $0x9b0] sm:$0xff]  ;;  %1542 = vst [vmem:[%s10149_s30 + $0x4c8] sm:$0xff] %v1541_v25 }
  0x65   : > { %1544 = vst [vmem:[%s10149_s30 + $0x4d0] sm:$0xff] %v1543_v26  ;;  %1546 = vst [vmem:[%s10149_s30 + $0x4d8] sm:$0xff] %v1545_v27  ;;  %v1547_v28 = vld [vmem:[%s10144_s29 + $0x9c0] sm:$0xff]  ;;  %v1549_v29 = vld [vmem:[%s10144_s29 + $0x9d0] sm:$0xff] }
  0x66   : > { %v1551_v30 = vld [vmem:[%s10144_s29 + $0x9e0] sm:$0xff]  ;;  %1548 = vst [vmem:[%s10149_s30 + $0x4e0] sm:$0xff] %v1547_v28  ;;  %1550 = vst [vmem:[%s10149_s30 + $0x4e8] sm:$0xff] %v1549_v29  ;;  %v1553_v31 = vld [vmem:[%s10144_s29 + $0x9f0] sm:$0xff] }
  0x67   : > { %1552 = vst [vmem:[%s10149_s30 + $0x4f0] sm:$0xff] %v1551_v30  ;;  %v1555_v32 = vld [vmem:[%s10144_s29 + $0xa00] sm:$0xff]  ;;  %v1557_v33 = vld [vmem:[%s10144_s29 + $0xa10] sm:$0xff]  ;;  %1554 = vst [vmem:[%s10149_s30 + $0x4f8] sm:$0xff] %v1553_v31 }
  0x68   : > { %1556 = vst [vmem:[%s10149_s30 + $0x500] sm:$0xff] %v1555_v32  ;;  %1558 = vst [vmem:[%s10149_s30 + $0x508] sm:$0xff] %v1557_v33  ;;  %v1559_v34 = vld [vmem:[%s10144_s29 + $0xa20] sm:$0xff]  ;;  %v1561_v35 = vld [vmem:[%s10144_s29 + $0xa30] sm:$0xff] }
  0x69   : > { %v1563_v36 = vld [vmem:[%s10144_s29 + $0xa40] sm:$0xff]  ;;  %1560 = vst [vmem:[%s10149_s30 + $0x510] sm:$0xff] %v1559_v34  ;;  %1562 = vst [vmem:[%s10149_s30 + $0x518] sm:$0xff] %v1561_v35  ;;  %v1565_v37 = vld [vmem:[%s10144_s29 + $0xa50] sm:$0xff] }
  0x6a   : > { %1564 = vst [vmem:[%s10149_s30 + $0x520] sm:$0xff] %v1563_v36  ;;  %v1567_v38 = vld [vmem:[%s10144_s29 + $0xa60] sm:$0xff]  ;;  %v1569_v39 = vld [vmem:[%s10144_s29 + $0xa70] sm:$0xff]  ;;  %1566 = vst [vmem:[%s10149_s30 + $0x528] sm:$0xff] %v1565_v37 }
  0x6b   : > { %1568 = vst [vmem:[%s10149_s30 + $0x530] sm:$0xff] %v1567_v38  ;;  %1570 = vst [vmem:[%s10149_s30 + $0x538] sm:$0xff] %v1569_v39  ;;  %v1571_v40 = vld [vmem:[%s10144_s29 + $0xa80] sm:$0xff]  ;;  %v1573_v41 = vld [vmem:[%s10144_s29 + $0xa90] sm:$0xff] }
  0x6c   : > { %v1575_v42 = vld [vmem:[%s10144_s29 + $0xaa0] sm:$0xff]  ;;  %1572 = vst [vmem:[%s10149_s30 + $0x540] sm:$0xff] %v1571_v40  ;;  %1574 = vst [vmem:[%s10149_s30 + $0x548] sm:$0xff] %v1573_v41  ;;  %v1577_v43 = vld [vmem:[%s10144_s29 + $0xab0] sm:$0xff] }
  0x6d   : > { %1576 = vst [vmem:[%s10149_s30 + $0x550] sm:$0xff] %v1575_v42  ;;  %v1579_v44 = vld [vmem:[%s10144_s29 + $0xac0] sm:$0xff]  ;;  %v1581_v45 = vld [vmem:[%s10144_s29 + $0xad0] sm:$0xff]  ;;  %1578 = vst [vmem:[%s10149_s30 + $0x558] sm:$0xff] %v1577_v43 }
  0x6e   : > { %1580 = vst [vmem:[%s10149_s30 + $0x560] sm:$0xff] %v1579_v44  ;;  %1582 = vst [vmem:[%s10149_s30 + $0x568] sm:$0xff] %v1581_v45  ;;  %v1583_v46 = vld [vmem:[%s10144_s29 + $0xae0] sm:$0xff]  ;;  %v1585_v47 = vld [vmem:[%s10144_s29 + $0xaf0] sm:$0xff] }
  0x6f   : > { %v1587_v48 = vld [vmem:[%s10144_s29 + $0xb00] sm:$0xff]  ;;  %1584 = vst [vmem:[%s10149_s30 + $0x570] sm:$0xff] %v1583_v46  ;;  %1586 = vst [vmem:[%s10149_s30 + $0x578] sm:$0xff] %v1585_v47  ;;  %v1589_v49 = vld [vmem:[%s10144_s29 + $0xb10] sm:$0xff] }
  0x70   : > { %1588 = vst [vmem:[%s10149_s30 + $0x580] sm:$0xff] %v1587_v48  ;;  %v1591_v50 = vld [vmem:[%s10144_s29 + $0xb20] sm:$0xff]  ;;  %v1593_v51 = vld [vmem:[%s10144_s29 + $0xb30] sm:$0xff]  ;;  %1590 = vst [vmem:[%s10149_s30 + $0x588] sm:$0xff] %v1589_v49 }
  0x71   : > { %1592 = vst [vmem:[%s10149_s30 + $0x590] sm:$0xff] %v1591_v50  ;;  %1594 = vst [vmem:[%s10149_s30 + $0x598] sm:$0xff] %v1593_v51  ;;  %v1595_v52 = vld [vmem:[%s10144_s29 + $0xb40] sm:$0xff]  ;;  %v1597_v53 = vld [vmem:[%s10144_s29 + $0xb50] sm:$0xff] }
  0x72   : > { %v1599_v54 = vld [vmem:[%s10144_s29 + $0xb60] sm:$0xff]  ;;  %1596 = vst [vmem:[%s10149_s30 + $0x5a0] sm:$0xff] %v1595_v52  ;;  %1598 = vst [vmem:[%s10149_s30 + $0x5a8] sm:$0xff] %v1597_v53  ;;  %v1601_v55 = vld [vmem:[%s10144_s29 + $0xb70] sm:$0xff] }
  0x73   : > { %1600 = vst [vmem:[%s10149_s30 + $0x5b0] sm:$0xff] %v1599_v54  ;;  %v1603_v56 = vld [vmem:[%s10144_s29 + $0xb80] sm:$0xff]  ;;  %v1605_v57 = vld [vmem:[%s10144_s29 + $0xb90] sm:$0xff]  ;;  %1602 = vst [vmem:[%s10149_s30 + $0x5b8] sm:$0xff] %v1601_v55 }
  0x74   : > { %1604 = vst [vmem:[%s10149_s30 + $0x5c0] sm:$0xff] %v1603_v56  ;;  %1606 = vst [vmem:[%s10149_s30 + $0x5c8] sm:$0xff] %v1605_v57  ;;  %v1607_v58 = vld [vmem:[%s10144_s29 + $0xba0] sm:$0xff]  ;;  %v1609_v59 = vld [vmem:[%s10144_s29 + $0xbb0] sm:$0xff] }
  0x75   : > { %v1611_v60 = vld [vmem:[%s10144_s29 + $0xbc0] sm:$0xff]  ;;  %1608 = vst [vmem:[%s10149_s30 + $0x5d0] sm:$0xff] %v1607_v58  ;;  %1610 = vst [vmem:[%s10149_s30 + $0x5d8] sm:$0xff] %v1609_v59  ;;  %v1613_v61 = vld [vmem:[%s10144_s29 + $0xbd0] sm:$0xff] }
  0x76   : > { %1612 = vst [vmem:[%s10149_s30 + $0x5e0] sm:$0xff] %v1611_v60  ;;  %v1615_v62 = vld [vmem:[%s10144_s29 + $0xbe0] sm:$0xff]  ;;  %v1617_v63 = vld [vmem:[%s10144_s29 + $0xbf0] sm:$0xff]  ;;  %1614 = vst [vmem:[%s10149_s30 + $0x5e8] sm:$0xff] %v1613_v61 }
  0x77   : > { %1616 = vst [vmem:[%s10149_s30 + $0x5f0] sm:$0xff] %v1615_v62  ;;  %1618 = vst [vmem:[%s10149_s30 + $0x5f8] sm:$0xff] %v1617_v63  ;;  %v1619_v0 = vld [vmem:[%s10144_s29 + $0xc00] sm:$0xff]  ;;  %v1621_v1 = vld [vmem:[%s10144_s29 + $0xc10] sm:$0xff] }
  0x78   : > { %v1623_v2 = vld [vmem:[%s10144_s29 + $0xc20] sm:$0xff]  ;;  %1620 = vst [vmem:[%s10149_s30 + $0x600] sm:$0xff] %v1619_v0  ;;  %1622 = vst [vmem:[%s10149_s30 + $0x608] sm:$0xff] %v1621_v1  ;;  %v1625_v3 = vld [vmem:[%s10144_s29 + $0xc30] sm:$0xff] }
  0x79   : > { %1624 = vst [vmem:[%s10149_s30 + $0x610] sm:$0xff] %v1623_v2  ;;  %v1627_v4 = vld [vmem:[%s10144_s29 + $0xc40] sm:$0xff]  ;;  %v1629_v5 = vld [vmem:[%s10144_s29 + $0xc50] sm:$0xff]  ;;  %1626 = vst [vmem:[%s10149_s30 + $0x618] sm:$0xff] %v1625_v3 }
  0x7a   : > { %1628 = vst [vmem:[%s10149_s30 + $0x620] sm:$0xff] %v1627_v4  ;;  %1630 = vst [vmem:[%s10149_s30 + $0x628] sm:$0xff] %v1629_v5  ;;  %v1631_v6 = vld [vmem:[%s10144_s29 + $0xc60] sm:$0xff]  ;;  %v1633_v7 = vld [vmem:[%s10144_s29 + $0xc70] sm:$0xff] }
  0x7b   : > { %v1635_v8 = vld [vmem:[%s10144_s29 + $0xc80] sm:$0xff]  ;;  %1632 = vst [vmem:[%s10149_s30 + $0x630] sm:$0xff] %v1631_v6  ;;  %1634 = vst [vmem:[%s10149_s30 + $0x638] sm:$0xff] %v1633_v7  ;;  %v1637_v9 = vld [vmem:[%s10144_s29 + $0xc90] sm:$0xff] }
  0x7c   : > { %1636 = vst [vmem:[%s10149_s30 + $0x640] sm:$0xff] %v1635_v8  ;;  %v1639_v10 = vld [vmem:[%s10144_s29 + $0xca0] sm:$0xff]  ;;  %v1641_v11 = vld [vmem:[%s10144_s29 + $0xcb0] sm:$0xff]  ;;  %1638 = vst [vmem:[%s10149_s30 + $0x648] sm:$0xff] %v1637_v9 }
  0x7d   : > { %1640 = vst [vmem:[%s10149_s30 + $0x650] sm:$0xff] %v1639_v10  ;;  %1642 = vst [vmem:[%s10149_s30 + $0x658] sm:$0xff] %v1641_v11  ;;  %v1643_v12 = vld [vmem:[%s10144_s29 + $0xcc0] sm:$0xff]  ;;  %v1645_v13 = vld [vmem:[%s10144_s29 + $0xcd0] sm:$0xff] }
  0x7e   : > { %v1647_v14 = vld [vmem:[%s10144_s29 + $0xce0] sm:$0xff]  ;;  %1644 = vst [vmem:[%s10149_s30 + $0x660] sm:$0xff] %v1643_v12  ;;  %1646 = vst [vmem:[%s10149_s30 + $0x668] sm:$0xff] %v1645_v13  ;;  %v1649_v15 = vld [vmem:[%s10144_s29 + $0xcf0] sm:$0xff] }
  0x7f   : > { %1648 = vst [vmem:[%s10149_s30 + $0x670] sm:$0xff] %v1647_v14  ;;  %v1651_v16 = vld [vmem:[%s10144_s29 + $0xd00] sm:$0xff]  ;;  %v1653_v17 = vld [vmem:[%s10144_s29 + $0xd10] sm:$0xff]  ;;  %1650 = vst [vmem:[%s10149_s30 + $0x678] sm:$0xff] %v1649_v15 }
  0x80   : > { %1652 = vst [vmem:[%s10149_s30 + $0x680] sm:$0xff] %v1651_v16  ;;  %1654 = vst [vmem:[%s10149_s30 + $0x688] sm:$0xff] %v1653_v17  ;;  %v1655_v18 = vld [vmem:[%s10144_s29 + $0xd20] sm:$0xff]  ;;  %v1657_v19 = vld [vmem:[%s10144_s29 + $0xd30] sm:$0xff] }
  0x81   : > { %v1659_v20 = vld [vmem:[%s10144_s29 + $0xd40] sm:$0xff]  ;;  %1656 = vst [vmem:[%s10149_s30 + $0x690] sm:$0xff] %v1655_v18  ;;  %1658 = vst [vmem:[%s10149_s30 + $0x698] sm:$0xff] %v1657_v19  ;;  %v1661_v21 = vld [vmem:[%s10144_s29 + $0xd50] sm:$0xff] }
  0x82   : > { %1660 = vst [vmem:[%s10149_s30 + $0x6a0] sm:$0xff] %v1659_v20  ;;  %v1663_v22 = vld [vmem:[%s10144_s29 + $0xd60] sm:$0xff]  ;;  %v1665_v23 = vld [vmem:[%s10144_s29 + $0xd70] sm:$0xff]  ;;  %1662 = vst [vmem:[%s10149_s30 + $0x6a8] sm:$0xff] %v1661_v21 }
  0x83   : > { %1664 = vst [vmem:[%s10149_s30 + $0x6b0] sm:$0xff] %v1663_v22  ;;  %1666 = vst [vmem:[%s10149_s30 + $0x6b8] sm:$0xff] %v1665_v23  ;;  %v1667_v24 = vld [vmem:[%s10144_s29 + $0xd80] sm:$0xff]  ;;  %v1669_v25 = vld [vmem:[%s10144_s29 + $0xd90] sm:$0xff] }
  0x84   : > { %v1671_v26 = vld [vmem:[%s10144_s29 + $0xda0] sm:$0xff]  ;;  %1668 = vst [vmem:[%s10149_s30 + $0x6c0] sm:$0xff] %v1667_v24  ;;  %1670 = vst [vmem:[%s10149_s30 + $0x6c8] sm:$0xff] %v1669_v25  ;;  %v1673_v27 = vld [vmem:[%s10144_s29 + $0xdb0] sm:$0xff] }
  0x85   : > { %1672 = vst [vmem:[%s10149_s30 + $0x6d0] sm:$0xff] %v1671_v26  ;;  %v1675_v28 = vld [vmem:[%s10144_s29 + $0xdc0] sm:$0xff]  ;;  %v1677_v29 = vld [vmem:[%s10144_s29 + $0xdd0] sm:$0xff]  ;;  %1674 = vst [vmem:[%s10149_s30 + $0x6d8] sm:$0xff] %v1673_v27 }
  0x86   : > { %1676 = vst [vmem:[%s10149_s30 + $0x6e0] sm:$0xff] %v1675_v28  ;;  %1678 = vst [vmem:[%s10149_s30 + $0x6e8] sm:$0xff] %v1677_v29  ;;  %v1679_v30 = vld [vmem:[%s10144_s29 + $0xde0] sm:$0xff]  ;;  %v1681_v31 = vld [vmem:[%s10144_s29 + $0xdf0] sm:$0xff] }
  0x87   : > { %v1683_v32 = vld [vmem:[%s10144_s29 + $0xe00] sm:$0xff]  ;;  %1680 = vst [vmem:[%s10149_s30 + $0x6f0] sm:$0xff] %v1679_v30  ;;  %1682 = vst [vmem:[%s10149_s30 + $0x6f8] sm:$0xff] %v1681_v31  ;;  %v1685_v33 = vld [vmem:[%s10144_s29 + $0xe10] sm:$0xff] }
  0x88   : > { %1684 = vst [vmem:[%s10149_s30 + $0x700] sm:$0xff] %v1683_v32  ;;  %v1687_v34 = vld [vmem:[%s10144_s29 + $0xe20] sm:$0xff]  ;;  %v1689_v35 = vld [vmem:[%s10144_s29 + $0xe30] sm:$0xff]  ;;  %1686 = vst [vmem:[%s10149_s30 + $0x708] sm:$0xff] %v1685_v33 }
  0x89   : > { %1688 = vst [vmem:[%s10149_s30 + $0x710] sm:$0xff] %v1687_v34  ;;  %1690 = vst [vmem:[%s10149_s30 + $0x718] sm:$0xff] %v1689_v35  ;;  %v1691_v36 = vld [vmem:[%s10144_s29 + $0xe40] sm:$0xff]  ;;  %v1693_v37 = vld [vmem:[%s10144_s29 + $0xe50] sm:$0xff] }
  0x8a   : > { %v1695_v38 = vld [vmem:[%s10144_s29 + $0xe60] sm:$0xff]  ;;  %1692 = vst [vmem:[%s10149_s30 + $0x720] sm:$0xff] %v1691_v36  ;;  %1694 = vst [vmem:[%s10149_s30 + $0x728] sm:$0xff] %v1693_v37  ;;  %v1697_v39 = vld [vmem:[%s10144_s29 + $0xe70] sm:$0xff] }
  0x8b   : > { %1696 = vst [vmem:[%s10149_s30 + $0x730] sm:$0xff] %v1695_v38  ;;  %v1699_v40 = vld [vmem:[%s10144_s29 + $0xe80] sm:$0xff]  ;;  %v1701_v41 = vld [vmem:[%s10144_s29 + $0xe90] sm:$0xff]  ;;  %1698 = vst [vmem:[%s10149_s30 + $0x738] sm:$0xff] %v1697_v39 }
  0x8c   : > { %1700 = vst [vmem:[%s10149_s30 + $0x740] sm:$0xff] %v1699_v40  ;;  %1702 = vst [vmem:[%s10149_s30 + $0x748] sm:$0xff] %v1701_v41  ;;  %v1703_v42 = vld [vmem:[%s10144_s29 + $0xea0] sm:$0xff]  ;;  %v1705_v43 = vld [vmem:[%s10144_s29 + $0xeb0] sm:$0xff] }
  0x8d   : > { %v1707_v44 = vld [vmem:[%s10144_s29 + $0xec0] sm:$0xff]  ;;  %1704 = vst [vmem:[%s10149_s30 + $0x750] sm:$0xff] %v1703_v42  ;;  %1706 = vst [vmem:[%s10149_s30 + $0x758] sm:$0xff] %v1705_v43  ;;  %v1709_v45 = vld [vmem:[%s10144_s29 + $0xed0] sm:$0xff] }
  0x8e   : > { %1708 = vst [vmem:[%s10149_s30 + $0x760] sm:$0xff] %v1707_v44  ;;  %v1711_v46 = vld [vmem:[%s10144_s29 + $0xee0] sm:$0xff]  ;;  %v1713_v47 = vld [vmem:[%s10144_s29 + $0xef0] sm:$0xff]  ;;  %1710 = vst [vmem:[%s10149_s30 + $0x768] sm:$0xff] %v1709_v45 }
  0x8f   : > { %1712 = vst [vmem:[%s10149_s30 + $0x770] sm:$0xff] %v1711_v46  ;;  %1714 = vst [vmem:[%s10149_s30 + $0x778] sm:$0xff] %v1713_v47  ;;  %v1715_v48 = vld [vmem:[%s10144_s29 + $0xf00] sm:$0xff]  ;;  %v1717_v49 = vld [vmem:[%s10144_s29 + $0xf10] sm:$0xff] }
  0x90   : > { %v1719_v50 = vld [vmem:[%s10144_s29 + $0xf20] sm:$0xff]  ;;  %1716 = vst [vmem:[%s10149_s30 + $0x780] sm:$0xff] %v1715_v48  ;;  %1718 = vst [vmem:[%s10149_s30 + $0x788] sm:$0xff] %v1717_v49  ;;  %v1721_v51 = vld [vmem:[%s10144_s29 + $0xf30] sm:$0xff] }
  0x91   : > { %1720 = vst [vmem:[%s10149_s30 + $0x790] sm:$0xff] %v1719_v50  ;;  %v1723_v52 = vld [vmem:[%s10144_s29 + $0xf40] sm:$0xff]  ;;  %v1725_v53 = vld [vmem:[%s10144_s29 + $0xf50] sm:$0xff]  ;;  %1722 = vst [vmem:[%s10149_s30 + $0x798] sm:$0xff] %v1721_v51 }
  0x92   : > { %1724 = vst [vmem:[%s10149_s30 + $0x7a0] sm:$0xff] %v1723_v52  ;;  %1726 = vst [vmem:[%s10149_s30 + $0x7a8] sm:$0xff] %v1725_v53  ;;  %v1727_v54 = vld [vmem:[%s10144_s29 + $0xf60] sm:$0xff]  ;;  %v1729_v55 = vld [vmem:[%s10144_s29 + $0xf70] sm:$0xff] }
  0x93   : > { %v1731_v56 = vld [vmem:[%s10144_s29 + $0xf80] sm:$0xff]  ;;  %1728 = vst [vmem:[%s10149_s30 + $0x7b0] sm:$0xff] %v1727_v54  ;;  %1730 = vst [vmem:[%s10149_s30 + $0x7b8] sm:$0xff] %v1729_v55  ;;  %v1733_v57 = vld [vmem:[%s10144_s29 + $0xf90] sm:$0xff] }
  0x94   : > { %1732 = vst [vmem:[%s10149_s30 + $0x7c0] sm:$0xff] %v1731_v56  ;;  %v1735_v58 = vld [vmem:[%s10144_s29 + $0xfa0] sm:$0xff]  ;;  %v1737_v59 = vld [vmem:[%s10144_s29 + $0xfb0] sm:$0xff]  ;;  %1734 = vst [vmem:[%s10149_s30 + $0x7c8] sm:$0xff] %v1733_v57 }
  0x95   : > { %1736 = vst [vmem:[%s10149_s30 + $0x7d0] sm:$0xff] %v1735_v58  ;;  %1738 = vst [vmem:[%s10149_s30 + $0x7d8] sm:$0xff] %v1737_v59  ;;  %v1739_v60 = vld [vmem:[%s10144_s29 + $0xfc0] sm:$0xff]  ;;  %v1741_v61 = vld [vmem:[%s10144_s29 + $0xfd0] sm:$0xff] }
  0x96   : > { %v1743_v62 = vld [vmem:[%s10144_s29 + $0xfe0] sm:$0xff]  ;;  %1740 = vst [vmem:[%s10149_s30 + $0x7e0] sm:$0xff] %v1739_v60  ;;  %1742 = vst [vmem:[%s10149_s30 + $0x7e8] sm:$0xff] %v1741_v61  ;;  %v1745_v63 = vld [vmem:[%s10144_s29 + $0xff0] sm:$0xff] }
  0x97   : > { %1744 = vst [vmem:[%s10149_s30 + $0x7f0] sm:$0xff] %v1743_v62  ;;  %v1747_v0 = vld [vmem:[%s10144_s29 + $0x1000] sm:$0xff]  ;;  %v1749_v1 = vld [vmem:[%s10144_s29 + $0x1010] sm:$0xff]  ;;  %1746 = vst [vmem:[%s10149_s30 + $0x7f8] sm:$0xff] %v1745_v63 }
  0x98   : > { %1748 = vst [vmem:[%s10149_s30 + $0x800] sm:$0xff] %v1747_v0  ;;  %1750 = vst [vmem:[%s10149_s30 + $0x808] sm:$0xff] %v1749_v1  ;;  %v1751_v2 = vld [vmem:[%s10144_s29 + $0x1020] sm:$0xff]  ;;  %v1753_v3 = vld [vmem:[%s10144_s29 + $0x1030] sm:$0xff] }
  0x99   : > { %v1755_v4 = vld [vmem:[%s10144_s29 + $0x1040] sm:$0xff]  ;;  %1752 = vst [vmem:[%s10149_s30 + $0x810] sm:$0xff] %v1751_v2  ;;  %1754 = vst [vmem:[%s10149_s30 + $0x818] sm:$0xff] %v1753_v3  ;;  %v1757_v5 = vld [vmem:[%s10144_s29 + $0x1050] sm:$0xff] }
  0x9a   : > { %1756 = vst [vmem:[%s10149_s30 + $0x820] sm:$0xff] %v1755_v4  ;;  %v1759_v6 = vld [vmem:[%s10144_s29 + $0x1060] sm:$0xff]  ;;  %v1761_v7 = vld [vmem:[%s10144_s29 + $0x1070] sm:$0xff]  ;;  %1758 = vst [vmem:[%s10149_s30 + $0x828] sm:$0xff] %v1757_v5 }
  0x9b   : > { %1760 = vst [vmem:[%s10149_s30 + $0x830] sm:$0xff] %v1759_v6  ;;  %1762 = vst [vmem:[%s10149_s30 + $0x838] sm:$0xff] %v1761_v7  ;;  %v1763_v8 = vld [vmem:[%s10144_s29 + $0x1080] sm:$0xff]  ;;  %v1765_v9 = vld [vmem:[%s10144_s29 + $0x1090] sm:$0xff] }
  0x9c   : > { %v1767_v10 = vld [vmem:[%s10144_s29 + $0x10a0] sm:$0xff]  ;;  %1764 = vst [vmem:[%s10149_s30 + $0x840] sm:$0xff] %v1763_v8  ;;  %1766 = vst [vmem:[%s10149_s30 + $0x848] sm:$0xff] %v1765_v9  ;;  %v1769_v11 = vld [vmem:[%s10144_s29 + $0x10b0] sm:$0xff] }
  0x9d   : > { %1768 = vst [vmem:[%s10149_s30 + $0x850] sm:$0xff] %v1767_v10  ;;  %v1771_v12 = vld [vmem:[%s10144_s29 + $0x10c0] sm:$0xff]  ;;  %v1773_v13 = vld [vmem:[%s10144_s29 + $0x10d0] sm:$0xff]  ;;  %1770 = vst [vmem:[%s10149_s30 + $0x858] sm:$0xff] %v1769_v11 }
  0x9e   : > { %1772 = vst [vmem:[%s10149_s30 + $0x860] sm:$0xff] %v1771_v12  ;;  %1774 = vst [vmem:[%s10149_s30 + $0x868] sm:$0xff] %v1773_v13  ;;  %v1775_v14 = vld [vmem:[%s10144_s29 + $0x10e0] sm:$0xff]  ;;  %v1777_v15 = vld [vmem:[%s10144_s29 + $0x10f0] sm:$0xff] }
  0x9f   : > { %v1779_v16 = vld [vmem:[%s10144_s29 + $0x1100] sm:$0xff]  ;;  %1776 = vst [vmem:[%s10149_s30 + $0x870] sm:$0xff] %v1775_v14  ;;  %1778 = vst [vmem:[%s10149_s30 + $0x878] sm:$0xff] %v1777_v15  ;;  %v1781_v17 = vld [vmem:[%s10144_s29 + $0x1110] sm:$0xff] }
  0xa0   : > { %1780 = vst [vmem:[%s10149_s30 + $0x880] sm:$0xff] %v1779_v16  ;;  %v1783_v18 = vld [vmem:[%s10144_s29 + $0x1120] sm:$0xff]  ;;  %v1785_v19 = vld [vmem:[%s10144_s29 + $0x1130] sm:$0xff]  ;;  %1782 = vst [vmem:[%s10149_s30 + $0x888] sm:$0xff] %v1781_v17 }
  0xa1   : > { %1784 = vst [vmem:[%s10149_s30 + $0x890] sm:$0xff] %v1783_v18  ;;  %1786 = vst [vmem:[%s10149_s30 + $0x898] sm:$0xff] %v1785_v19  ;;  %v1787_v20 = vld [vmem:[%s10144_s29 + $0x1140] sm:$0xff]  ;;  %v1789_v21 = vld [vmem:[%s10144_s29 + $0x1150] sm:$0xff] }
  0xa2   : > { %v1791_v22 = vld [vmem:[%s10144_s29 + $0x1160] sm:$0xff]  ;;  %1788 = vst [vmem:[%s10149_s30 + $0x8a0] sm:$0xff] %v1787_v20  ;;  %1790 = vst [vmem:[%s10149_s30 + $0x8a8] sm:$0xff] %v1789_v21  ;;  %v1793_v23 = vld [vmem:[%s10144_s29 + $0x1170] sm:$0xff] }
  0xa3   : > { %1792 = vst [vmem:[%s10149_s30 + $0x8b0] sm:$0xff] %v1791_v22  ;;  %v1795_v24 = vld [vmem:[%s10144_s29 + $0x1180] sm:$0xff]  ;;  %v1797_v25 = vld [vmem:[%s10144_s29 + $0x1190] sm:$0xff]  ;;  %1794 = vst [vmem:[%s10149_s30 + $0x8b8] sm:$0xff] %v1793_v23 }
  0xa4   : > { %1796 = vst [vmem:[%s10149_s30 + $0x8c0] sm:$0xff] %v1795_v24  ;;  %1798 = vst [vmem:[%s10149_s30 + $0x8c8] sm:$0xff] %v1797_v25  ;;  %v1799_v26 = vld [vmem:[%s10144_s29 + $0x11a0] sm:$0xff]  ;;  %v1801_v27 = vld [vmem:[%s10144_s29 + $0x11b0] sm:$0xff] }
  0xa5   : > { %v1803_v28 = vld [vmem:[%s10144_s29 + $0x11c0] sm:$0xff]  ;;  %1800 = vst [vmem:[%s10149_s30 + $0x8d0] sm:$0xff] %v1799_v26  ;;  %1802 = vst [vmem:[%s10149_s30 + $0x8d8] sm:$0xff] %v1801_v27  ;;  %v1805_v29 = vld [vmem:[%s10144_s29 + $0x11d0] sm:$0xff] }
  0xa6   : > { %1804 = vst [vmem:[%s10149_s30 + $0x8e0] sm:$0xff] %v1803_v28  ;;  %v1807_v30 = vld [vmem:[%s10144_s29 + $0x11e0] sm:$0xff]  ;;  %v1809_v31 = vld [vmem:[%s10144_s29 + $0x11f0] sm:$0xff]  ;;  %1806 = vst [vmem:[%s10149_s30 + $0x8e8] sm:$0xff] %v1805_v29 }
  0xa7   : > { %1808 = vst [vmem:[%s10149_s30 + $0x8f0] sm:$0xff] %v1807_v30  ;;  %1810 = vst [vmem:[%s10149_s30 + $0x8f8] sm:$0xff] %v1809_v31  ;;  %v1811_v32 = vld [vmem:[%s10144_s29 + $0x1200] sm:$0xff]  ;;  %v1813_v33 = vld [vmem:[%s10144_s29 + $0x1210] sm:$0xff] }
  0xa8   : > { %v1815_v34 = vld [vmem:[%s10144_s29 + $0x1220] sm:$0xff]  ;;  %1812 = vst [vmem:[%s10149_s30 + $0x900] sm:$0xff] %v1811_v32  ;;  %1814 = vst [vmem:[%s10149_s30 + $0x908] sm:$0xff] %v1813_v33  ;;  %v1817_v35 = vld [vmem:[%s10144_s29 + $0x1230] sm:$0xff] }
  0xa9   : > { %1816 = vst [vmem:[%s10149_s30 + $0x910] sm:$0xff] %v1815_v34  ;;  %v1819_v36 = vld [vmem:[%s10144_s29 + $0x1240] sm:$0xff]  ;;  %v1821_v37 = vld [vmem:[%s10144_s29 + $0x1250] sm:$0xff]  ;;  %1818 = vst [vmem:[%s10149_s30 + $0x918] sm:$0xff] %v1817_v35 }
  0xaa   : > { %1820 = vst [vmem:[%s10149_s30 + $0x920] sm:$0xff] %v1819_v36  ;;  %1822 = vst [vmem:[%s10149_s30 + $0x928] sm:$0xff] %v1821_v37  ;;  %v1823_v38 = vld [vmem:[%s10144_s29 + $0x1260] sm:$0xff]  ;;  %v1825_v39 = vld [vmem:[%s10144_s29 + $0x1270] sm:$0xff] }
  0xab   : > { %v1827_v40 = vld [vmem:[%s10144_s29 + $0x1280] sm:$0xff]  ;;  %1824 = vst [vmem:[%s10149_s30 + $0x930] sm:$0xff] %v1823_v38  ;;  %1826 = vst [vmem:[%s10149_s30 + $0x938] sm:$0xff] %v1825_v39  ;;  %v1829_v41 = vld [vmem:[%s10144_s29 + $0x1290] sm:$0xff] }
  0xac   : > { %1828 = vst [vmem:[%s10149_s30 + $0x940] sm:$0xff] %v1827_v40  ;;  %v1831_v42 = vld [vmem:[%s10144_s29 + $0x12a0] sm:$0xff]  ;;  %v1833_v43 = vld [vmem:[%s10144_s29 + $0x12b0] sm:$0xff]  ;;  %1830 = vst [vmem:[%s10149_s30 + $0x948] sm:$0xff] %v1829_v41 }
  0xad   : > { %1832 = vst [vmem:[%s10149_s30 + $0x950] sm:$0xff] %v1831_v42  ;;  %1834 = vst [vmem:[%s10149_s30 + $0x958] sm:$0xff] %v1833_v43  ;;  %v1835_v44 = vld [vmem:[%s10144_s29 + $0x12c0] sm:$0xff]  ;;  %v1837_v45 = vld [vmem:[%s10144_s29 + $0x12d0] sm:$0xff] }
  0xae   : > { %v1839_v46 = vld [vmem:[%s10144_s29 + $0x12e0] sm:$0xff]  ;;  %1836 = vst [vmem:[%s10149_s30 + $0x960] sm:$0xff] %v1835_v44  ;;  %1838 = vst [vmem:[%s10149_s30 + $0x968] sm:$0xff] %v1837_v45  ;;  %v1841_v47 = vld [vmem:[%s10144_s29 + $0x12f0] sm:$0xff] }
  0xaf   : > { %1840 = vst [vmem:[%s10149_s30 + $0x970] sm:$0xff] %v1839_v46  ;;  %v1843_v48 = vld [vmem:[%s10144_s29 + $0x1300] sm:$0xff]  ;;  %v1845_v49 = vld [vmem:[%s10144_s29 + $0x1310] sm:$0xff]  ;;  %1842 = vst [vmem:[%s10149_s30 + $0x978] sm:$0xff] %v1841_v47 }
  0xb0   : > { %1844 = vst [vmem:[%s10149_s30 + $0x980] sm:$0xff] %v1843_v48  ;;  %1846 = vst [vmem:[%s10149_s30 + $0x988] sm:$0xff] %v1845_v49  ;;  %v1847_v50 = vld [vmem:[%s10144_s29 + $0x1320] sm:$0xff]  ;;  %v1849_v51 = vld [vmem:[%s10144_s29 + $0x1330] sm:$0xff] }
  0xb1   : > { %v1851_v52 = vld [vmem:[%s10144_s29 + $0x1340] sm:$0xff]  ;;  %1848 = vst [vmem:[%s10149_s30 + $0x990] sm:$0xff] %v1847_v50  ;;  %1850 = vst [vmem:[%s10149_s30 + $0x998] sm:$0xff] %v1849_v51  ;;  %v1853_v53 = vld [vmem:[%s10144_s29 + $0x1350] sm:$0xff] }
  0xb2   : > { %1852 = vst [vmem:[%s10149_s30 + $0x9a0] sm:$0xff] %v1851_v52  ;;  %v1855_v54 = vld [vmem:[%s10144_s29 + $0x1360] sm:$0xff]  ;;  %v1857_v55 = vld [vmem:[%s10144_s29 + $0x1370] sm:$0xff]  ;;  %1854 = vst [vmem:[%s10149_s30 + $0x9a8] sm:$0xff] %v1853_v53 }
  0xb3   : > { %1856 = vst [vmem:[%s10149_s30 + $0x9b0] sm:$0xff] %v1855_v54  ;;  %1858 = vst [vmem:[%s10149_s30 + $0x9b8] sm:$0xff] %v1857_v55  ;;  %v1859_v56 = vld [vmem:[%s10144_s29 + $0x1380] sm:$0xff]  ;;  %v1861_v57 = vld [vmem:[%s10144_s29 + $0x1390] sm:$0xff] }
  0xb4   : > { %v1863_v58 = vld [vmem:[%s10144_s29 + $0x13a0] sm:$0xff]  ;;  %1860 = vst [vmem:[%s10149_s30 + $0x9c0] sm:$0xff] %v1859_v56  ;;  %1862 = vst [vmem:[%s10149_s30 + $0x9c8] sm:$0xff] %v1861_v57  ;;  %v1865_v59 = vld [vmem:[%s10144_s29 + $0x13b0] sm:$0xff] }
  0xb5   : > { %1864 = vst [vmem:[%s10149_s30 + $0x9d0] sm:$0xff] %v1863_v58  ;;  %v1867_v60 = vld [vmem:[%s10144_s29 + $0x13c0] sm:$0xff]  ;;  %v1869_v61 = vld [vmem:[%s10144_s29 + $0x13d0] sm:$0xff]  ;;  %1866 = vst [vmem:[%s10149_s30 + $0x9d8] sm:$0xff] %v1865_v59 }
  0xb6   : > { %1868 = vst [vmem:[%s10149_s30 + $0x9e0] sm:$0xff] %v1867_v60  ;;  %1870 = vst [vmem:[%s10149_s30 + $0x9e8] sm:$0xff] %v1869_v61  ;;  %v1871_v62 = vld [vmem:[%s10144_s29 + $0x13e0] sm:$0xff]  ;;  %v1873_v63 = vld [vmem:[%s10144_s29 + $0x13f0] sm:$0xff] }
  0xb7   : > { %v1875_v0 = vld [vmem:[%s10144_s29 + $0x1400] sm:$0xff]  ;;  %1872 = vst [vmem:[%s10149_s30 + $0x9f0] sm:$0xff] %v1871_v62  ;;  %1874 = vst [vmem:[%s10149_s30 + $0x9f8] sm:$0xff] %v1873_v63  ;;  %v1877_v1 = vld [vmem:[%s10144_s29 + $0x1410] sm:$0xff] }
  0xb8   : > { %1876 = vst [vmem:[%s10149_s30 + $0xa00] sm:$0xff] %v1875_v0  ;;  %v1879_v2 = vld [vmem:[%s10144_s29 + $0x1420] sm:$0xff]  ;;  %v1881_v3 = vld [vmem:[%s10144_s29 + $0x1430] sm:$0xff]  ;;  %1878 = vst [vmem:[%s10149_s30 + $0xa08] sm:$0xff] %v1877_v1 }
  0xb9   : > { %1880 = vst [vmem:[%s10149_s30 + $0xa10] sm:$0xff] %v1879_v2  ;;  %1882 = vst [vmem:[%s10149_s30 + $0xa18] sm:$0xff] %v1881_v3  ;;  %v1883_v4 = vld [vmem:[%s10144_s29 + $0x1440] sm:$0xff]  ;;  %v1885_v5 = vld [vmem:[%s10144_s29 + $0x1450] sm:$0xff] }
  0xba   : > { %v1887_v6 = vld [vmem:[%s10144_s29 + $0x1460] sm:$0xff]  ;;  %1884 = vst [vmem:[%s10149_s30 + $0xa20] sm:$0xff] %v1883_v4  ;;  %1886 = vst [vmem:[%s10149_s30 + $0xa28] sm:$0xff] %v1885_v5  ;;  %v1889_v7 = vld [vmem:[%s10144_s29 + $0x1470] sm:$0xff] }
  0xbb   : > { %1888 = vst [vmem:[%s10149_s30 + $0xa30] sm:$0xff] %v1887_v6  ;;  %v1891_v8 = vld [vmem:[%s10144_s29 + $0x1480] sm:$0xff]  ;;  %v1893_v9 = vld [vmem:[%s10144_s29 + $0x1490] sm:$0xff]  ;;  %1890 = vst [vmem:[%s10149_s30 + $0xa38] sm:$0xff] %v1889_v7 }
  0xbc   : > { %1892 = vst [vmem:[%s10149_s30 + $0xa40] sm:$0xff] %v1891_v8  ;;  %1894 = vst [vmem:[%s10149_s30 + $0xa48] sm:$0xff] %v1893_v9  ;;  %v1895_v10 = vld [vmem:[%s10144_s29 + $0x14a0] sm:$0xff]  ;;  %v1897_v11 = vld [vmem:[%s10144_s29 + $0x14b0] sm:$0xff] }
  0xbd   : > { %v1899_v12 = vld [vmem:[%s10144_s29 + $0x14c0] sm:$0xff]  ;;  %1896 = vst [vmem:[%s10149_s30 + $0xa50] sm:$0xff] %v1895_v10  ;;  %1898 = vst [vmem:[%s10149_s30 + $0xa58] sm:$0xff] %v1897_v11  ;;  %v1901_v13 = vld [vmem:[%s10144_s29 + $0x14d0] sm:$0xff] }
  0xbe   : > { %1900 = vst [vmem:[%s10149_s30 + $0xa60] sm:$0xff] %v1899_v12  ;;  %v1903_v14 = vld [vmem:[%s10144_s29 + $0x14e0] sm:$0xff]  ;;  %v1905_v15 = vld [vmem:[%s10144_s29 + $0x14f0] sm:$0xff]  ;;  %1902 = vst [vmem:[%s10149_s30 + $0xa68] sm:$0xff] %v1901_v13 }
  0xbf   : > { %1904 = vst [vmem:[%s10149_s30 + $0xa70] sm:$0xff] %v1903_v14  ;;  %1906 = vst [vmem:[%s10149_s30 + $0xa78] sm:$0xff] %v1905_v15  ;;  %v1907_v16 = vld [vmem:[%s10144_s29 + $0x1500] sm:$0xff]  ;;  %v1909_v17 = vld [vmem:[%s10144_s29 + $0x1510] sm:$0xff] }
  0xc0   : > { %v1911_v18 = vld [vmem:[%s10144_s29 + $0x1520] sm:$0xff]  ;;  %1908 = vst [vmem:[%s10149_s30 + $0xa80] sm:$0xff] %v1907_v16  ;;  %1910 = vst [vmem:[%s10149_s30 + $0xa88] sm:$0xff] %v1909_v17  ;;  %v1913_v19 = vld [vmem:[%s10144_s29 + $0x1530] sm:$0xff] }
  0xc1   : > { %1912 = vst [vmem:[%s10149_s30 + $0xa90] sm:$0xff] %v1911_v18  ;;  %v1915_v20 = vld [vmem:[%s10144_s29 + $0x1540] sm:$0xff]  ;;  %v1917_v21 = vld [vmem:[%s10144_s29 + $0x1550] sm:$0xff]  ;;  %1914 = vst [vmem:[%s10149_s30 + $0xa98] sm:$0xff] %v1913_v19 }
  0xc2   : > { %1916 = vst [vmem:[%s10149_s30 + $0xaa0] sm:$0xff] %v1915_v20  ;;  %1918 = vst [vmem:[%s10149_s30 + $0xaa8] sm:$0xff] %v1917_v21  ;;  %v1919_v22 = vld [vmem:[%s10144_s29 + $0x1560] sm:$0xff]  ;;  %v1921_v23 = vld [vmem:[%s10144_s29 + $0x1570] sm:$0xff] }
  0xc3   : > { %v1923_v24 = vld [vmem:[%s10144_s29 + $0x1580] sm:$0xff]  ;;  %1920 = vst [vmem:[%s10149_s30 + $0xab0] sm:$0xff] %v1919_v22  ;;  %1922 = vst [vmem:[%s10149_s30 + $0xab8] sm:$0xff] %v1921_v23  ;;  %v1925_v25 = vld [vmem:[%s10144_s29 + $0x1590] sm:$0xff] }
  0xc4   : > { %1924 = vst [vmem:[%s10149_s30 + $0xac0] sm:$0xff] %v1923_v24  ;;  %v1927_v26 = vld [vmem:[%s10144_s29 + $0x15a0] sm:$0xff]  ;;  %v1929_v27 = vld [vmem:[%s10144_s29 + $0x15b0] sm:$0xff]  ;;  %1926 = vst [vmem:[%s10149_s30 + $0xac8] sm:$0xff] %v1925_v25 }
  0xc5   : > { %1928 = vst [vmem:[%s10149_s30 + $0xad0] sm:$0xff] %v1927_v26  ;;  %1930 = vst [vmem:[%s10149_s30 + $0xad8] sm:$0xff] %v1929_v27  ;;  %v1931_v28 = vld [vmem:[%s10144_s29 + $0x15c0] sm:$0xff]  ;;  %v1933_v29 = vld [vmem:[%s10144_s29 + $0x15d0] sm:$0xff] }
  0xc6   : > { %v1935_v30 = vld [vmem:[%s10144_s29 + $0x15e0] sm:$0xff]  ;;  %1932 = vst [vmem:[%s10149_s30 + $0xae0] sm:$0xff] %v1931_v28  ;;  %1934 = vst [vmem:[%s10149_s30 + $0xae8] sm:$0xff] %v1933_v29  ;;  %v1937_v31 = vld [vmem:[%s10144_s29 + $0x15f0] sm:$0xff] }
  0xc7   : > { %1936 = vst [vmem:[%s10149_s30 + $0xaf0] sm:$0xff] %v1935_v30  ;;  %v1939_v32 = vld [vmem:[%s10144_s29 + $0x1600] sm:$0xff]  ;;  %v1941_v33 = vld [vmem:[%s10144_s29 + $0x1610] sm:$0xff]  ;;  %1938 = vst [vmem:[%s10149_s30 + $0xaf8] sm:$0xff] %v1937_v31 }
  0xc8   : > { %1940 = vst [vmem:[%s10149_s30 + $0xb00] sm:$0xff] %v1939_v32  ;;  %1942 = vst [vmem:[%s10149_s30 + $0xb08] sm:$0xff] %v1941_v33  ;;  %v1943_v34 = vld [vmem:[%s10144_s29 + $0x1620] sm:$0xff]  ;;  %v1945_v35 = vld [vmem:[%s10144_s29 + $0x1630] sm:$0xff] }
  0xc9   : > { %v1947_v36 = vld [vmem:[%s10144_s29 + $0x1640] sm:$0xff]  ;;  %1944 = vst [vmem:[%s10149_s30 + $0xb10] sm:$0xff] %v1943_v34  ;;  %1946 = vst [vmem:[%s10149_s30 + $0xb18] sm:$0xff] %v1945_v35  ;;  %v1949_v37 = vld [vmem:[%s10144_s29 + $0x1650] sm:$0xff] }
  0xca   : > { %1948 = vst [vmem:[%s10149_s30 + $0xb20] sm:$0xff] %v1947_v36  ;;  %v1951_v38 = vld [vmem:[%s10144_s29 + $0x1660] sm:$0xff]  ;;  %v1953_v39 = vld [vmem:[%s10144_s29 + $0x1670] sm:$0xff]  ;;  %1950 = vst [vmem:[%s10149_s30 + $0xb28] sm:$0xff] %v1949_v37 }
  0xcb   : > { %1952 = vst [vmem:[%s10149_s30 + $0xb30] sm:$0xff] %v1951_v38  ;;  %1954 = vst [vmem:[%s10149_s30 + $0xb38] sm:$0xff] %v1953_v39  ;;  %v1955_v40 = vld [vmem:[%s10144_s29 + $0x1680] sm:$0xff]  ;;  %v1957_v41 = vld [vmem:[%s10144_s29 + $0x1690] sm:$0xff] }
  0xcc   : > { %v1959_v42 = vld [vmem:[%s10144_s29 + $0x16a0] sm:$0xff]  ;;  %1956 = vst [vmem:[%s10149_s30 + $0xb40] sm:$0xff] %v1955_v40  ;;  %1958 = vst [vmem:[%s10149_s30 + $0xb48] sm:$0xff] %v1957_v41  ;;  %v1961_v43 = vld [vmem:[%s10144_s29 + $0x16b0] sm:$0xff] }
  0xcd   : > { %1960 = vst [vmem:[%s10149_s30 + $0xb50] sm:$0xff] %v1959_v42  ;;  %v1963_v44 = vld [vmem:[%s10144_s29 + $0x16c0] sm:$0xff]  ;;  %v1965_v45 = vld [vmem:[%s10144_s29 + $0x16d0] sm:$0xff]  ;;  %1962 = vst [vmem:[%s10149_s30 + $0xb58] sm:$0xff] %v1961_v43 }
  0xce   : > { %1964 = vst [vmem:[%s10149_s30 + $0xb60] sm:$0xff] %v1963_v44  ;;  %1966 = vst [vmem:[%s10149_s30 + $0xb68] sm:$0xff] %v1965_v45  ;;  %v1967_v46 = vld [vmem:[%s10144_s29 + $0x16e0] sm:$0xff]  ;;  %v1969_v47 = vld [vmem:[%s10144_s29 + $0x16f0] sm:$0xff] }
  0xcf   : > { %v1971_v48 = vld [vmem:[%s10144_s29 + $0x1700] sm:$0xff]  ;;  %1968 = vst [vmem:[%s10149_s30 + $0xb70] sm:$0xff] %v1967_v46  ;;  %1970 = vst [vmem:[%s10149_s30 + $0xb78] sm:$0xff] %v1969_v47  ;;  %v1973_v49 = vld [vmem:[%s10144_s29 + $0x1710] sm:$0xff] }
  0xd0   : > { %1972 = vst [vmem:[%s10149_s30 + $0xb80] sm:$0xff] %v1971_v48  ;;  %v1975_v50 = vld [vmem:[%s10144_s29 + $0x1720] sm:$0xff]  ;;  %v1977_v51 = vld [vmem:[%s10144_s29 + $0x1730] sm:$0xff]  ;;  %1974 = vst [vmem:[%s10149_s30 + $0xb88] sm:$0xff] %v1973_v49 }
  0xd1   : > { %1976 = vst [vmem:[%s10149_s30 + $0xb90] sm:$0xff] %v1975_v50  ;;  %1978 = vst [vmem:[%s10149_s30 + $0xb98] sm:$0xff] %v1977_v51  ;;  %v1979_v52 = vld [vmem:[%s10144_s29 + $0x1740] sm:$0xff]  ;;  %v1981_v53 = vld [vmem:[%s10144_s29 + $0x1750] sm:$0xff] }
  0xd2   : > { %v1983_v54 = vld [vmem:[%s10144_s29 + $0x1760] sm:$0xff]  ;;  %1980 = vst [vmem:[%s10149_s30 + $0xba0] sm:$0xff] %v1979_v52  ;;  %1982 = vst [vmem:[%s10149_s30 + $0xba8] sm:$0xff] %v1981_v53  ;;  %v1985_v55 = vld [vmem:[%s10144_s29 + $0x1770] sm:$0xff] }
  0xd3   : > { %1984 = vst [vmem:[%s10149_s30 + $0xbb0] sm:$0xff] %v1983_v54  ;;  %v1987_v56 = vld [vmem:[%s10144_s29 + $0x1780] sm:$0xff]  ;;  %v1989_v57 = vld [vmem:[%s10144_s29 + $0x1790] sm:$0xff]  ;;  %1986 = vst [vmem:[%s10149_s30 + $0xbb8] sm:$0xff] %v1985_v55 }
  0xd4   : > { %1988 = vst [vmem:[%s10149_s30 + $0xbc0] sm:$0xff] %v1987_v56  ;;  %1990 = vst [vmem:[%s10149_s30 + $0xbc8] sm:$0xff] %v1989_v57  ;;  %v1991_v58 = vld [vmem:[%s10144_s29 + $0x17a0] sm:$0xff]  ;;  %v1993_v59 = vld [vmem:[%s10144_s29 + $0x17b0] sm:$0xff] }
  0xd5   : > { %v1995_v60 = vld [vmem:[%s10144_s29 + $0x17c0] sm:$0xff]  ;;  %1992 = vst [vmem:[%s10149_s30 + $0xbd0] sm:$0xff] %v1991_v58  ;;  %1994 = vst [vmem:[%s10149_s30 + $0xbd8] sm:$0xff] %v1993_v59  ;;  %v1997_v61 = vld [vmem:[%s10144_s29 + $0x17d0] sm:$0xff] }
  0xd6   : > { %1996 = vst [vmem:[%s10149_s30 + $0xbe0] sm:$0xff] %v1995_v60  ;;  %v1999_v62 = vld [vmem:[%s10144_s29 + $0x17e0] sm:$0xff]  ;;  %v2001_v63 = vld [vmem:[%s10144_s29 + $0x17f0] sm:$0xff]  ;;  %1998 = vst [vmem:[%s10149_s30 + $0xbe8] sm:$0xff] %v1997_v61 }
  0xd7   : > { %2000 = vst [vmem:[%s10149_s30 + $0xbf0] sm:$0xff] %v1999_v62  ;;  %2002 = vst [vmem:[%s10149_s30 + $0xbf8] sm:$0xff] %v2001_v63  ;;  %v2003_v0 = vld [vmem:[%s10144_s29 + $0x1800] sm:$0xff]  ;;  %v2005_v1 = vld [vmem:[%s10144_s29 + $0x1810] sm:$0xff] }
  0xd8   : > { %v2007_v2 = vld [vmem:[%s10144_s29 + $0x1820] sm:$0xff]  ;;  %2004 = vst [vmem:[%s10149_s30 + $0xc00] sm:$0xff] %v2003_v0  ;;  %2006 = vst [vmem:[%s10149_s30 + $0xc08] sm:$0xff] %v2005_v1  ;;  %v2009_v3 = vld [vmem:[%s10144_s29 + $0x1830] sm:$0xff] }
  0xd9   : > { %2008 = vst [vmem:[%s10149_s30 + $0xc10] sm:$0xff] %v2007_v2  ;;  %v2011_v4 = vld [vmem:[%s10144_s29 + $0x1840] sm:$0xff]  ;;  %v2013_v5 = vld [vmem:[%s10144_s29 + $0x1850] sm:$0xff]  ;;  %2010 = vst [vmem:[%s10149_s30 + $0xc18] sm:$0xff] %v2009_v3 }
  0xda   : > { %2012 = vst [vmem:[%s10149_s30 + $0xc20] sm:$0xff] %v2011_v4  ;;  %2014 = vst [vmem:[%s10149_s30 + $0xc28] sm:$0xff] %v2013_v5  ;;  %v2015_v6 = vld [vmem:[%s10144_s29 + $0x1860] sm:$0xff]  ;;  %v2017_v7 = vld [vmem:[%s10144_s29 + $0x1870] sm:$0xff] }
  0xdb   : > { %v2019_v8 = vld [vmem:[%s10144_s29 + $0x1880] sm:$0xff]  ;;  %2016 = vst [vmem:[%s10149_s30 + $0xc30] sm:$0xff] %v2015_v6  ;;  %2018 = vst [vmem:[%s10149_s30 + $0xc38] sm:$0xff] %v2017_v7  ;;  %v2021_v9 = vld [vmem:[%s10144_s29 + $0x1890] sm:$0xff] }
  0xdc   : > { %2020 = vst [vmem:[%s10149_s30 + $0xc40] sm:$0xff] %v2019_v8  ;;  %v2023_v10 = vld [vmem:[%s10144_s29 + $0x18a0] sm:$0xff]  ;;  %v2025_v11 = vld [vmem:[%s10144_s29 + $0x18b0] sm:$0xff]  ;;  %2022 = vst [vmem:[%s10149_s30 + $0xc48] sm:$0xff] %v2021_v9 }
  0xdd   : > { %2024 = vst [vmem:[%s10149_s30 + $0xc50] sm:$0xff] %v2023_v10  ;;  %2026 = vst [vmem:[%s10149_s30 + $0xc58] sm:$0xff] %v2025_v11  ;;  %v2027_v12 = vld [vmem:[%s10144_s29 + $0x18c0] sm:$0xff]  ;;  %v2029_v13 = vld [vmem:[%s10144_s29 + $0x18d0] sm:$0xff] }
  0xde   : > { %v2031_v14 = vld [vmem:[%s10144_s29 + $0x18e0] sm:$0xff]  ;;  %2028 = vst [vmem:[%s10149_s30 + $0xc60] sm:$0xff] %v2027_v12  ;;  %2030 = vst [vmem:[%s10149_s30 + $0xc68] sm:$0xff] %v2029_v13  ;;  %v2033_v15 = vld [vmem:[%s10144_s29 + $0x18f0] sm:$0xff] }
  0xdf   : > { %2032 = vst [vmem:[%s10149_s30 + $0xc70] sm:$0xff] %v2031_v14  ;;  %v2035_v16 = vld [vmem:[%s10144_s29 + $0x1900] sm:$0xff]  ;;  %v2037_v17 = vld [vmem:[%s10144_s29 + $0x1910] sm:$0xff]  ;;  %2034 = vst [vmem:[%s10149_s30 + $0xc78] sm:$0xff] %v2033_v15 }
  0xe0   : > { %2036 = vst [vmem:[%s10149_s30 + $0xc80] sm:$0xff] %v2035_v16  ;;  %2038 = vst [vmem:[%s10149_s30 + $0xc88] sm:$0xff] %v2037_v17  ;;  %v2039_v18 = vld [vmem:[%s10144_s29 + $0x1920] sm:$0xff]  ;;  %v2041_v19 = vld [vmem:[%s10144_s29 + $0x1930] sm:$0xff] }
  0xe1   : > { %v2043_v20 = vld [vmem:[%s10144_s29 + $0x1940] sm:$0xff]  ;;  %2040 = vst [vmem:[%s10149_s30 + $0xc90] sm:$0xff] %v2039_v18  ;;  %2042 = vst [vmem:[%s10149_s30 + $0xc98] sm:$0xff] %v2041_v19  ;;  %v2045_v21 = vld [vmem:[%s10144_s29 + $0x1950] sm:$0xff] }
  0xe2   : > { %2044 = vst [vmem:[%s10149_s30 + $0xca0] sm:$0xff] %v2043_v20  ;;  %v2047_v22 = vld [vmem:[%s10144_s29 + $0x1960] sm:$0xff]  ;;  %v2049_v23 = vld [vmem:[%s10144_s29 + $0x1970] sm:$0xff]  ;;  %2046 = vst [vmem:[%s10149_s30 + $0xca8] sm:$0xff] %v2045_v21 }
  0xe3   : > { %2048 = vst [vmem:[%s10149_s30 + $0xcb0] sm:$0xff] %v2047_v22  ;;  %2050 = vst [vmem:[%s10149_s30 + $0xcb8] sm:$0xff] %v2049_v23  ;;  %v2051_v24 = vld [vmem:[%s10144_s29 + $0x1980] sm:$0xff]  ;;  %v2053_v25 = vld [vmem:[%s10144_s29 + $0x1990] sm:$0xff] }
  0xe4   : > { %v2055_v26 = vld [vmem:[%s10144_s29 + $0x19a0] sm:$0xff]  ;;  %2052 = vst [vmem:[%s10149_s30 + $0xcc0] sm:$0xff] %v2051_v24  ;;  %2054 = vst [vmem:[%s10149_s30 + $0xcc8] sm:$0xff] %v2053_v25  ;;  %v2057_v27 = vld [vmem:[%s10144_s29 + $0x19b0] sm:$0xff] }
  0xe5   : > { %2056 = vst [vmem:[%s10149_s30 + $0xcd0] sm:$0xff] %v2055_v26  ;;  %v2059_v28 = vld [vmem:[%s10144_s29 + $0x19c0] sm:$0xff]  ;;  %v2061_v29 = vld [vmem:[%s10144_s29 + $0x19d0] sm:$0xff]  ;;  %2058 = vst [vmem:[%s10149_s30 + $0xcd8] sm:$0xff] %v2057_v27 }
  0xe6   : > { %2060 = vst [vmem:[%s10149_s30 + $0xce0] sm:$0xff] %v2059_v28  ;;  %2062 = vst [vmem:[%s10149_s30 + $0xce8] sm:$0xff] %v2061_v29  ;;  %v2063_v30 = vld [vmem:[%s10144_s29 + $0x19e0] sm:$0xff]  ;;  %v2065_v31 = vld [vmem:[%s10144_s29 + $0x19f0] sm:$0xff] }
  0xe7   : > { %v2067_v32 = vld [vmem:[%s10144_s29 + $0x1a00] sm:$0xff]  ;;  %2064 = vst [vmem:[%s10149_s30 + $0xcf0] sm:$0xff] %v2063_v30  ;;  %2066 = vst [vmem:[%s10149_s30 + $0xcf8] sm:$0xff] %v2065_v31  ;;  %v2069_v33 = vld [vmem:[%s10144_s29 + $0x1a10] sm:$0xff] }
  0xe8   : > { %2068 = vst [vmem:[%s10149_s30 + $0xd00] sm:$0xff] %v2067_v32  ;;  %v2071_v34 = vld [vmem:[%s10144_s29 + $0x1a20] sm:$0xff]  ;;  %v2073_v35 = vld [vmem:[%s10144_s29 + $0x1a30] sm:$0xff]  ;;  %2070 = vst [vmem:[%s10149_s30 + $0xd08] sm:$0xff] %v2069_v33 }
  0xe9   : > { %2072 = vst [vmem:[%s10149_s30 + $0xd10] sm:$0xff] %v2071_v34  ;;  %2074 = vst [vmem:[%s10149_s30 + $0xd18] sm:$0xff] %v2073_v35  ;;  %v2075_v36 = vld [vmem:[%s10144_s29 + $0x1a40] sm:$0xff]  ;;  %v2077_v37 = vld [vmem:[%s10144_s29 + $0x1a50] sm:$0xff] }
  0xea   : > { %v2079_v38 = vld [vmem:[%s10144_s29 + $0x1a60] sm:$0xff]  ;;  %2076 = vst [vmem:[%s10149_s30 + $0xd20] sm:$0xff] %v2075_v36  ;;  %2078 = vst [vmem:[%s10149_s30 + $0xd28] sm:$0xff] %v2077_v37  ;;  %v2081_v39 = vld [vmem:[%s10144_s29 + $0x1a70] sm:$0xff] }
  0xeb   : > { %2080 = vst [vmem:[%s10149_s30 + $0xd30] sm:$0xff] %v2079_v38  ;;  %v2083_v40 = vld [vmem:[%s10144_s29 + $0x1a80] sm:$0xff]  ;;  %v2085_v41 = vld [vmem:[%s10144_s29 + $0x1a90] sm:$0xff]  ;;  %2082 = vst [vmem:[%s10149_s30 + $0xd38] sm:$0xff] %v2081_v39 }
  0xec   : > { %2084 = vst [vmem:[%s10149_s30 + $0xd40] sm:$0xff] %v2083_v40  ;;  %2086 = vst [vmem:[%s10149_s30 + $0xd48] sm:$0xff] %v2085_v41  ;;  %v2087_v42 = vld [vmem:[%s10144_s29 + $0x1aa0] sm:$0xff]  ;;  %v2089_v43 = vld [vmem:[%s10144_s29 + $0x1ab0] sm:$0xff] }
  0xed   : > { %v2091_v44 = vld [vmem:[%s10144_s29 + $0x1ac0] sm:$0xff]  ;;  %2088 = vst [vmem:[%s10149_s30 + $0xd50] sm:$0xff] %v2087_v42  ;;  %2090 = vst [vmem:[%s10149_s30 + $0xd58] sm:$0xff] %v2089_v43  ;;  %v2093_v45 = vld [vmem:[%s10144_s29 + $0x1ad0] sm:$0xff] }
  0xee   : > { %2092 = vst [vmem:[%s10149_s30 + $0xd60] sm:$0xff] %v2091_v44  ;;  %v2095_v46 = vld [vmem:[%s10144_s29 + $0x1ae0] sm:$0xff]  ;;  %v2097_v47 = vld [vmem:[%s10144_s29 + $0x1af0] sm:$0xff]  ;;  %2094 = vst [vmem:[%s10149_s30 + $0xd68] sm:$0xff] %v2093_v45 }
  0xef   : > { %2096 = vst [vmem:[%s10149_s30 + $0xd70] sm:$0xff] %v2095_v46  ;;  %2098 = vst [vmem:[%s10149_s30 + $0xd78] sm:$0xff] %v2097_v47  ;;  %v2099_v48 = vld [vmem:[%s10144_s29 + $0x1b00] sm:$0xff]  ;;  %v2101_v49 = vld [vmem:[%s10144_s29 + $0x1b10] sm:$0xff] }
  0xf0   : > { %v2103_v50 = vld [vmem:[%s10144_s29 + $0x1b20] sm:$0xff]  ;;  %2100 = vst [vmem:[%s10149_s30 + $0xd80] sm:$0xff] %v2099_v48  ;;  %2102 = vst [vmem:[%s10149_s30 + $0xd88] sm:$0xff] %v2101_v49  ;;  %v2105_v51 = vld [vmem:[%s10144_s29 + $0x1b30] sm:$0xff] }
  0xf1   : > { %2104 = vst [vmem:[%s10149_s30 + $0xd90] sm:$0xff] %v2103_v50  ;;  %v2107_v52 = vld [vmem:[%s10144_s29 + $0x1b40] sm:$0xff]  ;;  %v2109_v53 = vld [vmem:[%s10144_s29 + $0x1b50] sm:$0xff]  ;;  %2106 = vst [vmem:[%s10149_s30 + $0xd98] sm:$0xff] %v2105_v51 }
  0xf2   : > { %2108 = vst [vmem:[%s10149_s30 + $0xda0] sm:$0xff] %v2107_v52  ;;  %2110 = vst [vmem:[%s10149_s30 + $0xda8] sm:$0xff] %v2109_v53  ;;  %v2111_v54 = vld [vmem:[%s10144_s29 + $0x1b60] sm:$0xff]  ;;  %v2113_v55 = vld [vmem:[%s10144_s29 + $0x1b70] sm:$0xff] }
  0xf3   : > { %v2115_v56 = vld [vmem:[%s10144_s29 + $0x1b80] sm:$0xff]  ;;  %2112 = vst [vmem:[%s10149_s30 + $0xdb0] sm:$0xff] %v2111_v54  ;;  %2114 = vst [vmem:[%s10149_s30 + $0xdb8] sm:$0xff] %v2113_v55  ;;  %v2117_v57 = vld [vmem:[%s10144_s29 + $0x1b90] sm:$0xff] }
  0xf4   : > { %2116 = vst [vmem:[%s10149_s30 + $0xdc0] sm:$0xff] %v2115_v56  ;;  %v2119_v58 = vld [vmem:[%s10144_s29 + $0x1ba0] sm:$0xff]  ;;  %v2121_v59 = vld [vmem:[%s10144_s29 + $0x1bb0] sm:$0xff]  ;;  %2118 = vst [vmem:[%s10149_s30 + $0xdc8] sm:$0xff] %v2117_v57 }
  0xf5   : > { %2120 = vst [vmem:[%s10149_s30 + $0xdd0] sm:$0xff] %v2119_v58  ;;  %2122 = vst [vmem:[%s10149_s30 + $0xdd8] sm:$0xff] %v2121_v59  ;;  %v2123_v60 = vld [vmem:[%s10144_s29 + $0x1bc0] sm:$0xff]  ;;  %v2125_v61 = vld [vmem:[%s10144_s29 + $0x1bd0] sm:$0xff] }
  0xf6   : > { %v2127_v62 = vld [vmem:[%s10144_s29 + $0x1be0] sm:$0xff]  ;;  %2124 = vst [vmem:[%s10149_s30 + $0xde0] sm:$0xff] %v2123_v60  ;;  %2126 = vst [vmem:[%s10149_s30 + $0xde8] sm:$0xff] %v2125_v61  ;;  %v2129_v63 = vld [vmem:[%s10144_s29 + $0x1bf0] sm:$0xff] }
  0xf7   : > { %2128 = vst [vmem:[%s10149_s30 + $0xdf0] sm:$0xff] %v2127_v62  ;;  %v2131_v0 = vld [vmem:[%s10144_s29 + $0x1c00] sm:$0xff]  ;;  %v2133_v1 = vld [vmem:[%s10144_s29 + $0x1c10] sm:$0xff]  ;;  %2130 = vst [vmem:[%s10149_s30 + $0xdf8] sm:$0xff] %v2129_v63 }
  0xf8   : > { %2132 = vst [vmem:[%s10149_s30 + $0xe00] sm:$0xff] %v2131_v0  ;;  %2134 = vst [vmem:[%s10149_s30 + $0xe08] sm:$0xff] %v2133_v1  ;;  %v2135_v2 = vld [vmem:[%s10144_s29 + $0x1c20] sm:$0xff]  ;;  %v2137_v3 = vld [vmem:[%s10144_s29 + $0x1c30] sm:$0xff] }
  0xf9   : > { %v2139_v4 = vld [vmem:[%s10144_s29 + $0x1c40] sm:$0xff]  ;;  %2136 = vst [vmem:[%s10149_s30 + $0xe10] sm:$0xff] %v2135_v2  ;;  %2138 = vst [vmem:[%s10149_s30 + $0xe18] sm:$0xff] %v2137_v3  ;;  %v2141_v5 = vld [vmem:[%s10144_s29 + $0x1c50] sm:$0xff] }
  0xfa   : > { %2140 = vst [vmem:[%s10149_s30 + $0xe20] sm:$0xff] %v2139_v4  ;;  %v2143_v6 = vld [vmem:[%s10144_s29 + $0x1c60] sm:$0xff]  ;;  %v2145_v7 = vld [vmem:[%s10144_s29 + $0x1c70] sm:$0xff]  ;;  %2142 = vst [vmem:[%s10149_s30 + $0xe28] sm:$0xff] %v2141_v5 }
  0xfb   : > { %2144 = vst [vmem:[%s10149_s30 + $0xe30] sm:$0xff] %v2143_v6  ;;  %2146 = vst [vmem:[%s10149_s30 + $0xe38] sm:$0xff] %v2145_v7  ;;  %v2147_v8 = vld [vmem:[%s10144_s29 + $0x1c80] sm:$0xff]  ;;  %v2149_v9 = vld [vmem:[%s10144_s29 + $0x1c90] sm:$0xff] }
  0xfc   : > { %v2151_v10 = vld [vmem:[%s10144_s29 + $0x1ca0] sm:$0xff]  ;;  %2148 = vst [vmem:[%s10149_s30 + $0xe40] sm:$0xff] %v2147_v8  ;;  %2150 = vst [vmem:[%s10149_s30 + $0xe48] sm:$0xff] %v2149_v9  ;;  %v2153_v11 = vld [vmem:[%s10144_s29 + $0x1cb0] sm:$0xff] }
  0xfd   : > { %2152 = vst [vmem:[%s10149_s30 + $0xe50] sm:$0xff] %v2151_v10  ;;  %v2155_v12 = vld [vmem:[%s10144_s29 + $0x1cc0] sm:$0xff]  ;;  %v2157_v13 = vld [vmem:[%s10144_s29 + $0x1cd0] sm:$0xff]  ;;  %2154 = vst [vmem:[%s10149_s30 + $0xe58] sm:$0xff] %v2153_v11 }
  0xfe   : > { %2156 = vst [vmem:[%s10149_s30 + $0xe60] sm:$0xff] %v2155_v12  ;;  %2158 = vst [vmem:[%s10149_s30 + $0xe68] sm:$0xff] %v2157_v13  ;;  %v2159_v14 = vld [vmem:[%s10144_s29 + $0x1ce0] sm:$0xff]  ;;  %v2161_v15 = vld [vmem:[%s10144_s29 + $0x1cf0] sm:$0xff] }
  0xff   : > { %v2163_v16 = vld [vmem:[%s10144_s29 + $0x1d00] sm:$0xff]  ;;  %2160 = vst [vmem:[%s10149_s30 + $0xe70] sm:$0xff] %v2159_v14  ;;  %2162 = vst [vmem:[%s10149_s30 + $0xe78] sm:$0xff] %v2161_v15  ;;  %v2165_v17 = vld [vmem:[%s10144_s29 + $0x1d10] sm:$0xff] }
 0x100   : > { %2164 = vst [vmem:[%s10149_s30 + $0xe80] sm:$0xff] %v2163_v16  ;;  %v2167_v18 = vld [vmem:[%s10144_s29 + $0x1d20] sm:$0xff]  ;;  %v2169_v19 = vld [vmem:[%s10144_s29 + $0x1d30] sm:$0xff]  ;;  %2166 = vst [vmem:[%s10149_s30 + $0xe88] sm:$0xff] %v2165_v17 }
 0x101   : > { %2168 = vst [vmem:[%s10149_s30 + $0xe90] sm:$0xff] %v2167_v18  ;;  %2170 = vst [vmem:[%s10149_s30 + $0xe98] sm:$0xff] %v2169_v19  ;;  %v2171_v20 = vld [vmem:[%s10144_s29 + $0x1d40] sm:$0xff]  ;;  %v2173_v21 = vld [vmem:[%s10144_s29 + $0x1d50] sm:$0xff] }
 0x102   : > { %v2175_v22 = vld [vmem:[%s10144_s29 + $0x1d60] sm:$0xff]  ;;  %2172 = vst [vmem:[%s10149_s30 + $0xea0] sm:$0xff] %v2171_v20  ;;  %2174 = vst [vmem:[%s10149_s30 + $0xea8] sm:$0xff] %v2173_v21  ;;  %v2177_v23 = vld [vmem:[%s10144_s29 + $0x1d70] sm:$0xff] }
 0x103   : > { %2176 = vst [vmem:[%s10149_s30 + $0xeb0] sm:$0xff] %v2175_v22  ;;  %v2179_v24 = vld [vmem:[%s10144_s29 + $0x1d80] sm:$0xff]  ;;  %v2181_v25 = vld [vmem:[%s10144_s29 + $0x1d90] sm:$0xff]  ;;  %2178 = vst [vmem:[%s10149_s30 + $0xeb8] sm:$0xff] %v2177_v23 }
 0x104   : > { %2180 = vst [vmem:[%s10149_s30 + $0xec0] sm:$0xff] %v2179_v24  ;;  %2182 = vst [vmem:[%s10149_s30 + $0xec8] sm:$0xff] %v2181_v25  ;;  %v2183_v26 = vld [vmem:[%s10144_s29 + $0x1da0] sm:$0xff]  ;;  %v2185_v27 = vld [vmem:[%s10144_s29 + $0x1db0] sm:$0xff] }
 0x105   : > { %v2187_v28 = vld [vmem:[%s10144_s29 + $0x1dc0] sm:$0xff]  ;;  %2184 = vst [vmem:[%s10149_s30 + $0xed0] sm:$0xff] %v2183_v26  ;;  %2186 = vst [vmem:[%s10149_s30 + $0xed8] sm:$0xff] %v2185_v27  ;;  %v2189_v29 = vld [vmem:[%s10144_s29 + $0x1dd0] sm:$0xff] }
 0x106   : > { %2188 = vst [vmem:[%s10149_s30 + $0xee0] sm:$0xff] %v2187_v28  ;;  %v2191_v30 = vld [vmem:[%s10144_s29 + $0x1de0] sm:$0xff]  ;;  %v2193_v31 = vld [vmem:[%s10144_s29 + $0x1df0] sm:$0xff]  ;;  %2190 = vst [vmem:[%s10149_s30 + $0xee8] sm:$0xff] %v2189_v29 }
 0x107   : > { %2192 = vst [vmem:[%s10149_s30 + $0xef0] sm:$0xff] %v2191_v30  ;;  %2194 = vst [vmem:[%s10149_s30 + $0xef8] sm:$0xff] %v2193_v31  ;;  %v2195_v32 = vld [vmem:[%s10144_s29 + $0x1e00] sm:$0xff]  ;;  %v2197_v33 = vld [vmem:[%s10144_s29 + $0x1e10] sm:$0xff] }
 0x108   : > { %v2199_v34 = vld [vmem:[%s10144_s29 + $0x1e20] sm:$0xff]  ;;  %2196 = vst [vmem:[%s10149_s30 + $0xf00] sm:$0xff] %v2195_v32  ;;  %2198 = vst [vmem:[%s10149_s30 + $0xf08] sm:$0xff] %v2197_v33  ;;  %v2201_v35 = vld [vmem:[%s10144_s29 + $0x1e30] sm:$0xff] }
 0x109   : > { %2200 = vst [vmem:[%s10149_s30 + $0xf10] sm:$0xff] %v2199_v34  ;;  %v2203_v36 = vld [vmem:[%s10144_s29 + $0x1e40] sm:$0xff]  ;;  %v2205_v37 = vld [vmem:[%s10144_s29 + $0x1e50] sm:$0xff]  ;;  %2202 = vst [vmem:[%s10149_s30 + $0xf18] sm:$0xff] %v2201_v35 }
 0x10a   : > { %2204 = vst [vmem:[%s10149_s30 + $0xf20] sm:$0xff] %v2203_v36  ;;  %2206 = vst [vmem:[%s10149_s30 + $0xf28] sm:$0xff] %v2205_v37  ;;  %v2207_v38 = vld [vmem:[%s10144_s29 + $0x1e60] sm:$0xff]  ;;  %v2209_v39 = vld [vmem:[%s10144_s29 + $0x1e70] sm:$0xff] }
 0x10b   : > { %v2211_v40 = vld [vmem:[%s10144_s29 + $0x1e80] sm:$0xff]  ;;  %2208 = vst [vmem:[%s10149_s30 + $0xf30] sm:$0xff] %v2207_v38  ;;  %2210 = vst [vmem:[%s10149_s30 + $0xf38] sm:$0xff] %v2209_v39  ;;  %v2213_v41 = vld [vmem:[%s10144_s29 + $0x1e90] sm:$0xff] }
 0x10c   : > { %2212 = vst [vmem:[%s10149_s30 + $0xf40] sm:$0xff] %v2211_v40  ;;  %v2215_v42 = vld [vmem:[%s10144_s29 + $0x1ea0] sm:$0xff]  ;;  %v2217_v43 = vld [vmem:[%s10144_s29 + $0x1eb0] sm:$0xff]  ;;  %2214 = vst [vmem:[%s10149_s30 + $0xf48] sm:$0xff] %v2213_v41 }
 0x10d   : > { %2216 = vst [vmem:[%s10149_s30 + $0xf50] sm:$0xff] %v2215_v42  ;;  %2218 = vst [vmem:[%s10149_s30 + $0xf58] sm:$0xff] %v2217_v43  ;;  %v2219_v44 = vld [vmem:[%s10144_s29 + $0x1ec0] sm:$0xff]  ;;  %v2221_v45 = vld [vmem:[%s10144_s29 + $0x1ed0] sm:$0xff] }
 0x10e   : > { %v2223_v46 = vld [vmem:[%s10144_s29 + $0x1ee0] sm:$0xff]  ;;  %2220 = vst [vmem:[%s10149_s30 + $0xf60] sm:$0xff] %v2219_v44  ;;  %2222 = vst [vmem:[%s10149_s30 + $0xf68] sm:$0xff] %v2221_v45  ;;  %v2225_v47 = vld [vmem:[%s10144_s29 + $0x1ef0] sm:$0xff] }
 0x10f   : > { %2224 = vst [vmem:[%s10149_s30 + $0xf70] sm:$0xff] %v2223_v46  ;;  %v2227_v48 = vld [vmem:[%s10144_s29 + $0x1f00] sm:$0xff]  ;;  %v2229_v49 = vld [vmem:[%s10144_s29 + $0x1f10] sm:$0xff]  ;;  %2226 = vst [vmem:[%s10149_s30 + $0xf78] sm:$0xff] %v2225_v47 }
 0x110   : > { %2228 = vst [vmem:[%s10149_s30 + $0xf80] sm:$0xff] %v2227_v48  ;;  %2230 = vst [vmem:[%s10149_s30 + $0xf88] sm:$0xff] %v2229_v49  ;;  %v2231_v50 = vld [vmem:[%s10144_s29 + $0x1f20] sm:$0xff]  ;;  %v2233_v51 = vld [vmem:[%s10144_s29 + $0x1f30] sm:$0xff] }
 0x111   : > { %v2235_v52 = vld [vmem:[%s10144_s29 + $0x1f40] sm:$0xff]  ;;  %2232 = vst [vmem:[%s10149_s30 + $0xf90] sm:$0xff] %v2231_v50  ;;  %2234 = vst [vmem:[%s10149_s30 + $0xf98] sm:$0xff] %v2233_v51  ;;  %v2237_v53 = vld [vmem:[%s10144_s29 + $0x1f50] sm:$0xff] }
 0x112   : > { %2236 = vst [vmem:[%s10149_s30 + $0xfa0] sm:$0xff] %v2235_v52  ;;  %v2239_v54 = vld [vmem:[%s10144_s29 + $0x1f60] sm:$0xff]  ;;  %v2241_v55 = vld [vmem:[%s10144_s29 + $0x1f70] sm:$0xff]  ;;  %2238 = vst [vmem:[%s10149_s30 + $0xfa8] sm:$0xff] %v2237_v53 }
 0x113   : > { %2240 = vst [vmem:[%s10149_s30 + $0xfb0] sm:$0xff] %v2239_v54  ;;  %2242 = vst [vmem:[%s10149_s30 + $0xfb8] sm:$0xff] %v2241_v55  ;;  %v2243_v56 = vld [vmem:[%s10144_s29 + $0x1f80] sm:$0xff]  ;;  %v2245_v57 = vld [vmem:[%s10144_s29 + $0x1f90] sm:$0xff] }
 0x114   : > { %v2247_v58 = vld [vmem:[%s10144_s29 + $0x1fa0] sm:$0xff]  ;;  %2244 = vst [vmem:[%s10149_s30 + $0xfc0] sm:$0xff] %v2243_v56  ;;  %2246 = vst [vmem:[%s10149_s30 + $0xfc8] sm:$0xff] %v2245_v57  ;;  %v2249_v59 = vld [vmem:[%s10144_s29 + $0x1fb0] sm:$0xff] }
 0x115   : > { %2248 = vst [vmem:[%s10149_s30 + $0xfd0] sm:$0xff] %v2247_v58  ;;  %v2251_v60 = vld [vmem:[%s10144_s29 + $0x1fc0] sm:$0xff]  ;;  %v2253_v61 = vld [vmem:[%s10144_s29 + $0x1fd0] sm:$0xff]  ;;  %2250 = vst [vmem:[%s10149_s30 + $0xfd8] sm:$0xff] %v2249_v59 }
 0x116   : > { %2252 = vst [vmem:[%s10149_s30 + $0xfe0] sm:$0xff] %v2251_v60  ;;  %2254 = vst [vmem:[%s10149_s30 + $0xfe8] sm:$0xff] %v2253_v61  ;;  %v2255_v62 = vld [vmem:[%s10144_s29 + $0x1fe0] sm:$0xff]  ;;  %v2257_v63 = vld [vmem:[%s10144_s29 + $0x1ff0] sm:$0xff] }
 0x117   : > { %2256 = vst [vmem:[%s10149_s30 + $0xff0] sm:$0xff] %v2255_v62  ;;  %2258 = vst [vmem:[%s10149_s30 + $0xff8] sm:$0xff] %v2257_v63 }
 0x118 PF: > { %p8589_p7 = scmp.ge.s32.totalorder %s10064_s18, 1  ;;  %p4355_p8 = scmp.lt.s32.totalorder %s10064_s18, 5 }
 0x11a   : > { %p4356_p9 = pnand %p8589_p7, %p4355_p8 }
 0x11b   : > { %s4362_s4 = sand.u32 (!%p4356_p9), 1, %s10040_s12   ;;  %p4403_p10 = scmp.lt.s32.totalorder (!%p4356_p9), %s10052_s15, 1  ;;  %v10066_v36 = vmov (!%p4356_p9), 1983009808   ;;  %v4967_v38 = vlaneseq (!%p4356_p9)  ;;  %vm8373_vm0 = vcmask (!%p4356_p9), 1043456  }
 0x11c   : > { %4359 = sbr.rel (%p4356_p9) target bundleno = 1067 (0x42b), region = 80  ;;  %s8590_s5 = sshll.u32 (!%p4356_p9), %s4362_s4, 12  ;;  %v4965_v37 = vunpack.c.l.s4 (!%p4356_p9), %v10066_v36 }
 0x11d   : > { %s11175_s6 = scalar_lea.vmem (!%p4356_p9), [#allocation3], %s8590_s5  ;;  %v11220_v43 = vshrl.u32 (!%p4356_p9), %v4967_v38, 7  ;;  %s8593_s11 = sshll.u32 (!%p4356_p9), %s10048_s14, 1 }
 0x11e   : > { %v9230_v0 = vld [vmem:[%s11175_s6 + $0x4] ss:$8 sps:$4 sm:$0xff] (!%p4356_p9)   ;;  %v9234_v2 = vld [vmem:[%s11175_s6] ss:$8 sps:$4 sm:$0xff] (!%p4356_p9)   ;;  %v9236_v4 = vld [vmem:[%s11175_s6 + $0x14] ss:$8 sps:$4 sm:$0xff] (!%p4356_p9)   ;;  %v4966_v42 = vunpack.c.0.s8 (!%p4356_p9), %v4965_v37 }
 0x11f   : > { %v9232_v1 = vld [vmem:[%s11175_s6 + $0x804] ss:$8 sps:$4 sm:$0xff] (!%p4356_p9)   ;;  %7691 = vmatprep.subr.bf16.mxu1 (!%p4356_p9), %v9230_v0  ;;  %v9235_v3 = vld [vmem:[%s11175_s6 + $0x800] ss:$8 sps:$4 sm:$0xff] (!%p4356_p9)   ;;  %v9238_v5 = vld [vmem:[%s11175_s6 + $0x814] ss:$8 sps:$4 sm:$0xff] (!%p4356_p9)  }
 0x120   : > { %8019 = vmatprep.subr.bf16.mxu0 (!%p4356_p9), %v9232_v1  ;;  %7692 = vmatpush1.bf16.msra.mxu1 (!%p4356_p9), %v9234_v2  ;;  %v9240_v6 = vld [vmem:[%s11175_s6 + $0x10] ss:$8 sps:$4 sm:$0xff] (!%p4356_p9)   ;;  %v9242_v8 = vld [vmem:[%s11175_s6 + $0x24] ss:$8 sps:$4 sm:$0xff] (!%p4356_p9)   ;;  %v9246_v10 = vld [vmem:[%s11175_s6 + $0x20] ss:$8 sps:$4 sm:$0xff] (!%p4356_p9)   ;;  %v11234_v49 = vsub.s32 (!%p4356_p9), %v4966_v42, %v11220_v43 }
 0x121   : > { %8020 = vmatpush1.bf16.msra.mxu0 (!%p4356_p9), %v9235_v3  ;;  %7693 = vmatprep.subr.bf16.mxu1 (!%p4356_p9), %v9236_v4  ;;  %v9241_v7 = vld [vmem:[%s11175_s6 + $0x810] ss:$8 sps:$4 sm:$0xff] (!%p4356_p9)   ;;  %v9244_v9 = vld [vmem:[%s11175_s6 + $0x824] ss:$8 sps:$4 sm:$0xff] (!%p4356_p9)   ;;  %v9247_v11 = vld [vmem:[%s11175_s6 + $0x820] ss:$8 sps:$4 sm:$0xff] (!%p4356_p9)  }
 0x122   : > { %8021 = vmatprep.subr.bf16.mxu0 (!%p4356_p9), %v9238_v5  ;;  %v9248_v12 = vld [vmem:[%s11175_s6 + $0x34] ss:$8 sps:$4 sm:$0xff] (!%p4356_p9)   ;;  %v9252_v14 = vld [vmem:[%s11175_s6 + $0x30] ss:$8 sps:$4 sm:$0xff] (!%p4356_p9)   ;;  %v9254_v16 = vld [vmem:[%s11175_s6 + $0x44] ss:$8 sps:$4 sm:$0xff] (!%p4356_p9)  }
 0x123   : > { %v9250_v13 = vld [vmem:[%s11175_s6 + $0x834] ss:$8 sps:$4 sm:$0xff]   ;;  %v9253_v15 = vld [vmem:[%s11175_s6 + $0x830] ss:$8 sps:$4 sm:$0xff]   ;;  %v9256_v17 = vld [vmem:[%s11175_s6 + $0x844] ss:$8 sps:$4 sm:$0xff]  }
 0x124   : > { %7694 = vmatpush1.bf16.msra.mxu1 %v9240_v6  ;;  %v9258_v18 = vld [vmem:[%s11175_s6 + $0x40] ss:$8 sps:$4 sm:$0xff]   ;;  %v9260_v20 = vld [vmem:[%s11175_s6 + $0x54] ss:$8 sps:$4 sm:$0xff]   ;;  %v9264_v22 = vld [vmem:[%s11175_s6 + $0x50] ss:$8 sps:$4 sm:$0xff]  }
 0x125   : > { %8022 = vmatpush1.bf16.msra.mxu0 %v9241_v7  ;;  %7695 = vmatprep.subr.bf16.mxu1 %v9242_v8  ;;  %v9259_v19 = vld [vmem:[%s11175_s6 + $0x840] ss:$8 sps:$4 sm:$0xff]   ;;  %v9262_v21 = vld [vmem:[%s11175_s6 + $0x854] ss:$8 sps:$4 sm:$0xff]   ;;  %v9265_v23 = vld [vmem:[%s11175_s6 + $0x850] ss:$8 sps:$4 sm:$0xff]  }
 0x126   : > { %8023 = vmatprep.subr.bf16.mxu0 %v9244_v9  ;;  %v9266_v24 = vld [vmem:[%s11175_s6 + $0x64] ss:$8 sps:$4 sm:$0xff]   ;;  %v9270_v26 = vld [vmem:[%s11175_s6 + $0x60] ss:$8 sps:$4 sm:$0xff]   ;;  %v9272_v28 = vld [vmem:[%s11175_s6 + $0x74] ss:$8 sps:$4 sm:$0xff]  }
 0x127   : > { %v9268_v25 = vld [vmem:[%s11175_s6 + $0x864] ss:$8 sps:$4 sm:$0xff]   ;;  %v9271_v27 = vld [vmem:[%s11175_s6 + $0x860] ss:$8 sps:$4 sm:$0xff]   ;;  %v9274_v29 = vld [vmem:[%s11175_s6 + $0x874] ss:$8 sps:$4 sm:$0xff]  }
 0x128   : > { %7696 = vmatpush1.bf16.msra.mxu1 %v9246_v10  ;;  %v9276_v30 = vld [vmem:[%s11175_s6 + $0x70] ss:$8 sps:$4 sm:$0xff]   ;;  %v9278_v32 = vld [vmem:[%s11175_s6 + $0x84] ss:$8 sps:$4 sm:$0xff]   ;;  %v9282_v34 = vld [vmem:[%s11175_s6 + $0x80] ss:$8 sps:$4 sm:$0xff]  }
 0x129   : > { %8024 = vmatpush1.bf16.msra.mxu0 %v9247_v11  ;;  %7697 = vmatprep.subr.bf16.mxu1 %v9248_v12  ;;  %v9277_v31 = vld [vmem:[%s11175_s6 + $0x870] ss:$8 sps:$4 sm:$0xff]   ;;  %v9280_v33 = vld [vmem:[%s11175_s6 + $0x884] ss:$8 sps:$4 sm:$0xff]   ;;  %v9283_v35 = vld [vmem:[%s11175_s6 + $0x880] ss:$8 sps:$4 sm:$0xff]  }
 0x12a   : > { %8025 = vmatprep.subr.bf16.mxu0 %v9250_v13  ;;  %v9284_v39 = vld [vmem:[%s11175_s6 + $0x94] ss:$8 sps:$4 sm:$0xff]   ;;  %s11880_s15 = smov (!%p4403_p10, %s10052_s15), 1  ;;  %v9288_v41 = vld [vmem:[%s11175_s6 + $0x90] ss:$8 sps:$4 sm:$0xff]   ;;  %p4415_p11 = scmp.lt.s32.totalorder %s8593_s11, 3 }
 0x12b   : > { %v9286_v40 = vld [vmem:[%s11175_s6 + $0x894] ss:$8 sps:$4 sm:$0xff]   ;;  %v9289_v44 = vld [vmem:[%s11175_s6 + $0x890] ss:$8 sps:$4 sm:$0xff]   ;;  %v9290_v45 = vld [vmem:[%s11175_s6 + $0xa4] ss:$8 sps:$4 sm:$0xff]  }
 0x12c   : > { %7698 = vmatpush1.bf16.msra.mxu1 %v9252_v14  ;;  %s9114_s7 = sshll.u32 %s11880_s15, 6  ;;  %v9292_v46 = vld [vmem:[%s11175_s6 + $0x8a4] ss:$8 sps:$4 sm:$0xff]   ;;  %v9294_v47 = vld [vmem:[%s11175_s6 + $0xa0] ss:$8 sps:$4 sm:$0xff]   ;;  %s11882_s11 = smov (!%p4415_p11, %s8593_s11), 3 }
 0x12d   : > { %8026 = vmatpush1.bf16.msra.mxu0 %v9253_v15  ;;  %7699 = vmatprep.subr.bf16.mxu1 %v9254_v16  ;;  %v9295_v48 = vld [vmem:[%s11175_s6 + $0x8a0] ss:$8 sps:$4 sm:$0xff]   ;;  %s11231_s10 = scalar_lea.vmem %s11863_s0, %s9114_s7  ;;  %v9296_v50 = vld [vmem:[%s11175_s6 + $0xb4] ss:$8 sps:$4 sm:$0xff]   ;;  %v9300_v53 = vld [vmem:[%s11175_s6 + $0xb0] ss:$8 sps:$4 sm:$0xff]   ;;  %s4417_s22 = scalar_lea.vmem %s11865_s2, %s11882_s11 }
 0x12e   : > { %8027 = vmatprep.subr.bf16.mxu0 %v9256_v17  ;;  %v9298_v51 = vld [vmem:[%s11175_s6 + $0x8b4] ss:$8 sps:$4 sm:$0xff]   ;;  %v4435_v52 = vld [vmem:[%s11231_s10] sm:$0xff]  ;;  %v9301_v55 = vld [vmem:[%s11175_s6 + $0x8b0] ss:$8 sps:$4 sm:$0xff]   ;;  %s8595_s14 = sshll.u32 %s11880_s15, 2 }
 0x12f   : > { %v4970_v54 = vrot.slane %v4435_v52, %v11234_v49  ;;  %v4439_v56 = vld [vmem:[%s11231_s10 + $0x20] sm:$0xff]  ;;  %v9308_v0 = vld [vmem:[%s11175_s6 + $0xd4] ss:$8 sps:$4 sm:$0xff]   ;;  %v9312_v2 = vld [vmem:[%s11175_s6 + $0xd0] ss:$8 sps:$4 sm:$0xff]   ;;  %v4963_v10 = vcombine.high %v4435_v52, %v4435_v52  ;;  %s4425_s24 = sadd.s32 %s8595_s14, %s11882_s11 }
 0x130   : > { %7700 = vmatpush1.bf16.msra.mxu1 %v9258_v18  ;;  %v9302_v57 = vld [vmem:[%s11175_s6 + $0xc4] ss:$8 sps:$4 sm:$0xff]   ;;  %v5038_v60 = vrot.slane %v4439_v56, %v11234_v49  ;;  %v9306_v62 = vld [vmem:[%s11175_s6 + $0xc0] ss:$8 sps:$4 sm:$0xff]   ;;  %v9310_v1 = vld [vmem:[%s11175_s6 + $0x8d4] ss:$8 sps:$4 sm:$0xff]   ;;  %v5031_v11 = vcombine.high %v4439_v56, %v4439_v56 }
 0x131   : > { %8028 = vmatpush1.bf16.msra.mxu0 %v9259_v19  ;;  %7701 = vmatprep.subr.bf16.mxu1 %v9260_v20  ;;  %v9304_v58 = vld [vmem:[%s11175_s6 + $0x8c4] ss:$8 sps:$4 sm:$0xff]   ;;  %v4978_v59 = vcombine.high %v4970_v54, %v4970_v54  ;;  %v9307_v63 = vld [vmem:[%s11175_s6 + $0x8c0] ss:$8 sps:$4 sm:$0xff]   ;;  %v9313_v3 = vld [vmem:[%s11175_s6 + $0x8d0] ss:$8 sps:$4 sm:$0xff]   ;;  %v11263_v16 = vrot.slane %v4963_v10, %v11234_v49 }
 0x132   : > { %8029 = vmatprep.subr.bf16.mxu0 %v9262_v21  ;;  %v5046_v61 = vcombine.high %v5038_v60, %v5038_v60  ;;  %v9314_v4 = vld [vmem:[%s11175_s6 + $0xe4] ss:$8 sps:$4 sm:$0xff]   ;;  %v9318_v6 = vld [vmem:[%s11175_s6 + $0xe0] ss:$8 sps:$4 sm:$0xff]   ;;  %v9320_v8 = vld [vmem:[%s11175_s6 + $0xf4] ss:$8 sps:$4 sm:$0xff]   ;;  %v11266_v17 = vrot.slane %v5031_v11, %v11234_v49 }
 0x133   : > { %7723 = vmatprep.mubr.bf16.mxu1 %v4978_v59  ;;  %v9316_v5 = vld [vmem:[%s11175_s6 + $0x8e4] ss:$8 sps:$4 sm:$0xff]   ;;  %v9319_v7 = vld [vmem:[%s11175_s6 + $0x8e0] ss:$8 sps:$4 sm:$0xff]   ;;  %v9322_v9 = vld [vmem:[%s11175_s6 + $0x8f4] ss:$8 sps:$4 sm:$0xff]  }
 0x134   : > { %7702 = vmatpush1.bf16.msra.mxu1 %v9264_v22  ;;  %8051 = vmatprep.mubr.bf16.mxu0 %v5046_v61  ;;  %v9324_v12 = vld [vmem:[%s11175_s6 + $0xf0] ss:$8 sps:$4 sm:$0xff]   ;;  %v9329_v14 = vld [vmem:[%s11175_s6 + $0x104] ss:$8 sps:$4 sm:$0xff]   ;;  %v9327_v18 = vld [vmem:[%s11175_s6 + $0x100] ss:$8 sps:$4 sm:$0xff]   ;;  %v4979_v22 = vcombine.high %v11263_v16, %v11263_v16 }
 0x135   : > { %8030 = vmatpush1.bf16.msra.mxu0 %v9265_v23  ;;  %7703 = vmatprep.subr.bf16.mxu1 %v9266_v24  ;;  %v9325_v13 = vld [vmem:[%s11175_s6 + $0x8f0] ss:$8 sps:$4 sm:$0xff]   ;;  %v9333_v15 = vld [vmem:[%s11175_s6 + $0x904] ss:$8 sps:$4 sm:$0xff]   ;;  %v9331_v19 = vld [vmem:[%s11175_s6 + $0x900] ss:$8 sps:$4 sm:$0xff]   ;;  %v5047_v23 = vcombine.high %v11266_v17, %v11266_v17 }
 0x136   : > { %8031 = vmatprep.subr.bf16.mxu0 %v9268_v25  ;;  %v9336_v20 = vld [vmem:[%s11175_s6 + $0x114] ss:$8 sps:$4 sm:$0xff]   ;;  %v9334_v24 = vld [vmem:[%s11175_s6 + $0x110] ss:$8 sps:$4 sm:$0xff]   ;;  %v9352_v36 = vld [vmem:[%s11175_s6 + $0x140] ss:$8 sps:$4 sm:$0xff]  }
 0x137   : > { %v9339_v21 = vld [vmem:[%s11175_s6 + $0x914] ss:$8 sps:$4 sm:$0xff]   ;;  %v9337_v25 = vld [vmem:[%s11175_s6 + $0x910] ss:$8 sps:$4 sm:$0xff]   ;;  %v9355_v37 = vld [vmem:[%s11175_s6 + $0x940] ss:$8 sps:$4 sm:$0xff]  }
 0x138   : > { %7704 = vmatpush1.bf16.msra.mxu1 %v9270_v26  ;;  %v9342_v26 = vld [vmem:[%s11175_s6 + $0x124] ss:$8 sps:$4 sm:$0xff]   ;;  %v9360_v38 = vld [vmem:[%s11175_s6 + $0x154] ss:$8 sps:$4 sm:$0xff]   ;;  %v9385_v59 = vld [vmem:[%s11175_s6 + $0x990] ss:$8 sps:$4 sm:$0xff]  }
 0x139   : > { %8032 = vmatpush1.bf16.msra.mxu0 %v9271_v27  ;;  %7705 = vmatprep.subr.bf16.mxu1 %v9272_v28  ;;  %v9345_v27 = vld [vmem:[%s11175_s6 + $0x924] ss:$8 sps:$4 sm:$0xff]   ;;  %v9340_v28 = vld [vmem:[%s11175_s6 + $0x120] ss:$8 sps:$4 sm:$0xff]   ;;  %v9384_v56 = vld [vmem:[%s11175_s6 + $0x194] ss:$8 sps:$4 sm:$0xff]  }
 0x13a   : > { %8033 = vmatprep.subr.bf16.mxu0 %v9274_v29  ;;  %v9343_v29 = vld [vmem:[%s11175_s6 + $0x920] ss:$8 sps:$4 sm:$0xff]   ;;  %v9366_v42 = vld [vmem:[%s11175_s6 + $0x164] ss:$8 sps:$4 sm:$0xff]   ;;  %v9406_v10 = vld [vmem:[%s11175_s6 + $0x1d0] ss:$8 sps:$4 sm:$0xff]  }
 0x13b   : > { %v9378_v52 = vld [vmem:[%s11175_s6 + $0x184] ss:$8 sps:$4 sm:$0xff]   ;;  %v9409_v11 = vld [vmem:[%s11175_s6 + $0x9d0] ss:$8 sps:$4 sm:$0xff]   ;;  %s8596_s25 = sshll.u32 %s4425_s24, 1 }
 0x13c   : > { %7706 = vmatpush1.bf16.msra.mxu1 %v9276_v30  ;;  %v9348_v30 = vld [vmem:[%s11175_s6 + $0x134] ss:$8 sps:$4 sm:$0xff]   ;;  %v9393_v61 = vld [vmem:[%s11175_s6 + $0x9a4] ss:$8 sps:$4 sm:$0xff]   ;;  %s4427_s28 = scalar_lea.vmem %s11866_s3, %s8596_s25 }
 0x13d   : > { %8034 = vmatpush1.bf16.msra.mxu0 %v9277_v31  ;;  %7707 = vmatprep.subr.bf16.mxu1 %v9278_v32  ;;  %v9351_v31 = vld [vmem:[%s11175_s6 + $0x934] ss:$8 sps:$4 sm:$0xff]   ;;  %v9346_v32 = vld [vmem:[%s11175_s6 + $0x130] ss:$8 sps:$4 sm:$0xff]  }
 0x13e   : > { %8035 = vmatprep.subr.bf16.mxu0 %v9280_v33  ;;  %v9349_v33 = vld [vmem:[%s11175_s6 + $0x930] ss:$8 sps:$4 sm:$0xff]  }
 0x140   : > { %7708 = vmatpush1.bf16.msra.mxu1 %v9282_v34  ;;  %v9354_v34 = vld [vmem:[%s11175_s6 + $0x144] ss:$8 sps:$4 sm:$0xff]  }
 0x141   : > { %8036 = vmatpush1.bf16.msra.mxu0 %v9283_v35  ;;  %7709 = vmatprep.subr.bf16.mxu1 %v9284_v39  ;;  %v9357_v35 = vld [vmem:[%s11175_s6 + $0x944] ss:$8 sps:$4 sm:$0xff]   ;;  %v9363_v39 = vld [vmem:[%s11175_s6 + $0x954] ss:$8 sps:$4 sm:$0xff]  }
 0x142   : > { %8037 = vmatprep.subr.bf16.mxu0 %v9286_v40  ;;  %v9358_v40 = vld [vmem:[%s11175_s6 + $0x150] ss:$8 sps:$4 sm:$0xff]  }
 0x144   : > { %7710 = vmatpush1.bf16.msra.mxu1 %v9288_v41  ;;  %v9361_v41 = vld [vmem:[%s11175_s6 + $0x950] ss:$8 sps:$4 sm:$0xff]  }
 0x145   : > { %8038 = vmatpush1.bf16.msra.mxu0 %v9289_v44  ;;  %7711 = vmatprep.subr.bf16.mxu1 %v9290_v45  ;;  %v9369_v44 = vld [vmem:[%s11175_s6 + $0x964] ss:$8 sps:$4 sm:$0xff]   ;;  %v9364_v45 = vld [vmem:[%s11175_s6 + $0x160] ss:$8 sps:$4 sm:$0xff]  }
 0x146   : > { %8039 = vmatprep.subr.bf16.mxu0 %v9292_v46  ;;  %v9367_v46 = vld [vmem:[%s11175_s6 + $0x960] ss:$8 sps:$4 sm:$0xff]  }
 0x148   : > { %7712 = vmatpush1.bf16.msra.mxu1 %v9294_v47  ;;  %v9372_v47 = vld [vmem:[%s11175_s6 + $0x174] ss:$8 sps:$4 sm:$0xff]  }
 0x149   : > { %8040 = vmatpush1.bf16.msra.mxu0 %v9295_v48  ;;  %7713 = vmatprep.subr.bf16.mxu1 %v9296_v50  ;;  %v9375_v48 = vld [vmem:[%s11175_s6 + $0x974] ss:$8 sps:$4 sm:$0xff]   ;;  %v9370_v50 = vld [vmem:[%s11175_s6 + $0x170] ss:$8 sps:$4 sm:$0xff]  }
 0x14a   : > { %8041 = vmatprep.subr.bf16.mxu0 %v9298_v51  ;;  %v9373_v51 = vld [vmem:[%s11175_s6 + $0x970] ss:$8 sps:$4 sm:$0xff]  }
 0x14c   : > { %7714 = vmatpush1.bf16.msra.mxu1 %v9300_v53  ;;  %v9381_v53 = vld [vmem:[%s11175_s6 + $0x984] ss:$8 sps:$4 sm:$0xff]  }
 0x14d   : > { %8042 = vmatpush1.bf16.msra.mxu0 %v9301_v55  ;;  %7715 = vmatprep.subr.bf16.mxu1 %v9302_v57  ;;  %v9379_v55 = vld [vmem:[%s11175_s6 + $0x980] ss:$8 sps:$4 sm:$0xff]   ;;  %v9387_v57 = vld [vmem:[%s11175_s6 + $0x994] ss:$8 sps:$4 sm:$0xff]  }
 0x14e   : > { %8043 = vmatprep.subr.bf16.mxu0 %v9304_v58  ;;  %v9382_v58 = vld [vmem:[%s11175_s6 + $0x190] ss:$8 sps:$4 sm:$0xff]  }
 0x150   : > { %7716 = vmatpush1.bf16.msra.mxu1 %v9306_v62  ;;  %v9388_v62 = vld [vmem:[%s11175_s6 + $0x1a0] ss:$8 sps:$4 sm:$0xff]  }
 0x151   : > { %8044 = vmatpush1.bf16.msra.mxu0 %v9307_v63  ;;  %7717 = vmatprep.subr.bf16.mxu1 %v9308_v0  ;;  %v9391_v63 = vld [vmem:[%s11175_s6 + $0x9a0] ss:$8 sps:$4 sm:$0xff]   ;;  %v9396_v0 = vld [vmem:[%s11175_s6 + $0x1b4] ss:$8 sps:$4 sm:$0xff]  }
 0x152   : > { %8045 = vmatprep.subr.bf16.mxu0 %v9310_v1  ;;  %v9399_v1 = vld [vmem:[%s11175_s6 + $0x9b4] ss:$8 sps:$4 sm:$0xff]  }
 0x154   : > { %7718 = vmatpush1.bf16.msra.mxu1 %v9312_v2  ;;  %v9394_v2 = vld [vmem:[%s11175_s6 + $0x1b0] ss:$8 sps:$4 sm:$0xff]  }
 0x155   : > { %8046 = vmatpush1.bf16.msra.mxu0 %v9313_v3  ;;  %7719 = vmatprep.subr.bf16.mxu1 %v9314_v4  ;;  %v9397_v3 = vld [vmem:[%s11175_s6 + $0x9b0] ss:$8 sps:$4 sm:$0xff]   ;;  %v9402_v4 = vld [vmem:[%s11175_s6 + $0x1c4] ss:$8 sps:$4 sm:$0xff]  }
 0x156   : > { %8047 = vmatprep.subr.bf16.mxu0 %v9316_v5  ;;  %v9405_v5 = vld [vmem:[%s11175_s6 + $0x9c4] ss:$8 sps:$4 sm:$0xff]  }
 0x158   : > { %7720 = vmatpush1.bf16.msra.mxu1 %v9318_v6  ;;  %v9400_v6 = vld [vmem:[%s11175_s6 + $0x1c0] ss:$8 sps:$4 sm:$0xff]  }
 0x159   : > { %8048 = vmatpush1.bf16.msra.mxu0 %v9319_v7  ;;  %7721 = vmatprep.subr.bf16.mxu1 %v9320_v8  ;;  %v9403_v7 = vld [vmem:[%s11175_s6 + $0x9c0] ss:$8 sps:$4 sm:$0xff]   ;;  %v9408_v8 = vld [vmem:[%s11175_s6 + $0x1d4] ss:$8 sps:$4 sm:$0xff]  }
 0x15a   : > { %8049 = vmatprep.subr.bf16.mxu0 %v9322_v9  ;;  %v9411_v9 = vld [vmem:[%s11175_s6 + $0x9d4] ss:$8 sps:$4 sm:$0xff]  }
 0x15c   : > { %7722 = vmatpush1.bf16.msra.mxu1 %v9324_v12  ;;  %v9414_v12 = vld [vmem:[%s11175_s6 + $0x1e4] ss:$8 sps:$4 sm:$0xff]  }
 0x15d   : > { %8050 = vmatpush1.bf16.msra.mxu0 %v9325_v13  ;;  %7732 = vmatprep.subr.bf16.mxu1 %v9329_v14  ;;  %v9417_v13 = vld [vmem:[%s11175_s6 + $0x9e4] ss:$8 sps:$4 sm:$0xff]   ;;  %v9412_v14 = vld [vmem:[%s11175_s6 + $0x1e0] ss:$8 sps:$4 sm:$0xff]  }
 0x15e   : > { %8060 = vmatprep.subr.bf16.mxu0 %v9333_v15  ;;  %v9415_v15 = vld [vmem:[%s11175_s6 + $0x9e0] ss:$8 sps:$4 sm:$0xff]  }
 0x15f   : > { %7724 = vmatmul.mubr.bf16.vlgmr.msra.gmra.mrb[0].mxu1 %v4970_v54  ;;  %v9376_v54 = vld [vmem:[%s11175_s6 + $0x180] ss:$8 sps:$4 sm:$0xff]  }
 0x160   : > { %8052 = vmatmul.mubr.bf16.vlgmr.msra.gmra.mrb[0].mxu0 %v5038_v60  ;;  %7733 = vmatpush1.bf16.msra.mxu1 %v9327_v18  ;;  %v9390_v60 = vld [vmem:[%s11175_s6 + $0x1a4] ss:$8 sps:$4 sm:$0xff]   ;;  %v9420_v18 = vld [vmem:[%s11175_s6 + $0x1f4] ss:$8 sps:$4 sm:$0xff]  }
 0x161   : > { %8061 = vmatpush1.bf16.msra.mxu0 %v9331_v19  ;;  %7734 = vmatprep.subr.bf16.mxu1 %v9336_v20  ;;  %v9423_v19 = vld [vmem:[%s11175_s6 + $0x9f4] ss:$8 sps:$4 sm:$0xff]   ;;  %v9418_v20 = vld [vmem:[%s11175_s6 + $0x1f0] ss:$8 sps:$4 sm:$0xff]  }
 0x162   : > { %8062 = vmatprep.subr.bf16.mxu0 %v9339_v21  ;;  %7764 = vmatprep.mubr.bf16.mxu1 %v4979_v22  ;;  %v9421_v21 = vld [vmem:[%s11175_s6 + $0x9f0] ss:$8 sps:$4 sm:$0xff]   ;;  %v9426_v22 = vld [vmem:[%s11175_s6 + $0x204] ss:$8 sps:$4 sm:$0xff]  }
 0x163   : > { %8092 = vmatprep.mubr.bf16.mxu0 %v5047_v23  ;;  %v9429_v23 = vld [vmem:[%s11175_s6 + $0xa04] ss:$8 sps:$4 sm:$0xff]  }
 0x164   : > { %7735 = vmatpush1.bf16.msra.mxu1 %v9334_v24  ;;  %v9424_v24 = vld [vmem:[%s11175_s6 + $0x200] ss:$8 sps:$4 sm:$0xff]  }
 0x165   : > { %8063 = vmatpush1.bf16.msra.mxu0 %v9337_v25  ;;  %7736 = vmatprep.subr.bf16.mxu1 %v9342_v26  ;;  %v9427_v25 = vld [vmem:[%s11175_s6 + $0xa00] ss:$8 sps:$4 sm:$0xff]   ;;  %v9432_v26 = vld [vmem:[%s11175_s6 + $0x214] ss:$8 sps:$4 sm:$0xff]  }
 0x166   : > { %8064 = vmatprep.subr.bf16.mxu0 %v9345_v27  ;;  %v11340_v27 = vld [vmem:[%s11231_s10 + $0x8] sm:$0xff] }
 0x168   : > { %7737 = vmatpush1.bf16.msra.mxu1 %v9340_v28  ;;  %v9435_v28 = vld [vmem:[%s11175_s6 + $0xa14] ss:$8 sps:$4 sm:$0xff]  }
 0x169   : > { %8065 = vmatpush1.bf16.msra.mxu0 %v9343_v29  ;;  %7738 = vmatprep.subr.bf16.mxu1 %v9348_v30  ;;  %v11345_v29 = vrot.slane %v11340_v27, %v11234_v49  ;;  %v11348_v30 = vld [vmem:[%s11231_s10 + $0x28] sm:$0xff] }
 0x16a   : > { %8066 = vmatprep.subr.bf16.mxu0 %v9351_v31  ;;  %v9430_v31 = vld [vmem:[%s11175_s6 + $0x210] ss:$8 sps:$4 sm:$0xff]  }
 0x16c   : > { %7739 = vmatpush1.bf16.msra.mxu1 %v9346_v32  ;;  %v9433_v32 = vld [vmem:[%s11175_s6 + $0xa10] ss:$8 sps:$4 sm:$0xff]  }
 0x16d   : > { %8067 = vmatpush1.bf16.msra.mxu0 %v9349_v33  ;;  %7740 = vmatprep.subr.bf16.mxu1 %v9354_v34  ;;  %v4995_v33 = vcombine.high %v11345_v29, %v11345_v29  ;;  %v11358_v34 = vrot.slane %v11348_v30, %v11234_v49 }
 0x16e   : > { %8068 = vmatprep.subr.bf16.mxu0 %v9357_v35  ;;  %v9438_v35 = vld [vmem:[%s11175_s6 + $0x224] ss:$8 sps:$4 sm:$0xff]  }
 0x170   : > { %7741 = vmatpush1.bf16.msra.mxu1 %v9352_v36  ;;  %v9436_v36 = vld [vmem:[%s11175_s6 + $0x220] ss:$8 sps:$4 sm:$0xff]  }
 0x171   : > { %8069 = vmatpush1.bf16.msra.mxu0 %v9355_v37  ;;  %7742 = vmatprep.subr.bf16.mxu1 %v9360_v38  ;;  %v9439_v37 = vld [vmem:[%s11175_s6 + $0xa20] ss:$8 sps:$4 sm:$0xff]   ;;  %v9444_v38 = vld [vmem:[%s11175_s6 + $0x234] ss:$8 sps:$4 sm:$0xff]  }
 0x172   : > { %8070 = vmatprep.subr.bf16.mxu0 %v9363_v39  ;;  %v9447_v39 = vld [vmem:[%s11175_s6 + $0xa34] ss:$8 sps:$4 sm:$0xff]  }
 0x174   : > { %7743 = vmatpush1.bf16.msra.mxu1 %v9358_v40  ;;  %v9442_v40 = vld [vmem:[%s11175_s6 + $0x230] ss:$8 sps:$4 sm:$0xff]  }
 0x175   : > { %8071 = vmatpush1.bf16.msra.mxu0 %v9361_v41  ;;  %7744 = vmatprep.subr.bf16.mxu1 %v9366_v42  ;;  %v9445_v41 = vld [vmem:[%s11175_s6 + $0xa30] ss:$8 sps:$4 sm:$0xff]   ;;  %v9450_v42 = vld [vmem:[%s11175_s6 + $0x244] ss:$8 sps:$4 sm:$0xff]  }
 0x176   : > { %8072 = vmatprep.subr.bf16.mxu0 %v9369_v44  ;;  %v9453_v44 = vld [vmem:[%s11175_s6 + $0xa44] ss:$8 sps:$4 sm:$0xff]  }
 0x178   : > { %7745 = vmatpush1.bf16.msra.mxu1 %v9364_v45  ;;  %v9448_v45 = vld [vmem:[%s11175_s6 + $0x240] ss:$8 sps:$4 sm:$0xff]  }
 0x179   : > { %8073 = vmatpush1.bf16.msra.mxu0 %v9367_v46  ;;  %7746 = vmatprep.subr.bf16.mxu1 %v9372_v47  ;;  %v9451_v46 = vld [vmem:[%s11175_s6 + $0xa40] ss:$8 sps:$4 sm:$0xff]   ;;  %v9456_v47 = vld [vmem:[%s11175_s6 + $0x254] ss:$8 sps:$4 sm:$0xff]  }
 0x17a   : > { %8074 = vmatprep.subr.bf16.mxu0 %v9375_v48  ;;  %v9459_v48 = vld [vmem:[%s11175_s6 + $0xa54] ss:$8 sps:$4 sm:$0xff]  }
 0x17c   : > { %7747 = vmatpush1.bf16.msra.mxu1 %v9370_v50  ;;  %v9454_v50 = vld [vmem:[%s11175_s6 + $0x250] ss:$8 sps:$4 sm:$0xff]  }
 0x17d   : > { %8075 = vmatpush1.bf16.msra.mxu0 %v9373_v51  ;;  %7748 = vmatprep.subr.bf16.mxu1 %v9378_v52  ;;  %v9457_v51 = vld [vmem:[%s11175_s6 + $0xa50] ss:$8 sps:$4 sm:$0xff]   ;;  %v9462_v52 = vld [vmem:[%s11175_s6 + $0x264] ss:$8 sps:$4 sm:$0xff]  }
 0x17e   : > { %8076 = vmatprep.subr.bf16.mxu0 %v9381_v53  ;;  %v9465_v53 = vld [vmem:[%s11175_s6 + $0xa64] ss:$8 sps:$4 sm:$0xff]  }
 0x180   : > { %7749 = vmatpush1.bf16.msra.mxu1 %v9376_v54  ;;  %v9460_v54 = vld [vmem:[%s11175_s6 + $0x260] ss:$8 sps:$4 sm:$0xff]  }
 0x181   : > { %8077 = vmatpush1.bf16.msra.mxu0 %v9379_v55  ;;  %7750 = vmatprep.subr.bf16.mxu1 %v9384_v56  ;;  %v9463_v55 = vld [vmem:[%s11175_s6 + $0xa60] ss:$8 sps:$4 sm:$0xff]   ;;  %v9468_v56 = vld [vmem:[%s11175_s6 + $0x274] ss:$8 sps:$4 sm:$0xff]  }
 0x182   : > { %8078 = vmatprep.subr.bf16.mxu0 %v9387_v57  ;;  %v9471_v57 = vld [vmem:[%s11175_s6 + $0xa74] ss:$8 sps:$4 sm:$0xff]  }
 0x184   : > { %7751 = vmatpush1.bf16.msra.mxu1 %v9382_v58  ;;  %v9466_v58 = vld [vmem:[%s11175_s6 + $0x270] ss:$8 sps:$4 sm:$0xff]  }
 0x185   : > { %8079 = vmatpush1.bf16.msra.mxu0 %v9385_v59  ;;  %7752 = vmatprep.subr.bf16.mxu1 %v9390_v60  ;;  %v9469_v59 = vld [vmem:[%s11175_s6 + $0xa70] ss:$8 sps:$4 sm:$0xff]   ;;  %v9474_v60 = vld [vmem:[%s11175_s6 + $0x284] ss:$8 sps:$4 sm:$0xff]  }
 0x186   : > { %8080 = vmatprep.subr.bf16.mxu0 %v9393_v61  ;;  %v9477_v61 = vld [vmem:[%s11175_s6 + $0xa84] ss:$8 sps:$4 sm:$0xff]  }
 0x188   : > { %7753 = vmatpush1.bf16.msra.mxu1 %v9388_v62  ;;  %v9472_v62 = vld [vmem:[%s11175_s6 + $0x280] ss:$8 sps:$4 sm:$0xff]  }
 0x189   : > { %8081 = vmatpush1.bf16.msra.mxu0 %v9391_v63  ;;  %7754 = vmatprep.subr.bf16.mxu1 %v9396_v0  ;;  %v9475_v63 = vld [vmem:[%s11175_s6 + $0xa80] ss:$8 sps:$4 sm:$0xff]   ;;  %v9480_v0 = vld [vmem:[%s11175_s6 + $0x294] ss:$8 sps:$4 sm:$0xff]  }
 0x18a   : > { %8082 = vmatprep.subr.bf16.mxu0 %v9399_v1  ;;  %v9483_v1 = vld [vmem:[%s11175_s6 + $0xa94] ss:$8 sps:$4 sm:$0xff]  }
 0x18c   : > { %7755 = vmatpush1.bf16.msra.mxu1 %v9394_v2  ;;  %v9478_v2 = vld [vmem:[%s11175_s6 + $0x290] ss:$8 sps:$4 sm:$0xff]  }
 0x18d   : > { %8083 = vmatpush1.bf16.msra.mxu0 %v9397_v3  ;;  %7756 = vmatprep.subr.bf16.mxu1 %v9402_v4  ;;  %v9481_v3 = vld [vmem:[%s11175_s6 + $0xa90] ss:$8 sps:$4 sm:$0xff]   ;;  %v9486_v4 = vld [vmem:[%s11175_s6 + $0x2a4] ss:$8 sps:$4 sm:$0xff]  }
 0x18e   : > { %8084 = vmatprep.subr.bf16.mxu0 %v9405_v5  ;;  %v9489_v5 = vld [vmem:[%s11175_s6 + $0xaa4] ss:$8 sps:$4 sm:$0xff]  }
 0x190   : > { %7757 = vmatpush1.bf16.msra.mxu1 %v9400_v6  ;;  %v9484_v6 = vld [vmem:[%s11175_s6 + $0x2a0] ss:$8 sps:$4 sm:$0xff]  }
 0x191   : > { %8085 = vmatpush1.bf16.msra.mxu0 %v9403_v7  ;;  %7758 = vmatprep.subr.bf16.mxu1 %v9408_v8  ;;  %v9487_v7 = vld [vmem:[%s11175_s6 + $0xaa0] ss:$8 sps:$4 sm:$0xff]   ;;  %v9492_v8 = vld [vmem:[%s11175_s6 + $0x2b4] ss:$8 sps:$4 sm:$0xff]  }
 0x192   : > { %8086 = vmatprep.subr.bf16.mxu0 %v9411_v9  ;;  %v9495_v9 = vld [vmem:[%s11175_s6 + $0xab4] ss:$8 sps:$4 sm:$0xff]  }
 0x194   : > { %7759 = vmatpush1.bf16.msra.mxu1 %v9406_v10  ;;  %v9490_v10 = vld [vmem:[%s11175_s6 + $0x2b0] ss:$8 sps:$4 sm:$0xff]  }
 0x195   : > { %8087 = vmatpush1.bf16.msra.mxu0 %v9409_v11  ;;  %7760 = vmatprep.subr.bf16.mxu1 %v9414_v12  ;;  %v9493_v11 = vld [vmem:[%s11175_s6 + $0xab0] ss:$8 sps:$4 sm:$0xff]   ;;  %v9498_v12 = vld [vmem:[%s11175_s6 + $0x2c4] ss:$8 sps:$4 sm:$0xff]  }
 0x196   : > { %8088 = vmatprep.subr.bf16.mxu0 %v9417_v13  ;;  %v9501_v13 = vld [vmem:[%s11175_s6 + $0xac4] ss:$8 sps:$4 sm:$0xff]  }
 0x198   : > { %7761 = vmatpush1.bf16.msra.mxu1 %v9412_v14  ;;  %v9496_v14 = vld [vmem:[%s11175_s6 + $0x2c0] ss:$8 sps:$4 sm:$0xff]  }
 0x199   : > { %8089 = vmatpush1.bf16.msra.mxu0 %v9415_v15  ;;  %7762 = vmatprep.subr.bf16.mxu1 %v9420_v18  ;;  %v9499_v15 = vld [vmem:[%s11175_s6 + $0xac0] ss:$8 sps:$4 sm:$0xff]   ;;  %v9504_v18 = vld [vmem:[%s11175_s6 + $0x2d4] ss:$8 sps:$4 sm:$0xff]  }
 0x19a   : > { %8090 = vmatprep.subr.bf16.mxu0 %v9423_v19  ;;  %v9507_v19 = vld [vmem:[%s11175_s6 + $0xad4] ss:$8 sps:$4 sm:$0xff]  }
 0x19c   : > { %7763 = vmatpush1.bf16.msra.mxu1 %v9418_v20  ;;  %v9502_v20 = vld [vmem:[%s11175_s6 + $0x2d0] ss:$8 sps:$4 sm:$0xff]  }
 0x19d   : > { %8091 = vmatpush1.bf16.msra.mxu0 %v9421_v21  ;;  %7773 = vmatprep.subr.bf16.mxu1 %v9426_v22  ;;  %v9505_v21 = vld [vmem:[%s11175_s6 + $0xad0] ss:$8 sps:$4 sm:$0xff]   ;;  %v9510_v22 = vld [vmem:[%s11175_s6 + $0x2e4] ss:$8 sps:$4 sm:$0xff]  }
 0x19e   : > { %8101 = vmatprep.subr.bf16.mxu0 %v9429_v23  ;;  %v9513_v23 = vld [vmem:[%s11175_s6 + $0xae4] ss:$8 sps:$4 sm:$0xff]  }
 0x19f   : > { %7765 = vmatmul.mubr.bf16.vlgmr.msra.gmra.mrb[0].mxu1 %v11263_v16  ;;  %v9441_v16 = vld [vmem:[%s11175_s6 + $0xa24] ss:$8 sps:$4 sm:$0xff]  }
 0x1a0   : > { %8093 = vmatmul.mubr.bf16.vlgmr.msra.gmra.mrb[0].mxu0 %v11266_v17  ;;  %7774 = vmatpush1.bf16.msra.mxu1 %v9424_v24  ;;  %v5063_v17 = vcombine.high %v11358_v34, %v11358_v34  ;;  %v9508_v24 = vld [vmem:[%s11175_s6 + $0x2e0] ss:$8 sps:$4 sm:$0xff]  }
 0x1a1   : > { %8102 = vmatpush1.bf16.msra.mxu0 %v9427_v25  ;;  %7775 = vmatprep.subr.bf16.mxu1 %v9432_v26  ;;  %v9511_v25 = vld [vmem:[%s11175_s6 + $0xae0] ss:$8 sps:$4 sm:$0xff]   ;;  %v9516_v26 = vld [vmem:[%s11175_s6 + $0x2f4] ss:$8 sps:$4 sm:$0xff]  }
 0x1a2   : > { %8103 = vmatprep.subr.bf16.mxu0 %v9435_v28  ;;  %7805 = vmatprep.mubr.bf16.mxu1 %v4995_v33  ;;  %v9519_v28 = vld [vmem:[%s11175_s6 + $0xaf4] ss:$8 sps:$4 sm:$0xff]   ;;  %v9514_v33 = vld [vmem:[%s11175_s6 + $0x2f0] ss:$8 sps:$4 sm:$0xff]  }
 0x1a3   : > { %8133 = vmatprep.mubr.bf16.mxu0 %v5063_v17  ;;  %v9525_v17 = vld [vmem:[%s11175_s6 + $0xb04] ss:$8 sps:$4 sm:$0xff]  }
 0x1a4   : > { %7776 = vmatpush1.bf16.msra.mxu1 %v9430_v31  ;;  %v4980_v31 = vcombine.high %v11340_v27, %v11340_v27 }
 0x1a5   : > { %8104 = vmatpush1.bf16.msra.mxu0 %v9433_v32  ;;  %7777 = vmatprep.subr.bf16.mxu1 %v9438_v35  ;;  %v5048_v32 = vcombine.high %v11348_v30, %v11348_v30  ;;  %v9517_v35 = vld [vmem:[%s11175_s6 + $0xaf0] ss:$8 sps:$4 sm:$0xff]   ;;  %v9523_v30 = vld [vmem:[%s11175_s6 + $0xb00] ss:$8 sps:$4 sm:$0xff]  }
 0x1a6   : > { %8105 = vmatprep.subr.bf16.mxu0 %v9441_v16  ;;  %v9522_v16 = vld [vmem:[%s11175_s6 + $0x304] ss:$8 sps:$4 sm:$0xff]  }
 0x1a7   : > { %v11428_v27 = vrot.slane %v5048_v32, %v11234_v49  ;;  %v9601_v32 = vld [vmem:[%s11175_s6 + $0xbd0] ss:$8 sps:$4 sm:$0xff]  }
 0x1a8   : > { %7778 = vmatpush1.bf16.msra.mxu1 %v9436_v36  ;;  %v11425_v36 = vrot.slane %v4980_v31, %v11234_v49  ;;  %v9598_v31 = vld [vmem:[%s11175_s6 + $0x3d0] ss:$8 sps:$4 sm:$0xff]  }
 0x1a9   : > { %8106 = vmatpush1.bf16.msra.mxu0 %v9439_v37  ;;  %7779 = vmatprep.subr.bf16.mxu1 %v9444_v38  ;;  %v9520_v37 = vld [vmem:[%s11175_s6 + $0x300] ss:$8 sps:$4 sm:$0xff]   ;;  %v9528_v38 = vld [vmem:[%s11175_s6 + $0x314] ss:$8 sps:$4 sm:$0xff]  }
 0x1aa   : > { %8107 = vmatprep.subr.bf16.mxu0 %v9447_v39  ;;  %v9531_v39 = vld [vmem:[%s11175_s6 + $0xb14] ss:$8 sps:$4 sm:$0xff]  }
 0x1ac   : > { %7780 = vmatpush1.bf16.msra.mxu1 %v9442_v40  ;;  %v4996_v40 = vcombine.high %v11425_v36, %v11425_v36 }
 0x1ad   : > { %8108 = vmatpush1.bf16.msra.mxu0 %v9445_v41  ;;  %7781 = vmatprep.subr.bf16.mxu1 %v9450_v42  ;;  %v5064_v41 = vcombine.high %v11428_v27, %v11428_v27  ;;  %v9526_v42 = vld [vmem:[%s11175_s6 + $0x310] ss:$8 sps:$4 sm:$0xff]  }
 0x1ae   : > { %8109 = vmatprep.subr.bf16.mxu0 %v9453_v44  ;;  %v9529_v44 = vld [vmem:[%s11175_s6 + $0xb10] ss:$8 sps:$4 sm:$0xff]  }
 0x1b0   : > { %7782 = vmatpush1.bf16.msra.mxu1 %v9448_v45  ;;  %v9534_v45 = vld [vmem:[%s11175_s6 + $0x324] ss:$8 sps:$4 sm:$0xff]  }
 0x1b1   : > { %8110 = vmatpush1.bf16.msra.mxu0 %v9451_v46  ;;  %7783 = vmatprep.subr.bf16.mxu1 %v9456_v47  ;;  %v9537_v46 = vld [vmem:[%s11175_s6 + $0xb24] ss:$8 sps:$4 sm:$0xff]   ;;  %v9532_v47 = vld [vmem:[%s11175_s6 + $0x320] ss:$8 sps:$4 sm:$0xff]  }
 0x1b2   : > { %8111 = vmatprep.subr.bf16.mxu0 %v9459_v48  ;;  %v9543_v48 = vld [vmem:[%s11175_s6 + $0xb34] ss:$8 sps:$4 sm:$0xff]  }
 0x1b4   : > { %7784 = vmatpush1.bf16.msra.mxu1 %v9454_v50  ;;  %v9538_v50 = vld [vmem:[%s11175_s6 + $0x330] ss:$8 sps:$4 sm:$0xff]  }
 0x1b5   : > { %8112 = vmatpush1.bf16.msra.mxu0 %v9457_v51  ;;  %7785 = vmatprep.subr.bf16.mxu1 %v9462_v52  ;;  %v9541_v51 = vld [vmem:[%s11175_s6 + $0xb30] ss:$8 sps:$4 sm:$0xff]   ;;  %v9546_v52 = vld [vmem:[%s11175_s6 + $0x344] ss:$8 sps:$4 sm:$0xff]  }
 0x1b6   : > { %8113 = vmatprep.subr.bf16.mxu0 %v9465_v53  ;;  %v9549_v53 = vld [vmem:[%s11175_s6 + $0xb44] ss:$8 sps:$4 sm:$0xff]  }
 0x1b8   : > { %7786 = vmatpush1.bf16.msra.mxu1 %v9460_v54  ;;  %v9544_v54 = vld [vmem:[%s11175_s6 + $0x340] ss:$8 sps:$4 sm:$0xff]  }
 0x1b9   : > { %8114 = vmatpush1.bf16.msra.mxu0 %v9463_v55  ;;  %7787 = vmatprep.subr.bf16.mxu1 %v9468_v56  ;;  %v9547_v55 = vld [vmem:[%s11175_s6 + $0xb40] ss:$8 sps:$4 sm:$0xff]   ;;  %v9552_v56 = vld [vmem:[%s11175_s6 + $0x354] ss:$8 sps:$4 sm:$0xff]  }
 0x1ba   : > { %8115 = vmatprep.subr.bf16.mxu0 %v9471_v57  ;;  %v9555_v57 = vld [vmem:[%s11175_s6 + $0xb54] ss:$8 sps:$4 sm:$0xff]  }
 0x1bc   : > { %7788 = vmatpush1.bf16.msra.mxu1 %v9466_v58  ;;  %v9550_v58 = vld [vmem:[%s11175_s6 + $0x350] ss:$8 sps:$4 sm:$0xff]  }
 0x1bd   : > { %8116 = vmatpush1.bf16.msra.mxu0 %v9469_v59  ;;  %7789 = vmatprep.subr.bf16.mxu1 %v9474_v60  ;;  %v9553_v59 = vld [vmem:[%s11175_s6 + $0xb50] ss:$8 sps:$4 sm:$0xff]   ;;  %v9558_v60 = vld [vmem:[%s11175_s6 + $0x364] ss:$8 sps:$4 sm:$0xff]  }
 0x1be   : > { %8117 = vmatprep.subr.bf16.mxu0 %v9477_v61  ;;  %v9561_v61 = vld [vmem:[%s11175_s6 + $0xb64] ss:$8 sps:$4 sm:$0xff]  }
 0x1c0   : > { %7790 = vmatpush1.bf16.msra.mxu1 %v9472_v62  ;;  %v9556_v62 = vld [vmem:[%s11175_s6 + $0x360] ss:$8 sps:$4 sm:$0xff]  }
 0x1c1   : > { %8118 = vmatpush1.bf16.msra.mxu0 %v9475_v63  ;;  %7791 = vmatprep.subr.bf16.mxu1 %v9480_v0  ;;  %v9559_v63 = vld [vmem:[%s11175_s6 + $0xb60] ss:$8 sps:$4 sm:$0xff]   ;;  %v9564_v0 = vld [vmem:[%s11175_s6 + $0x374] ss:$8 sps:$4 sm:$0xff]  }
 0x1c2   : > { %8119 = vmatprep.subr.bf16.mxu0 %v9483_v1  ;;  %v9567_v1 = vld [vmem:[%s11175_s6 + $0xb74] ss:$8 sps:$4 sm:$0xff]  }
 0x1c4   : > { %7792 = vmatpush1.bf16.msra.mxu1 %v9478_v2  ;;  %v9562_v2 = vld [vmem:[%s11175_s6 + $0x370] ss:$8 sps:$4 sm:$0xff]  }
 0x1c5   : > { %8120 = vmatpush1.bf16.msra.mxu0 %v9481_v3  ;;  %7793 = vmatprep.subr.bf16.mxu1 %v9486_v4  ;;  %v9565_v3 = vld [vmem:[%s11175_s6 + $0xb70] ss:$8 sps:$4 sm:$0xff]   ;;  %v9570_v4 = vld [vmem:[%s11175_s6 + $0x384] ss:$8 sps:$4 sm:$0xff]  }
 0x1c6   : > { %8121 = vmatprep.subr.bf16.mxu0 %v9489_v5  ;;  %v9573_v5 = vld [vmem:[%s11175_s6 + $0xb84] ss:$8 sps:$4 sm:$0xff]  }
 0x1c8   : > { %7794 = vmatpush1.bf16.msra.mxu1 %v9484_v6  ;;  %v9568_v6 = vld [vmem:[%s11175_s6 + $0x380] ss:$8 sps:$4 sm:$0xff]  }
 0x1c9   : > { %8122 = vmatpush1.bf16.msra.mxu0 %v9487_v7  ;;  %7795 = vmatprep.subr.bf16.mxu1 %v9492_v8  ;;  %v9571_v7 = vld [vmem:[%s11175_s6 + $0xb80] ss:$8 sps:$4 sm:$0xff]   ;;  %v9576_v8 = vld [vmem:[%s11175_s6 + $0x394] ss:$8 sps:$4 sm:$0xff]  }
 0x1ca   : > { %8123 = vmatprep.subr.bf16.mxu0 %v9495_v9  ;;  %v9579_v9 = vld [vmem:[%s11175_s6 + $0xb94] ss:$8 sps:$4 sm:$0xff]  }
 0x1cc   : > { %7796 = vmatpush1.bf16.msra.mxu1 %v9490_v10  ;;  %v9574_v10 = vld [vmem:[%s11175_s6 + $0x390] ss:$8 sps:$4 sm:$0xff]  }
 0x1cd   : > { %8124 = vmatpush1.bf16.msra.mxu0 %v9493_v11  ;;  %7797 = vmatprep.subr.bf16.mxu1 %v9498_v12  ;;  %v9577_v11 = vld [vmem:[%s11175_s6 + $0xb90] ss:$8 sps:$4 sm:$0xff]   ;;  %v9582_v12 = vld [vmem:[%s11175_s6 + $0x3a4] ss:$8 sps:$4 sm:$0xff]  }
 0x1ce   : > { %8125 = vmatprep.subr.bf16.mxu0 %v9501_v13  ;;  %v9585_v13 = vld [vmem:[%s11175_s6 + $0xba4] ss:$8 sps:$4 sm:$0xff]  }
 0x1d0   : > { %7798 = vmatpush1.bf16.msra.mxu1 %v9496_v14  ;;  %v9580_v14 = vld [vmem:[%s11175_s6 + $0x3a0] ss:$8 sps:$4 sm:$0xff]  }
 0x1d1   : > { %8126 = vmatpush1.bf16.msra.mxu0 %v9499_v15  ;;  %7799 = vmatprep.subr.bf16.mxu1 %v9504_v18  ;;  %v9583_v15 = vld [vmem:[%s11175_s6 + $0xba0] ss:$8 sps:$4 sm:$0xff]   ;;  %v9588_v18 = vld [vmem:[%s11175_s6 + $0x3b4] ss:$8 sps:$4 sm:$0xff]  }
 0x1d2   : > { %8127 = vmatprep.subr.bf16.mxu0 %v9507_v19  ;;  %v9591_v19 = vld [vmem:[%s11175_s6 + $0xbb4] ss:$8 sps:$4 sm:$0xff]  }
 0x1d4   : > { %7800 = vmatpush1.bf16.msra.mxu1 %v9502_v20  ;;  %v9586_v20 = vld [vmem:[%s11175_s6 + $0x3b0] ss:$8 sps:$4 sm:$0xff]  }
 0x1d5   : > { %8128 = vmatpush1.bf16.msra.mxu0 %v9505_v21  ;;  %7801 = vmatprep.subr.bf16.mxu1 %v9510_v22  ;;  %v9589_v21 = vld [vmem:[%s11175_s6 + $0xbb0] ss:$8 sps:$4 sm:$0xff]   ;;  %v9594_v22 = vld [vmem:[%s11175_s6 + $0x3c4] ss:$8 sps:$4 sm:$0xff]  }
 0x1d6   : > { %8129 = vmatprep.subr.bf16.mxu0 %v9513_v23  ;;  %v9597_v23 = vld [vmem:[%s11175_s6 + $0xbc4] ss:$8 sps:$4 sm:$0xff]  }
 0x1d8   : > { %7802 = vmatpush1.bf16.msra.mxu1 %v9508_v24  ;;  %v9592_v24 = vld [vmem:[%s11175_s6 + $0x3c0] ss:$8 sps:$4 sm:$0xff]  }
 0x1d9   : > { %8130 = vmatpush1.bf16.msra.mxu0 %v9511_v25  ;;  %7803 = vmatprep.subr.bf16.mxu1 %v9516_v26  ;;  %v9595_v25 = vld [vmem:[%s11175_s6 + $0xbc0] ss:$8 sps:$4 sm:$0xff]   ;;  %v9600_v26 = vld [vmem:[%s11175_s6 + $0x3d4] ss:$8 sps:$4 sm:$0xff]  }
 0x1da   : > { %8131 = vmatprep.subr.bf16.mxu0 %v9519_v28  ;;  %v9603_v28 = vld [vmem:[%s11175_s6 + $0xbd4] ss:$8 sps:$4 sm:$0xff]  }
 0x1dc   : > { %7804 = vmatpush1.bf16.msra.mxu1 %v9514_v33  ;;  %v9606_v33 = vld [vmem:[%s11175_s6 + $0x3e4] ss:$8 sps:$4 sm:$0xff]  }
 0x1dd   : > { %8132 = vmatpush1.bf16.msra.mxu0 %v9517_v35  ;;  %7814 = vmatprep.subr.bf16.mxu1 %v9522_v16  ;;  %v9609_v35 = vld [vmem:[%s11175_s6 + $0xbe4] ss:$8 sps:$4 sm:$0xff]   ;;  %v9604_v16 = vld [vmem:[%s11175_s6 + $0x3e0] ss:$8 sps:$4 sm:$0xff]  }
 0x1de   : > { %8142 = vmatprep.subr.bf16.mxu0 %v9525_v17  ;;  %v9607_v17 = vld [vmem:[%s11175_s6 + $0xbe0] ss:$8 sps:$4 sm:$0xff]  }
 0x1df   : > { %7806 = vmatmul.mubr.bf16.vlgmr.msra.gmra.mrb[0].mxu1 %v11345_v29  ;;  %v9535_v29 = vld [vmem:[%s11175_s6 + $0xb20] ss:$8 sps:$4 sm:$0xff]  }
 0x1e0   : > { %8134 = vmatmul.mubr.bf16.vlgmr.msra.gmra.mrb[0].mxu0 %v11358_v34  ;;  %7815 = vmatpush1.bf16.msra.mxu1 %v9520_v37  ;;  %v9540_v34 = vld [vmem:[%s11175_s6 + $0x334] ss:$8 sps:$4 sm:$0xff]  }
 0x1e1   : > { %8143 = vmatpush1.bf16.msra.mxu0 %v9523_v30  ;;  %7816 = vmatprep.subr.bf16.mxu1 %v9528_v38  ;;  %v9612_v37 = vld [vmem:[%s11175_s6 + $0x3f4] ss:$8 sps:$4 sm:$0xff]  }
 0x1e2   : > { %8144 = vmatprep.subr.bf16.mxu0 %v9531_v39  ;;  %7846 = vmatprep.mubr.bf16.mxu1 %v4996_v40  ;;  %v9615_v30 = vld [vmem:[%s11175_s6 + $0xbf4] ss:$8 sps:$4 sm:$0xff]   ;;  %v9610_v40 = vld [vmem:[%s11175_s6 + $0x3f0] ss:$8 sps:$4 sm:$0xff]  }
 0x1e3   : > { %8174 = vmatprep.mubr.bf16.mxu0 %v5064_v41  ;;  %v11497_v38 = vld [vmem:[%s11231_s10 + $0x10] sm:$0xff] }
 0x1e4   : > { %7817 = vmatpush1.bf16.msra.mxu1 %v9526_v42  ;;  %v11500_v39 = vld [vmem:[%s11231_s10 + $0x30] sm:$0xff]  ;;  %v9619_v42 = vld [vmem:[%s11175_s6 + $0x404] ss:$8 sps:$4 sm:$0xff]  }
 0x1e5   : > { %8145 = vmatpush1.bf16.msra.mxu0 %v9529_v44  ;;  %7818 = vmatprep.subr.bf16.mxu1 %v9534_v45  ;;  %v9613_v41 = vld [vmem:[%s11175_s6 + $0xbf0] ss:$8 sps:$4 sm:$0xff]   ;;  %v9623_v44 = vld [vmem:[%s11175_s6 + $0xc04] ss:$8 sps:$4 sm:$0xff]   ;;  %v11508_v45 = vrot.slane %v11497_v38, %v11234_v49 }
 0x1e6   : > { %8146 = vmatprep.subr.bf16.mxu0 %v9537_v46  ;;  %v11512_v46 = vrot.slane %v11500_v39, %v11234_v49 }
 0x1e8   : > { %7819 = vmatpush1.bf16.msra.mxu1 %v9532_v47  ;;  %v9617_v47 = vld [vmem:[%s11175_s6 + $0x400] ss:$8 sps:$4 sm:$0xff]  }
 0x1e9   : > { %8147 = vmatpush1.bf16.msra.mxu0 %v9535_v29  ;;  %7820 = vmatprep.subr.bf16.mxu1 %v9540_v34  ;;  %v9621_v29 = vld [vmem:[%s11175_s6 + $0xc00] ss:$8 sps:$4 sm:$0xff]   ;;  %v9626_v34 = vld [vmem:[%s11175_s6 + $0x414] ss:$8 sps:$4 sm:$0xff]  }
 0x1ea   : > { %8148 = vmatprep.subr.bf16.mxu0 %v9543_v48  ;;  %v9629_v48 = vld [vmem:[%s11175_s6 + $0xc14] ss:$8 sps:$4 sm:$0xff]  }
 0x1ec   : > { %7821 = vmatpush1.bf16.msra.mxu1 %v9538_v50  ;;  %v5012_v50 = vcombine.high %v11508_v45, %v11508_v45 }
 0x1ed   : > { %8149 = vmatpush1.bf16.msra.mxu0 %v9541_v51  ;;  %7822 = vmatprep.subr.bf16.mxu1 %v9546_v52  ;;  %v5080_v51 = vcombine.high %v11512_v46, %v11512_v46  ;;  %v9624_v52 = vld [vmem:[%s11175_s6 + $0x410] ss:$8 sps:$4 sm:$0xff]  }
 0x1ee   : > { %8150 = vmatprep.subr.bf16.mxu0 %v9549_v53  ;;  %v9627_v53 = vld [vmem:[%s11175_s6 + $0xc10] ss:$8 sps:$4 sm:$0xff]  }
 0x1f0   : > { %7823 = vmatpush1.bf16.msra.mxu1 %v9544_v54  ;;  %v9632_v54 = vld [vmem:[%s11175_s6 + $0x424] ss:$8 sps:$4 sm:$0xff]  }
 0x1f1   : > { %8151 = vmatpush1.bf16.msra.mxu0 %v9547_v55  ;;  %7824 = vmatprep.subr.bf16.mxu1 %v9552_v56  ;;  %v9635_v55 = vld [vmem:[%s11175_s6 + $0xc24] ss:$8 sps:$4 sm:$0xff]   ;;  %v9638_v56 = vld [vmem:[%s11175_s6 + $0x434] ss:$8 sps:$4 sm:$0xff]  }
 0x1f2   : > { %8152 = vmatprep.subr.bf16.mxu0 %v9555_v57  ;;  %v9641_v57 = vld [vmem:[%s11175_s6 + $0xc34] ss:$8 sps:$4 sm:$0xff]  }
 0x1f4   : > { %7825 = vmatpush1.bf16.msra.mxu1 %v9550_v58  ;;  %v9636_v58 = vld [vmem:[%s11175_s6 + $0x430] ss:$8 sps:$4 sm:$0xff]  }
 0x1f5   : > { %8153 = vmatpush1.bf16.msra.mxu0 %v9553_v59  ;;  %7826 = vmatprep.subr.bf16.mxu1 %v9558_v60  ;;  %v9639_v59 = vld [vmem:[%s11175_s6 + $0xc30] ss:$8 sps:$4 sm:$0xff]   ;;  %v9644_v60 = vld [vmem:[%s11175_s6 + $0x444] ss:$8 sps:$4 sm:$0xff]  }
 0x1f6   : > { %8154 = vmatprep.subr.bf16.mxu0 %v9561_v61  ;;  %v9647_v61 = vld [vmem:[%s11175_s6 + $0xc44] ss:$8 sps:$4 sm:$0xff]  }
 0x1f8   : > { %7827 = vmatpush1.bf16.msra.mxu1 %v9556_v62  ;;  %v9642_v62 = vld [vmem:[%s11175_s6 + $0x440] ss:$8 sps:$4 sm:$0xff]  }
 0x1f9   : > { %8155 = vmatpush1.bf16.msra.mxu0 %v9559_v63  ;;  %7828 = vmatprep.subr.bf16.mxu1 %v9564_v0  ;;  %v9645_v63 = vld [vmem:[%s11175_s6 + $0xc40] ss:$8 sps:$4 sm:$0xff]   ;;  %v9650_v0 = vld [vmem:[%s11175_s6 + $0x454] ss:$8 sps:$4 sm:$0xff]  }
 0x1fa   : > { %8156 = vmatprep.subr.bf16.mxu0 %v9567_v1  ;;  %v9653_v1 = vld [vmem:[%s11175_s6 + $0xc54] ss:$8 sps:$4 sm:$0xff]  }
 0x1fc   : > { %7829 = vmatpush1.bf16.msra.mxu1 %v9562_v2  ;;  %v9648_v2 = vld [vmem:[%s11175_s6 + $0x450] ss:$8 sps:$4 sm:$0xff]  }
 0x1fd   : > { %8157 = vmatpush1.bf16.msra.mxu0 %v9565_v3  ;;  %7830 = vmatprep.subr.bf16.mxu1 %v9570_v4  ;;  %v9651_v3 = vld [vmem:[%s11175_s6 + $0xc50] ss:$8 sps:$4 sm:$0xff]   ;;  %v9656_v4 = vld [vmem:[%s11175_s6 + $0x464] ss:$8 sps:$4 sm:$0xff]  }
 0x1fe   : > { %8158 = vmatprep.subr.bf16.mxu0 %v9573_v5  ;;  %v9659_v5 = vld [vmem:[%s11175_s6 + $0xc64] ss:$8 sps:$4 sm:$0xff]  }
 0x200   : > { %7831 = vmatpush1.bf16.msra.mxu1 %v9568_v6  ;;  %v9654_v6 = vld [vmem:[%s11175_s6 + $0x460] ss:$8 sps:$4 sm:$0xff]  }
 0x201   : > { %8159 = vmatpush1.bf16.msra.mxu0 %v9571_v7  ;;  %7832 = vmatprep.subr.bf16.mxu1 %v9576_v8  ;;  %v9657_v7 = vld [vmem:[%s11175_s6 + $0xc60] ss:$8 sps:$4 sm:$0xff]   ;;  %v9662_v8 = vld [vmem:[%s11175_s6 + $0x474] ss:$8 sps:$4 sm:$0xff]  }
 0x202   : > { %8160 = vmatprep.subr.bf16.mxu0 %v9579_v9  ;;  %v9665_v9 = vld [vmem:[%s11175_s6 + $0xc74] ss:$8 sps:$4 sm:$0xff]  }
 0x204   : > { %7833 = vmatpush1.bf16.msra.mxu1 %v9574_v10  ;;  %v9660_v10 = vld [vmem:[%s11175_s6 + $0x470] ss:$8 sps:$4 sm:$0xff]  }
 0x205   : > { %8161 = vmatpush1.bf16.msra.mxu0 %v9577_v11  ;;  %7834 = vmatprep.subr.bf16.mxu1 %v9582_v12  ;;  %v9663_v11 = vld [vmem:[%s11175_s6 + $0xc70] ss:$8 sps:$4 sm:$0xff]   ;;  %v9668_v12 = vld [vmem:[%s11175_s6 + $0x484] ss:$8 sps:$4 sm:$0xff]  }
 0x206   : > { %8162 = vmatprep.subr.bf16.mxu0 %v9585_v13  ;;  %v9671_v13 = vld [vmem:[%s11175_s6 + $0xc84] ss:$8 sps:$4 sm:$0xff]  }
 0x208   : > { %7835 = vmatpush1.bf16.msra.mxu1 %v9580_v14  ;;  %v9666_v14 = vld [vmem:[%s11175_s6 + $0x480] ss:$8 sps:$4 sm:$0xff]  }
 0x209   : > { %8163 = vmatpush1.bf16.msra.mxu0 %v9583_v15  ;;  %7836 = vmatprep.subr.bf16.mxu1 %v9588_v18  ;;  %v9669_v15 = vld [vmem:[%s11175_s6 + $0xc80] ss:$8 sps:$4 sm:$0xff]   ;;  %v9674_v18 = vld [vmem:[%s11175_s6 + $0x494] ss:$8 sps:$4 sm:$0xff]  }
 0x20a   : > { %8164 = vmatprep.subr.bf16.mxu0 %v9591_v19  ;;  %v9677_v19 = vld [vmem:[%s11175_s6 + $0xc94] ss:$8 sps:$4 sm:$0xff]  }
 0x20c   : > { %7837 = vmatpush1.bf16.msra.mxu1 %v9586_v20  ;;  %v9672_v20 = vld [vmem:[%s11175_s6 + $0x490] ss:$8 sps:$4 sm:$0xff]  }
 0x20d   : > { %8165 = vmatpush1.bf16.msra.mxu0 %v9589_v21  ;;  %7838 = vmatprep.subr.bf16.mxu1 %v9594_v22  ;;  %v9675_v21 = vld [vmem:[%s11175_s6 + $0xc90] ss:$8 sps:$4 sm:$0xff]   ;;  %v9680_v22 = vld [vmem:[%s11175_s6 + $0x4a4] ss:$8 sps:$4 sm:$0xff]  }
 0x20e   : > { %8166 = vmatprep.subr.bf16.mxu0 %v9597_v23  ;;  %v9683_v23 = vld [vmem:[%s11175_s6 + $0xca4] ss:$8 sps:$4 sm:$0xff]  }
 0x210   : > { %7839 = vmatpush1.bf16.msra.mxu1 %v9592_v24  ;;  %v9678_v24 = vld [vmem:[%s11175_s6 + $0x4a0] ss:$8 sps:$4 sm:$0xff]  }
 0x211   : > { %8167 = vmatpush1.bf16.msra.mxu0 %v9595_v25  ;;  %7840 = vmatprep.subr.bf16.mxu1 %v9600_v26  ;;  %v9681_v25 = vld [vmem:[%s11175_s6 + $0xca0] ss:$8 sps:$4 sm:$0xff]   ;;  %v9686_v26 = vld [vmem:[%s11175_s6 + $0x4b4] ss:$8 sps:$4 sm:$0xff]  }
 0x212   : > { %8168 = vmatprep.subr.bf16.mxu0 %v9603_v28  ;;  %v9689_v28 = vld [vmem:[%s11175_s6 + $0xcb4] ss:$8 sps:$4 sm:$0xff]  }
 0x214   : > { %7841 = vmatpush1.bf16.msra.mxu1 %v9598_v31  ;;  %v9684_v31 = vld [vmem:[%s11175_s6 + $0x4b0] ss:$8 sps:$4 sm:$0xff]  }
 0x215   : > { %8169 = vmatpush1.bf16.msra.mxu0 %v9601_v32  ;;  %7842 = vmatprep.subr.bf16.mxu1 %v9606_v33  ;;  %v9687_v32 = vld [vmem:[%s11175_s6 + $0xcb0] ss:$8 sps:$4 sm:$0xff]   ;;  %v9692_v33 = vld [vmem:[%s11175_s6 + $0x4c4] ss:$8 sps:$4 sm:$0xff]  }
 0x216   : > { %8170 = vmatprep.subr.bf16.mxu0 %v9609_v35  ;;  %v9695_v35 = vld [vmem:[%s11175_s6 + $0xcc4] ss:$8 sps:$4 sm:$0xff]  }
 0x218   : > { %7843 = vmatpush1.bf16.msra.mxu1 %v9604_v16  ;;  %v9690_v16 = vld [vmem:[%s11175_s6 + $0x4c0] ss:$8 sps:$4 sm:$0xff]  }
 0x219   : > { %8171 = vmatpush1.bf16.msra.mxu0 %v9607_v17  ;;  %7844 = vmatprep.subr.bf16.mxu1 %v9612_v37  ;;  %v9693_v17 = vld [vmem:[%s11175_s6 + $0xcc0] ss:$8 sps:$4 sm:$0xff]   ;;  %v9698_v37 = vld [vmem:[%s11175_s6 + $0x4d4] ss:$8 sps:$4 sm:$0xff]  }
 0x21a   : > { %8172 = vmatprep.subr.bf16.mxu0 %v9615_v30  ;;  %v9701_v30 = vld [vmem:[%s11175_s6 + $0xcd4] ss:$8 sps:$4 sm:$0xff]  }
 0x21c   : > { %7845 = vmatpush1.bf16.msra.mxu1 %v9610_v40  ;;  %v9696_v40 = vld [vmem:[%s11175_s6 + $0x4d0] ss:$8 sps:$4 sm:$0xff]  }
 0x21d   : > { %8173 = vmatpush1.bf16.msra.mxu0 %v9613_v41  ;;  %7855 = vmatprep.subr.bf16.mxu1 %v9619_v42  ;;  %v9699_v41 = vld [vmem:[%s11175_s6 + $0xcd0] ss:$8 sps:$4 sm:$0xff]   ;;  %v9704_v42 = vld [vmem:[%s11175_s6 + $0x4e4] ss:$8 sps:$4 sm:$0xff]  }
 0x21e   : > { %8183 = vmatprep.subr.bf16.mxu0 %v9623_v44  ;;  %v9707_v44 = vld [vmem:[%s11175_s6 + $0xce4] ss:$8 sps:$4 sm:$0xff]  }
 0x21f   : > { %7847 = vmatmul.mubr.bf16.vlgmr.msra.gmra.mrb[0].mxu1 %v11425_v36  ;;  %v9630_v36 = vld [vmem:[%s11175_s6 + $0x420] ss:$8 sps:$4 sm:$0xff]  }
 0x220   : > { %8175 = vmatmul.mubr.bf16.vlgmr.msra.gmra.mrb[0].mxu0 %v11428_v27  ;;  %7856 = vmatpush1.bf16.msra.mxu1 %v9617_v47  ;;  %v9633_v27 = vld [vmem:[%s11175_s6 + $0xc20] ss:$8 sps:$4 sm:$0xff]  }
 0x221   : > { %8184 = vmatpush1.bf16.msra.mxu0 %v9621_v29  ;;  %7857 = vmatprep.subr.bf16.mxu1 %v9626_v34  ;;  %v9702_v47 = vld [vmem:[%s11175_s6 + $0x4e0] ss:$8 sps:$4 sm:$0xff]   ;;  %v9710_v34 = vld [vmem:[%s11175_s6 + $0x4f4] ss:$8 sps:$4 sm:$0xff]  }
 0x222   : > { %8185 = vmatprep.subr.bf16.mxu0 %v9629_v48  ;;  %7887 = vmatprep.mubr.bf16.mxu1 %v5012_v50  ;;  %v9705_v29 = vld [vmem:[%s11175_s6 + $0xce0] ss:$8 sps:$4 sm:$0xff]   ;;  %v9713_v48 = vld [vmem:[%s11175_s6 + $0xcf4] ss:$8 sps:$4 sm:$0xff]   ;;  %v4997_v50 = vcombine.high %v11497_v38, %v11497_v38 }
 0x223   : > { %8215 = vmatprep.mubr.bf16.mxu0 %v5080_v51  ;;  %v5065_v51 = vcombine.high %v11500_v39, %v11500_v39  ;;  %v9714_v38 = vld [vmem:[%s11175_s6 + $0x500] ss:$8 sps:$4 sm:$0xff]  }
 0x224   : > { %7858 = vmatpush1.bf16.msra.mxu1 %v9624_v52  ;;  %v9708_v52 = vld [vmem:[%s11175_s6 + $0x4f0] ss:$8 sps:$4 sm:$0xff]   ;;  %v9717_v39 = vld [vmem:[%s11175_s6 + $0xd00] ss:$8 sps:$4 sm:$0xff]  }
 0x225   : > { %8186 = vmatpush1.bf16.msra.mxu0 %v9627_v53  ;;  %7859 = vmatprep.subr.bf16.mxu1 %v9632_v54  ;;  %v9711_v53 = vld [vmem:[%s11175_s6 + $0xcf0] ss:$8 sps:$4 sm:$0xff]   ;;  %v9716_v54 = vld [vmem:[%s11175_s6 + $0x504] ss:$8 sps:$4 sm:$0xff]  }
 0x226   : > { %8187 = vmatprep.subr.bf16.mxu0 %v9635_v55  ;;  %v9719_v55 = vld [vmem:[%s11175_s6 + $0xd04] ss:$8 sps:$4 sm:$0xff]  }
 0x228   : > { %7860 = vmatpush1.bf16.msra.mxu1 %v9630_v36  ;;  %v11589_v36 = vrot.slane %v4997_v50, %v11234_v49  ;;  %v9792_v50 = vld [vmem:[%s11175_s6 + $0x5d0] ss:$8 sps:$4 sm:$0xff]  }
 0x229   : > { %8188 = vmatpush1.bf16.msra.mxu0 %v9633_v27  ;;  %7861 = vmatprep.subr.bf16.mxu1 %v9638_v56  ;;  %v11592_v27 = vrot.slane %v5065_v51, %v11234_v49  ;;  %v9722_v56 = vld [vmem:[%s11175_s6 + $0x514] ss:$8 sps:$4 sm:$0xff]   ;;  %v9795_v51 = vld [vmem:[%s11175_s6 + $0xdd0] ss:$8 sps:$4 sm:$0xff]  }
 0x22a   : > { %8189 = vmatprep.subr.bf16.mxu0 %v9641_v57  ;;  %v9725_v57 = vld [vmem:[%s11175_s6 + $0xd14] ss:$8 sps:$4 sm:$0xff]  }
 0x22c   : > { %7862 = vmatpush1.bf16.msra.mxu1 %v9636_v58  ;;  %v5013_v58 = vcombine.high %v11589_v36, %v11589_v36 }
 0x22d   : > { %8190 = vmatpush1.bf16.msra.mxu0 %v9639_v59  ;;  %7863 = vmatprep.subr.bf16.mxu1 %v9644_v60  ;;  %v5081_v59 = vcombine.high %v11592_v27, %v11592_v27  ;;  %v9720_v60 = vld [vmem:[%s11175_s6 + $0x510] ss:$8 sps:$4 sm:$0xff]  }
 0x22e   : > { %8191 = vmatprep.subr.bf16.mxu0 %v9647_v61  ;;  %v9723_v61 = vld [vmem:[%s11175_s6 + $0xd10] ss:$8 sps:$4 sm:$0xff]  }
 0x230   : > { %7864 = vmatpush1.bf16.msra.mxu1 %v9642_v62  ;;  %v9728_v62 = vld [vmem:[%s11175_s6 + $0x524] ss:$8 sps:$4 sm:$0xff]  }
 0x231   : > { %8192 = vmatpush1.bf16.msra.mxu0 %v9645_v63  ;;  %7865 = vmatprep.subr.bf16.mxu1 %v9650_v0  ;;  %v9731_v63 = vld [vmem:[%s11175_s6 + $0xd24] ss:$8 sps:$4 sm:$0xff]   ;;  %v9734_v0 = vld [vmem:[%s11175_s6 + $0x534] ss:$8 sps:$4 sm:$0xff]  }
 0x232   : > { %8193 = vmatprep.subr.bf16.mxu0 %v9653_v1  ;;  %v9737_v1 = vld [vmem:[%s11175_s6 + $0xd34] ss:$8 sps:$4 sm:$0xff]  }
 0x234   : > { %7866 = vmatpush1.bf16.msra.mxu1 %v9648_v2  ;;  %v9732_v2 = vld [vmem:[%s11175_s6 + $0x530] ss:$8 sps:$4 sm:$0xff]  }
 0x235   : > { %8194 = vmatpush1.bf16.msra.mxu0 %v9651_v3  ;;  %7867 = vmatprep.subr.bf16.mxu1 %v9656_v4  ;;  %v9735_v3 = vld [vmem:[%s11175_s6 + $0xd30] ss:$8 sps:$4 sm:$0xff]   ;;  %v9740_v4 = vld [vmem:[%s11175_s6 + $0x544] ss:$8 sps:$4 sm:$0xff]  }
 0x236   : > { %8195 = vmatprep.subr.bf16.mxu0 %v9659_v5  ;;  %v9743_v5 = vld [vmem:[%s11175_s6 + $0xd44] ss:$8 sps:$4 sm:$0xff]  }
 0x238   : > { %7868 = vmatpush1.bf16.msra.mxu1 %v9654_v6  ;;  %v9738_v6 = vld [vmem:[%s11175_s6 + $0x540] ss:$8 sps:$4 sm:$0xff]  }
 0x239   : > { %8196 = vmatpush1.bf16.msra.mxu0 %v9657_v7  ;;  %7869 = vmatprep.subr.bf16.mxu1 %v9662_v8  ;;  %v9741_v7 = vld [vmem:[%s11175_s6 + $0xd40] ss:$8 sps:$4 sm:$0xff]   ;;  %v9746_v8 = vld [vmem:[%s11175_s6 + $0x554] ss:$8 sps:$4 sm:$0xff]  }
 0x23a   : > { %8197 = vmatprep.subr.bf16.mxu0 %v9665_v9  ;;  %v9749_v9 = vld [vmem:[%s11175_s6 + $0xd54] ss:$8 sps:$4 sm:$0xff]  }
 0x23c   : > { %7870 = vmatpush1.bf16.msra.mxu1 %v9660_v10  ;;  %v9744_v10 = vld [vmem:[%s11175_s6 + $0x550] ss:$8 sps:$4 sm:$0xff]  }
 0x23d   : > { %8198 = vmatpush1.bf16.msra.mxu0 %v9663_v11  ;;  %7871 = vmatprep.subr.bf16.mxu1 %v9668_v12  ;;  %v9747_v11 = vld [vmem:[%s11175_s6 + $0xd50] ss:$8 sps:$4 sm:$0xff]   ;;  %v9752_v12 = vld [vmem:[%s11175_s6 + $0x564] ss:$8 sps:$4 sm:$0xff]  }
 0x23e   : > { %8199 = vmatprep.subr.bf16.mxu0 %v9671_v13  ;;  %v9755_v13 = vld [vmem:[%s11175_s6 + $0xd64] ss:$8 sps:$4 sm:$0xff]  }
 0x240   : > { %7872 = vmatpush1.bf16.msra.mxu1 %v9666_v14  ;;  %v9750_v14 = vld [vmem:[%s11175_s6 + $0x560] ss:$8 sps:$4 sm:$0xff]  }
 0x241   : > { %8200 = vmatpush1.bf16.msra.mxu0 %v9669_v15  ;;  %7873 = vmatprep.subr.bf16.mxu1 %v9674_v18  ;;  %v9753_v15 = vld [vmem:[%s11175_s6 + $0xd60] ss:$8 sps:$4 sm:$0xff]   ;;  %v9758_v18 = vld [vmem:[%s11175_s6 + $0x574] ss:$8 sps:$4 sm:$0xff]  }
 0x242   : > { %8201 = vmatprep.subr.bf16.mxu0 %v9677_v19  ;;  %v9761_v19 = vld [vmem:[%s11175_s6 + $0xd74] ss:$8 sps:$4 sm:$0xff]  }
 0x244   : > { %7874 = vmatpush1.bf16.msra.mxu1 %v9672_v20  ;;  %v9756_v20 = vld [vmem:[%s11175_s6 + $0x570] ss:$8 sps:$4 sm:$0xff]  }
 0x245   : > { %8202 = vmatpush1.bf16.msra.mxu0 %v9675_v21  ;;  %7875 = vmatprep.subr.bf16.mxu1 %v9680_v22  ;;  %v9759_v21 = vld [vmem:[%s11175_s6 + $0xd70] ss:$8 sps:$4 sm:$0xff]   ;;  %v9764_v22 = vld [vmem:[%s11175_s6 + $0x584] ss:$8 sps:$4 sm:$0xff]  }
 0x246   : > { %8203 = vmatprep.subr.bf16.mxu0 %v9683_v23  ;;  %v9767_v23 = vld [vmem:[%s11175_s6 + $0xd84] ss:$8 sps:$4 sm:$0xff]  }
 0x248   : > { %7876 = vmatpush1.bf16.msra.mxu1 %v9678_v24  ;;  %v9762_v24 = vld [vmem:[%s11175_s6 + $0x580] ss:$8 sps:$4 sm:$0xff]  }
 0x249   : > { %8204 = vmatpush1.bf16.msra.mxu0 %v9681_v25  ;;  %7877 = vmatprep.subr.bf16.mxu1 %v9686_v26  ;;  %v9765_v25 = vld [vmem:[%s11175_s6 + $0xd80] ss:$8 sps:$4 sm:$0xff]   ;;  %v9770_v26 = vld [vmem:[%s11175_s6 + $0x594] ss:$8 sps:$4 sm:$0xff]  }
 0x24a   : > { %8205 = vmatprep.subr.bf16.mxu0 %v9689_v28  ;;  %v9773_v28 = vld [vmem:[%s11175_s6 + $0xd94] ss:$8 sps:$4 sm:$0xff]  }
 0x24c   : > { %7878 = vmatpush1.bf16.msra.mxu1 %v9684_v31  ;;  %v9768_v31 = vld [vmem:[%s11175_s6 + $0x590] ss:$8 sps:$4 sm:$0xff]  }
 0x24d   : > { %8206 = vmatpush1.bf16.msra.mxu0 %v9687_v32  ;;  %7879 = vmatprep.subr.bf16.mxu1 %v9692_v33  ;;  %v9771_v32 = vld [vmem:[%s11175_s6 + $0xd90] ss:$8 sps:$4 sm:$0xff]   ;;  %v9776_v33 = vld [vmem:[%s11175_s6 + $0x5a4] ss:$8 sps:$4 sm:$0xff]  }
 0x24e   : > { %8207 = vmatprep.subr.bf16.mxu0 %v9695_v35  ;;  %v9779_v35 = vld [vmem:[%s11175_s6 + $0xda4] ss:$8 sps:$4 sm:$0xff]  }
 0x250   : > { %7880 = vmatpush1.bf16.msra.mxu1 %v9690_v16  ;;  %v9774_v16 = vld [vmem:[%s11175_s6 + $0x5a0] ss:$8 sps:$4 sm:$0xff]  }
 0x251   : > { %8208 = vmatpush1.bf16.msra.mxu0 %v9693_v17  ;;  %7881 = vmatprep.subr.bf16.mxu1 %v9698_v37  ;;  %v9777_v17 = vld [vmem:[%s11175_s6 + $0xda0] ss:$8 sps:$4 sm:$0xff]   ;;  %v9782_v37 = vld [vmem:[%s11175_s6 + $0x5b4] ss:$8 sps:$4 sm:$0xff]  }
 0x252   : > { %8209 = vmatprep.subr.bf16.mxu0 %v9701_v30  ;;  %v9785_v30 = vld [vmem:[%s11175_s6 + $0xdb4] ss:$8 sps:$4 sm:$0xff]  }
 0x254   : > { %7882 = vmatpush1.bf16.msra.mxu1 %v9696_v40  ;;  %v9780_v40 = vld [vmem:[%s11175_s6 + $0x5b0] ss:$8 sps:$4 sm:$0xff]  }
 0x255   : > { %8210 = vmatpush1.bf16.msra.mxu0 %v9699_v41  ;;  %7883 = vmatprep.subr.bf16.mxu1 %v9704_v42  ;;  %v9783_v41 = vld [vmem:[%s11175_s6 + $0xdb0] ss:$8 sps:$4 sm:$0xff]   ;;  %v9788_v42 = vld [vmem:[%s11175_s6 + $0x5c4] ss:$8 sps:$4 sm:$0xff]  }
 0x256   : > { %8211 = vmatprep.subr.bf16.mxu0 %v9707_v44  ;;  %v9791_v44 = vld [vmem:[%s11175_s6 + $0xdc4] ss:$8 sps:$4 sm:$0xff]  }
 0x258   : > { %7884 = vmatpush1.bf16.msra.mxu1 %v9702_v47  ;;  %v9786_v47 = vld [vmem:[%s11175_s6 + $0x5c0] ss:$8 sps:$4 sm:$0xff]  }
 0x259   : > { %8212 = vmatpush1.bf16.msra.mxu0 %v9705_v29  ;;  %7885 = vmatprep.subr.bf16.mxu1 %v9710_v34  ;;  %v9789_v29 = vld [vmem:[%s11175_s6 + $0xdc0] ss:$8 sps:$4 sm:$0xff]   ;;  %v9794_v34 = vld [vmem:[%s11175_s6 + $0x5d4] ss:$8 sps:$4 sm:$0xff]  }
 0x25a   : > { %8213 = vmatprep.subr.bf16.mxu0 %v9713_v48  ;;  %v9797_v48 = vld [vmem:[%s11175_s6 + $0xdd4] ss:$8 sps:$4 sm:$0xff]  }
 0x25c   : > { %7886 = vmatpush1.bf16.msra.mxu1 %v9708_v52  ;;  %v9800_v52 = vld [vmem:[%s11175_s6 + $0x5e4] ss:$8 sps:$4 sm:$0xff]  }
 0x25d   : > { %8214 = vmatpush1.bf16.msra.mxu0 %v9711_v53  ;;  %7896 = vmatprep.subr.bf16.mxu1 %v9716_v54  ;;  %v9803_v53 = vld [vmem:[%s11175_s6 + $0xde4] ss:$8 sps:$4 sm:$0xff]   ;;  %v9798_v54 = vld [vmem:[%s11175_s6 + $0x5e0] ss:$8 sps:$4 sm:$0xff]  }
 0x25e   : > { %8224 = vmatprep.subr.bf16.mxu0 %v9719_v55  ;;  %v9801_v55 = vld [vmem:[%s11175_s6 + $0xde0] ss:$8 sps:$4 sm:$0xff]  }
 0x25f   : > { %7888 = vmatmul.mubr.bf16.vlgmr.msra.gmra.mrb[0].mxu1 %v11508_v45  ;;  %v9726_v45 = vld [vmem:[%s11175_s6 + $0x520] ss:$8 sps:$4 sm:$0xff]  }
 0x260   : > { %8216 = vmatmul.mubr.bf16.vlgmr.msra.gmra.mrb[0].mxu0 %v11512_v46  ;;  %7897 = vmatpush1.bf16.msra.mxu1 %v9714_v38  ;;  %v9729_v46 = vld [vmem:[%s11175_s6 + $0xd20] ss:$8 sps:$4 sm:$0xff]   ;;  %v9806_v38 = vld [vmem:[%s11175_s6 + $0x5f4] ss:$8 sps:$4 sm:$0xff]  }
 0x261   : > { %8225 = vmatpush1.bf16.msra.mxu0 %v9717_v39  ;;  %7898 = vmatprep.subr.bf16.mxu1 %v9722_v56  ;;  %v9809_v39 = vld [vmem:[%s11175_s6 + $0xdf4] ss:$8 sps:$4 sm:$0xff]  }
 0x262   : > { %8226 = vmatprep.subr.bf16.mxu0 %v9725_v57  ;;  %7928 = vmatprep.mubr.bf16.mxu1 %v5013_v58  ;;  %v11661_v56 = vld [vmem:[%s11231_s10 + $0x18] sm:$0xff] }
 0x263   : > { %8256 = vmatprep.mubr.bf16.mxu0 %v5081_v59  ;;  %v11664_v57 = vld [vmem:[%s11231_s10 + $0x38] sm:$0xff] }
 0x264   : > { %7899 = vmatpush1.bf16.msra.mxu1 %v9720_v60  ;;  %v9804_v58 = vld [vmem:[%s11175_s6 + $0x5f0] ss:$8 sps:$4 sm:$0xff]   ;;  %v9813_v60 = vld [vmem:[%s11175_s6 + $0x604] ss:$8 sps:$4 sm:$0xff]  }
 0x265   : > { %8227 = vmatpush1.bf16.msra.mxu0 %v9723_v61  ;;  %7900 = vmatprep.subr.bf16.mxu1 %v9728_v62  ;;  %v9807_v59 = vld [vmem:[%s11175_s6 + $0xdf0] ss:$8 sps:$4 sm:$0xff]   ;;  %v9817_v61 = vld [vmem:[%s11175_s6 + $0xe04] ss:$8 sps:$4 sm:$0xff]   ;;  %v11672_v62 = vrot.slane %v11661_v56, %v11234_v49 }
 0x266   : > { %8228 = vmatprep.subr.bf16.mxu0 %v9731_v63  ;;  %v11676_v63 = vrot.slane %v11664_v57, %v11234_v49 }
 0x268   : > { %7901 = vmatpush1.bf16.msra.mxu1 %v9726_v45  ;;  %v9811_v45 = vld [vmem:[%s11175_s6 + $0x600] ss:$8 sps:$4 sm:$0xff]  }
 0x269   : > { %8229 = vmatpush1.bf16.msra.mxu0 %v9729_v46  ;;  %7902 = vmatprep.subr.bf16.mxu1 %v9734_v0  ;;  %v9815_v46 = vld [vmem:[%s11175_s6 + $0xe00] ss:$8 sps:$4 sm:$0xff]   ;;  %v9820_v0 = vld [vmem:[%s11175_s6 + $0x614] ss:$8 sps:$4 sm:$0xff]  }
 0x26a   : > { %8230 = vmatprep.subr.bf16.mxu0 %v9737_v1  ;;  %v9823_v1 = vld [vmem:[%s11175_s6 + $0xe14] ss:$8 sps:$4 sm:$0xff]  }
 0x26c   : > { %7903 = vmatpush1.bf16.msra.mxu1 %v9732_v2  ;;  %v5029_v2 = vcombine.high %v11672_v62, %v11672_v62 }
 0x26d   : > { %8231 = vmatpush1.bf16.msra.mxu0 %v9735_v3  ;;  %7904 = vmatprep.subr.bf16.mxu1 %v9740_v4  ;;  %v5097_v3 = vcombine.high %v11676_v63, %v11676_v63  ;;  %v9818_v4 = vld [vmem:[%s11175_s6 + $0x610] ss:$8 sps:$4 sm:$0xff]  }
 0x26e   : > { %8232 = vmatprep.subr.bf16.mxu0 %v9743_v5  ;;  %v9821_v5 = vld [vmem:[%s11175_s6 + $0xe10] ss:$8 sps:$4 sm:$0xff]  }
 0x270   : > { %7905 = vmatpush1.bf16.msra.mxu1 %v9738_v6  ;;  %v9826_v6 = vld [vmem:[%s11175_s6 + $0x624] ss:$8 sps:$4 sm:$0xff]  }
 0x271   : > { %8233 = vmatpush1.bf16.msra.mxu0 %v9741_v7  ;;  %7906 = vmatprep.subr.bf16.mxu1 %v9746_v8  ;;  %v9829_v7 = vld [vmem:[%s11175_s6 + $0xe24] ss:$8 sps:$4 sm:$0xff]   ;;  %v9832_v8 = vld [vmem:[%s11175_s6 + $0x634] ss:$8 sps:$4 sm:$0xff]  }
 0x272   : > { %8234 = vmatprep.subr.bf16.mxu0 %v9749_v9  ;;  %v9835_v9 = vld [vmem:[%s11175_s6 + $0xe34] ss:$8 sps:$4 sm:$0xff]  }
 0x274   : > { %7907 = vmatpush1.bf16.msra.mxu1 %v9744_v10  ;;  %v9830_v10 = vld [vmem:[%s11175_s6 + $0x630] ss:$8 sps:$4 sm:$0xff]  }
 0x275   : > { %8235 = vmatpush1.bf16.msra.mxu0 %v9747_v11  ;;  %7908 = vmatprep.subr.bf16.mxu1 %v9752_v12  ;;  %v9833_v11 = vld [vmem:[%s11175_s6 + $0xe30] ss:$8 sps:$4 sm:$0xff]   ;;  %v9838_v12 = vld [vmem:[%s11175_s6 + $0x644] ss:$8 sps:$4 sm:$0xff]  }
 0x276   : > { %8236 = vmatprep.subr.bf16.mxu0 %v9755_v13  ;;  %v9841_v13 = vld [vmem:[%s11175_s6 + $0xe44] ss:$8 sps:$4 sm:$0xff]  }
 0x278   : > { %7909 = vmatpush1.bf16.msra.mxu1 %v9750_v14  ;;  %v9836_v14 = vld [vmem:[%s11175_s6 + $0x640] ss:$8 sps:$4 sm:$0xff]  }
 0x279   : > { %8237 = vmatpush1.bf16.msra.mxu0 %v9753_v15  ;;  %7910 = vmatprep.subr.bf16.mxu1 %v9758_v18  ;;  %v9839_v15 = vld [vmem:[%s11175_s6 + $0xe40] ss:$8 sps:$4 sm:$0xff]   ;;  %v9844_v18 = vld [vmem:[%s11175_s6 + $0x654] ss:$8 sps:$4 sm:$0xff]  }
 0x27a   : > { %8238 = vmatprep.subr.bf16.mxu0 %v9761_v19  ;;  %v9847_v19 = vld [vmem:[%s11175_s6 + $0xe54] ss:$8 sps:$4 sm:$0xff]  }
 0x27c   : > { %7911 = vmatpush1.bf16.msra.mxu1 %v9756_v20  ;;  %v9842_v20 = vld [vmem:[%s11175_s6 + $0x650] ss:$8 sps:$4 sm:$0xff]  }
 0x27d   : > { %8239 = vmatpush1.bf16.msra.mxu0 %v9759_v21  ;;  %7912 = vmatprep.subr.bf16.mxu1 %v9764_v22  ;;  %v9845_v21 = vld [vmem:[%s11175_s6 + $0xe50] ss:$8 sps:$4 sm:$0xff]   ;;  %v9850_v22 = vld [vmem:[%s11175_s6 + $0x664] ss:$8 sps:$4 sm:$0xff]  }
 0x27e   : > { %8240 = vmatprep.subr.bf16.mxu0 %v9767_v23  ;;  %v9853_v23 = vld [vmem:[%s11175_s6 + $0xe64] ss:$8 sps:$4 sm:$0xff]  }
 0x280   : > { %7913 = vmatpush1.bf16.msra.mxu1 %v9762_v24  ;;  %v9848_v24 = vld [vmem:[%s11175_s6 + $0x660] ss:$8 sps:$4 sm:$0xff]  }
 0x281   : > { %8241 = vmatpush1.bf16.msra.mxu0 %v9765_v25  ;;  %7914 = vmatprep.subr.bf16.mxu1 %v9770_v26  ;;  %v9851_v25 = vld [vmem:[%s11175_s6 + $0xe60] ss:$8 sps:$4 sm:$0xff]   ;;  %v9856_v26 = vld [vmem:[%s11175_s6 + $0x674] ss:$8 sps:$4 sm:$0xff]  }
 0x282   : > { %8242 = vmatprep.subr.bf16.mxu0 %v9773_v28  ;;  %v9859_v28 = vld [vmem:[%s11175_s6 + $0xe74] ss:$8 sps:$4 sm:$0xff]  }
 0x284   : > { %7915 = vmatpush1.bf16.msra.mxu1 %v9768_v31  ;;  %v9854_v31 = vld [vmem:[%s11175_s6 + $0x670] ss:$8 sps:$4 sm:$0xff]  }
 0x285   : > { %8243 = vmatpush1.bf16.msra.mxu0 %v9771_v32  ;;  %7916 = vmatprep.subr.bf16.mxu1 %v9776_v33  ;;  %v9857_v32 = vld [vmem:[%s11175_s6 + $0xe70] ss:$8 sps:$4 sm:$0xff]   ;;  %v9862_v33 = vld [vmem:[%s11175_s6 + $0x684] ss:$8 sps:$4 sm:$0xff]  }
 0x286   : > { %8244 = vmatprep.subr.bf16.mxu0 %v9779_v35  ;;  %v9865_v35 = vld [vmem:[%s11175_s6 + $0xe84] ss:$8 sps:$4 sm:$0xff]  }
 0x288   : > { %7917 = vmatpush1.bf16.msra.mxu1 %v9774_v16  ;;  %v9860_v16 = vld [vmem:[%s11175_s6 + $0x680] ss:$8 sps:$4 sm:$0xff]  }
 0x289   : > { %8245 = vmatpush1.bf16.msra.mxu0 %v9777_v17  ;;  %7918 = vmatprep.subr.bf16.mxu1 %v9782_v37  ;;  %v9863_v17 = vld [vmem:[%s11175_s6 + $0xe80] ss:$8 sps:$4 sm:$0xff]   ;;  %v9868_v37 = vld [vmem:[%s11175_s6 + $0x694] ss:$8 sps:$4 sm:$0xff]  }
 0x28a   : > { %8246 = vmatprep.subr.bf16.mxu0 %v9785_v30  ;;  %v9871_v30 = vld [vmem:[%s11175_s6 + $0xe94] ss:$8 sps:$4 sm:$0xff]  }
 0x28c   : > { %7919 = vmatpush1.bf16.msra.mxu1 %v9780_v40  ;;  %v9866_v40 = vld [vmem:[%s11175_s6 + $0x690] ss:$8 sps:$4 sm:$0xff]  }
 0x28d   : > { %8247 = vmatpush1.bf16.msra.mxu0 %v9783_v41  ;;  %7920 = vmatprep.subr.bf16.mxu1 %v9788_v42  ;;  %v9869_v41 = vld [vmem:[%s11175_s6 + $0xe90] ss:$8 sps:$4 sm:$0xff]   ;;  %v9874_v42 = vld [vmem:[%s11175_s6 + $0x6a4] ss:$8 sps:$4 sm:$0xff]  }
 0x28e   : > { %8248 = vmatprep.subr.bf16.mxu0 %v9791_v44  ;;  %v9877_v44 = vld [vmem:[%s11175_s6 + $0xea4] ss:$8 sps:$4 sm:$0xff]  }
 0x290   : > { %7921 = vmatpush1.bf16.msra.mxu1 %v9786_v47  ;;  %v9872_v47 = vld [vmem:[%s11175_s6 + $0x6a0] ss:$8 sps:$4 sm:$0xff]  }
 0x291   : > { %8249 = vmatpush1.bf16.msra.mxu0 %v9789_v29  ;;  %7922 = vmatprep.subr.bf16.mxu1 %v9794_v34  ;;  %v9875_v29 = vld [vmem:[%s11175_s6 + $0xea0] ss:$8 sps:$4 sm:$0xff]   ;;  %v9880_v34 = vld [vmem:[%s11175_s6 + $0x6b4] ss:$8 sps:$4 sm:$0xff]  }
 0x292   : > { %8250 = vmatprep.subr.bf16.mxu0 %v9797_v48  ;;  %v9883_v48 = vld [vmem:[%s11175_s6 + $0xeb4] ss:$8 sps:$4 sm:$0xff]  }
 0x294   : > { %7923 = vmatpush1.bf16.msra.mxu1 %v9792_v50  ;;  %v9878_v50 = vld [vmem:[%s11175_s6 + $0x6b0] ss:$8 sps:$4 sm:$0xff]  }
 0x295   : > { %8251 = vmatpush1.bf16.msra.mxu0 %v9795_v51  ;;  %7924 = vmatprep.subr.bf16.mxu1 %v9800_v52  ;;  %v9881_v51 = vld [vmem:[%s11175_s6 + $0xeb0] ss:$8 sps:$4 sm:$0xff]   ;;  %v9886_v52 = vld [vmem:[%s11175_s6 + $0x6c4] ss:$8 sps:$4 sm:$0xff]  }
 0x296   : > { %8252 = vmatprep.subr.bf16.mxu0 %v9803_v53  ;;  %v9889_v53 = vld [vmem:[%s11175_s6 + $0xec4] ss:$8 sps:$4 sm:$0xff]  }
 0x298   : > { %7925 = vmatpush1.bf16.msra.mxu1 %v9798_v54  ;;  %v9884_v54 = vld [vmem:[%s11175_s6 + $0x6c0] ss:$8 sps:$4 sm:$0xff]  }
 0x299   : > { %8253 = vmatpush1.bf16.msra.mxu0 %v9801_v55  ;;  %7926 = vmatprep.subr.bf16.mxu1 %v9806_v38  ;;  %v9887_v55 = vld [vmem:[%s11175_s6 + $0xec0] ss:$8 sps:$4 sm:$0xff]   ;;  %v9892_v38 = vld [vmem:[%s11175_s6 + $0x6d4] ss:$8 sps:$4 sm:$0xff]  }
 0x29a   : > { %8254 = vmatprep.subr.bf16.mxu0 %v9809_v39  ;;  %v9895_v39 = vld [vmem:[%s11175_s6 + $0xed4] ss:$8 sps:$4 sm:$0xff]  }
 0x29c   : > { %7927 = vmatpush1.bf16.msra.mxu1 %v9804_v58  ;;  %v9890_v58 = vld [vmem:[%s11175_s6 + $0x6d0] ss:$8 sps:$4 sm:$0xff]  }
 0x29d   : > { %8255 = vmatpush1.bf16.msra.mxu0 %v9807_v59  ;;  %7937 = vmatprep.subr.bf16.mxu1 %v9813_v60  ;;  %v9893_v59 = vld [vmem:[%s11175_s6 + $0xed0] ss:$8 sps:$4 sm:$0xff]   ;;  %v9898_v60 = vld [vmem:[%s11175_s6 + $0x6e4] ss:$8 sps:$4 sm:$0xff]  }
 0x29e   : > { %8265 = vmatprep.subr.bf16.mxu0 %v9817_v61  ;;  %v9901_v61 = vld [vmem:[%s11175_s6 + $0xee4] ss:$8 sps:$4 sm:$0xff]  }
 0x29f   : > { %7929 = vmatmul.mubr.bf16.vlgmr.msra.gmra.mrb[0].mxu1 %v11589_v36  ;;  %v9824_v36 = vld [vmem:[%s11175_s6 + $0x620] ss:$8 sps:$4 sm:$0xff]  }
 0x2a0   : > { %8257 = vmatmul.mubr.bf16.vlgmr.msra.gmra.mrb[0].mxu0 %v11592_v27  ;;  %7938 = vmatpush1.bf16.msra.mxu1 %v9811_v45  ;;  %v9827_v27 = vld [vmem:[%s11175_s6 + $0xe20] ss:$8 sps:$4 sm:$0xff]  }
 0x2a1   : > { %8266 = vmatpush1.bf16.msra.mxu0 %v9815_v46  ;;  %7939 = vmatprep.subr.bf16.mxu1 %v9820_v0  ;;  %v9896_v45 = vld [vmem:[%s11175_s6 + $0x6e0] ss:$8 sps:$4 sm:$0xff]   ;;  %v9904_v0 = vld [vmem:[%s11175_s6 + $0x6f4] ss:$8 sps:$4 sm:$0xff]  }
 0x2a2   : > { %8267 = vmatprep.subr.bf16.mxu0 %v9823_v1  ;;  %7969 = vmatprep.mubr.bf16.mxu1 %v5029_v2  ;;  %v9899_v46 = vld [vmem:[%s11175_s6 + $0xee0] ss:$8 sps:$4 sm:$0xff]   ;;  %v9907_v1 = vld [vmem:[%s11175_s6 + $0xef4] ss:$8 sps:$4 sm:$0xff]   ;;  %v5014_v2 = vcombine.high %v11661_v56, %v11661_v56 }
 0x2a3   : > { %8297 = vmatprep.mubr.bf16.mxu0 %v5097_v3  ;;  %v5082_v3 = vcombine.high %v11664_v57, %v11664_v57  ;;  %v9908_v56 = vld [vmem:[%s11175_s6 + $0x700] ss:$8 sps:$4 sm:$0xff]  }
 0x2a4   : > { %7940 = vmatpush1.bf16.msra.mxu1 %v9818_v4  ;;  %v9902_v4 = vld [vmem:[%s11175_s6 + $0x6f0] ss:$8 sps:$4 sm:$0xff]   ;;  %v9911_v57 = vld [vmem:[%s11175_s6 + $0xf00] ss:$8 sps:$4 sm:$0xff]  }
 0x2a5   : > { %8268 = vmatpush1.bf16.msra.mxu0 %v9821_v5  ;;  %7941 = vmatprep.subr.bf16.mxu1 %v9826_v6  ;;  %v9905_v5 = vld [vmem:[%s11175_s6 + $0xef0] ss:$8 sps:$4 sm:$0xff]   ;;  %v9910_v6 = vld [vmem:[%s11175_s6 + $0x704] ss:$8 sps:$4 sm:$0xff]  }
 0x2a6   : > { %8269 = vmatprep.subr.bf16.mxu0 %v9829_v7  ;;  %v9913_v7 = vld [vmem:[%s11175_s6 + $0xf04] ss:$8 sps:$4 sm:$0xff]  }
 0x2a8   : > { %7942 = vmatpush1.bf16.msra.mxu1 %v9824_v36  ;;  %v11753_v36 = vrot.slane %v5014_v2, %v11234_v49  ;;  %v9989_v2 = vld [vmem:[%s11175_s6 + $0xfd0] ss:$8 sps:$4 sm:$0xff]  }
 0x2a9   : > { %8270 = vmatpush1.bf16.msra.mxu0 %v9827_v27  ;;  %7943 = vmatprep.subr.bf16.mxu1 %v9832_v8  ;;  %v11756_v27 = vrot.slane %v5082_v3, %v11234_v49  ;;  %v9916_v8 = vld [vmem:[%s11175_s6 + $0x714] ss:$8 sps:$4 sm:$0xff]   ;;  %v9914_v49 = vld [vmem:[%s11175_s6 + $0x710] ss:$8 sps:$4 sm:$0xff]   ;;  %v9994_v3 = vld [vmem:[%s11175_s6 + $0x7e4] ss:$8 sps:$4 sm:$0xff]  }
 0x2aa   : > { %8271 = vmatprep.subr.bf16.mxu0 %v9835_v9  ;;  %v9919_v9 = vld [vmem:[%s11175_s6 + $0xf14] ss:$8 sps:$4 sm:$0xff]  }
 0x2ac   : > { %7944 = vmatpush1.bf16.msra.mxu1 %v9830_v10  ;;  %v5030_v10 = vcombine.high %v11753_v36, %v11753_v36 }
 0x2ad   : > { %8272 = vmatpush1.bf16.msra.mxu0 %v9833_v11  ;;  %7945 = vmatprep.subr.bf16.mxu1 %v9838_v12  ;;  %v5098_v11 = vcombine.high %v11756_v27, %v11756_v27  ;;  %v9917_v12 = vld [vmem:[%s11175_s6 + $0xf10] ss:$8 sps:$4 sm:$0xff]  }
 0x2ae   : > { %8273 = vmatprep.subr.bf16.mxu0 %v9841_v13  ;;  %v9922_v13 = vld [vmem:[%s11175_s6 + $0x724] ss:$8 sps:$4 sm:$0xff]  }
 0x2b0   : > { %7946 = vmatpush1.bf16.msra.mxu1 %v9836_v14  ;;  %v9925_v14 = vld [vmem:[%s11175_s6 + $0xf24] ss:$8 sps:$4 sm:$0xff]  }
 0x2b1   : > { %8274 = vmatpush1.bf16.msra.mxu0 %v9839_v15  ;;  %7947 = vmatprep.subr.bf16.mxu1 %v9844_v18  ;;  %v9928_v15 = vld [vmem:[%s11175_s6 + $0x734] ss:$8 sps:$4 sm:$0xff]  }
 0x2b2   : > { %8275 = vmatprep.subr.bf16.mxu0 %v9847_v19  ;;  %v9931_v18 = vld [vmem:[%s11175_s6 + $0xf34] ss:$8 sps:$4 sm:$0xff]   ;;  %v9926_v19 = vld [vmem:[%s11175_s6 + $0x730] ss:$8 sps:$4 sm:$0xff]  }
 0x2b4   : > { %7948 = vmatpush1.bf16.msra.mxu1 %v9842_v20  ;;  %v9929_v20 = vld [vmem:[%s11175_s6 + $0xf30] ss:$8 sps:$4 sm:$0xff]  }
 0x2b5   : > { %8276 = vmatpush1.bf16.msra.mxu0 %v9845_v21  ;;  %7949 = vmatprep.subr.bf16.mxu1 %v9850_v22  ;;  %v9934_v21 = vld [vmem:[%s11175_s6 + $0x744] ss:$8 sps:$4 sm:$0xff]  }
 0x2b6   : > { %8277 = vmatprep.subr.bf16.mxu0 %v9853_v23  ;;  %v9937_v22 = vld [vmem:[%s11175_s6 + $0xf44] ss:$8 sps:$4 sm:$0xff]   ;;  %v9932_v23 = vld [vmem:[%s11175_s6 + $0x740] ss:$8 sps:$4 sm:$0xff]  }
 0x2b8   : > { %7950 = vmatpush1.bf16.msra.mxu1 %v9848_v24  ;;  %v9935_v24 = vld [vmem:[%s11175_s6 + $0xf40] ss:$8 sps:$4 sm:$0xff]  }
 0x2b9   : > { %8278 = vmatpush1.bf16.msra.mxu0 %v9851_v25  ;;  %7951 = vmatprep.subr.bf16.mxu1 %v9856_v26  ;;  %v9940_v25 = vld [vmem:[%s11175_s6 + $0x754] ss:$8 sps:$4 sm:$0xff]  }
 0x2ba   : > { %8279 = vmatprep.subr.bf16.mxu0 %v9859_v28  ;;  %v9943_v26 = vld [vmem:[%s11175_s6 + $0xf54] ss:$8 sps:$4 sm:$0xff]   ;;  %v9938_v28 = vld [vmem:[%s11175_s6 + $0x750] ss:$8 sps:$4 sm:$0xff]  }
 0x2bc   : > { %7952 = vmatpush1.bf16.msra.mxu1 %v9854_v31  ;;  %v9941_v31 = vld [vmem:[%s11175_s6 + $0xf50] ss:$8 sps:$4 sm:$0xff]  }
 0x2bd   : > { %8280 = vmatpush1.bf16.msra.mxu0 %v9857_v32  ;;  %7953 = vmatprep.subr.bf16.mxu1 %v9862_v33  ;;  %v9946_v32 = vld [vmem:[%s11175_s6 + $0x764] ss:$8 sps:$4 sm:$0xff]  }
 0x2be   : > { %8281 = vmatprep.subr.bf16.mxu0 %v9865_v35  ;;  %v9949_v33 = vld [vmem:[%s11175_s6 + $0xf64] ss:$8 sps:$4 sm:$0xff]   ;;  %v9944_v35 = vld [vmem:[%s11175_s6 + $0x760] ss:$8 sps:$4 sm:$0xff]  }
 0x2c0   : > { %7954 = vmatpush1.bf16.msra.mxu1 %v9860_v16  ;;  %v9947_v16 = vld [vmem:[%s11175_s6 + $0xf60] ss:$8 sps:$4 sm:$0xff]  }
 0x2c1   : > { %8282 = vmatpush1.bf16.msra.mxu0 %v9863_v17  ;;  %7955 = vmatprep.subr.bf16.mxu1 %v9868_v37  ;;  %v9952_v17 = vld [vmem:[%s11175_s6 + $0x774] ss:$8 sps:$4 sm:$0xff]  }
 0x2c2   : > { %8283 = vmatprep.subr.bf16.mxu0 %v9871_v30  ;;  %v9955_v37 = vld [vmem:[%s11175_s6 + $0xf74] ss:$8 sps:$4 sm:$0xff]   ;;  %v9950_v30 = vld [vmem:[%s11175_s6 + $0x770] ss:$8 sps:$4 sm:$0xff]  }
 0x2c4   : > { %7956 = vmatpush1.bf16.msra.mxu1 %v9866_v40  ;;  %v9953_v40 = vld [vmem:[%s11175_s6 + $0xf70] ss:$8 sps:$4 sm:$0xff]  }
 0x2c5   : > { %8284 = vmatpush1.bf16.msra.mxu0 %v9869_v41  ;;  %7957 = vmatprep.subr.bf16.mxu1 %v9874_v42  ;;  %v9958_v41 = vld [vmem:[%s11175_s6 + $0x784] ss:$8 sps:$4 sm:$0xff]  }
 0x2c6   : > { %8285 = vmatprep.subr.bf16.mxu0 %v9877_v44  ;;  %v9961_v42 = vld [vmem:[%s11175_s6 + $0xf84] ss:$8 sps:$4 sm:$0xff]   ;;  %v9956_v44 = vld [vmem:[%s11175_s6 + $0x780] ss:$8 sps:$4 sm:$0xff]  }
 0x2c8   : > { %7958 = vmatpush1.bf16.msra.mxu1 %v9872_v47  ;;  %v9959_v47 = vld [vmem:[%s11175_s6 + $0xf80] ss:$8 sps:$4 sm:$0xff]  }
 0x2c9   : > { %8286 = vmatpush1.bf16.msra.mxu0 %v9875_v29  ;;  %7959 = vmatprep.subr.bf16.mxu1 %v9880_v34  ;;  %v9964_v29 = vld [vmem:[%s11175_s6 + $0x794] ss:$8 sps:$4 sm:$0xff]  }
 0x2ca   : > { %8287 = vmatprep.subr.bf16.mxu0 %v9883_v48  ;;  %v9967_v34 = vld [vmem:[%s11175_s6 + $0xf94] ss:$8 sps:$4 sm:$0xff]   ;;  %v9962_v48 = vld [vmem:[%s11175_s6 + $0x790] ss:$8 sps:$4 sm:$0xff]  }
 0x2cc   : > { %7960 = vmatpush1.bf16.msra.mxu1 %v9878_v50  ;;  %v9965_v50 = vld [vmem:[%s11175_s6 + $0xf90] ss:$8 sps:$4 sm:$0xff]  }
 0x2cd   : > { %8288 = vmatpush1.bf16.msra.mxu0 %v9881_v51  ;;  %7961 = vmatprep.subr.bf16.mxu1 %v9886_v52  ;;  %v9970_v51 = vld [vmem:[%s11175_s6 + $0x7a4] ss:$8 sps:$4 sm:$0xff]  }
 0x2ce   : > { %8289 = vmatprep.subr.bf16.mxu0 %v9889_v53  ;;  %v9973_v52 = vld [vmem:[%s11175_s6 + $0xfa4] ss:$8 sps:$4 sm:$0xff]   ;;  %v9968_v53 = vld [vmem:[%s11175_s6 + $0x7a0] ss:$8 sps:$4 sm:$0xff]  }
 0x2d0   : > { %7962 = vmatpush1.bf16.msra.mxu1 %v9884_v54  ;;  %v9971_v54 = vld [vmem:[%s11175_s6 + $0xfa0] ss:$8 sps:$4 sm:$0xff]  }
 0x2d1   : > { %8290 = vmatpush1.bf16.msra.mxu0 %v9887_v55  ;;  %7963 = vmatprep.subr.bf16.mxu1 %v9892_v38  ;;  %v9976_v55 = vld [vmem:[%s11175_s6 + $0x7b4] ss:$8 sps:$4 sm:$0xff]  }
 0x2d2   : > { %8291 = vmatprep.subr.bf16.mxu0 %v9895_v39  ;;  %v9979_v38 = vld [vmem:[%s11175_s6 + $0xfb4] ss:$8 sps:$4 sm:$0xff]   ;;  %v9974_v39 = vld [vmem:[%s11175_s6 + $0x7b0] ss:$8 sps:$4 sm:$0xff]  }
 0x2d4   : > { %7964 = vmatpush1.bf16.msra.mxu1 %v9890_v58  ;;  %v9977_v58 = vld [vmem:[%s11175_s6 + $0xfb0] ss:$8 sps:$4 sm:$0xff]  }
 0x2d5   : > { %8292 = vmatpush1.bf16.msra.mxu0 %v9893_v59  ;;  %7965 = vmatprep.subr.bf16.mxu1 %v9898_v60  ;;  %v9982_v59 = vld [vmem:[%s11175_s6 + $0x7c4] ss:$8 sps:$4 sm:$0xff]  }
 0x2d6   : > { %8293 = vmatprep.subr.bf16.mxu0 %v9901_v61  ;;  %v9985_v60 = vld [vmem:[%s11175_s6 + $0xfc4] ss:$8 sps:$4 sm:$0xff]   ;;  %v9980_v61 = vld [vmem:[%s11175_s6 + $0x7c0] ss:$8 sps:$4 sm:$0xff]  }
 0x2d8   : > { %7966 = vmatpush1.bf16.msra.mxu1 %v9896_v45  ;;  %v9983_v45 = vld [vmem:[%s11175_s6 + $0xfc0] ss:$8 sps:$4 sm:$0xff]  }
 0x2d9   : > { %8294 = vmatpush1.bf16.msra.mxu0 %v9899_v46  ;;  %7967 = vmatprep.subr.bf16.mxu1 %v9904_v0  ;;  %v9988_v46 = vld [vmem:[%s11175_s6 + $0x7d4] ss:$8 sps:$4 sm:$0xff]  }
 0x2da   : > { %8295 = vmatprep.subr.bf16.mxu0 %v9907_v1  ;;  %v9991_v0 = vld [vmem:[%s11175_s6 + $0xfd4] ss:$8 sps:$4 sm:$0xff]   ;;  %v9986_v1 = vld [vmem:[%s11175_s6 + $0x7d0] ss:$8 sps:$4 sm:$0xff]  }
 0x2dc   : > { %7968 = vmatpush1.bf16.msra.mxu1 %v9902_v4  ;;  %v9997_v4 = vld [vmem:[%s11175_s6 + $0xfe4] ss:$8 sps:$4 sm:$0xff]  }
 0x2dd   : > { %8296 = vmatpush1.bf16.msra.mxu0 %v9905_v5  ;;  %7978 = vmatprep.subr.bf16.mxu1 %v9910_v6  ;;  %v9992_v5 = vld [vmem:[%s11175_s6 + $0x7e0] ss:$8 sps:$4 sm:$0xff]  }
 0x2de   : > { %8306 = vmatprep.subr.bf16.mxu0 %v9913_v7  ;;  %v9995_v6 = vld [vmem:[%s11175_s6 + $0xfe0] ss:$8 sps:$4 sm:$0xff]   ;;  %v10000_v7 = vld [vmem:[%s11175_s6 + $0x7f4] ss:$8 sps:$4 sm:$0xff]  }
 0x2df   : > { %7970 = vmatmul.mubr.bf16.vlgmr.msra.gmra.mrb[0].mxu1 %v11672_v62  ;;  %v9920_v62 = vld [vmem:[%s11175_s6 + $0x720] ss:$8 sps:$4 sm:$0xff]  }
 0x2e0   : > { %8298 = vmatmul.mubr.bf16.vlgmr.msra.gmra.mrb[0].mxu0 %v11676_v63  ;;  %7979 = vmatpush1.bf16.msra.mxu1 %v9908_v56  ;;  %v9923_v63 = vld [vmem:[%s11175_s6 + $0xf20] ss:$8 sps:$4 sm:$0xff]   ;;  %v10003_v56 = vld [vmem:[%s11175_s6 + $0xff4] ss:$8 sps:$4 sm:$0xff]  }
 0x2e1   : > { %8307 = vmatpush1.bf16.msra.mxu0 %v9911_v57  ;;  %7980 = vmatprep.subr.bf16.mxu1 %v9916_v8  ;;  %v9998_v57 = vld [vmem:[%s11175_s6 + $0x7f0] ss:$8 sps:$4 sm:$0xff]  }
 0x2e2   : > { %8308 = vmatprep.subr.bf16.mxu0 %v9919_v9  ;;  %8010 = vmatprep.mubr.bf16.mxu1 %v5030_v10  ;;  %v10001_v8 = vld [vmem:[%s11175_s6 + $0xff0] ss:$8 sps:$4 sm:$0xff]   ;;  %v8361_v9 = vsub.s32 0, %v11220_v43  ;;  %v8365_v10 = vsub.s32 1, %v11220_v43 }
 0x2e3   : > { %8338 = vmatprep.mubr.bf16.mxu0 %v5098_v11  ;;  %v8357_v11 = vld [vmem:[%s4417_s22] sm:$0x3] }
 0x2e4   : > { %7981 = vmatpush1.bf16.msra.mxu1 %v9914_v49  ;;  %v8362_v49 = vrot.slane %v8357_v11, %v8361_v9 }
 0x2e5   : > { %8309 = vmatpush1.bf16.msra.mxu0 %v9917_v12  ;;  %7982 = vmatprep.subr.bf16.mxu1 %v9922_v13  ;;  %v8366_v12 = vrot.slane %v8357_v11, %v8365_v10 }
 0x2e6   : > { %8310 = vmatprep.subr.bf16.mxu0 %v9925_v14 }
 0x2e8   : > { %7983 = vmatpush1.bf16.msra.mxu1 %v9920_v62 }
 0x2e9   : > { %8311 = vmatpush1.bf16.msra.mxu0 %v9923_v63  ;;  %7984 = vmatprep.subr.bf16.mxu1 %v9928_v15  ;;  %v8367_v15 = vcombine.low %v8362_v49, %v8366_v12 }
 0x2ea   : > { %8312 = vmatprep.subr.bf16.mxu0 %v9931_v18 }
 0x2ec   : > { %7985 = vmatpush1.bf16.msra.mxu1 %v9926_v19 }
 0x2ed   : > { %8313 = vmatpush1.bf16.msra.mxu0 %v9929_v20  ;;  %7986 = vmatprep.subr.bf16.mxu1 %v9934_v21 }
 0x2ee   : > { %8314 = vmatprep.subr.bf16.mxu0 %v9937_v22 }
 0x2f0   : > { %7987 = vmatpush1.bf16.msra.mxu1 %v9932_v23 }
 0x2f1   : > { %8315 = vmatpush1.bf16.msra.mxu0 %v9935_v24  ;;  %7988 = vmatprep.subr.bf16.mxu1 %v9940_v25 }
 0x2f2   : > { %8316 = vmatprep.subr.bf16.mxu0 %v9943_v26 }
 0x2f4   : > { %7989 = vmatpush1.bf16.msra.mxu1 %v9938_v28 }
 0x2f5   : > { %8317 = vmatpush1.bf16.msra.mxu0 %v9941_v31  ;;  %7990 = vmatprep.subr.bf16.mxu1 %v9946_v32 }
 0x2f6   : > { %8318 = vmatprep.subr.bf16.mxu0 %v9949_v33 }
 0x2f8   : > { %7991 = vmatpush1.bf16.msra.mxu1 %v9944_v35 }
 0x2f9   : > { %8319 = vmatpush1.bf16.msra.mxu0 %v9947_v16  ;;  %7992 = vmatprep.subr.bf16.mxu1 %v9952_v17 }
 0x2fa   : > { %8320 = vmatprep.subr.bf16.mxu0 %v9955_v37 }
 0x2fc   : > { %7993 = vmatpush1.bf16.msra.mxu1 %v9950_v30 }
 0x2fd   : > { %8321 = vmatpush1.bf16.msra.mxu0 %v9953_v40  ;;  %7994 = vmatprep.subr.bf16.mxu1 %v9958_v41 }
 0x2fe   : > { %8322 = vmatprep.subr.bf16.mxu0 %v9961_v42 }
 0x300   : > { %7995 = vmatpush1.bf16.msra.mxu1 %v9956_v44 }
 0x301   : > { %8323 = vmatpush1.bf16.msra.mxu0 %v9959_v47  ;;  %7996 = vmatprep.subr.bf16.mxu1 %v9964_v29 }
 0x302   : > { %8324 = vmatprep.subr.bf16.mxu0 %v9967_v34 }
 0x304   : > { %7997 = vmatpush1.bf16.msra.mxu1 %v9962_v48 }
 0x305   : > { %8325 = vmatpush1.bf16.msra.mxu0 %v9965_v50  ;;  %7998 = vmatprep.subr.bf16.mxu1 %v9970_v51 }
 0x306   : > { %8326 = vmatprep.subr.bf16.mxu0 %v9973_v52 }
 0x308   : > { %7999 = vmatpush1.bf16.msra.mxu1 %v9968_v53 }
 0x309   : > { %8327 = vmatpush1.bf16.msra.mxu0 %v9971_v54  ;;  %8000 = vmatprep.subr.bf16.mxu1 %v9976_v55 }
 0x30a   : > { %8328 = vmatprep.subr.bf16.mxu0 %v9979_v38 }
 0x30c   : > { %8001 = vmatpush1.bf16.msra.mxu1 %v9974_v39 }
 0x30d   : > { %8329 = vmatpush1.bf16.msra.mxu0 %v9977_v58  ;;  %8002 = vmatprep.subr.bf16.mxu1 %v9982_v59 }
 0x30e   : > { %8330 = vmatprep.subr.bf16.mxu0 %v9985_v60 }
 0x310   : > { %8003 = vmatpush1.bf16.msra.mxu1 %v9980_v61 }
 0x311   : > { %8331 = vmatpush1.bf16.msra.mxu0 %v9983_v45  ;;  %8004 = vmatprep.subr.bf16.mxu1 %v9988_v46 }
 0x312   : > { %8332 = vmatprep.subr.bf16.mxu0 %v9991_v0 }
 0x314   : > { %8005 = vmatpush1.bf16.msra.mxu1 %v9986_v1 }
 0x315   : > { %8333 = vmatpush1.bf16.msra.mxu0 %v9989_v2  ;;  %8006 = vmatprep.subr.bf16.mxu1 %v9994_v3 }
 0x316   : > { %8334 = vmatprep.subr.bf16.mxu0 %v9997_v4 }
 0x318   : > { %8007 = vmatpush1.bf16.msra.mxu1 %v9992_v5 }
 0x319   : > { %8335 = vmatpush1.bf16.msra.mxu0 %v9995_v6  ;;  %8008 = vmatprep.subr.bf16.mxu1 %v10000_v7 }
 0x31a   : > { %8336 = vmatprep.subr.bf16.mxu0 %v10003_v56 }
 0x31c   : > { %8009 = vmatpush1.bf16.msra.mxu1 %v9998_v57 }
 0x31d   : > { %8337 = vmatpush1.bf16.msra.mxu0 %v10001_v8 }
 0x31f   : > { %8011 = vmatmul.mubr.bf16.vlgmr.msra.gmra.mrb[0].mxu1 %v11753_v36 }
 0x320   : > { %8339 = vmatmul.mubr.bf16.vlgmr.msra.gmra.mrb[0].mxu0 %v11756_v27 }
 0x3f2   : > { %v8012_v13 = vpop.f32.mrb[0].mxu1 }
 0x3f3   : > { %v8340_v36 = vpop.f32.mrb[0].mxu0  ;;  %v8014_v27 = vpop.f32.mrb[1].mxu1 }
 0x3f4   : > { %v9115_v14 = vadd.f32 %v8340_v36, %v8012_v13  ;;  %v8342_v62 = vpop.f32.mrb[1].mxu0  ;;  %v8016_v18 = vpop.f32.mrb[2].mxu1 }
 0x3f5   : > { %v9116_v63 = vadd.f32 %v8342_v62, %v8014_v27  ;;  %v8344_v19 = vpop.f32.mrb[2].mxu0  ;;  %v8017_v20 = vpop.f32.mrb[3].mxu1 }
 0x3f6   : > { %v8345_v21 = vpop.f32.mrb[3].mxu0 }
 0x3f7   : > { %v8349_v22 = vcombine.low %v9115_v14, %v9116_v63 }
 0x3f9   : > { %v8369_v23 = vadd.f32 %v8367_v15, %v8349_v22 }
 0x3fb   : > { %v8371_v24 = vcombine.high %v8369_v23, %v8369_v23  ;;  %v8374_v25 = vsel %vm8373_vm0, %v8369_v23, 0.0  ;;  %v8390_v43 = vmul.f32 %v8369_v23, %v8369_v23 }
 0x3fc   : > { %v8375_v26 = vrot.slane %v8374_v25, 4 }
 0x3fd   : > { %v8381_v28 = vsel %vm8373_vm0, %v8371_v24, 0.0  ;;  %v8392_v31 = vcombine.high %v8390_v43, %v8390_v43  ;;  %v8394_v32 = vsel %vm8373_vm0, %v8390_v43, 0.0 }
 0x3fe   : > { %v8376_v33 = vadd.f32 %v8375_v26, %v8374_v25  ;;  %v8382_v35 = vrot.slane %v8381_v28, 4  ;;  %v8395_v16 = vrot.slane %v8394_v32, 4 }
 0x3ff   : > { %v8401_v17 = vsel %vm8373_vm0, %v8392_v31, 0.0 }
 0x400   : > { %v8377_v37 = vrot.slane %v8376_v33, 2  ;;  %v8383_v30 = vadd.f32 %v8382_v35, %v8381_v28  ;;  %v8396_v40 = vadd.f32 %v8395_v16, %v8394_v32  ;;  %v8402_v41 = vrot.slane %v8401_v17, 4 }
 0x402   : > { %v8378_v42 = vadd.f32 %v8377_v37, %v8376_v33  ;;  %v8384_v44 = vrot.slane %v8383_v30, 2  ;;  %v8397_v47 = vrot.slane %v8396_v40, 2  ;;  %v8403_v29 = vadd.f32 %v8402_v41, %v8401_v17 }
 0x404   : > { %v8379_v34 = vrot.slane %v8378_v42, 1  ;;  %v8385_v48 = vadd.f32 %v8384_v44, %v8383_v30  ;;  %v8398_v50 = vadd.f32 %v8397_v47, %v8396_v40  ;;  %v8404_v51 = vrot.slane %v8403_v29, 2 }
 0x406   : > { %v8380_v52 = vadd.f32 %v8379_v34, %v8378_v42  ;;  %v8386_v53 = vrot.slane %v8385_v48, 1  ;;  %v8399_v54 = vrot.slane %v8398_v50, 1  ;;  %v8405_v55 = vadd.f32 %v8404_v51, %v8403_v29 }
 0x408   : > { %v8387_v38 = vadd.f32 %v8386_v53, %v8385_v48  ;;  %v8388_v39 = vmul.f32 0.25, %v8380_v52  ;;  %v8400_v58 = vadd.f32 %v8399_v54, %v8398_v50  ;;  %v8406_v59 = vrot.slane %v8405_v55, 1 }
 0x40a   : > { %v8389_v60 = vmul.f32 0.25, %v8387_v38  ;;  %v8407_v61 = vadd.f32 %v8406_v59, %v8405_v55  ;;  %v8408_v45 = vmul.f32 0.25, %v8400_v58  ;;  %v8410_v46 = vmul.f32 %v8388_v39, %v8388_v39 }
 0x40c   : > { %v8409_v0 = vmul.f32 0.25, %v8407_v61  ;;  %v8411_v1 = vmul.f32 %v8389_v60, %v8389_v60  ;;  %v8412_v2 = vsub.f32 %v8408_v45, %v8410_v46  ;;  %v8418_v56 = vcombine.low %v8388_v39, %v8389_v60 }
 0x40e   : > { %v8413_v3 = vsub.f32 %v8409_v0, %v8411_v1  ;;  %v8414_v4 = vmax.f32 %v8412_v2, 0.0  ;;  %v8420_v9 = vsub.f32 %v8369_v23, %v8418_v56 }
 0x410   : > { %v8415_v5 = vmax.f32 %v8413_v3, 0.0  ;;  %v8421_v6 = vadd.f32 1e-05, %v8414_v4 }
 0x412   : > { %v8422_v7 = vadd.f32 1e-05, %v8415_v5  ;;  %10006 = vrsqrt.f32 %v8421_v6 }
 0x414   : > { %10008 = vrsqrt.f32 %v8422_v7 }
 0x41c   : > { %v10007_v57 = vpop.eup %10006 }
 0x41e   : > { %v10009_v8 = vpop.eup %10008 }
 0x41f   : > { %v8427_v10 = vcombine.low %v10007_v57, %v10009_v8 }
 0x421   : > { %v8429_v11 = vmul.f32 %v8427_v10, %v8420_v9 }
 0x423   : > { %vm8430_vm1 = vcmp.ge.f32.partialorder %v8429_v11, 0.0  ;;  %v8431_v49 = vmul.f32 0.2, %v8429_v11 }
 0x425   : > { %v8432_v12 = vsel %vm8430_vm1, %v8429_v11, %v8431_v49 }
 0x426   : > { %v8434_v13 = vcombine.high %v8432_v12, %v8432_v12 }
 0x428   : > { %v9109_v36 = vpack.c.bf16 %v8434_v13, %v8432_v12 }
 0x42a   : > { %9110 = vst.sshfl [vmem:[%s4427_s28] sm:$0x33 pattern:$0x76325410] %v9109_v36 }
 0x42b PF: > { %s13_s18 = sadd.s32 1, %s10064_s18   ;;  %s11867_s12 = smov %s10044_s13 }
 0x42c   : > { %p10_p12 = scmp.ge.s32.totalorder %s13_s18, 6   ;;  %s11868_s13 = smov %s10136_s23 }
 0x42d   : > { %s11869_s14 = smov %s10056_s16  ;;  %s11870_s15 = smov %s10060_s17 }
 0x42e   : > { %s11871_s16 = smov %s11874_s19  ;;  %s11872_s17 = smov %s11878_s20 }
 0x42f   :  { %12 = sbr.rel (!%p10_p12) target bundleno = 4 (0x4), region = 139 }

// kernel: discriminator_forward.9
= control target key start
LH: loop header
LB: loop body
LE: loop exit
PB: predicated region body
PF: predicated region fallthrough
CT: control target
= control target key end

     0   :  { %s9211_s1 = inlined_call_operand.vmem [shape: bf16[8192,128], index: 1, kind: input, shape index: {}]   ;;  %s9212_s0 = inlined_call_operand.vmem [shape: bf16[8,8192], index: 0, kind: input, shape index: {}]   ;;  %s9213_s2 = inlined_call_operand.vmem [shape: f32[1,128], index: 2, kind: input, shape index: {}]   ;;  %s9214_s3 = inlined_call_operand.vmem [shape: f32[8,128], index: 3, kind: output, shape index: {}]  }
   0x1   :  { %v6953_v0 = vld [vmem:[%s9211_s1 + $0x40] sm:$0xff]   ;;  %v6957_v4 = vld [vmem:[%s9211_s1 + $0x48] sm:$0xff]   ;;  %v6961_v8 = vld [vmem:[%s9211_s1 + $0x50] sm:$0xff]  }
   0x2   :  { %v6954_v1 = vld [vmem:[%s9211_s1 + $0xc0] sm:$0xff]   ;;  %6249 = vmatprep.subr.bf16.mxu0 %v6953_v0  ;;  %v6958_v5 = vld [vmem:[%s9211_s1 + $0xc8] sm:$0xff]   ;;  %v6962_v9 = vld [vmem:[%s9211_s1 + $0xd0] sm:$0xff]  }
   0x3   :  { %v6955_v2 = vld [vmem:[%s9211_s1] sm:$0xff]   ;;  %6271 = vmatprep.subr.bf16.mxu1 %v6954_v1  ;;  %v6959_v6 = vld [vmem:[%s9211_s1 + $0x8] sm:$0xff]   ;;  %v6963_v10 = vld [vmem:[%s9211_s1 + $0x10] sm:$0xff]  }
   0x4   :  { %v6956_v3 = vld [vmem:[%s9211_s1 + $0x80] sm:$0xff]   ;;  %6250 = vmatpush3.bf16.msra.mxu0 %v6955_v2  ;;  %v6960_v7 = vld [vmem:[%s9211_s1 + $0x88] sm:$0xff]   ;;  %v6964_v11 = vld [vmem:[%s9211_s1 + $0x90] sm:$0xff]  }
   0x5   :  { %6272 = vmatpush3.bf16.msra.mxu1 %v6956_v3  ;;  %6251 = vmatprep.subr.bf16.mxu0 %v6957_v4  ;;  %v6965_v12 = vld [vmem:[%s9211_s1 + $0x58] sm:$0xff]   ;;  %v6969_v16 = vld [vmem:[%s9211_s1 + $0x60] sm:$0xff]   ;;  %v6973_v20 = vld [vmem:[%s9211_s1 + $0x68] sm:$0xff]  }
   0x6   :  { %6273 = vmatprep.subr.bf16.mxu1 %v6958_v5  ;;  %v6966_v13 = vld [vmem:[%s9211_s1 + $0xd8] sm:$0xff]   ;;  %v6970_v17 = vld [vmem:[%s9211_s1 + $0xe0] sm:$0xff]   ;;  %v6974_v21 = vld [vmem:[%s9211_s1 + $0xe8] sm:$0xff]  }
   0x7   :  { %v6967_v14 = vld [vmem:[%s9211_s1 + $0x18] sm:$0xff]   ;;  %v6971_v18 = vld [vmem:[%s9211_s1 + $0x20] sm:$0xff]   ;;  %v6975_v22 = vld [vmem:[%s9211_s1 + $0x28] sm:$0xff]  }
   0x8   :  { %6252 = vmatpush3.bf16.msra.mxu0 %v6959_v6  ;;  %v6968_v15 = vld [vmem:[%s9211_s1 + $0x98] sm:$0xff]   ;;  %v6972_v19 = vld [vmem:[%s9211_s1 + $0xa0] sm:$0xff]   ;;  %v6976_v23 = vld [vmem:[%s9211_s1 + $0xa8] sm:$0xff]  }
   0x9   :  { %6274 = vmatpush3.bf16.msra.mxu1 %v6960_v7  ;;  %6253 = vmatprep.subr.bf16.mxu0 %v6961_v8  ;;  %v6977_v24 = vld [vmem:[%s9211_s1 + $0x70] sm:$0xff]   ;;  %v6981_v28 = vld [vmem:[%s9211_s1 + $0x78] sm:$0xff]   ;;  %v21_v32 = vld [vmem:[%s9212_s0] sm:$0xff] }
   0xa   :  { %6275 = vmatprep.subr.bf16.mxu1 %v6962_v9  ;;  %v6978_v25 = vld [vmem:[%s9211_s1 + $0xf0] sm:$0xff]   ;;  %v6982_v29 = vld [vmem:[%s9211_s1 + $0xf8] sm:$0xff]   ;;  %v22_v33 = vld [vmem:[%s9212_s0 + $0x8] sm:$0xff]  ;;  %v5672_v34 = vcombine.low %v21_v32, %v21_v32  ;;  %v5673_v35 = vcombine.high %v21_v32, %v21_v32 }
   0xb   :  { %v6979_v26 = vld [vmem:[%s9211_s1 + $0x30] sm:$0xff]   ;;  %v6983_v30 = vld [vmem:[%s9211_s1 + $0x38] sm:$0xff]   ;;  %v5674_v36 = vcombine.low %v22_v33, %v22_v33  ;;  %v5675_v37 = vcombine.high %v22_v33, %v22_v33  ;;  %v6989_v38 = vld [vmem:[%s9211_s1 + $0x140] sm:$0xff]  }
   0xc   :  { %6254 = vmatpush3.bf16.msra.mxu0 %v6963_v10  ;;  %v6980_v27 = vld [vmem:[%s9211_s1 + $0xb0] sm:$0xff]   ;;  %v6984_v31 = vld [vmem:[%s9211_s1 + $0xb8] sm:$0xff]   ;;  %v6990_v39 = vld [vmem:[%s9211_s1 + $0x1c0] sm:$0xff]   ;;  %4405 = vmatprep.mubr.bf16.mxu0 %v5673_v35 }
   0xd   :  { %6276 = vmatpush3.bf16.msra.mxu1 %v6964_v11  ;;  %6255 = vmatprep.subr.bf16.mxu0 %v6965_v12  ;;  %v6991_v40 = vld [vmem:[%s9211_s1 + $0x100] sm:$0xff]   ;;  %v6993_v42 = vld [vmem:[%s9211_s1 + $0x148] sm:$0xff]   ;;  %v6997_v46 = vld [vmem:[%s9211_s1 + $0x150] sm:$0xff]  }
   0xe   :  { %6277 = vmatprep.subr.bf16.mxu1 %v6966_v13  ;;  %4445 = vmatprep.mubr.bf16.mxu1 %v5675_v37  ;;  %v6992_v41 = vld [vmem:[%s9211_s1 + $0x180] sm:$0xff]   ;;  %v6994_v43 = vld [vmem:[%s9211_s1 + $0x1c8] sm:$0xff]   ;;  %v6998_v47 = vld [vmem:[%s9211_s1 + $0x1d0] sm:$0xff]  }
   0xf   :  { %v6995_v44 = vld [vmem:[%s9211_s1 + $0x108] sm:$0xff]   ;;  %v6999_v48 = vld [vmem:[%s9211_s1 + $0x110] sm:$0xff]   ;;  %v7001_v50 = vld [vmem:[%s9211_s1 + $0x158] sm:$0xff]  }
  0x10   :  { %6256 = vmatpush3.bf16.msra.mxu0 %v6967_v14  ;;  %v6996_v45 = vld [vmem:[%s9211_s1 + $0x188] sm:$0xff]   ;;  %v7000_v49 = vld [vmem:[%s9211_s1 + $0x190] sm:$0xff]   ;;  %v7002_v51 = vld [vmem:[%s9211_s1 + $0x1d8] sm:$0xff]  }
  0x11   :  { %6278 = vmatpush3.bf16.msra.mxu1 %v6968_v15  ;;  %6257 = vmatprep.subr.bf16.mxu0 %v6969_v16  ;;  %v7003_v52 = vld [vmem:[%s9211_s1 + $0x118] sm:$0xff]   ;;  %v7005_v54 = vld [vmem:[%s9211_s1 + $0x160] sm:$0xff]   ;;  %v7009_v58 = vld [vmem:[%s9211_s1 + $0x168] sm:$0xff]  }
  0x12   :  { %6279 = vmatprep.subr.bf16.mxu1 %v6970_v17  ;;  %v7004_v53 = vld [vmem:[%s9211_s1 + $0x198] sm:$0xff]   ;;  %v7006_v55 = vld [vmem:[%s9211_s1 + $0x1e0] sm:$0xff]   ;;  %v7010_v59 = vld [vmem:[%s9211_s1 + $0x1e8] sm:$0xff]  }
  0x13   :  { %v7007_v56 = vld [vmem:[%s9211_s1 + $0x120] sm:$0xff]   ;;  %v7011_v60 = vld [vmem:[%s9211_s1 + $0x128] sm:$0xff]   ;;  %v7013_v62 = vld [vmem:[%s9211_s1 + $0x170] sm:$0xff]  }
  0x14   :  { %6258 = vmatpush3.bf16.msra.mxu0 %v6971_v18  ;;  %v7008_v57 = vld [vmem:[%s9211_s1 + $0x1a0] sm:$0xff]   ;;  %v7012_v61 = vld [vmem:[%s9211_s1 + $0x1a8] sm:$0xff]   ;;  %v7014_v63 = vld [vmem:[%s9211_s1 + $0x1f0] sm:$0xff]  }
  0x15   :  { %6280 = vmatpush3.bf16.msra.mxu1 %v6972_v19  ;;  %6259 = vmatprep.subr.bf16.mxu0 %v6973_v20  ;;  %v7015_v0 = vld [vmem:[%s9211_s1 + $0x130] sm:$0xff]   ;;  %v7017_v2 = vld [vmem:[%s9211_s1 + $0x178] sm:$0xff]   ;;  %v7025_v12 = vld [vmem:[%s9211_s1 + $0x240] sm:$0xff]  }
  0x16   :  { %6281 = vmatprep.subr.bf16.mxu1 %v6974_v21  ;;  %v7016_v1 = vld [vmem:[%s9211_s1 + $0x1b0] sm:$0xff]   ;;  %v7018_v3 = vld [vmem:[%s9211_s1 + $0x1f8] sm:$0xff]   ;;  %v7026_v13 = vld [vmem:[%s9211_s1 + $0x2c0] sm:$0xff]  }
  0x17   :  { %v7019_v4 = vld [vmem:[%s9211_s1 + $0x138] sm:$0xff]   ;;  %v23_v6 = vld [vmem:[%s9212_s0 + $0x10] sm:$0xff]  ;;  %v7027_v14 = vld [vmem:[%s9211_s1 + $0x200] sm:$0xff]  }
  0x18   :  { %6260 = vmatpush3.bf16.msra.mxu0 %v6975_v22  ;;  %v7020_v5 = vld [vmem:[%s9211_s1 + $0x1b8] sm:$0xff]   ;;  %v5676_v7 = vcombine.low %v23_v6, %v23_v6  ;;  %v5677_v8 = vcombine.high %v23_v6, %v23_v6  ;;  %v7028_v15 = vld [vmem:[%s9211_s1 + $0x280] sm:$0xff]   ;;  %v7029_v16 = vld [vmem:[%s9211_s1 + $0x248] sm:$0xff]  }
  0x19   :  { %6282 = vmatpush3.bf16.msra.mxu1 %v6976_v23  ;;  %6261 = vmatprep.subr.bf16.mxu0 %v6977_v24  ;;  %v24_v9 = vld [vmem:[%s9212_s0 + $0x18] sm:$0xff]  ;;  %v7030_v17 = vld [vmem:[%s9211_s1 + $0x2c8] sm:$0xff]   ;;  %v7033_v20 = vld [vmem:[%s9211_s1 + $0x250] sm:$0xff]  }
  0x1a   :  { %6283 = vmatprep.subr.bf16.mxu1 %v6978_v25  ;;  %v5678_v10 = vcombine.low %v24_v9, %v24_v9  ;;  %v5679_v11 = vcombine.high %v24_v9, %v24_v9  ;;  %v7031_v18 = vld [vmem:[%s9211_s1 + $0x208] sm:$0xff]   ;;  %v7034_v21 = vld [vmem:[%s9211_s1 + $0x2d0] sm:$0xff]   ;;  %v7037_v24 = vld [vmem:[%s9211_s1 + $0x258] sm:$0xff]  }
  0x1b   :  { %v7032_v19 = vld [vmem:[%s9211_s1 + $0x288] sm:$0xff]   ;;  %v7035_v22 = vld [vmem:[%s9211_s1 + $0x210] sm:$0xff]   ;;  %v7038_v25 = vld [vmem:[%s9211_s1 + $0x2d8] sm:$0xff]  }
  0x1c   :  { %6262 = vmatpush3.bf16.msra.mxu0 %v6979_v26  ;;  %v7036_v23 = vld [vmem:[%s9211_s1 + $0x290] sm:$0xff]   ;;  %v7039_v26 = vld [vmem:[%s9211_s1 + $0x218] sm:$0xff]   ;;  %v7045_v32 = vld [vmem:[%s9211_s1 + $0x268] sm:$0xff]  }
  0x1d   :  { %6284 = vmatpush3.bf16.msra.mxu1 %v6980_v27  ;;  %6263 = vmatprep.subr.bf16.mxu0 %v6981_v28  ;;  %v7040_v27 = vld [vmem:[%s9211_s1 + $0x298] sm:$0xff]   ;;  %v7041_v28 = vld [vmem:[%s9211_s1 + $0x260] sm:$0xff]   ;;  %v7046_v33 = vld [vmem:[%s9211_s1 + $0x2e8] sm:$0xff]  }
  0x1e   :  { %6285 = vmatprep.subr.bf16.mxu1 %v6982_v29  ;;  %v7042_v29 = vld [vmem:[%s9211_s1 + $0x2e0] sm:$0xff]   ;;  %v7048_v35 = vld [vmem:[%s9211_s1 + $0x2a8] sm:$0xff]   ;;  %v7050_v37 = vld [vmem:[%s9211_s1 + $0x2f0] sm:$0xff]  }
  0x1f   :  { %v7081_v6 = vld [vmem:[%s9211_s1 + $0x368] sm:$0xff]  }
  0x20   :  { %6264 = vmatpush3.bf16.msra.mxu0 %v6983_v30  ;;  %v7043_v30 = vld [vmem:[%s9211_s1 + $0x220] sm:$0xff]   ;;  %v7084_v9 = vld [vmem:[%s9211_s1 + $0x3a8] sm:$0xff]  }
  0x21   :  { %6286 = vmatpush3.bf16.msra.mxu1 %v6984_v31  ;;  %6293 = vmatprep.subr.bf16.mxu0 %v6989_v38  ;;  %v7044_v31 = vld [vmem:[%s9211_s1 + $0x2a0] sm:$0xff]   ;;  %v7051_v38 = vld [vmem:[%s9211_s1 + $0x230] sm:$0xff]  }
  0x22   :  { %6315 = vmatprep.subr.bf16.mxu1 %v6990_v39  ;;  %v7052_v39 = vld [vmem:[%s9211_s1 + $0x2b0] sm:$0xff]  }
  0x23   :  { %4406 = vmatmul.mubr.bf16.vlgmr.msra.gmra.mrb[0].mxu0 %v5672_v34  ;;  %v7047_v34 = vld [vmem:[%s9211_s1 + $0x228] sm:$0xff]  }
  0x24   :  { %4446 = vmatmul.mubr.bf16.vlgmr.msra.gmra.mrb[0].mxu1 %v5674_v36  ;;  %6294 = vmatpush3.bf16.msra.mxu0 %v6991_v40  ;;  %v7049_v36 = vld [vmem:[%s9211_s1 + $0x270] sm:$0xff]   ;;  %v7053_v40 = vld [vmem:[%s9211_s1 + $0x278] sm:$0xff]  }
  0x25   :  { %6316 = vmatpush3.bf16.msra.mxu1 %v6992_v41  ;;  %6295 = vmatprep.subr.bf16.mxu0 %v6993_v42  ;;  %v7054_v41 = vld [vmem:[%s9211_s1 + $0x2f8] sm:$0xff]  }
  0x26   :  { %6317 = vmatprep.subr.bf16.mxu1 %v6994_v43  ;;  %4485 = vmatprep.mubr.bf16.mxu0 %v5677_v8  ;;  %v7055_v42 = vld [vmem:[%s9211_s1 + $0x238] sm:$0xff]   ;;  %v7083_v8 = vld [vmem:[%s9211_s1 + $0x328] sm:$0xff]  }
  0x27   :  { %4525 = vmatprep.mubr.bf16.mxu1 %v5679_v11  ;;  %v7056_v43 = vld [vmem:[%s9211_s1 + $0x2b8] sm:$0xff]   ;;  %v7086_v11 = vld [vmem:[%s9211_s1 + $0x3f0] sm:$0xff]  }
  0x28   :  { %6296 = vmatpush3.bf16.msra.mxu0 %v6995_v44  ;;  %v25_v44 = vld [vmem:[%s9212_s0 + $0x20] sm:$0xff] }
  0x29   :  { %6318 = vmatpush3.bf16.msra.mxu1 %v6996_v45  ;;  %6297 = vmatprep.subr.bf16.mxu0 %v6997_v46  ;;  %v26_v45 = vld [vmem:[%s9212_s0 + $0x28] sm:$0xff]  ;;  %v5680_v46 = vcombine.low %v25_v44, %v25_v44 }
  0x2a   :  { %6319 = vmatprep.subr.bf16.mxu1 %v6998_v47  ;;  %v5681_v47 = vcombine.high %v25_v44, %v25_v44  ;;  %v7117_v44 = vld [vmem:[%s9211_s1 + $0x468] sm:$0xff]  }
  0x2c   :  { %6298 = vmatpush3.bf16.msra.mxu0 %v6999_v48  ;;  %v5682_v48 = vcombine.low %v26_v45, %v26_v45 }
  0x2d   :  { %6320 = vmatpush3.bf16.msra.mxu1 %v7000_v49  ;;  %6299 = vmatprep.subr.bf16.mxu0 %v7001_v50  ;;  %v5683_v49 = vcombine.high %v26_v45, %v26_v45  ;;  %v7061_v50 = vld [vmem:[%s9211_s1 + $0x340] sm:$0xff]   ;;  %v7118_v45 = vld [vmem:[%s9211_s1 + $0x4e8] sm:$0xff]  }
  0x2e   :  { %6321 = vmatprep.subr.bf16.mxu1 %v7002_v51  ;;  %v7062_v51 = vld [vmem:[%s9211_s1 + $0x3c0] sm:$0xff]  }
  0x30   :  { %6300 = vmatpush3.bf16.msra.mxu0 %v7003_v52  ;;  %v7063_v52 = vld [vmem:[%s9211_s1 + $0x300] sm:$0xff]  }
  0x31   :  { %6322 = vmatpush3.bf16.msra.mxu1 %v7004_v53  ;;  %6301 = vmatprep.subr.bf16.mxu0 %v7005_v54  ;;  %v7064_v53 = vld [vmem:[%s9211_s1 + $0x380] sm:$0xff]   ;;  %v7065_v54 = vld [vmem:[%s9211_s1 + $0x348] sm:$0xff]  }
  0x32   :  { %6323 = vmatprep.subr.bf16.mxu1 %v7006_v55  ;;  %v7066_v55 = vld [vmem:[%s9211_s1 + $0x3c8] sm:$0xff]  }
  0x34   :  { %6302 = vmatpush3.bf16.msra.mxu0 %v7007_v56  ;;  %v7067_v56 = vld [vmem:[%s9211_s1 + $0x308] sm:$0xff]  }
  0x35   :  { %6324 = vmatpush3.bf16.msra.mxu1 %v7008_v57  ;;  %6303 = vmatprep.subr.bf16.mxu0 %v7009_v58  ;;  %v7068_v57 = vld [vmem:[%s9211_s1 + $0x388] sm:$0xff]   ;;  %v7069_v58 = vld [vmem:[%s9211_s1 + $0x350] sm:$0xff]  }
  0x36   :  { %6325 = vmatprep.subr.bf16.mxu1 %v7010_v59  ;;  %v7070_v59 = vld [vmem:[%s9211_s1 + $0x3d0] sm:$0xff]  }
  0x38   :  { %6304 = vmatpush3.bf16.msra.mxu0 %v7011_v60  ;;  %v7071_v60 = vld [vmem:[%s9211_s1 + $0x310] sm:$0xff]  }
  0x39   :  { %6326 = vmatpush3.bf16.msra.mxu1 %v7012_v61  ;;  %6305 = vmatprep.subr.bf16.mxu0 %v7013_v62  ;;  %v7072_v61 = vld [vmem:[%s9211_s1 + $0x390] sm:$0xff]   ;;  %v7073_v62 = vld [vmem:[%s9211_s1 + $0x358] sm:$0xff]  }
  0x3a   :  { %6327 = vmatprep.subr.bf16.mxu1 %v7014_v63  ;;  %v7074_v63 = vld [vmem:[%s9211_s1 + $0x3d8] sm:$0xff]  }
  0x3c   :  { %6306 = vmatpush3.bf16.msra.mxu0 %v7015_v0  ;;  %v7075_v0 = vld [vmem:[%s9211_s1 + $0x318] sm:$0xff]  }
  0x3d   :  { %6328 = vmatpush3.bf16.msra.mxu1 %v7016_v1  ;;  %6307 = vmatprep.subr.bf16.mxu0 %v7017_v2  ;;  %v7076_v1 = vld [vmem:[%s9211_s1 + $0x398] sm:$0xff]   ;;  %v7077_v2 = vld [vmem:[%s9211_s1 + $0x360] sm:$0xff]  }
  0x3e   :  { %6329 = vmatprep.subr.bf16.mxu1 %v7018_v3  ;;  %v7078_v3 = vld [vmem:[%s9211_s1 + $0x3e0] sm:$0xff]  }
  0x40   :  { %6308 = vmatpush3.bf16.msra.mxu0 %v7019_v4  ;;  %v7079_v4 = vld [vmem:[%s9211_s1 + $0x320] sm:$0xff]  }
  0x41   :  { %6330 = vmatpush3.bf16.msra.mxu1 %v7020_v5  ;;  %6337 = vmatprep.subr.bf16.mxu0 %v7025_v12  ;;  %v7080_v5 = vld [vmem:[%s9211_s1 + $0x3a0] sm:$0xff]   ;;  %v7087_v12 = vld [vmem:[%s9211_s1 + $0x330] sm:$0xff]  }
  0x42   :  { %6359 = vmatprep.subr.bf16.mxu1 %v7026_v13  ;;  %v7088_v13 = vld [vmem:[%s9211_s1 + $0x3b0] sm:$0xff]  }
  0x43   :  { %4486 = vmatmul.mubr.bf16.vlgmr.msra.gmra.mrb[4].mxu0 %v5676_v7  ;;  %v7082_v7 = vld [vmem:[%s9211_s1 + $0x3e8] sm:$0xff]  }
  0x44   :  { %4526 = vmatmul.mubr.bf16.vlgmr.msra.gmra.mrb[4].mxu1 %v5678_v10  ;;  %6338 = vmatpush3.bf16.msra.mxu0 %v7027_v14  ;;  %v7085_v10 = vld [vmem:[%s9211_s1 + $0x370] sm:$0xff]   ;;  %v7089_v14 = vld [vmem:[%s9211_s1 + $0x378] sm:$0xff]  }
  0x45   :  { %6360 = vmatpush3.bf16.msra.mxu1 %v7028_v15  ;;  %6339 = vmatprep.subr.bf16.mxu0 %v7029_v16  ;;  %v7090_v15 = vld [vmem:[%s9211_s1 + $0x3f8] sm:$0xff]  }
  0x46   :  { %6361 = vmatprep.subr.bf16.mxu1 %v7030_v17  ;;  %4565 = vmatprep.mubr.bf16.mxu0 %v5681_v47  ;;  %v7091_v16 = vld [vmem:[%s9211_s1 + $0x338] sm:$0xff]   ;;  %v7120_v47 = vld [vmem:[%s9211_s1 + $0x4a8] sm:$0xff]  }
  0x47   :  { %4605 = vmatprep.mubr.bf16.mxu1 %v5683_v49  ;;  %v7092_v17 = vld [vmem:[%s9211_s1 + $0x3b8] sm:$0xff]   ;;  %v7122_v49 = vld [vmem:[%s9211_s1 + $0x4f0] sm:$0xff]  }
  0x48   :  { %6340 = vmatpush3.bf16.msra.mxu0 %v7031_v18  ;;  %v27_v18 = vld [vmem:[%s9212_s0 + $0x30] sm:$0xff] }
  0x49   :  { %6362 = vmatpush3.bf16.msra.mxu1 %v7032_v19  ;;  %6341 = vmatprep.subr.bf16.mxu0 %v7033_v20  ;;  %v28_v19 = vld [vmem:[%s9212_s0 + $0x38] sm:$0xff]  ;;  %v5684_v20 = vcombine.low %v27_v18, %v27_v18 }
  0x4a   :  { %6363 = vmatprep.subr.bf16.mxu1 %v7034_v21  ;;  %v5685_v21 = vcombine.high %v27_v18, %v27_v18  ;;  %v7153_v18 = vld [vmem:[%s9211_s1 + $0x568] sm:$0xff]  }
  0x4c   :  { %6342 = vmatpush3.bf16.msra.mxu0 %v7035_v22  ;;  %v5686_v22 = vcombine.low %v28_v19, %v28_v19 }
  0x4d   :  { %6364 = vmatpush3.bf16.msra.mxu1 %v7036_v23  ;;  %6343 = vmatprep.subr.bf16.mxu0 %v7037_v24  ;;  %v7097_v23 = vld [vmem:[%s9211_s1 + $0x440] sm:$0xff]   ;;  %v5687_v24 = vcombine.high %v28_v19, %v28_v19  ;;  %v7154_v19 = vld [vmem:[%s9211_s1 + $0x5e8] sm:$0xff]  }
  0x4e   :  { %6365 = vmatprep.subr.bf16.mxu1 %v7038_v25  ;;  %v7098_v25 = vld [vmem:[%s9211_s1 + $0x4c0] sm:$0xff]  }
  0x50   :  { %6344 = vmatpush3.bf16.msra.mxu0 %v7039_v26  ;;  %v7099_v26 = vld [vmem:[%s9211_s1 + $0x400] sm:$0xff]  }
  0x51   :  { %6366 = vmatpush3.bf16.msra.mxu1 %v7040_v27  ;;  %6345 = vmatprep.subr.bf16.mxu0 %v7041_v28  ;;  %v7100_v27 = vld [vmem:[%s9211_s1 + $0x480] sm:$0xff]   ;;  %v7101_v28 = vld [vmem:[%s9211_s1 + $0x448] sm:$0xff]  }
  0x52   :  { %6367 = vmatprep.subr.bf16.mxu1 %v7042_v29  ;;  %v7102_v29 = vld [vmem:[%s9211_s1 + $0x4c8] sm:$0xff]  }
  0x54   :  { %6346 = vmatpush3.bf16.msra.mxu0 %v7043_v30  ;;  %v7103_v30 = vld [vmem:[%s9211_s1 + $0x408] sm:$0xff]  }
  0x55   :  { %6368 = vmatpush3.bf16.msra.mxu1 %v7044_v31  ;;  %6347 = vmatprep.subr.bf16.mxu0 %v7045_v32  ;;  %v7104_v31 = vld [vmem:[%s9211_s1 + $0x488] sm:$0xff]   ;;  %v7105_v32 = vld [vmem:[%s9211_s1 + $0x450] sm:$0xff]  }
  0x56   :  { %6369 = vmatprep.subr.bf16.mxu1 %v7046_v33  ;;  %v7106_v33 = vld [vmem:[%s9211_s1 + $0x4d0] sm:$0xff]  }
  0x58   :  { %6348 = vmatpush3.bf16.msra.mxu0 %v7047_v34  ;;  %v7107_v34 = vld [vmem:[%s9211_s1 + $0x410] sm:$0xff]  }
  0x59   :  { %6370 = vmatpush3.bf16.msra.mxu1 %v7048_v35  ;;  %6349 = vmatprep.subr.bf16.mxu0 %v7049_v36  ;;  %v7108_v35 = vld [vmem:[%s9211_s1 + $0x490] sm:$0xff]   ;;  %v7109_v36 = vld [vmem:[%s9211_s1 + $0x458] sm:$0xff]  }
  0x5a   :  { %6371 = vmatprep.subr.bf16.mxu1 %v7050_v37  ;;  %v7110_v37 = vld [vmem:[%s9211_s1 + $0x4d8] sm:$0xff]  }
  0x5c   :  { %6350 = vmatpush3.bf16.msra.mxu0 %v7051_v38  ;;  %v7111_v38 = vld [vmem:[%s9211_s1 + $0x418] sm:$0xff]  }
  0x5d   :  { %6372 = vmatpush3.bf16.msra.mxu1 %v7052_v39  ;;  %6351 = vmatprep.subr.bf16.mxu0 %v7053_v40  ;;  %v7112_v39 = vld [vmem:[%s9211_s1 + $0x498] sm:$0xff]   ;;  %v7113_v40 = vld [vmem:[%s9211_s1 + $0x460] sm:$0xff]  }
  0x5e   :  { %6373 = vmatprep.subr.bf16.mxu1 %v7054_v41  ;;  %v7114_v41 = vld [vmem:[%s9211_s1 + $0x4e0] sm:$0xff]  }
  0x60   :  { %6352 = vmatpush3.bf16.msra.mxu0 %v7055_v42  ;;  %v7115_v42 = vld [vmem:[%s9211_s1 + $0x420] sm:$0xff]  }
  0x61   :  { %6374 = vmatpush3.bf16.msra.mxu1 %v7056_v43  ;;  %6381 = vmatprep.subr.bf16.mxu0 %v7061_v50  ;;  %v7116_v43 = vld [vmem:[%s9211_s1 + $0x4a0] sm:$0xff]   ;;  %v7123_v50 = vld [vmem:[%s9211_s1 + $0x430] sm:$0xff]  }
  0x62   :  { %6403 = vmatprep.subr.bf16.mxu1 %v7062_v51  ;;  %v7124_v51 = vld [vmem:[%s9211_s1 + $0x4b0] sm:$0xff]  }
  0x63   :  { %4566 = vmatmul.mubr.bf16.vlgmr.msra.gmra.mrb[8].mxu0 %v5680_v46  ;;  %v7119_v46 = vld [vmem:[%s9211_s1 + $0x428] sm:$0xff]  }
  0x64   :  { %4606 = vmatmul.mubr.bf16.vlgmr.msra.gmra.mrb[8].mxu1 %v5682_v48  ;;  %6382 = vmatpush3.bf16.msra.mxu0 %v7063_v52  ;;  %v7121_v48 = vld [vmem:[%s9211_s1 + $0x470] sm:$0xff]   ;;  %v7125_v52 = vld [vmem:[%s9211_s1 + $0x478] sm:$0xff]  }
  0x65   :  { %6404 = vmatpush3.bf16.msra.mxu1 %v7064_v53  ;;  %6383 = vmatprep.subr.bf16.mxu0 %v7065_v54  ;;  %v7126_v53 = vld [vmem:[%s9211_s1 + $0x4f8] sm:$0xff]  }
  0x66   :  { %6405 = vmatprep.subr.bf16.mxu1 %v7066_v55  ;;  %4645 = vmatprep.mubr.bf16.mxu0 %v5685_v21  ;;  %v7127_v54 = vld [vmem:[%s9211_s1 + $0x438] sm:$0xff]   ;;  %v7156_v21 = vld [vmem:[%s9211_s1 + $0x5a8] sm:$0xff]  }
  0x67   :  { %4685 = vmatprep.mubr.bf16.mxu1 %v5687_v24  ;;  %v7128_v55 = vld [vmem:[%s9211_s1 + $0x4b8] sm:$0xff]   ;;  %v7159_v24 = vld [vmem:[%s9211_s1 + $0x530] sm:$0xff]  }
  0x68   :  { %6384 = vmatpush3.bf16.msra.mxu0 %v7067_v56  ;;  %v29_v56 = vld [vmem:[%s9212_s0 + $0x40] sm:$0xff] }
  0x69   :  { %6406 = vmatpush3.bf16.msra.mxu1 %v7068_v57  ;;  %6385 = vmatprep.subr.bf16.mxu0 %v7069_v58  ;;  %v5688_v57 = vcombine.low %v29_v56, %v29_v56  ;;  %v5689_v58 = vcombine.high %v29_v56, %v29_v56  ;;  %v7189_v56 = vld [vmem:[%s9211_s1 + $0x668] sm:$0xff]  }
  0x6a   :  { %6407 = vmatprep.subr.bf16.mxu1 %v7070_v59  ;;  %v30_v59 = vld [vmem:[%s9212_s0 + $0x48] sm:$0xff] }
  0x6c   :  { %6386 = vmatpush3.bf16.msra.mxu0 %v7071_v60  ;;  %v5690_v60 = vcombine.low %v30_v59, %v30_v59 }
  0x6d   :  { %6408 = vmatpush3.bf16.msra.mxu1 %v7072_v61  ;;  %6387 = vmatprep.subr.bf16.mxu0 %v7073_v62  ;;  %v5691_v61 = vcombine.high %v30_v59, %v30_v59  ;;  %v7133_v62 = vld [vmem:[%s9211_s1 + $0x540] sm:$0xff]   ;;  %v7192_v59 = vld [vmem:[%s9211_s1 + $0x6a8] sm:$0xff]  }
  0x6e   :  { %6409 = vmatprep.subr.bf16.mxu1 %v7074_v63  ;;  %v7134_v63 = vld [vmem:[%s9211_s1 + $0x5c0] sm:$0xff]  }
  0x70   :  { %6388 = vmatpush3.bf16.msra.mxu0 %v7075_v0  ;;  %v7135_v0 = vld [vmem:[%s9211_s1 + $0x500] sm:$0xff]  }
  0x71   :  { %6410 = vmatpush3.bf16.msra.mxu1 %v7076_v1  ;;  %6389 = vmatprep.subr.bf16.mxu0 %v7077_v2  ;;  %v7136_v1 = vld [vmem:[%s9211_s1 + $0x580] sm:$0xff]   ;;  %v7137_v2 = vld [vmem:[%s9211_s1 + $0x548] sm:$0xff]  }
  0x72   :  { %6411 = vmatprep.subr.bf16.mxu1 %v7078_v3  ;;  %v7138_v3 = vld [vmem:[%s9211_s1 + $0x5c8] sm:$0xff]  }
  0x74   :  { %6390 = vmatpush3.bf16.msra.mxu0 %v7079_v4  ;;  %v7139_v4 = vld [vmem:[%s9211_s1 + $0x508] sm:$0xff]  }
  0x75   :  { %6412 = vmatpush3.bf16.msra.mxu1 %v7080_v5  ;;  %6391 = vmatprep.subr.bf16.mxu0 %v7081_v6  ;;  %v7140_v5 = vld [vmem:[%s9211_s1 + $0x588] sm:$0xff]   ;;  %v7141_v6 = vld [vmem:[%s9211_s1 + $0x550] sm:$0xff]  }
  0x76   :  { %6413 = vmatprep.subr.bf16.mxu1 %v7082_v7  ;;  %v7142_v7 = vld [vmem:[%s9211_s1 + $0x5d0] sm:$0xff]  }
  0x78   :  { %6392 = vmatpush3.bf16.msra.mxu0 %v7083_v8  ;;  %v7143_v8 = vld [vmem:[%s9211_s1 + $0x510] sm:$0xff]  }
  0x79   :  { %6414 = vmatpush3.bf16.msra.mxu1 %v7084_v9  ;;  %6393 = vmatprep.subr.bf16.mxu0 %v7085_v10  ;;  %v7144_v9 = vld [vmem:[%s9211_s1 + $0x590] sm:$0xff]   ;;  %v7145_v10 = vld [vmem:[%s9211_s1 + $0x558] sm:$0xff]  }
  0x7a   :  { %6415 = vmatprep.subr.bf16.mxu1 %v7086_v11  ;;  %v7146_v11 = vld [vmem:[%s9211_s1 + $0x5d8] sm:$0xff]  }
  0x7c   :  { %6394 = vmatpush3.bf16.msra.mxu0 %v7087_v12  ;;  %v7147_v12 = vld [vmem:[%s9211_s1 + $0x518] sm:$0xff]  }
  0x7d   :  { %6416 = vmatpush3.bf16.msra.mxu1 %v7088_v13  ;;  %6395 = vmatprep.subr.bf16.mxu0 %v7089_v14  ;;  %v7148_v13 = vld [vmem:[%s9211_s1 + $0x598] sm:$0xff]   ;;  %v7149_v14 = vld [vmem:[%s9211_s1 + $0x560] sm:$0xff]  }
  0x7e   :  { %6417 = vmatprep.subr.bf16.mxu1 %v7090_v15  ;;  %v7150_v15 = vld [vmem:[%s9211_s1 + $0x5e0] sm:$0xff]  }
  0x80   :  { %6396 = vmatpush3.bf16.msra.mxu0 %v7091_v16  ;;  %v7151_v16 = vld [vmem:[%s9211_s1 + $0x520] sm:$0xff]  }
  0x81   :  { %6418 = vmatpush3.bf16.msra.mxu1 %v7092_v17  ;;  %6425 = vmatprep.subr.bf16.mxu0 %v7097_v23  ;;  %v7152_v17 = vld [vmem:[%s9211_s1 + $0x5a0] sm:$0xff]   ;;  %v7158_v23 = vld [vmem:[%s9211_s1 + $0x5f0] sm:$0xff]  }
  0x82   :  { %6447 = vmatprep.subr.bf16.mxu1 %v7098_v25  ;;  %v7160_v25 = vld [vmem:[%s9211_s1 + $0x5b0] sm:$0xff]  }
  0x83   :  { %4646 = vmatmul.mubr.bf16.vlgmr.msra.gmra.mrb[12].mxu0 %v5684_v20  ;;  %v7155_v20 = vld [vmem:[%s9211_s1 + $0x528] sm:$0xff]  }
  0x84   :  { %4686 = vmatmul.mubr.bf16.vlgmr.msra.gmra.mrb[12].mxu1 %v5686_v22  ;;  %6426 = vmatpush3.bf16.msra.mxu0 %v7099_v26  ;;  %v7157_v22 = vld [vmem:[%s9211_s1 + $0x570] sm:$0xff]   ;;  %v7161_v26 = vld [vmem:[%s9211_s1 + $0x578] sm:$0xff]  }
  0x85   :  { %6448 = vmatpush3.bf16.msra.mxu1 %v7100_v27  ;;  %6427 = vmatprep.subr.bf16.mxu0 %v7101_v28  ;;  %v7162_v27 = vld [vmem:[%s9211_s1 + $0x5f8] sm:$0xff]  }
  0x86   :  { %6449 = vmatprep.subr.bf16.mxu1 %v7102_v29  ;;  %4725 = vmatprep.mubr.bf16.mxu0 %v5689_v58  ;;  %v7163_v28 = vld [vmem:[%s9211_s1 + $0x538] sm:$0xff]   ;;  %v7191_v58 = vld [vmem:[%s9211_s1 + $0x628] sm:$0xff]  }
  0x87   :  { %4765 = vmatprep.mubr.bf16.mxu1 %v5691_v61  ;;  %v7164_v29 = vld [vmem:[%s9211_s1 + $0x5b8] sm:$0xff]   ;;  %v7194_v61 = vld [vmem:[%s9211_s1 + $0x6f0] sm:$0xff]  }
  0x88   :  { %6428 = vmatpush3.bf16.msra.mxu0 %v7103_v30  ;;  %v31_v30 = vld [vmem:[%s9212_s0 + $0x50] sm:$0xff] }
  0x89   :  { %6450 = vmatpush3.bf16.msra.mxu1 %v7104_v31  ;;  %6429 = vmatprep.subr.bf16.mxu0 %v7105_v32  ;;  %v32_v31 = vld [vmem:[%s9212_s0 + $0x58] sm:$0xff]  ;;  %v5692_v32 = vcombine.low %v31_v30, %v31_v30 }
  0x8a   :  { %6451 = vmatprep.subr.bf16.mxu1 %v7106_v33  ;;  %v5693_v33 = vcombine.high %v31_v30, %v31_v30  ;;  %v7224_v30 = vld [vmem:[%s9211_s1 + $0x7a0] sm:$0xff]  }
  0x8c   :  { %6430 = vmatpush3.bf16.msra.mxu0 %v7107_v34  ;;  %v5694_v34 = vcombine.low %v32_v31, %v32_v31 }
  0x8d   :  { %6452 = vmatpush3.bf16.msra.mxu1 %v7108_v35  ;;  %6431 = vmatprep.subr.bf16.mxu0 %v7109_v36  ;;  %v5695_v35 = vcombine.high %v32_v31, %v32_v31  ;;  %v7169_v36 = vld [vmem:[%s9211_s1 + $0x640] sm:$0xff]  }
  0x8e   :  { %6453 = vmatprep.subr.bf16.mxu1 %v7110_v37  ;;  %v7170_v37 = vld [vmem:[%s9211_s1 + $0x6c0] sm:$0xff]  }
  0x90   :  { %6432 = vmatpush3.bf16.msra.mxu0 %v7111_v38  ;;  %v7171_v38 = vld [vmem:[%s9211_s1 + $0x600] sm:$0xff]  }
  0x91   :  { %6454 = vmatpush3.bf16.msra.mxu1 %v7112_v39  ;;  %6433 = vmatprep.subr.bf16.mxu0 %v7113_v40  ;;  %v7172_v39 = vld [vmem:[%s9211_s1 + $0x680] sm:$0xff]   ;;  %v7173_v40 = vld [vmem:[%s9211_s1 + $0x648] sm:$0xff]  }
  0x92   :  { %6455 = vmatprep.subr.bf16.mxu1 %v7114_v41  ;;  %v7174_v41 = vld [vmem:[%s9211_s1 + $0x6c8] sm:$0xff]  }
  0x94   :  { %6434 = vmatpush3.bf16.msra.mxu0 %v7115_v42  ;;  %v7175_v42 = vld [vmem:[%s9211_s1 + $0x608] sm:$0xff]  }
  0x95   :  { %6456 = vmatpush3.bf16.msra.mxu1 %v7116_v43  ;;  %6435 = vmatprep.subr.bf16.mxu0 %v7117_v44  ;;  %v7176_v43 = vld [vmem:[%s9211_s1 + $0x688] sm:$0xff]   ;;  %v7177_v44 = vld [vmem:[%s9211_s1 + $0x650] sm:$0xff]  }
  0x96   :  { %6457 = vmatprep.subr.bf16.mxu1 %v7118_v45  ;;  %v7178_v45 = vld [vmem:[%s9211_s1 + $0x6d0] sm:$0xff]  }
  0x98   :  { %6436 = vmatpush3.bf16.msra.mxu0 %v7119_v46  ;;  %v7179_v46 = vld [vmem:[%s9211_s1 + $0x610] sm:$0xff]  }
  0x99   :  { %6458 = vmatpush3.bf16.msra.mxu1 %v7120_v47  ;;  %6437 = vmatprep.subr.bf16.mxu0 %v7121_v48  ;;  %v7180_v47 = vld [vmem:[%s9211_s1 + $0x690] sm:$0xff]   ;;  %v7181_v48 = vld [vmem:[%s9211_s1 + $0x658] sm:$0xff]  }
  0x9a   :  { %6459 = vmatprep.subr.bf16.mxu1 %v7122_v49  ;;  %v7182_v49 = vld [vmem:[%s9211_s1 + $0x6d8] sm:$0xff]  }
  0x9c   :  { %6438 = vmatpush3.bf16.msra.mxu0 %v7123_v50  ;;  %v7183_v50 = vld [vmem:[%s9211_s1 + $0x618] sm:$0xff]  }
  0x9d   :  { %6460 = vmatpush3.bf16.msra.mxu1 %v7124_v51  ;;  %6439 = vmatprep.subr.bf16.mxu0 %v7125_v52  ;;  %v7184_v51 = vld [vmem:[%s9211_s1 + $0x698] sm:$0xff]   ;;  %v7185_v52 = vld [vmem:[%s9211_s1 + $0x660] sm:$0xff]  }
  0x9e   :  { %6461 = vmatprep.subr.bf16.mxu1 %v7126_v53  ;;  %v7186_v53 = vld [vmem:[%s9211_s1 + $0x6e0] sm:$0xff]  }
  0xa0   :  { %6440 = vmatpush3.bf16.msra.mxu0 %v7127_v54  ;;  %v7187_v54 = vld [vmem:[%s9211_s1 + $0x620] sm:$0xff]  }
  0xa1   :  { %6462 = vmatpush3.bf16.msra.mxu1 %v7128_v55  ;;  %6469 = vmatprep.subr.bf16.mxu0 %v7133_v62  ;;  %v7188_v55 = vld [vmem:[%s9211_s1 + $0x6a0] sm:$0xff]   ;;  %v7195_v62 = vld [vmem:[%s9211_s1 + $0x630] sm:$0xff]  }
  0xa2   :  { %6491 = vmatprep.subr.bf16.mxu1 %v7134_v63  ;;  %v7196_v63 = vld [vmem:[%s9211_s1 + $0x6b0] sm:$0xff]  }
  0xa3   :  { %4726 = vmatmul.mubr.bf16.vlgmr.msra.gmra.mrb[16].mxu0 %v5688_v57  ;;  %v7190_v57 = vld [vmem:[%s9211_s1 + $0x6e8] sm:$0xff]  }
  0xa4   :  { %4766 = vmatmul.mubr.bf16.vlgmr.msra.gmra.mrb[16].mxu1 %v5690_v60  ;;  %6470 = vmatpush3.bf16.msra.mxu0 %v7135_v0  ;;  %v7193_v60 = vld [vmem:[%s9211_s1 + $0x670] sm:$0xff]   ;;  %v7197_v0 = vld [vmem:[%s9211_s1 + $0x678] sm:$0xff]  }
  0xa5   :  { %6492 = vmatpush3.bf16.msra.mxu1 %v7136_v1  ;;  %6471 = vmatprep.subr.bf16.mxu0 %v7137_v2  ;;  %v7198_v1 = vld [vmem:[%s9211_s1 + $0x6f8] sm:$0xff]  }
  0xa6   :  { %6493 = vmatprep.subr.bf16.mxu1 %v7138_v3  ;;  %4805 = vmatprep.mubr.bf16.mxu0 %v5693_v33  ;;  %v7199_v2 = vld [vmem:[%s9211_s1 + $0x638] sm:$0xff]   ;;  %v7225_v33 = vld [vmem:[%s9211_s1 + $0x768] sm:$0xff]  }
  0xa7   :  { %4845 = vmatprep.mubr.bf16.mxu1 %v5695_v35  ;;  %v7200_v3 = vld [vmem:[%s9211_s1 + $0x6b8] sm:$0xff]  }
  0xa8   :  { %6472 = vmatpush3.bf16.msra.mxu0 %v7139_v4  ;;  %v33_v4 = vld [vmem:[%s9212_s0 + $0x60] sm:$0xff] }
  0xa9   :  { %6494 = vmatpush3.bf16.msra.mxu1 %v7140_v5  ;;  %6473 = vmatprep.subr.bf16.mxu0 %v7141_v6  ;;  %v34_v5 = vld [vmem:[%s9212_s0 + $0x68] sm:$0xff]  ;;  %v5696_v6 = vcombine.low %v33_v4, %v33_v4 }
  0xaa   :  { %6495 = vmatprep.subr.bf16.mxu1 %v7142_v7  ;;  %v5697_v7 = vcombine.high %v33_v4, %v33_v4  ;;  %v7250_v4 = vld [vmem:[%s9211_s1 + $0x8d0] sm:$0xff]  }
  0xac   :  { %6474 = vmatpush3.bf16.msra.mxu0 %v7143_v8  ;;  %v5698_v8 = vcombine.low %v34_v5, %v34_v5 }
  0xad   :  { %6496 = vmatpush3.bf16.msra.mxu1 %v7144_v9  ;;  %6475 = vmatprep.subr.bf16.mxu0 %v7145_v10  ;;  %v7205_v9 = vld [vmem:[%s9211_s1 + $0x740] sm:$0xff]   ;;  %v5699_v10 = vcombine.high %v34_v5, %v34_v5  ;;  %v7251_v5 = vld [vmem:[%s9211_s1 + $0x810] sm:$0xff]  }
  0xae   :  { %6497 = vmatprep.subr.bf16.mxu1 %v7146_v11  ;;  %v7206_v11 = vld [vmem:[%s9211_s1 + $0x7c0] sm:$0xff]  }
  0xb0   :  { %6476 = vmatpush3.bf16.msra.mxu0 %v7147_v12  ;;  %v7207_v12 = vld [vmem:[%s9211_s1 + $0x700] sm:$0xff]  }
  0xb1   :  { %6498 = vmatpush3.bf16.msra.mxu1 %v7148_v13  ;;  %6477 = vmatprep.subr.bf16.mxu0 %v7149_v14  ;;  %v7208_v13 = vld [vmem:[%s9211_s1 + $0x780] sm:$0xff]   ;;  %v7209_v14 = vld [vmem:[%s9211_s1 + $0x748] sm:$0xff]  }
  0xb2   :  { %6499 = vmatprep.subr.bf16.mxu1 %v7150_v15  ;;  %v7210_v15 = vld [vmem:[%s9211_s1 + $0x7c8] sm:$0xff]  }
  0xb4   :  { %6478 = vmatpush3.bf16.msra.mxu0 %v7151_v16  ;;  %v7211_v16 = vld [vmem:[%s9211_s1 + $0x708] sm:$0xff]  }
  0xb5   :  { %6500 = vmatpush3.bf16.msra.mxu1 %v7152_v17  ;;  %6479 = vmatprep.subr.bf16.mxu0 %v7153_v18  ;;  %v7212_v17 = vld [vmem:[%s9211_s1 + $0x788] sm:$0xff]   ;;  %v7213_v18 = vld [vmem:[%s9211_s1 + $0x750] sm:$0xff]  }
  0xb6   :  { %6501 = vmatprep.subr.bf16.mxu1 %v7154_v19  ;;  %v7214_v19 = vld [vmem:[%s9211_s1 + $0x7d0] sm:$0xff]  }
  0xb8   :  { %6480 = vmatpush3.bf16.msra.mxu0 %v7155_v20  ;;  %v7215_v20 = vld [vmem:[%s9211_s1 + $0x710] sm:$0xff]  }
  0xb9   :  { %6502 = vmatpush3.bf16.msra.mxu1 %v7156_v21  ;;  %6481 = vmatprep.subr.bf16.mxu0 %v7157_v22  ;;  %v7216_v21 = vld [vmem:[%s9211_s1 + $0x790] sm:$0xff]   ;;  %v7217_v22 = vld [vmem:[%s9211_s1 + $0x758] sm:$0xff]  }
  0xba   :  { %6503 = vmatprep.subr.bf16.mxu1 %v7158_v23  ;;  %v7218_v23 = vld [vmem:[%s9211_s1 + $0x7d8] sm:$0xff]  }
  0xbc   :  { %6482 = vmatpush3.bf16.msra.mxu0 %v7159_v24  ;;  %v7219_v24 = vld [vmem:[%s9211_s1 + $0x718] sm:$0xff]  }
  0xbd   :  { %6504 = vmatpush3.bf16.msra.mxu1 %v7160_v25  ;;  %6483 = vmatprep.subr.bf16.mxu0 %v7161_v26  ;;  %v7220_v25 = vld [vmem:[%s9211_s1 + $0x798] sm:$0xff]   ;;  %v7221_v26 = vld [vmem:[%s9211_s1 + $0x760] sm:$0xff]  }
  0xbe   :  { %6505 = vmatprep.subr.bf16.mxu1 %v7162_v27  ;;  %v7222_v27 = vld [vmem:[%s9211_s1 + $0x7e0] sm:$0xff]  }
  0xc0   :  { %6484 = vmatpush3.bf16.msra.mxu0 %v7163_v28  ;;  %v7223_v28 = vld [vmem:[%s9211_s1 + $0x720] sm:$0xff]  }
  0xc1   :  { %6506 = vmatpush3.bf16.msra.mxu1 %v7164_v29  ;;  %6513 = vmatprep.subr.bf16.mxu0 %v7169_v36  ;;  %v7226_v36 = vld [vmem:[%s9211_s1 + $0x7e8] sm:$0xff]  }
  0xc2   :  { %6535 = vmatprep.subr.bf16.mxu1 %v7170_v37 }
  0xc3   :  { %4806 = vmatmul.mubr.bf16.vlgmr.msra.gmra.mrb[20].mxu0 %v5692_v32 }
  0xc4   :  { %4846 = vmatmul.mubr.bf16.vlgmr.msra.gmra.mrb[20].mxu1 %v5694_v34  ;;  %6514 = vmatpush3.bf16.msra.mxu0 %v7171_v38 }
  0xc5   :  { %6536 = vmatpush3.bf16.msra.mxu1 %v7172_v39  ;;  %6515 = vmatprep.subr.bf16.mxu0 %v7173_v40  ;;  %v7227_v40 = vld [vmem:[%s9211_s1 + $0x728] sm:$0xff]  }
  0xc6   :  { %6537 = vmatprep.subr.bf16.mxu1 %v7174_v41  ;;  %4885 = vmatprep.mubr.bf16.mxu0 %v5697_v7  ;;  %v7253_v7 = vld [vmem:[%s9211_s1 + $0x858] sm:$0xff]  }
  0xc7   :  { %4925 = vmatprep.mubr.bf16.mxu1 %v5699_v10  ;;  %v7256_v10 = vld [vmem:[%s9211_s1 + $0x898] sm:$0xff]  }
  0xc8   :  { %6516 = vmatpush3.bf16.msra.mxu0 %v7175_v42 }
  0xc9   :  { %6538 = vmatpush3.bf16.msra.mxu1 %v7176_v43  ;;  %6517 = vmatprep.subr.bf16.mxu0 %v7177_v44  ;;  %v7228_v43 = vld [vmem:[%s9211_s1 + $0x7a8] sm:$0xff]  }
  0xca   :  { %6539 = vmatprep.subr.bf16.mxu1 %v7178_v45  ;;  %v7229_v45 = vld [vmem:[%s9211_s1 + $0x770] sm:$0xff]  }
  0xcc   :  { %6518 = vmatpush3.bf16.msra.mxu0 %v7179_v46  ;;  %v7230_v46 = vld [vmem:[%s9211_s1 + $0x7f0] sm:$0xff]  }
  0xcd   :  { %6540 = vmatpush3.bf16.msra.mxu1 %v7180_v47  ;;  %6519 = vmatprep.subr.bf16.mxu0 %v7181_v48  ;;  %v7231_v47 = vld [vmem:[%s9211_s1 + $0x730] sm:$0xff]  }
  0xce   :  { %6541 = vmatprep.subr.bf16.mxu1 %v7182_v49  ;;  %v7232_v48 = vld [vmem:[%s9211_s1 + $0x7b0] sm:$0xff]   ;;  %v7233_v49 = vld [vmem:[%s9211_s1 + $0x778] sm:$0xff]  }
  0xd0   :  { %6520 = vmatpush3.bf16.msra.mxu0 %v7183_v50  ;;  %v7234_v50 = vld [vmem:[%s9211_s1 + $0x7f8] sm:$0xff]  }
  0xd1   :  { %6542 = vmatpush3.bf16.msra.mxu1 %v7184_v51  ;;  %6521 = vmatprep.subr.bf16.mxu0 %v7185_v52  ;;  %v7235_v51 = vld [vmem:[%s9211_s1 + $0x738] sm:$0xff]  }
  0xd2   :  { %6543 = vmatprep.subr.bf16.mxu1 %v7186_v53  ;;  %v7236_v52 = vld [vmem:[%s9211_s1 + $0x7b8] sm:$0xff]   ;;  %v35_v53 = vld [vmem:[%s9212_s0 + $0x70] sm:$0xff] }
  0xd4   :  { %6522 = vmatpush3.bf16.msra.mxu0 %v7187_v54  ;;  %v36_v54 = vld [vmem:[%s9212_s0 + $0x78] sm:$0xff] }
  0xd5   :  { %6544 = vmatpush3.bf16.msra.mxu1 %v7188_v55  ;;  %6523 = vmatprep.subr.bf16.mxu0 %v7189_v56  ;;  %v5700_v55 = vcombine.low %v35_v53, %v35_v53  ;;  %v5701_v56 = vcombine.high %v35_v53, %v35_v53  ;;  %v7285_v53 = vld [vmem:[%s9211_s1 + $0x950] sm:$0xff]  }
  0xd6   :  { %6545 = vmatprep.subr.bf16.mxu1 %v7190_v57  ;;  %v5702_v57 = vcombine.low %v36_v54, %v36_v54 }
  0xd8   :  { %6524 = vmatpush3.bf16.msra.mxu0 %v7191_v58  ;;  %v7241_v58 = vld [vmem:[%s9211_s1 + $0x840] sm:$0xff]  }
  0xd9   :  { %6546 = vmatpush3.bf16.msra.mxu1 %v7192_v59  ;;  %6525 = vmatprep.subr.bf16.mxu0 %v7193_v60  ;;  %v5703_v59 = vcombine.high %v36_v54, %v36_v54  ;;  %v7242_v60 = vld [vmem:[%s9211_s1 + $0x8c0] sm:$0xff]   ;;  %v7286_v54 = vld [vmem:[%s9211_s1 + $0x9d0] sm:$0xff]  }
  0xda   :  { %6547 = vmatprep.subr.bf16.mxu1 %v7194_v61  ;;  %v7243_v61 = vld [vmem:[%s9211_s1 + $0x800] sm:$0xff]  }
  0xdc   :  { %6526 = vmatpush3.bf16.msra.mxu0 %v7195_v62  ;;  %v7244_v62 = vld [vmem:[%s9211_s1 + $0x880] sm:$0xff]  }
  0xdd   :  { %6548 = vmatpush3.bf16.msra.mxu1 %v7196_v63  ;;  %6527 = vmatprep.subr.bf16.mxu0 %v7197_v0  ;;  %v7245_v63 = vld [vmem:[%s9211_s1 + $0x848] sm:$0xff]  }
  0xde   :  { %6549 = vmatprep.subr.bf16.mxu1 %v7198_v1  ;;  %v7246_v0 = vld [vmem:[%s9211_s1 + $0x8c8] sm:$0xff]  }
  0xdf   :  { %v7247_v1 = vld [vmem:[%s9211_s1 + $0x808] sm:$0xff]  }
  0xe0   :  { %6528 = vmatpush3.bf16.msra.mxu0 %v7199_v2  ;;  %v7248_v2 = vld [vmem:[%s9211_s1 + $0x888] sm:$0xff]  }
  0xe1   :  { %6550 = vmatpush3.bf16.msra.mxu1 %v7200_v3  ;;  %6557 = vmatprep.subr.bf16.mxu0 %v7205_v9  ;;  %v7249_v3 = vld [vmem:[%s9211_s1 + $0x850] sm:$0xff]   ;;  %v7255_v9 = vld [vmem:[%s9211_s1 + $0x818] sm:$0xff]  }
  0xe2   :  { %6579 = vmatprep.subr.bf16.mxu1 %v7206_v11  ;;  %v7257_v11 = vld [vmem:[%s9211_s1 + $0x860] sm:$0xff]  }
  0xe3   :  { %4886 = vmatmul.mubr.bf16.vlgmr.msra.gmra.mrb[24].mxu0 %v5696_v6  ;;  %v7252_v6 = vld [vmem:[%s9211_s1 + $0x890] sm:$0xff]  }
  0xe4   :  { %4926 = vmatmul.mubr.bf16.vlgmr.msra.gmra.mrb[24].mxu1 %v5698_v8  ;;  %6558 = vmatpush3.bf16.msra.mxu0 %v7207_v12  ;;  %v7254_v8 = vld [vmem:[%s9211_s1 + $0x8d8] sm:$0xff]   ;;  %v7258_v12 = vld [vmem:[%s9211_s1 + $0x8e0] sm:$0xff]  }
  0xe5   :  { %6580 = vmatpush3.bf16.msra.mxu1 %v7208_v13  ;;  %6559 = vmatprep.subr.bf16.mxu0 %v7209_v14  ;;  %v7259_v13 = vld [vmem:[%s9211_s1 + $0x820] sm:$0xff]  }
  0xe6   :  { %6581 = vmatprep.subr.bf16.mxu1 %v7210_v15  ;;  %4965 = vmatprep.mubr.bf16.mxu0 %v5701_v56  ;;  %v7260_v15 = vld [vmem:[%s9211_s1 + $0x8a0] sm:$0xff]   ;;  %v7288_v56 = vld [vmem:[%s9211_s1 + $0x990] sm:$0xff]  }
  0xe7   :  { %5005 = vmatprep.mubr.bf16.mxu1 %v5703_v59  ;;  %v7291_v59 = vld [vmem:[%s9211_s1 + $0x918] sm:$0xff]  }
  0xe8   :  { %6560 = vmatpush3.bf16.msra.mxu0 %v7211_v16 }
  0xe9   :  { %6582 = vmatpush3.bf16.msra.mxu1 %v7212_v17  ;;  %6561 = vmatprep.subr.bf16.mxu0 %v7213_v18  ;;  %v7261_v18 = vld [vmem:[%s9211_s1 + $0x868] sm:$0xff]  }
  0xea   :  { %6583 = vmatprep.subr.bf16.mxu1 %v7214_v19 }
  0xec   :  { %6562 = vmatpush3.bf16.msra.mxu0 %v7215_v20 }
  0xed   :  { %6584 = vmatpush3.bf16.msra.mxu1 %v7216_v21  ;;  %6563 = vmatprep.subr.bf16.mxu0 %v7217_v22  ;;  %v7262_v21 = vld [vmem:[%s9211_s1 + $0x8e8] sm:$0xff]  }
  0xee   :  { %6585 = vmatprep.subr.bf16.mxu1 %v7218_v23 }
  0xf0   :  { %6564 = vmatpush3.bf16.msra.mxu0 %v7219_v24 }
  0xf1   :  { %6586 = vmatpush3.bf16.msra.mxu1 %v7220_v25  ;;  %6565 = vmatprep.subr.bf16.mxu0 %v7221_v26  ;;  %v7263_v26 = vld [vmem:[%s9211_s1 + $0x828] sm:$0xff]  }
  0xf2   :  { %6587 = vmatprep.subr.bf16.mxu1 %v7222_v27 }
  0xf4   :  { %6566 = vmatpush3.bf16.msra.mxu0 %v7223_v28  ;;  %v7264_v28 = vld [vmem:[%s9211_s1 + $0x8a8] sm:$0xff]  }
  0xf5   :  { %6588 = vmatpush3.bf16.msra.mxu1 %v7224_v30  ;;  %6567 = vmatprep.subr.bf16.mxu0 %v7225_v33  ;;  %v7267_v33 = vld [vmem:[%s9211_s1 + $0x830] sm:$0xff]  }
  0xf6   :  { %v6265_v29 = vpop.f32.mrb[0].mxu0  ;;  %6589 = vmatprep.subr.bf16.mxu1 %v7226_v36  ;;  %v7270_v36 = vld [vmem:[%s9211_s1 + $0x8f8] sm:$0xff]  }
  0xf7   :  { %v6287_v31 = vpop.f32.mrb[0].mxu1  ;;  %v6266_v32 = vpop.f32.mrb[1].mxu0 }
  0xf8   :  { %v6267_v34 = vadd.f32 %v6266_v32, %v6265_v29  ;;  %v6288_v35 = vpop.f32.mrb[1].mxu1  ;;  %v6268_v38 = vpop.f32.mrb[2].mxu0  ;;  %6568 = vmatpush3.bf16.msra.mxu0 %v7227_v40  ;;  %v7266_v32 = vld [vmem:[%s9211_s1 + $0x8f0] sm:$0xff]   ;;  %v38_v40 = vld [vmem:[%s9212_s0 + $0x88] sm:$0xff] }
  0xf9   :  { %v6289_v37 = vadd.f32 %v6288_v35, %v6287_v31  ;;  %v6290_v39 = vpop.f32.mrb[2].mxu1  ;;  %v6269_v41 = vpop.f32.mrb[3].mxu0  ;;  %6590 = vmatpush3.bf16.msra.mxu1 %v7228_v43  ;;  %6569 = vmatprep.subr.bf16.mxu0 %v7229_v45  ;;  %v7265_v31 = vld [vmem:[%s9211_s1 + $0x870] sm:$0xff]   ;;  %v7269_v35 = vld [vmem:[%s9211_s1 + $0x878] sm:$0xff]   ;;  %v5706_v43 = vcombine.low %v38_v40, %v38_v40  ;;  %v5707_v45 = vcombine.high %v38_v40, %v38_v40 }
  0xfa   :  { %v6291_v44 = vpop.f32.mrb[3].mxu1  ;;  %6591 = vmatprep.subr.bf16.mxu1 %v7230_v46  ;;  %v7272_v38 = vld [vmem:[%s9211_s1 + $0x8b8] sm:$0xff]   ;;  %v37_v39 = vld [vmem:[%s9212_s0 + $0x80] sm:$0xff]  ;;  %v7322_v40 = vld [vmem:[%s9211_s1 + $0xad0] sm:$0xff]  }
  0xfb   :  { %v8332_v42 = vadd.f32 %v6289_v37, %v6267_v34  ;;  %v7268_v34 = vld [vmem:[%s9211_s1 + $0x8b0] sm:$0xff]   ;;  %v7271_v37 = vld [vmem:[%s9211_s1 + $0x838] sm:$0xff]   ;;  %v5704_v41 = vcombine.low %v37_v39, %v37_v39  ;;  %v7277_v44 = vld [vmem:[%s9211_s1 + $0x940] sm:$0xff]  }
  0xfc   :  { %6570 = vmatpush3.bf16.msra.mxu0 %v7231_v47  ;;  %v7278_v46 = vld [vmem:[%s9211_s1 + $0x9c0] sm:$0xff]  }
  0xfd   :  { %6592 = vmatpush3.bf16.msra.mxu1 %v7232_v48  ;;  %6571 = vmatprep.subr.bf16.mxu0 %v7233_v49  ;;  %v7279_v47 = vld [vmem:[%s9211_s1 + $0x900] sm:$0xff]   ;;  %v7281_v49 = vld [vmem:[%s9211_s1 + $0x948] sm:$0xff]  }
  0xfe   :  { %6593 = vmatprep.subr.bf16.mxu1 %v7234_v50  ;;  %v7280_v48 = vld [vmem:[%s9211_s1 + $0x980] sm:$0xff]   ;;  %v7282_v50 = vld [vmem:[%s9211_s1 + $0x9c8] sm:$0xff]  }
 0x100   :  { %6572 = vmatpush3.bf16.msra.mxu0 %v7235_v51  ;;  %v7283_v51 = vld [vmem:[%s9211_s1 + $0x908] sm:$0xff]  }
 0x101   :  { %6594 = vmatpush3.bf16.msra.mxu1 %v7236_v52  ;;  %6601 = vmatprep.subr.bf16.mxu0 %v7241_v58  ;;  %v7284_v52 = vld [vmem:[%s9211_s1 + $0x988] sm:$0xff]   ;;  %v7290_v58 = vld [vmem:[%s9211_s1 + $0x9d8] sm:$0xff]  }
 0x102   :  { %6623 = vmatprep.subr.bf16.mxu1 %v7242_v60  ;;  %v7292_v60 = vld [vmem:[%s9211_s1 + $0x998] sm:$0xff]  }
 0x103   :  { %4966 = vmatmul.mubr.bf16.vlgmr.msra.gmra.mrb[28].mxu0 %v5700_v55  ;;  %v7287_v55 = vld [vmem:[%s9211_s1 + $0x910] sm:$0xff]  }
 0x104   :  { %5006 = vmatmul.mubr.bf16.vlgmr.msra.gmra.mrb[28].mxu1 %v5702_v57  ;;  %6602 = vmatpush3.bf16.msra.mxu0 %v7243_v61  ;;  %v7289_v57 = vld [vmem:[%s9211_s1 + $0x958] sm:$0xff]   ;;  %v7293_v61 = vld [vmem:[%s9211_s1 + $0x960] sm:$0xff]  }
 0x105   :  { %6624 = vmatpush3.bf16.msra.mxu1 %v7244_v62  ;;  %6603 = vmatprep.subr.bf16.mxu0 %v7245_v63  ;;  %v7294_v62 = vld [vmem:[%s9211_s1 + $0x9e0] sm:$0xff]  }
 0x106   :  { %6625 = vmatprep.subr.bf16.mxu1 %v7246_v0  ;;  %5085 = vmatprep.mubr.bf16.mxu1 %v5707_v45  ;;  %v7295_v0 = vld [vmem:[%s9211_s1 + $0x920] sm:$0xff]   ;;  %v7327_v45 = vld [vmem:[%s9211_s1 + $0xa18] sm:$0xff]  }
 0x108   :  { %6604 = vmatpush3.bf16.msra.mxu0 %v7247_v1 }
 0x109   :  { %6626 = vmatpush3.bf16.msra.mxu1 %v7248_v2  ;;  %6605 = vmatprep.subr.bf16.mxu0 %v7249_v3  ;;  %v7296_v2 = vld [vmem:[%s9211_s1 + $0x9a0] sm:$0xff]  }
 0x10a   :  { %6627 = vmatprep.subr.bf16.mxu1 %v7250_v4 }
 0x10c   :  { %6606 = vmatpush3.bf16.msra.mxu0 %v7251_v5  ;;  %v7297_v5 = vld [vmem:[%s9211_s1 + $0x968] sm:$0xff]  }
 0x10d   :  { %6628 = vmatpush3.bf16.msra.mxu1 %v7252_v6  ;;  %6607 = vmatprep.subr.bf16.mxu0 %v7253_v7 }
 0x10e   :  { %6629 = vmatprep.subr.bf16.mxu1 %v7254_v8  ;;  %v7298_v8 = vld [vmem:[%s9211_s1 + $0x9e8] sm:$0xff]  }
 0x110   :  { %6608 = vmatpush3.bf16.msra.mxu0 %v7255_v9 }
 0x111   :  { %6630 = vmatpush3.bf16.msra.mxu1 %v7256_v10  ;;  %6609 = vmatprep.subr.bf16.mxu0 %v7257_v11  ;;  %v7299_v11 = vld [vmem:[%s9211_s1 + $0x928] sm:$0xff]  }
 0x112   :  { %6631 = vmatprep.subr.bf16.mxu1 %v7258_v12 }
 0x114   :  { %6610 = vmatpush3.bf16.msra.mxu0 %v7259_v13  ;;  %v7300_v13 = vld [vmem:[%s9211_s1 + $0x9a8] sm:$0xff]  }
 0x115   :  { %6632 = vmatpush3.bf16.msra.mxu1 %v7260_v15  ;;  %6611 = vmatprep.subr.bf16.mxu0 %v7261_v18  ;;  %v7302_v18 = vld [vmem:[%s9211_s1 + $0x9f0] sm:$0xff]  }
 0x116   :  { %v6309_v14 = vpop.f32.mrb[4].mxu0  ;;  %6633 = vmatprep.subr.bf16.mxu1 %v7262_v21  ;;  %v7305_v21 = vld [vmem:[%s9211_s1 + $0x978] sm:$0xff]  }
 0x117   :  { %v6331_v16 = vpop.f32.mrb[4].mxu1  ;;  %v6310_v17 = vpop.f32.mrb[5].mxu0 }
 0x118   :  { %v6311_v19 = vadd.f32 %v6310_v17, %v6309_v14  ;;  %v6332_v20 = vpop.f32.mrb[5].mxu1  ;;  %v6312_v23 = vpop.f32.mrb[6].mxu0  ;;  %6612 = vmatpush3.bf16.msra.mxu0 %v7263_v26 }
 0x119   :  { %v6333_v22 = vadd.f32 %v6332_v20, %v6331_v16  ;;  %v6334_v24 = vpop.f32.mrb[6].mxu1  ;;  %v6313_v27 = vpop.f32.mrb[7].mxu0  ;;  %6634 = vmatpush3.bf16.msra.mxu1 %v7264_v28  ;;  %6613 = vmatprep.subr.bf16.mxu0 %v7265_v31  ;;  %v7301_v16 = vld [vmem:[%s9211_s1 + $0x970] sm:$0xff]   ;;  %v7307_v23 = vld [vmem:[%s9211_s1 + $0x938] sm:$0xff]   ;;  %v7313_v31 = vld [vmem:[%s9211_s1 + $0xa40] sm:$0xff]  }
 0x11a   :  { %v4488_v25 = vadd.f32 %v6311_v19, %v8332_v42  ;;  %v6335_v29 = vpop.f32.mrb[7].mxu1  ;;  %6635 = vmatprep.subr.bf16.mxu1 %v7266_v32  ;;  %v5705_v42 = vcombine.high %v37_v39, %v37_v39  ;;  %v7303_v19 = vld [vmem:[%s9211_s1 + $0x930] sm:$0xff]   ;;  %v7308_v24 = vld [vmem:[%s9211_s1 + $0x9b8] sm:$0xff]   ;;  %v7314_v32 = vld [vmem:[%s9211_s1 + $0xac0] sm:$0xff]  }
 0x11b   :  { %v7304_v20 = vld [vmem:[%s9211_s1 + $0x9b0] sm:$0xff]   ;;  %v40_v28 = vld [vmem:[%s9212_s0 + $0x98] sm:$0xff] }
 0x11c   :  { %v8440_v30 = vadd.f32 %v6333_v22, %v4488_v25  ;;  %6614 = vmatpush3.bf16.msra.mxu0 %v7267_v33  ;;  %5045 = vmatprep.mubr.bf16.mxu0 %v5705_v42  ;;  %v7306_v22 = vld [vmem:[%s9211_s1 + $0x9f8] sm:$0xff]   ;;  %v39_v25 = vld [vmem:[%s9212_s0 + $0x90] sm:$0xff]  ;;  %v5710_v29 = vcombine.low %v40_v28, %v40_v28  ;;  %v7315_v33 = vld [vmem:[%s9211_s1 + $0xa00] sm:$0xff]  }
 0x11d   :  { %6636 = vmatpush3.bf16.msra.mxu1 %v7268_v34  ;;  %6615 = vmatprep.subr.bf16.mxu0 %v7269_v35  ;;  %v5708_v26 = vcombine.low %v39_v25, %v39_v25  ;;  %v5709_v27 = vcombine.high %v39_v25, %v39_v25  ;;  %v7316_v34 = vld [vmem:[%s9211_s1 + $0xa80] sm:$0xff]   ;;  %v7317_v35 = vld [vmem:[%s9211_s1 + $0xa48] sm:$0xff]   ;;  %v7321_v39 = vld [vmem:[%s9211_s1 + $0xa50] sm:$0xff]  }
 0x11e   :  { %6637 = vmatprep.subr.bf16.mxu1 %v7270_v36  ;;  %v7318_v36 = vld [vmem:[%s9211_s1 + $0xac8] sm:$0xff]   ;;  %v7324_v42 = vld [vmem:[%s9211_s1 + $0xa90] sm:$0xff]  }
 0x11f   :  { %v7357_v25 = vld [vmem:[%s9211_s1 + $0xb50] sm:$0xff]  }
 0x120   :  { %6616 = vmatpush3.bf16.msra.mxu0 %v7271_v37  ;;  %v7319_v37 = vld [vmem:[%s9211_s1 + $0xa08] sm:$0xff]  }
 0x121   :  { %6638 = vmatpush3.bf16.msra.mxu1 %v7272_v38  ;;  %6645 = vmatprep.subr.bf16.mxu0 %v7277_v44  ;;  %v7320_v38 = vld [vmem:[%s9211_s1 + $0xa88] sm:$0xff]   ;;  %v7326_v44 = vld [vmem:[%s9211_s1 + $0xad8] sm:$0xff]  }
 0x122   :  { %6667 = vmatprep.subr.bf16.mxu1 %v7278_v46  ;;  %v7328_v46 = vld [vmem:[%s9211_s1 + $0xa98] sm:$0xff]  }
 0x123   :  { %5046 = vmatmul.mubr.bf16.vlgmr.msra.gmra.mrb[32].mxu0 %v5704_v41  ;;  %v7323_v41 = vld [vmem:[%s9211_s1 + $0xa10] sm:$0xff]  }
 0x124   :  { %5086 = vmatmul.mubr.bf16.vlgmr.msra.gmra.mrb[32].mxu1 %v5706_v43  ;;  %6646 = vmatpush3.bf16.msra.mxu0 %v7279_v47  ;;  %v7325_v43 = vld [vmem:[%s9211_s1 + $0xa58] sm:$0xff]   ;;  %v7329_v47 = vld [vmem:[%s9211_s1 + $0xa60] sm:$0xff]  }
 0x125   :  { %6668 = vmatpush3.bf16.msra.mxu1 %v7280_v48  ;;  %6647 = vmatprep.subr.bf16.mxu0 %v7281_v49  ;;  %v7330_v48 = vld [vmem:[%s9211_s1 + $0xae0] sm:$0xff]  }
 0x126   :  { %6669 = vmatprep.subr.bf16.mxu1 %v7282_v50  ;;  %5125 = vmatprep.mubr.bf16.mxu0 %v5709_v27  ;;  %v7331_v50 = vld [vmem:[%s9211_s1 + $0xa20] sm:$0xff]   ;;  %v7359_v27 = vld [vmem:[%s9211_s1 + $0xb10] sm:$0xff]  }
 0x128   :  { %6648 = vmatpush3.bf16.msra.mxu0 %v7283_v51 }
 0x129   :  { %6670 = vmatpush3.bf16.msra.mxu1 %v7284_v52  ;;  %6649 = vmatprep.subr.bf16.mxu0 %v7285_v53  ;;  %v7332_v52 = vld [vmem:[%s9211_s1 + $0xaa0] sm:$0xff]  }
 0x12a   :  { %6671 = vmatprep.subr.bf16.mxu1 %v7286_v54 }
 0x12c   :  { %6650 = vmatpush3.bf16.msra.mxu0 %v7287_v55  ;;  %v7333_v55 = vld [vmem:[%s9211_s1 + $0xa68] sm:$0xff]  }
 0x12d   :  { %6672 = vmatpush3.bf16.msra.mxu1 %v7288_v56  ;;  %6651 = vmatprep.subr.bf16.mxu0 %v7289_v57 }
 0x12e   :  { %6673 = vmatprep.subr.bf16.mxu1 %v7290_v58  ;;  %v7334_v58 = vld [vmem:[%s9211_s1 + $0xae8] sm:$0xff]  }
 0x130   :  { %6652 = vmatpush3.bf16.msra.mxu0 %v7291_v59 }
 0x131   :  { %6674 = vmatpush3.bf16.msra.mxu1 %v7292_v60  ;;  %6653 = vmatprep.subr.bf16.mxu0 %v7293_v61  ;;  %v7335_v61 = vld [vmem:[%s9211_s1 + $0xa28] sm:$0xff]  }
 0x132   :  { %6675 = vmatprep.subr.bf16.mxu1 %v7294_v62 }
 0x134   :  { %6654 = vmatpush3.bf16.msra.mxu0 %v7295_v0 }
 0x135   :  { %6676 = vmatpush3.bf16.msra.mxu1 %v7296_v2  ;;  %6655 = vmatprep.subr.bf16.mxu0 %v7297_v5  ;;  %v7337_v2 = vld [vmem:[%s9211_s1 + $0xa70] sm:$0xff]  }
 0x136   :  { %v6353_v63 = vpop.f32.mrb[8].mxu0  ;;  %6677 = vmatprep.subr.bf16.mxu1 %v7298_v8  ;;  %v7339_v5 = vld [vmem:[%s9211_s1 + $0xa30] sm:$0xff]   ;;  %v7342_v8 = vld [vmem:[%s9211_s1 + $0xaf8] sm:$0xff]  }
 0x137   :  { %v6375_v1 = vpop.f32.mrb[8].mxu1  ;;  %v6354_v3 = vpop.f32.mrb[9].mxu0 }
 0x138   :  { %v6376_v4 = vpop.f32.mrb[9].mxu1  ;;  %v6355_v6 = vadd.f32 %v6354_v3, %v6353_v63  ;;  %v6356_v9 = vpop.f32.mrb[10].mxu0  ;;  %6656 = vmatpush3.bf16.msra.mxu0 %v7299_v11  ;;  %v7336_v63 = vld [vmem:[%s9211_s1 + $0xaa8] sm:$0xff]   ;;  %v41_v11 = vld [vmem:[%s9212_s0 + $0xa0] sm:$0xff] }
 0x139   :  { %v6377_v7 = vadd.f32 %v6376_v4, %v6375_v1  ;;  %v6378_v10 = vpop.f32.mrb[10].mxu1  ;;  %v6357_v14 = vpop.f32.mrb[11].mxu0  ;;  %6678 = vmatpush3.bf16.msra.mxu1 %v7300_v13  ;;  %6657 = vmatprep.subr.bf16.mxu0 %v7301_v16  ;;  %v7338_v4 = vld [vmem:[%s9211_s1 + $0xaf0] sm:$0xff]   ;;  %v7343_v9 = vld [vmem:[%s9211_s1 + $0xa38] sm:$0xff]   ;;  %v5712_v13 = vcombine.low %v41_v11, %v41_v11 }
 0x13a   :  { %v4568_v12 = vadd.f32 %v6355_v6, %v8440_v30  ;;  %v6379_v15 = vpop.f32.mrb[11].mxu1  ;;  %6679 = vmatprep.subr.bf16.mxu1 %v7302_v18  ;;  %v5711_v30 = vcombine.high %v40_v28, %v40_v28  ;;  %v7340_v6 = vld [vmem:[%s9211_s1 + $0xab0] sm:$0xff]   ;;  %v7344_v10 = vld [vmem:[%s9211_s1 + $0xab8] sm:$0xff]   ;;  %v5713_v14 = vcombine.high %v41_v11, %v41_v11  ;;  %v7350_v18 = vld [vmem:[%s9211_s1 + $0xbc0] sm:$0xff]  }
 0x13b   :  { %v7360_v28 = vld [vmem:[%s9211_s1 + $0xb90] sm:$0xff]  }
 0x13c   :  { %v8548_v17 = vadd.f32 %v6377_v7, %v4568_v12  ;;  %6658 = vmatpush3.bf16.msra.mxu0 %v7303_v19  ;;  %5165 = vmatprep.mubr.bf16.mxu1 %v5711_v30  ;;  %v7341_v7 = vld [vmem:[%s9211_s1 + $0xa78] sm:$0xff]   ;;  %v42_v12 = vld [vmem:[%s9212_s0 + $0xa8] sm:$0xff]  ;;  %v7351_v19 = vld [vmem:[%s9211_s1 + $0xb00] sm:$0xff]  }
 0x13d   :  { %6680 = vmatpush3.bf16.msra.mxu1 %v7304_v20  ;;  %6659 = vmatprep.subr.bf16.mxu0 %v7305_v21  ;;  %v5714_v15 = vcombine.low %v42_v12, %v42_v12  ;;  %v5715_v16 = vcombine.high %v42_v12, %v42_v12  ;;  %v7352_v20 = vld [vmem:[%s9211_s1 + $0xb80] sm:$0xff]   ;;  %v7353_v21 = vld [vmem:[%s9211_s1 + $0xb48] sm:$0xff]   ;;  %v7362_v30 = vld [vmem:[%s9211_s1 + $0xbd8] sm:$0xff]  }
 0x13e   :  { %6681 = vmatprep.subr.bf16.mxu1 %v7306_v22  ;;  %v7354_v22 = vld [vmem:[%s9211_s1 + $0xbc8] sm:$0xff]   ;;  %v7393_v11 = vld [vmem:[%s9211_s1 + $0xc50] sm:$0xff]  }
 0x13f   :  { %v7394_v12 = vld [vmem:[%s9211_s1 + $0xcd0] sm:$0xff]  }
 0x140   :  { %6660 = vmatpush3.bf16.msra.mxu0 %v7307_v23  ;;  %v7355_v23 = vld [vmem:[%s9211_s1 + $0xb08] sm:$0xff]  }
 0x141   :  { %6682 = vmatpush3.bf16.msra.mxu1 %v7308_v24  ;;  %6689 = vmatprep.subr.bf16.mxu0 %v7313_v31  ;;  %v7356_v24 = vld [vmem:[%s9211_s1 + $0xb88] sm:$0xff]   ;;  %v7363_v31 = vld [vmem:[%s9211_s1 + $0xb18] sm:$0xff]  }
 0x142   :  { %6711 = vmatprep.subr.bf16.mxu1 %v7314_v32  ;;  %v7364_v32 = vld [vmem:[%s9211_s1 + $0xb98] sm:$0xff]  }
 0x143   :  { %5126 = vmatmul.mubr.bf16.vlgmr.msra.gmra.mrb[36].mxu0 %v5708_v26  ;;  %v7358_v26 = vld [vmem:[%s9211_s1 + $0xbd0] sm:$0xff]  }
 0x144   :  { %5166 = vmatmul.mubr.bf16.vlgmr.msra.gmra.mrb[36].mxu1 %v5710_v29  ;;  %6690 = vmatpush3.bf16.msra.mxu0 %v7315_v33  ;;  %v7361_v29 = vld [vmem:[%s9211_s1 + $0xb58] sm:$0xff]   ;;  %v7365_v33 = vld [vmem:[%s9211_s1 + $0xb60] sm:$0xff]  }
 0x145   :  { %6712 = vmatpush3.bf16.msra.mxu1 %v7316_v34  ;;  %6691 = vmatprep.subr.bf16.mxu0 %v7317_v35  ;;  %v7366_v34 = vld [vmem:[%s9211_s1 + $0xbe0] sm:$0xff]  }
 0x146   :  { %6713 = vmatprep.subr.bf16.mxu1 %v7318_v36  ;;  %5205 = vmatprep.mubr.bf16.mxu0 %v5713_v14  ;;  %v7367_v35 = vld [vmem:[%s9211_s1 + $0xb20] sm:$0xff]   ;;  %v7396_v14 = vld [vmem:[%s9211_s1 + $0xc90] sm:$0xff]  }
 0x147   :  { %5245 = vmatprep.mubr.bf16.mxu1 %v5715_v16  ;;  %v7398_v16 = vld [vmem:[%s9211_s1 + $0xcd8] sm:$0xff]  }
 0x148   :  { %6692 = vmatpush3.bf16.msra.mxu0 %v7319_v37  ;;  %v7368_v37 = vld [vmem:[%s9211_s1 + $0xba0] sm:$0xff]  }
 0x149   :  { %6714 = vmatpush3.bf16.msra.mxu1 %v7320_v38  ;;  %6693 = vmatprep.subr.bf16.mxu0 %v7321_v39 }
 0x14a   :  { %6715 = vmatprep.subr.bf16.mxu1 %v7322_v40 }
 0x14c   :  { %6694 = vmatpush3.bf16.msra.mxu0 %v7323_v41 }
 0x14d   :  { %6716 = vmatpush3.bf16.msra.mxu1 %v7324_v42  ;;  %6695 = vmatprep.subr.bf16.mxu0 %v7325_v43  ;;  %v7369_v43 = vld [vmem:[%s9211_s1 + $0xb68] sm:$0xff]  }
 0x14e   :  { %6717 = vmatprep.subr.bf16.mxu1 %v7326_v44 }
 0x150   :  { %6696 = vmatpush3.bf16.msra.mxu0 %v7327_v45  ;;  %v7370_v45 = vld [vmem:[%s9211_s1 + $0xbe8] sm:$0xff]  }
 0x151   :  { %6718 = vmatpush3.bf16.msra.mxu1 %v7328_v46  ;;  %6697 = vmatprep.subr.bf16.mxu0 %v7329_v47 }
 0x152   :  { %6719 = vmatprep.subr.bf16.mxu1 %v7330_v48  ;;  %v7371_v48 = vld [vmem:[%s9211_s1 + $0xb28] sm:$0xff]  }
 0x154   :  { %6698 = vmatpush3.bf16.msra.mxu0 %v7331_v50  ;;  %v7372_v50 = vld [vmem:[%s9211_s1 + $0xba8] sm:$0xff]  }
 0x155   :  { %6720 = vmatpush3.bf16.msra.mxu1 %v7332_v52  ;;  %6699 = vmatprep.subr.bf16.mxu0 %v7333_v55  ;;  %v7375_v55 = vld [vmem:[%s9211_s1 + $0xb30] sm:$0xff]  }
 0x156   :  { %v6397_v49 = vpop.f32.mrb[12].mxu0  ;;  %6721 = vmatprep.subr.bf16.mxu1 %v7334_v58  ;;  %v7378_v58 = vld [vmem:[%s9211_s1 + $0xbf8] sm:$0xff]  }
 0x157   :  { %v6419_v51 = vpop.f32.mrb[12].mxu1  ;;  %v6398_v53 = vpop.f32.mrb[13].mxu0 }
 0x158   :  { %v6420_v54 = vpop.f32.mrb[13].mxu1  ;;  %v6399_v56 = vadd.f32 %v6398_v53, %v6397_v49  ;;  %v6400_v59 = vpop.f32.mrb[14].mxu0  ;;  %6700 = vmatpush3.bf16.msra.mxu0 %v7335_v61  ;;  %v7373_v53 = vld [vmem:[%s9211_s1 + $0xb70] sm:$0xff]  }
 0x159   :  { %v6421_v57 = vadd.f32 %v6420_v54, %v6419_v51  ;;  %v6422_v60 = vpop.f32.mrb[14].mxu1  ;;  %v6401_v0 = vpop.f32.mrb[15].mxu0  ;;  %6722 = vmatpush3.bf16.msra.mxu1 %v7336_v63  ;;  %6701 = vmatprep.subr.bf16.mxu0 %v7337_v2  ;;  %v7374_v54 = vld [vmem:[%s9211_s1 + $0xbf0] sm:$0xff]   ;;  %v7379_v59 = vld [vmem:[%s9211_s1 + $0xb38] sm:$0xff]  }
 0x15a   :  { %v4648_v62 = vadd.f32 %v6399_v56, %v8548_v17  ;;  %v6423_v1 = vpop.f32.mrb[15].mxu1  ;;  %6723 = vmatprep.subr.bf16.mxu1 %v7338_v4  ;;  %v7349_v17 = vld [vmem:[%s9211_s1 + $0xb40] sm:$0xff]   ;;  %v7376_v56 = vld [vmem:[%s9211_s1 + $0xbb0] sm:$0xff]   ;;  %v7380_v60 = vld [vmem:[%s9211_s1 + $0xbb8] sm:$0xff]  }
 0x15b   :  { %v43_v61 = vld [vmem:[%s9212_s0 + $0xb0] sm:$0xff]  ;;  %v7386_v4 = vld [vmem:[%s9211_s1 + $0xcc0] sm:$0xff]  }
 0x15c   :  { %v8653_v3 = vadd.f32 %v6421_v57, %v4648_v62  ;;  %6702 = vmatpush3.bf16.msra.mxu0 %v7339_v5  ;;  %v7377_v57 = vld [vmem:[%s9211_s1 + $0xb78] sm:$0xff]   ;;  %v5716_v63 = vcombine.low %v43_v61, %v43_v61  ;;  %v5717_v0 = vcombine.high %v43_v61, %v43_v61  ;;  %v7387_v5 = vld [vmem:[%s9211_s1 + $0xc00] sm:$0xff]   ;;  %v7429_v61 = vld [vmem:[%s9211_s1 + $0xd50] sm:$0xff]  }
 0x15d   :  { %6724 = vmatpush3.bf16.msra.mxu1 %v7340_v6  ;;  %6703 = vmatprep.subr.bf16.mxu0 %v7341_v7  ;;  %v44_v62 = vld [vmem:[%s9212_s0 + $0xb8] sm:$0xff]  ;;  %v7388_v6 = vld [vmem:[%s9211_s1 + $0xc80] sm:$0xff]   ;;  %v7389_v7 = vld [vmem:[%s9211_s1 + $0xc48] sm:$0xff]  }
 0x15e   :  { %6725 = vmatprep.subr.bf16.mxu1 %v7342_v8  ;;  %v5718_v1 = vcombine.low %v44_v62, %v44_v62  ;;  %v5719_v2 = vcombine.high %v44_v62, %v44_v62  ;;  %v7390_v8 = vld [vmem:[%s9211_s1 + $0xcc8] sm:$0xff]   ;;  %v7430_v62 = vld [vmem:[%s9211_s1 + $0xdd0] sm:$0xff]  }
 0x160   :  { %6704 = vmatpush3.bf16.msra.mxu0 %v7343_v9  ;;  %v7391_v9 = vld [vmem:[%s9211_s1 + $0xc08] sm:$0xff]  }
 0x161   :  { %6726 = vmatpush3.bf16.msra.mxu1 %v7344_v10  ;;  %6733 = vmatprep.subr.bf16.mxu0 %v7349_v17  ;;  %v7392_v10 = vld [vmem:[%s9211_s1 + $0xc88] sm:$0xff]   ;;  %v7399_v17 = vld [vmem:[%s9211_s1 + $0xc18] sm:$0xff]  }
 0x162   :  { %6755 = vmatprep.subr.bf16.mxu1 %v7350_v18  ;;  %v7400_v18 = vld [vmem:[%s9211_s1 + $0xc98] sm:$0xff]  }
 0x163   :  { %5206 = vmatmul.mubr.bf16.vlgmr.msra.gmra.mrb[40].mxu0 %v5712_v13  ;;  %v7395_v13 = vld [vmem:[%s9211_s1 + $0xc10] sm:$0xff]  }
 0x164   :  { %5246 = vmatmul.mubr.bf16.vlgmr.msra.gmra.mrb[40].mxu1 %v5714_v15  ;;  %6734 = vmatpush3.bf16.msra.mxu0 %v7351_v19  ;;  %v7397_v15 = vld [vmem:[%s9211_s1 + $0xc58] sm:$0xff]   ;;  %v7401_v19 = vld [vmem:[%s9211_s1 + $0xc60] sm:$0xff]  }
 0x165   :  { %6756 = vmatpush3.bf16.msra.mxu1 %v7352_v20  ;;  %6735 = vmatprep.subr.bf16.mxu0 %v7353_v21  ;;  %v7402_v20 = vld [vmem:[%s9211_s1 + $0xce0] sm:$0xff]  }
 0x166   :  { %6757 = vmatprep.subr.bf16.mxu1 %v7354_v22  ;;  %5285 = vmatprep.mubr.bf16.mxu0 %v5717_v0  ;;  %v7403_v22 = vld [vmem:[%s9211_s1 + $0xc20] sm:$0xff]   ;;  %v7432_v0 = vld [vmem:[%s9211_s1 + $0xd90] sm:$0xff]  }
 0x167   :  { %5325 = vmatprep.mubr.bf16.mxu1 %v5719_v2  ;;  %v7434_v2 = vld [vmem:[%s9211_s1 + $0xdd8] sm:$0xff]  }
 0x168   :  { %6736 = vmatpush3.bf16.msra.mxu0 %v7355_v23 }
 0x169   :  { %6758 = vmatpush3.bf16.msra.mxu1 %v7356_v24  ;;  %6737 = vmatprep.subr.bf16.mxu0 %v7357_v25  ;;  %v7404_v24 = vld [vmem:[%s9211_s1 + $0xca0] sm:$0xff]  }
 0x16a   :  { %6759 = vmatprep.subr.bf16.mxu1 %v7358_v26 }
 0x16c   :  { %6738 = vmatpush3.bf16.msra.mxu0 %v7359_v27 }
 0x16d   :  { %6760 = vmatpush3.bf16.msra.mxu1 %v7360_v28  ;;  %6739 = vmatprep.subr.bf16.mxu0 %v7361_v29  ;;  %v7405_v28 = vld [vmem:[%s9211_s1 + $0xc68] sm:$0xff]  }
 0x16e   :  { %6761 = vmatprep.subr.bf16.mxu1 %v7362_v30  ;;  %v7406_v30 = vld [vmem:[%s9211_s1 + $0xce8] sm:$0xff]  }
 0x170   :  { %6740 = vmatpush3.bf16.msra.mxu0 %v7363_v31 }
 0x171   :  { %6762 = vmatpush3.bf16.msra.mxu1 %v7364_v32  ;;  %6741 = vmatprep.subr.bf16.mxu0 %v7365_v33 }
 0x172   :  { %6763 = vmatprep.subr.bf16.mxu1 %v7366_v34  ;;  %v7407_v34 = vld [vmem:[%s9211_s1 + $0xc28] sm:$0xff]  }
 0x174   :  { %6742 = vmatpush3.bf16.msra.mxu0 %v7367_v35  ;;  %v7408_v35 = vld [vmem:[%s9211_s1 + $0xca8] sm:$0xff]  }
 0x175   :  { %6764 = vmatpush3.bf16.msra.mxu1 %v7368_v37  ;;  %6743 = vmatprep.subr.bf16.mxu0 %v7369_v43  ;;  %v7413_v43 = vld [vmem:[%s9211_s1 + $0xc78] sm:$0xff]  }
 0x176   :  { %v6441_v36 = vpop.f32.mrb[16].mxu0  ;;  %6765 = vmatprep.subr.bf16.mxu1 %v7370_v45  ;;  %v7415_v45 = vld [vmem:[%s9211_s1 + $0xc38] sm:$0xff]  }
 0x177   :  { %v6463_v38 = vpop.f32.mrb[16].mxu1  ;;  %v6442_v39 = vpop.f32.mrb[17].mxu0 }
 0x178   :  { %v6464_v40 = vpop.f32.mrb[17].mxu1  ;;  %v6443_v41 = vadd.f32 %v6442_v39, %v6441_v36  ;;  %v6444_v44 = vpop.f32.mrb[18].mxu0  ;;  %6744 = vmatpush3.bf16.msra.mxu0 %v7371_v48  ;;  %v7409_v39 = vld [vmem:[%s9211_s1 + $0xc70] sm:$0xff]   ;;  %v46_v48 = vld [vmem:[%s9212_s0 + $0xc8] sm:$0xff] }
 0x179   :  { %v6465_v42 = vadd.f32 %v6464_v40, %v6463_v38  ;;  %v6466_v46 = vpop.f32.mrb[18].mxu1  ;;  %v6445_v49 = vpop.f32.mrb[19].mxu0  ;;  %6766 = vmatpush3.bf16.msra.mxu1 %v7372_v50  ;;  %6745 = vmatprep.subr.bf16.mxu0 %v7373_v53  ;;  %v7410_v40 = vld [vmem:[%s9211_s1 + $0xcf0] sm:$0xff]   ;;  %v7414_v44 = vld [vmem:[%s9211_s1 + $0xcf8] sm:$0xff]   ;;  %v5723_v53 = vcombine.high %v46_v48, %v46_v48 }
 0x17a   :  { %v4728_v47 = vadd.f32 %v6443_v41, %v8653_v3  ;;  %v6467_v51 = vpop.f32.mrb[19].mxu1  ;;  %6767 = vmatprep.subr.bf16.mxu1 %v7374_v54  ;;  %v7385_v3 = vld [vmem:[%s9211_s1 + $0xc40] sm:$0xff]   ;;  %v7411_v41 = vld [vmem:[%s9211_s1 + $0xc30] sm:$0xff]   ;;  %v7416_v46 = vld [vmem:[%s9211_s1 + $0xcb8] sm:$0xff]  }
 0x17b   :  { %v5722_v51 = vcombine.low %v46_v48, %v46_v48  ;;  %v7422_v54 = vld [vmem:[%s9211_s1 + $0xdc0] sm:$0xff]   ;;  %v7466_v48 = vld [vmem:[%s9211_s1 + $0xed0] sm:$0xff]  }
 0x17c   :  { %v8755_v52 = vadd.f32 %v6465_v42, %v4728_v47  ;;  %6746 = vmatpush3.bf16.msra.mxu0 %v7375_v55  ;;  %v7412_v42 = vld [vmem:[%s9211_s1 + $0xcb0] sm:$0xff]   ;;  %v45_v47 = vld [vmem:[%s9212_s0 + $0xc0] sm:$0xff] }
 0x17d   :  { %6768 = vmatpush3.bf16.msra.mxu1 %v7376_v56  ;;  %6747 = vmatprep.subr.bf16.mxu0 %v7377_v57  ;;  %v5720_v49 = vcombine.low %v45_v47, %v45_v47  ;;  %v5721_v50 = vcombine.high %v45_v47, %v45_v47  ;;  %v7423_v55 = vld [vmem:[%s9211_s1 + $0xd00] sm:$0xff]   ;;  %v7425_v57 = vld [vmem:[%s9211_s1 + $0xd48] sm:$0xff]   ;;  %v7465_v47 = vld [vmem:[%s9211_s1 + $0xe50] sm:$0xff]  }
 0x17e   :  { %6769 = vmatprep.subr.bf16.mxu1 %v7378_v58  ;;  %v7424_v56 = vld [vmem:[%s9211_s1 + $0xd80] sm:$0xff]   ;;  %v7426_v58 = vld [vmem:[%s9211_s1 + $0xdc8] sm:$0xff]  }
 0x180   :  { %6748 = vmatpush3.bf16.msra.mxu0 %v7379_v59  ;;  %v7427_v59 = vld [vmem:[%s9211_s1 + $0xd08] sm:$0xff]  }
 0x181   :  { %6770 = vmatpush3.bf16.msra.mxu1 %v7380_v60  ;;  %6777 = vmatprep.subr.bf16.mxu0 %v7385_v3  ;;  %v7428_v60 = vld [vmem:[%s9211_s1 + $0xd88] sm:$0xff]   ;;  %v7435_v3 = vld [vmem:[%s9211_s1 + $0xd18] sm:$0xff]  }
 0x182   :  { %6799 = vmatprep.subr.bf16.mxu1 %v7386_v4  ;;  %v7436_v4 = vld [vmem:[%s9211_s1 + $0xd98] sm:$0xff]  }
 0x183   :  { %5286 = vmatmul.mubr.bf16.vlgmr.msra.gmra.mrb[44].mxu0 %v5716_v63  ;;  %v7431_v63 = vld [vmem:[%s9211_s1 + $0xd10] sm:$0xff]  }
 0x184   :  { %5326 = vmatmul.mubr.bf16.vlgmr.msra.gmra.mrb[44].mxu1 %v5718_v1  ;;  %6778 = vmatpush3.bf16.msra.mxu0 %v7387_v5  ;;  %v7433_v1 = vld [vmem:[%s9211_s1 + $0xd58] sm:$0xff]   ;;  %v7437_v5 = vld [vmem:[%s9211_s1 + $0xd60] sm:$0xff]  }
 0x185   :  { %6800 = vmatpush3.bf16.msra.mxu1 %v7388_v6  ;;  %6779 = vmatprep.subr.bf16.mxu0 %v7389_v7  ;;  %v7438_v6 = vld [vmem:[%s9211_s1 + $0xde0] sm:$0xff]  }
 0x186   :  { %6801 = vmatprep.subr.bf16.mxu1 %v7390_v8  ;;  %5365 = vmatprep.mubr.bf16.mxu0 %v5721_v50  ;;  %v7439_v8 = vld [vmem:[%s9211_s1 + $0xd20] sm:$0xff]   ;;  %v7468_v50 = vld [vmem:[%s9211_s1 + $0xe90] sm:$0xff]  }
 0x187   :  { %5405 = vmatprep.mubr.bf16.mxu1 %v5723_v53  ;;  %v7471_v53 = vld [vmem:[%s9211_s1 + $0xe18] sm:$0xff]  }
 0x188   :  { %6780 = vmatpush3.bf16.msra.mxu0 %v7391_v9 }
 0x189   :  { %6802 = vmatpush3.bf16.msra.mxu1 %v7392_v10  ;;  %6781 = vmatprep.subr.bf16.mxu0 %v7393_v11  ;;  %v7440_v10 = vld [vmem:[%s9211_s1 + $0xda0] sm:$0xff]  }
 0x18a   :  { %6803 = vmatprep.subr.bf16.mxu1 %v7394_v12 }
 0x18c   :  { %6782 = vmatpush3.bf16.msra.mxu0 %v7395_v13  ;;  %v7441_v13 = vld [vmem:[%s9211_s1 + $0xd68] sm:$0xff]  }
 0x18d   :  { %6804 = vmatpush3.bf16.msra.mxu1 %v7396_v14  ;;  %6783 = vmatprep.subr.bf16.mxu0 %v7397_v15 }
 0x18e   :  { %6805 = vmatprep.subr.bf16.mxu1 %v7398_v16  ;;  %v7442_v16 = vld [vmem:[%s9211_s1 + $0xde8] sm:$0xff]  }
 0x190   :  { %6784 = vmatpush3.bf16.msra.mxu0 %v7399_v17 }
 0x191   :  { %6806 = vmatpush3.bf16.msra.mxu1 %v7400_v18  ;;  %6785 = vmatprep.subr.bf16.mxu0 %v7401_v19  ;;  %v7443_v19 = vld [vmem:[%s9211_s1 + $0xd28] sm:$0xff]  }
 0x192   :  { %6807 = vmatprep.subr.bf16.mxu1 %v7402_v20 }
 0x194   :  { %6786 = vmatpush3.bf16.msra.mxu0 %v7403_v22 }
 0x195   :  { %6808 = vmatpush3.bf16.msra.mxu1 %v7404_v24  ;;  %6787 = vmatprep.subr.bf16.mxu0 %v7405_v28  ;;  %v7445_v24 = vld [vmem:[%s9211_s1 + $0xd70] sm:$0xff]  }
 0x196   :  { %v6485_v21 = vpop.f32.mrb[20].mxu0  ;;  %6809 = vmatprep.subr.bf16.mxu1 %v7406_v30  ;;  %v7448_v28 = vld [vmem:[%s9211_s1 + $0xdb0] sm:$0xff]   ;;  %v7450_v30 = vld [vmem:[%s9211_s1 + $0xdf8] sm:$0xff]  }
 0x197   :  { %v6507_v23 = vpop.f32.mrb[20].mxu1  ;;  %v6486_v25 = vpop.f32.mrb[21].mxu0 }
 0x198   :  { %v6487_v26 = vadd.f32 %v6486_v25, %v6485_v21  ;;  %v6508_v27 = vpop.f32.mrb[21].mxu1  ;;  %v6488_v31 = vpop.f32.mrb[22].mxu0  ;;  %6788 = vmatpush3.bf16.msra.mxu0 %v7407_v34  ;;  %v7444_v21 = vld [vmem:[%s9211_s1 + $0xda8] sm:$0xff]  }
 0x199   :  { %v6509_v29 = vadd.f32 %v6508_v27, %v6507_v23  ;;  %v6510_v33 = vpop.f32.mrb[22].mxu1  ;;  %v6489_v36 = vpop.f32.mrb[23].mxu0  ;;  %6810 = vmatpush3.bf16.msra.mxu1 %v7408_v35  ;;  %6789 = vmatprep.subr.bf16.mxu0 %v7409_v39  ;;  %v7447_v27 = vld [vmem:[%s9211_s1 + $0xd30] sm:$0xff]   ;;  %v7451_v31 = vld [vmem:[%s9211_s1 + $0xd38] sm:$0xff]   ;;  %v7457_v39 = vld [vmem:[%s9211_s1 + $0xe40] sm:$0xff]  }
 0x19a   :  { %v4808_v32 = vadd.f32 %v6487_v26, %v8755_v52  ;;  %v6511_v38 = vpop.f32.mrb[23].mxu1  ;;  %6811 = vmatprep.subr.bf16.mxu1 %v7410_v40  ;;  %v7421_v52 = vld [vmem:[%s9211_s1 + $0xd40] sm:$0xff]   ;;  %v7446_v26 = vld [vmem:[%s9211_s1 + $0xdf0] sm:$0xff]   ;;  %v48_v36 = vld [vmem:[%s9212_s0 + $0xd8] sm:$0xff] }
 0x19b   :  { %v47_v33 = vld [vmem:[%s9212_s0 + $0xd0] sm:$0xff]  ;;  %v5727_v38 = vcombine.high %v48_v36, %v48_v36  ;;  %v7458_v40 = vld [vmem:[%s9211_s1 + $0xec0] sm:$0xff]  }
 0x19c   :  { %v8860_v37 = vadd.f32 %v6509_v29, %v4808_v32  ;;  %6790 = vmatpush3.bf16.msra.mxu0 %v7411_v41  ;;  %v7449_v29 = vld [vmem:[%s9211_s1 + $0xd78] sm:$0xff]   ;;  %v5724_v34 = vcombine.low %v47_v33, %v47_v33  ;;  %v5725_v35 = vcombine.high %v47_v33, %v47_v33  ;;  %v7459_v41 = vld [vmem:[%s9211_s1 + $0xe00] sm:$0xff]   ;;  %v7501_v33 = vld [vmem:[%s9211_s1 + $0xf50] sm:$0xff]  }
 0x19d   :  { %6812 = vmatpush3.bf16.msra.mxu1 %v7412_v42  ;;  %6791 = vmatprep.subr.bf16.mxu0 %v7413_v43  ;;  %v7452_v32 = vld [vmem:[%s9211_s1 + $0xdb8] sm:$0xff]   ;;  %v7460_v42 = vld [vmem:[%s9211_s1 + $0xe80] sm:$0xff]   ;;  %v7461_v43 = vld [vmem:[%s9211_s1 + $0xe48] sm:$0xff]  }
 0x19e   :  { %6813 = vmatprep.subr.bf16.mxu1 %v7414_v44  ;;  %v7462_v44 = vld [vmem:[%s9211_s1 + $0xec8] sm:$0xff]  }
 0x1a0   :  { %6792 = vmatpush3.bf16.msra.mxu0 %v7415_v45  ;;  %v7463_v45 = vld [vmem:[%s9211_s1 + $0xe08] sm:$0xff]  }
 0x1a1   :  { %6814 = vmatpush3.bf16.msra.mxu1 %v7416_v46  ;;  %6821 = vmatprep.subr.bf16.mxu0 %v7421_v52  ;;  %v7464_v46 = vld [vmem:[%s9211_s1 + $0xe88] sm:$0xff]   ;;  %v7470_v52 = vld [vmem:[%s9211_s1 + $0xed8] sm:$0xff]  }
 0x1a2   :  { %6843 = vmatprep.subr.bf16.mxu1 %v7422_v54  ;;  %v7472_v54 = vld [vmem:[%s9211_s1 + $0xe98] sm:$0xff]  }
 0x1a3   :  { %5366 = vmatmul.mubr.bf16.vlgmr.msra.gmra.mrb[48].mxu0 %v5720_v49  ;;  %v7467_v49 = vld [vmem:[%s9211_s1 + $0xe10] sm:$0xff]  }
 0x1a4   :  { %5406 = vmatmul.mubr.bf16.vlgmr.msra.gmra.mrb[48].mxu1 %v5722_v51  ;;  %6822 = vmatpush3.bf16.msra.mxu0 %v7423_v55  ;;  %v7469_v51 = vld [vmem:[%s9211_s1 + $0xe58] sm:$0xff]   ;;  %v7473_v55 = vld [vmem:[%s9211_s1 + $0xe60] sm:$0xff]  }
 0x1a5   :  { %6844 = vmatpush3.bf16.msra.mxu1 %v7424_v56  ;;  %6823 = vmatprep.subr.bf16.mxu0 %v7425_v57  ;;  %v7474_v56 = vld [vmem:[%s9211_s1 + $0xee0] sm:$0xff]  }
 0x1a6   :  { %6845 = vmatprep.subr.bf16.mxu1 %v7426_v58  ;;  %5445 = vmatprep.mubr.bf16.mxu0 %v5725_v35  ;;  %v7475_v58 = vld [vmem:[%s9211_s1 + $0xe20] sm:$0xff]   ;;  %v7503_v35 = vld [vmem:[%s9211_s1 + $0xf10] sm:$0xff]  }
 0x1a7   :  { %5485 = vmatprep.mubr.bf16.mxu1 %v5727_v38  ;;  %v7506_v38 = vld [vmem:[%s9211_s1 + $0xfd8] sm:$0xff]  }
 0x1a8   :  { %6824 = vmatpush3.bf16.msra.mxu0 %v7427_v59 }
 0x1a9   :  { %6846 = vmatpush3.bf16.msra.mxu1 %v7428_v60  ;;  %6825 = vmatprep.subr.bf16.mxu0 %v7429_v61  ;;  %v7476_v60 = vld [vmem:[%s9211_s1 + $0xea0] sm:$0xff]  }
 0x1aa   :  { %6847 = vmatprep.subr.bf16.mxu1 %v7430_v62 }
 0x1ac   :  { %6826 = vmatpush3.bf16.msra.mxu0 %v7431_v63  ;;  %v7477_v63 = vld [vmem:[%s9211_s1 + $0xe68] sm:$0xff]  }
 0x1ad   :  { %6848 = vmatpush3.bf16.msra.mxu1 %v7432_v0  ;;  %6827 = vmatprep.subr.bf16.mxu0 %v7433_v1 }
 0x1ae   :  { %6849 = vmatprep.subr.bf16.mxu1 %v7434_v2  ;;  %v7478_v2 = vld [vmem:[%s9211_s1 + $0xee8] sm:$0xff]  }
 0x1b0   :  { %6828 = vmatpush3.bf16.msra.mxu0 %v7435_v3 }
 0x1b1   :  { %6850 = vmatpush3.bf16.msra.mxu1 %v7436_v4  ;;  %6829 = vmatprep.subr.bf16.mxu0 %v7437_v5  ;;  %v7479_v5 = vld [vmem:[%s9211_s1 + $0xe28] sm:$0xff]  }
 0x1b2   :  { %6851 = vmatprep.subr.bf16.mxu1 %v7438_v6 }
 0x1b4   :  { %6830 = vmatpush3.bf16.msra.mxu0 %v7439_v8 }
 0x1b5   :  { %6852 = vmatpush3.bf16.msra.mxu1 %v7440_v10  ;;  %6831 = vmatprep.subr.bf16.mxu0 %v7441_v13  ;;  %v7481_v10 = vld [vmem:[%s9211_s1 + $0xe70] sm:$0xff]  }
 0x1b6   :  { %v6529_v7 = vpop.f32.mrb[24].mxu0  ;;  %6853 = vmatprep.subr.bf16.mxu1 %v7442_v16  ;;  %v7483_v13 = vld [vmem:[%s9211_s1 + $0xe30] sm:$0xff]   ;;  %v7486_v16 = vld [vmem:[%s9211_s1 + $0xef8] sm:$0xff]  }
 0x1b7   :  { %v6551_v9 = vpop.f32.mrb[24].mxu1  ;;  %v6530_v11 = vpop.f32.mrb[25].mxu0 }
 0x1b8   :  { %v6552_v12 = vpop.f32.mrb[25].mxu1  ;;  %v6531_v14 = vadd.f32 %v6530_v11, %v6529_v7  ;;  %v6532_v17 = vpop.f32.mrb[26].mxu0  ;;  %6832 = vmatpush3.bf16.msra.mxu0 %v7443_v19  ;;  %v7480_v7 = vld [vmem:[%s9211_s1 + $0xea8] sm:$0xff]   ;;  %v49_v19 = vld [vmem:[%s9212_s0 + $0xe0] sm:$0xff] }
 0x1b9   :  { %v6553_v15 = vadd.f32 %v6552_v12, %v6551_v9  ;;  %v6554_v18 = vpop.f32.mrb[26].mxu1  ;;  %v6533_v22 = vpop.f32.mrb[27].mxu0  ;;  %6854 = vmatpush3.bf16.msra.mxu1 %v7444_v21  ;;  %6833 = vmatprep.subr.bf16.mxu0 %v7445_v24  ;;  %v7482_v12 = vld [vmem:[%s9211_s1 + $0xef0] sm:$0xff]   ;;  %v7487_v17 = vld [vmem:[%s9211_s1 + $0xe38] sm:$0xff]   ;;  %v5728_v21 = vcombine.low %v49_v19, %v49_v19 }
 0x1ba   :  { %v4888_v20 = vadd.f32 %v6531_v14, %v8860_v37  ;;  %v6555_v23 = vpop.f32.mrb[27].mxu1  ;;  %6855 = vmatprep.subr.bf16.mxu1 %v7446_v26  ;;  %v5726_v37 = vcombine.low %v48_v36, %v48_v36  ;;  %v7484_v14 = vld [vmem:[%s9211_s1 + $0xeb0] sm:$0xff]   ;;  %v7488_v18 = vld [vmem:[%s9211_s1 + $0xeb8] sm:$0xff]   ;;  %v5729_v22 = vcombine.high %v49_v19, %v49_v19  ;;  %v7494_v26 = vld [vmem:[%s9211_s1 + $0xfc0] sm:$0xff]  }
 0x1bb   :  { %v7504_v36 = vld [vmem:[%s9211_s1 + $0xf90] sm:$0xff]  }
 0x1bc   :  { %v8968_v25 = vadd.f32 %v6553_v15, %v4888_v20  ;;  %6834 = vmatpush3.bf16.msra.mxu0 %v7447_v27  ;;  %v7485_v15 = vld [vmem:[%s9211_s1 + $0xe78] sm:$0xff]   ;;  %v50_v20 = vld [vmem:[%s9212_s0 + $0xe8] sm:$0xff]  ;;  %v7495_v27 = vld [vmem:[%s9211_s1 + $0xf00] sm:$0xff]  }
 0x1bd   :  { %6856 = vmatpush3.bf16.msra.mxu1 %v7448_v28  ;;  %6835 = vmatprep.subr.bf16.mxu0 %v7449_v29  ;;  %v5730_v23 = vcombine.low %v50_v20, %v50_v20  ;;  %v5731_v24 = vcombine.high %v50_v20, %v50_v20  ;;  %v7496_v28 = vld [vmem:[%s9211_s1 + $0xf80] sm:$0xff]   ;;  %v7497_v29 = vld [vmem:[%s9211_s1 + $0xf48] sm:$0xff]  }
 0x1be   :  { %6857 = vmatprep.subr.bf16.mxu1 %v7450_v30  ;;  %v7498_v30 = vld [vmem:[%s9211_s1 + $0xfc8] sm:$0xff]  }
 0x1c0   :  { %6836 = vmatpush3.bf16.msra.mxu0 %v7451_v31  ;;  %v7499_v31 = vld [vmem:[%s9211_s1 + $0xf08] sm:$0xff]  }
 0x1c1   :  { %6858 = vmatpush3.bf16.msra.mxu1 %v7452_v32  ;;  %6865 = vmatprep.subr.bf16.mxu0 %v7457_v39  ;;  %v7500_v32 = vld [vmem:[%s9211_s1 + $0xf88] sm:$0xff]   ;;  %v7507_v39 = vld [vmem:[%s9211_s1 + $0xf18] sm:$0xff]  }
 0x1c2   :  { %6887 = vmatprep.subr.bf16.mxu1 %v7458_v40  ;;  %v7508_v40 = vld [vmem:[%s9211_s1 + $0xf98] sm:$0xff]  }
 0x1c3   :  { %5446 = vmatmul.mubr.bf16.vlgmr.msra.gmra.mrb[52].mxu0 %v5724_v34  ;;  %v7502_v34 = vld [vmem:[%s9211_s1 + $0xfd0] sm:$0xff]  }
 0x1c4   :  { %5486 = vmatmul.mubr.bf16.vlgmr.msra.gmra.mrb[52].mxu1 %v5726_v37  ;;  %6866 = vmatpush3.bf16.msra.mxu0 %v7459_v41  ;;  %v7505_v37 = vld [vmem:[%s9211_s1 + $0xf58] sm:$0xff]   ;;  %v7509_v41 = vld [vmem:[%s9211_s1 + $0xf60] sm:$0xff]  }
 0x1c5   :  { %6888 = vmatpush3.bf16.msra.mxu1 %v7460_v42  ;;  %6867 = vmatprep.subr.bf16.mxu0 %v7461_v43  ;;  %v7510_v42 = vld [vmem:[%s9211_s1 + $0xfe0] sm:$0xff]  }
 0x1c6   :  { %6889 = vmatprep.subr.bf16.mxu1 %v7462_v44  ;;  %5525 = vmatprep.mubr.bf16.mxu0 %v5729_v22  ;;  %v7511_v43 = vld [vmem:[%s9211_s1 + $0xf20] sm:$0xff]  }
 0x1c7   :  { %5565 = vmatprep.mubr.bf16.mxu1 %v5731_v24 }
 0x1c8   :  { %6868 = vmatpush3.bf16.msra.mxu0 %v7463_v45  ;;  %v7512_v45 = vld [vmem:[%s9211_s1 + $0xfa0] sm:$0xff]  }
 0x1c9   :  { %6890 = vmatpush3.bf16.msra.mxu1 %v7464_v46  ;;  %6869 = vmatprep.subr.bf16.mxu0 %v7465_v47 }
 0x1ca   :  { %6891 = vmatprep.subr.bf16.mxu1 %v7466_v48 }
 0x1cc   :  { %6870 = vmatpush3.bf16.msra.mxu0 %v7467_v49 }
 0x1cd   :  { %6892 = vmatpush3.bf16.msra.mxu1 %v7468_v50  ;;  %6871 = vmatprep.subr.bf16.mxu0 %v7469_v51  ;;  %v7513_v51 = vld [vmem:[%s9211_s1 + $0xf68] sm:$0xff]  }
 0x1ce   :  { %6893 = vmatprep.subr.bf16.mxu1 %v7470_v52 }
 0x1d0   :  { %6872 = vmatpush3.bf16.msra.mxu0 %v7471_v53  ;;  %v7514_v53 = vld [vmem:[%s9211_s1 + $0xfe8] sm:$0xff]  }
 0x1d1   :  { %6894 = vmatpush3.bf16.msra.mxu1 %v7472_v54  ;;  %6873 = vmatprep.subr.bf16.mxu0 %v7473_v55 }
 0x1d2   :  { %6895 = vmatprep.subr.bf16.mxu1 %v7474_v56  ;;  %v7515_v56 = vld [vmem:[%s9211_s1 + $0xf28] sm:$0xff]  }
 0x1d4   :  { %6874 = vmatpush3.bf16.msra.mxu0 %v7475_v58  ;;  %v7516_v58 = vld [vmem:[%s9211_s1 + $0xfa8] sm:$0xff]  }
 0x1d5   :  { %6896 = vmatpush3.bf16.msra.mxu1 %v7476_v60  ;;  %6875 = vmatprep.subr.bf16.mxu0 %v7477_v63  ;;  %v7519_v63 = vld [vmem:[%s9211_s1 + $0xf30] sm:$0xff]  }
 0x1d6   :  { %v6573_v57 = vpop.f32.mrb[28].mxu0  ;;  %6897 = vmatprep.subr.bf16.mxu1 %v7478_v2  ;;  %v7522_v2 = vld [vmem:[%s9211_s1 + $0xff8] sm:$0xff]  }
 0x1d7   :  { %v6595_v59 = vpop.f32.mrb[28].mxu1  ;;  %v6574_v61 = vpop.f32.mrb[29].mxu0 }
 0x1d8   :  { %v6596_v62 = vpop.f32.mrb[29].mxu1  ;;  %v6575_v0 = vadd.f32 %v6574_v61, %v6573_v57  ;;  %v6576_v3 = vpop.f32.mrb[30].mxu0  ;;  %6876 = vmatpush3.bf16.msra.mxu0 %v7479_v5  ;;  %v7517_v61 = vld [vmem:[%s9211_s1 + $0xf70] sm:$0xff]  }
 0x1d9   :  { %v6597_v1 = vadd.f32 %v6596_v62, %v6595_v59  ;;  %v6598_v4 = vpop.f32.mrb[30].mxu1  ;;  %v6577_v8 = vpop.f32.mrb[31].mxu0  ;;  %6898 = vmatpush3.bf16.msra.mxu1 %v7480_v7  ;;  %6877 = vmatprep.subr.bf16.mxu0 %v7481_v10  ;;  %v7518_v62 = vld [vmem:[%s9211_s1 + $0xff0] sm:$0xff]   ;;  %v7523_v3 = vld [vmem:[%s9211_s1 + $0xf38] sm:$0xff]  }
 0x1da   :  { %v4968_v6 = vadd.f32 %v6575_v0, %v8968_v25  ;;  %v6599_v9 = vpop.f32.mrb[31].mxu1  ;;  %6899 = vmatprep.subr.bf16.mxu1 %v7482_v12  ;;  %v7493_v25 = vld [vmem:[%s9211_s1 + $0xf40] sm:$0xff]   ;;  %v7520_v0 = vld [vmem:[%s9211_s1 + $0xfb0] sm:$0xff]   ;;  %v7524_v4 = vld [vmem:[%s9211_s1 + $0xfb8] sm:$0xff]  }
 0x1db   :  { %v51_v5 = vld [vmem:[%s9212_s0 + $0xf0] sm:$0xff] }
 0x1dc   :  { %v9073_v11 = vadd.f32 %v6597_v1, %v4968_v6  ;;  %6878 = vmatpush3.bf16.msra.mxu0 %v7483_v13  ;;  %v7521_v1 = vld [vmem:[%s9211_s1 + $0xf78] sm:$0xff]   ;;  %v5732_v7 = vcombine.low %v51_v5, %v51_v5  ;;  %v5733_v8 = vcombine.high %v51_v5, %v51_v5 }
 0x1dd   :  { %6900 = vmatpush3.bf16.msra.mxu1 %v7484_v14  ;;  %6879 = vmatprep.subr.bf16.mxu0 %v7485_v15  ;;  %v52_v6 = vld [vmem:[%s9212_s0 + $0xf8] sm:$0xff] }
 0x1de   :  { %6901 = vmatprep.subr.bf16.mxu1 %v7486_v16  ;;  %v5734_v9 = vcombine.low %v52_v6, %v52_v6  ;;  %v5735_v10 = vcombine.high %v52_v6, %v52_v6 }
 0x1e0   :  { %6880 = vmatpush3.bf16.msra.mxu0 %v7487_v17 }
 0x1e1   :  { %6902 = vmatpush3.bf16.msra.mxu1 %v7488_v18  ;;  %6909 = vmatprep.subr.bf16.mxu0 %v7493_v25 }
 0x1e2   :  { %6931 = vmatprep.subr.bf16.mxu1 %v7494_v26 }
 0x1e3   :  { %5526 = vmatmul.mubr.bf16.vlgmr.msra.gmra.mrb[56].mxu0 %v5728_v21 }
 0x1e4   :  { %5566 = vmatmul.mubr.bf16.vlgmr.msra.gmra.mrb[56].mxu1 %v5730_v23  ;;  %6910 = vmatpush3.bf16.msra.mxu0 %v7495_v27 }
 0x1e5   :  { %6932 = vmatpush3.bf16.msra.mxu1 %v7496_v28  ;;  %6911 = vmatprep.subr.bf16.mxu0 %v7497_v29 }
 0x1e6   :  { %6933 = vmatprep.subr.bf16.mxu1 %v7498_v30  ;;  %5605 = vmatprep.mubr.bf16.mxu0 %v5733_v8 }
 0x1e7   :  { %5645 = vmatprep.mubr.bf16.mxu1 %v5735_v10 }
 0x1e8   :  { %6912 = vmatpush3.bf16.msra.mxu0 %v7499_v31 }
 0x1e9   :  { %6934 = vmatpush3.bf16.msra.mxu1 %v7500_v32  ;;  %6913 = vmatprep.subr.bf16.mxu0 %v7501_v33 }
 0x1ea   :  { %6935 = vmatprep.subr.bf16.mxu1 %v7502_v34 }
 0x1ec   :  { %6914 = vmatpush3.bf16.msra.mxu0 %v7503_v35 }
 0x1ed   :  { %6936 = vmatpush3.bf16.msra.mxu1 %v7504_v36  ;;  %6915 = vmatprep.subr.bf16.mxu0 %v7505_v37 }
 0x1ee   :  { %6937 = vmatprep.subr.bf16.mxu1 %v7506_v38 }
 0x1f0   :  { %6916 = vmatpush3.bf16.msra.mxu0 %v7507_v39 }
 0x1f1   :  { %6938 = vmatpush3.bf16.msra.mxu1 %v7508_v40  ;;  %6917 = vmatprep.subr.bf16.mxu0 %v7509_v41 }
 0x1f2   :  { %6939 = vmatprep.subr.bf16.mxu1 %v7510_v42 }
 0x1f4   :  { %6918 = vmatpush3.bf16.msra.mxu0 %v7511_v43 }
 0x1f5   :  { %6940 = vmatpush3.bf16.msra.mxu1 %v7512_v45  ;;  %6919 = vmatprep.subr.bf16.mxu0 %v7513_v51 }
 0x1f6   :  { %v6617_v44 = vpop.f32.mrb[32].mxu0  ;;  %6941 = vmatprep.subr.bf16.mxu1 %v7514_v53 }
 0x1f7   :  { %v6639_v46 = vpop.f32.mrb[32].mxu1  ;;  %v6618_v47 = vpop.f32.mrb[33].mxu0 }
 0x1f8   :  { %v6640_v48 = vpop.f32.mrb[33].mxu1  ;;  %v6619_v49 = vadd.f32 %v6618_v47, %v6617_v44  ;;  %v6620_v52 = vpop.f32.mrb[34].mxu0  ;;  %6920 = vmatpush3.bf16.msra.mxu0 %v7515_v56 }
 0x1f9   :  { %v6641_v50 = vadd.f32 %v6640_v48, %v6639_v46  ;;  %v6642_v54 = vpop.f32.mrb[34].mxu1  ;;  %v6621_v57 = vpop.f32.mrb[35].mxu0  ;;  %6942 = vmatpush3.bf16.msra.mxu1 %v7516_v58  ;;  %6921 = vmatprep.subr.bf16.mxu0 %v7517_v61 }
 0x1fa   :  { %v5048_v55 = vadd.f32 %v6619_v49, %v9073_v11  ;;  %v6643_v59 = vpop.f32.mrb[35].mxu1  ;;  %6943 = vmatprep.subr.bf16.mxu1 %v7518_v62 }
 0x1fc   :  { %v5088_v60 = vadd.f32 %v6641_v50, %v5048_v55  ;;  %6922 = vmatpush3.bf16.msra.mxu0 %v7519_v63 }
 0x1fd   :  { %6944 = vmatpush3.bf16.msra.mxu1 %v7520_v0  ;;  %6923 = vmatprep.subr.bf16.mxu0 %v7521_v1 }
 0x1fe   :  { %6945 = vmatprep.subr.bf16.mxu1 %v7522_v2 }
 0x200   :  { %6924 = vmatpush3.bf16.msra.mxu0 %v7523_v3 }
 0x201   :  { %6946 = vmatpush3.bf16.msra.mxu1 %v7524_v4 }
 0x203   :  { %5606 = vmatmul.mubr.bf16.vlgmr.msra.gmra.mrb[60].mxu0 %v5732_v7 }
 0x204   :  { %5646 = vmatmul.mubr.bf16.vlgmr.msra.gmra.mrb[60].mxu1 %v5734_v9 }
 0x216   :  { %v6661_v11 = vpop.f32.mrb[36].mxu0 }
 0x217   :  { %v6683_v12 = vpop.f32.mrb[36].mxu1  ;;  %v6662_v13 = vpop.f32.mrb[37].mxu0 }
 0x218   :  { %v6684_v14 = vpop.f32.mrb[37].mxu1  ;;  %v6663_v15 = vadd.f32 %v6662_v13, %v6661_v11  ;;  %v6664_v17 = vpop.f32.mrb[38].mxu0 }
 0x219   :  { %v6685_v16 = vadd.f32 %v6684_v14, %v6683_v12  ;;  %v6686_v18 = vpop.f32.mrb[38].mxu1  ;;  %v6665_v19 = vpop.f32.mrb[39].mxu0 }
 0x21a   :  { %v6687_v20 = vpop.f32.mrb[39].mxu1  ;;  %v5128_v21 = vadd.f32 %v6663_v15, %v5088_v60 }
 0x21c   :  { %v5168_v22 = vadd.f32 %v6685_v16, %v5128_v21 }
 0x236   :  { %v6705_v23 = vpop.f32.mrb[40].mxu0 }
 0x237   :  { %v6727_v24 = vpop.f32.mrb[40].mxu1  ;;  %v6706_v25 = vpop.f32.mrb[41].mxu0 }
 0x238   :  { %v6707_v26 = vadd.f32 %v6706_v25, %v6705_v23  ;;  %v6728_v27 = vpop.f32.mrb[41].mxu1  ;;  %v6708_v28 = vpop.f32.mrb[42].mxu0 }
 0x239   :  { %v6729_v29 = vadd.f32 %v6728_v27, %v6727_v24  ;;  %v6730_v30 = vpop.f32.mrb[42].mxu1  ;;  %v6709_v31 = vpop.f32.mrb[43].mxu0 }
 0x23a   :  { %v5208_v32 = vadd.f32 %v6707_v26, %v5168_v22  ;;  %v6731_v33 = vpop.f32.mrb[43].mxu1  ;;  %v6248_v30 = vld [vmem:[%s9213_s2] ss:$0 sm:$0xff] }
 0x23c   :  { %v5248_v34 = vadd.f32 %v6729_v29, %v5208_v32 }
 0x256   :  { %v6749_v35 = vpop.f32.mrb[44].mxu0 }
 0x257   :  { %v6771_v36 = vpop.f32.mrb[44].mxu1  ;;  %v6750_v37 = vpop.f32.mrb[45].mxu0 }
 0x258   :  { %v6751_v38 = vadd.f32 %v6750_v37, %v6749_v35  ;;  %v6772_v39 = vpop.f32.mrb[45].mxu1  ;;  %v6752_v40 = vpop.f32.mrb[46].mxu0 }
 0x259   :  { %v6773_v41 = vadd.f32 %v6772_v39, %v6771_v36  ;;  %v6774_v42 = vpop.f32.mrb[46].mxu1  ;;  %v6753_v43 = vpop.f32.mrb[47].mxu0 }
 0x25a   :  { %v5288_v44 = vadd.f32 %v6751_v38, %v5248_v34  ;;  %v6775_v45 = vpop.f32.mrb[47].mxu1 }
 0x25c   :  { %v5328_v46 = vadd.f32 %v6773_v41, %v5288_v44 }
 0x276   :  { %v6793_v47 = vpop.f32.mrb[48].mxu0 }
 0x277   :  { %v6815_v48 = vpop.f32.mrb[48].mxu1  ;;  %v6794_v49 = vpop.f32.mrb[49].mxu0 }
 0x278   :  { %v6795_v50 = vadd.f32 %v6794_v49, %v6793_v47  ;;  %v6816_v51 = vpop.f32.mrb[49].mxu1  ;;  %v6796_v52 = vpop.f32.mrb[50].mxu0 }
 0x279   :  { %v6817_v53 = vadd.f32 %v6816_v51, %v6815_v48  ;;  %v6818_v54 = vpop.f32.mrb[50].mxu1  ;;  %v6797_v55 = vpop.f32.mrb[51].mxu0 }
 0x27a   :  { %v5368_v56 = vadd.f32 %v6795_v50, %v5328_v46  ;;  %v6819_v57 = vpop.f32.mrb[51].mxu1 }
 0x27c   :  { %v5408_v58 = vadd.f32 %v6817_v53, %v5368_v56 }
 0x296   :  { %v6837_v59 = vpop.f32.mrb[52].mxu0 }
 0x297   :  { %v6859_v60 = vpop.f32.mrb[52].mxu1  ;;  %v6838_v61 = vpop.f32.mrb[53].mxu0 }
 0x298   :  { %v6860_v62 = vpop.f32.mrb[53].mxu1  ;;  %v6839_v63 = vadd.f32 %v6838_v61, %v6837_v59  ;;  %v6840_v1 = vpop.f32.mrb[54].mxu0 }
 0x299   :  { %v6861_v0 = vadd.f32 %v6860_v62, %v6859_v60  ;;  %v6862_v2 = vpop.f32.mrb[54].mxu1  ;;  %v6841_v3 = vpop.f32.mrb[55].mxu0 }
 0x29a   :  { %v6863_v4 = vpop.f32.mrb[55].mxu1  ;;  %v5448_v5 = vadd.f32 %v6839_v63, %v5408_v58 }
 0x29c   :  { %v5488_v6 = vadd.f32 %v6861_v0, %v5448_v5 }
 0x2b6   :  { %v6881_v7 = vpop.f32.mrb[56].mxu0 }
 0x2b7   :  { %v6903_v8 = vpop.f32.mrb[56].mxu1  ;;  %v6882_v9 = vpop.f32.mrb[57].mxu0 }
 0x2b8   :  { %v6883_v10 = vadd.f32 %v6882_v9, %v6881_v7  ;;  %v6904_v11 = vpop.f32.mrb[57].mxu1  ;;  %v6884_v12 = vpop.f32.mrb[58].mxu0 }
 0x2b9   :  { %v6905_v13 = vadd.f32 %v6904_v11, %v6903_v8  ;;  %v6906_v14 = vpop.f32.mrb[58].mxu1  ;;  %v6885_v15 = vpop.f32.mrb[59].mxu0 }
 0x2ba   :  { %v5528_v16 = vadd.f32 %v6883_v10, %v5488_v6  ;;  %v6907_v17 = vpop.f32.mrb[59].mxu1 }
 0x2bc   :  { %v5568_v18 = vadd.f32 %v6905_v13, %v5528_v16 }
 0x2d6   :  { %v6925_v19 = vpop.f32.mrb[60].mxu0 }
 0x2d7   :  { %v6947_v20 = vpop.f32.mrb[60].mxu1  ;;  %v6926_v21 = vpop.f32.mrb[61].mxu0 }
 0x2d8   :  { %v6927_v22 = vadd.f32 %v6926_v21, %v6925_v19  ;;  %v6948_v23 = vpop.f32.mrb[61].mxu1  ;;  %v6928_v24 = vpop.f32.mrb[62].mxu0 }
 0x2d9   :  { %v6949_v25 = vadd.f32 %v6948_v23, %v6947_v20  ;;  %v6950_v26 = vpop.f32.mrb[62].mxu1  ;;  %v6929_v27 = vpop.f32.mrb[63].mxu0 }
 0x2da   :  { %v5608_v28 = vadd.f32 %v6927_v22, %v5568_v18  ;;  %v6951_v29 = vpop.f32.mrb[63].mxu1 }
 0x2dc   :  { %v5648_v31 = vadd.f32 %v6949_v25, %v5608_v28 }
 0x2de   :  { %v5666_v32 = vadd.f32 %v6248_v30, %v5648_v31 }
 0x2e0   :  { %5667 = vst [vmem:[%s9214_s3] sm:$0xff] %v5666_v32 }

</bundles_post_ra>
